<compile_context>
chip_gen: v7x
topology: tpu7x:2x2x1
jax: 0.10.0
libtpu: 0.0.40
codegen_flags: <defaults>
</compile_context>

<pallas_src>
import functools
import math

import numpy as np
import jax
import jax.numpy as jnp
from jax.experimental import pallas as pl
from jax.experimental.pallas import tpu as pltpu


def _rup(x, m):
    return (x + m - 1) // m * m


# ----------------------------------------------------------------------------
# Pallas kernels
# ----------------------------------------------------------------------------

def _mm_kernel(x_ref, w_ref, s_ref, b_ref, *rest, relu, res_scale, has_res, nk):
    """MXU matmul with fused scale/bias (+residual) (+ReLU) epilogue.

    x: (TM, TK) bf16, w: (TK, TN) bf16, s/b: (1, TN) f32,
    optional skip r: (TM, TN) f32, output o: (TM, TN) f32.
    """
    if has_res:
        r_ref, o_ref = rest
    else:
        (o_ref,) = rest
        r_ref = None

    def epilogue(acc):
        y = acc * s_ref[...] + b_ref[...]
        if has_res:
            y = r_ref[...] + res_scale * y
        if relu:
            y = jnp.maximum(y, 0.0)
        o_ref[...] = y

    if nk == 1:
        # Single K step (true for every layer of this network): no accumulator.
        epilogue(jnp.dot(x_ref[...], w_ref[...],
                         preferred_element_type=jnp.float32))
    else:
        # Generic path (unused here): accumulate into the resident f32 output
        # block, finalize on the last K step.
        k = pl.program_id(2)

        @pl.when(k == 0)
        def _():
            o_ref[...] = jnp.zeros_like(o_ref)

        o_ref[...] += jnp.dot(x_ref[...], w_ref[...],
                              preferred_element_type=jnp.float32)

        @pl.when(k == nk - 1)
        def _():
            epilogue(o_ref[...])


def matmul_fused(x, w, scale, bias, *, relu, residual=None, res_scale=1.0):
    """y = relu?(residual + res_scale * ((x @ w) * scale + bias)) on the MXU."""
    M, K = x.shape
    N = w.shape[1]

    # ---- adaptive tiling --------------------------------------------------
    if M <= 256:
        tm = _rup(max(M, 8), 16)          # bf16 sublane packing -> multiple of 16
        Mp = tm                           # single M tile
    else:
        tm = 256
        Mp = _rup(M, tm)
    Np = _rup(N, 128)
    tn = 512 if Np % 512 == 0 else (256 if Np % 256 == 0 else 128)
    Kp = _rup(K, 128)
    if Kp <= 4096:
        tk = Kp                           # one reduction step (always, in this net)
    else:
        tk = 2048
        Kp = _rup(K, tk)
    nk = Kp // tk

    xp = jnp.pad(x.astype(jnp.bfloat16), ((0, Mp - M), (0, Kp - K)))
    wp = jnp.pad(w.astype(jnp.bfloat16), ((0, Kp - K), (0, Np - N)))
    sp = jnp.pad(scale.astype(jnp.float32)[None, :], ((0, 0), (0, Np - N)))
    bp = jnp.pad(bias.astype(jnp.float32)[None, :], ((0, 0), (0, Np - N)))

    operands = [xp, wp, sp, bp]
    in_specs = [
        pl.BlockSpec((tm, tk), lambda i, j, k: (i, k)),
        pl.BlockSpec((tk, tn), lambda i, j, k: (k, j)),
        pl.BlockSpec((1, tn), lambda i, j, k: (0, j)),
        pl.BlockSpec((1, tn), lambda i, j, k: (0, j)),
    ]
    has_res = residual is not None
    if has_res:
        rp = jnp.pad(residual.astype(jnp.float32), ((0, Mp - M), (0, Np - N)))
        operands.append(rp)
        in_specs.append(pl.BlockSpec((tm, tn), lambda i, j, k: (i, j)))

    out = pl.pallas_call(
        functools.partial(_mm_kernel, relu=relu, res_scale=float(res_scale),
                          has_res=has_res, nk=nk),
        out_shape=jax.ShapeDtypeStruct((Mp, Np), jnp.float32),
        grid_spec=pltpu.PrefetchScalarGridSpec(
            num_scalar_prefetch=0,
            grid=(Mp // tm, Np // tn, nk),
            in_specs=in_specs,
            out_specs=pl.BlockSpec((tm, tn), lambda i, j, k: (i, j)),
        ),
        compiler_params=pltpu.CompilerParams(
            dimension_semantics=("parallel", "parallel", "arbitrary"),
            vmem_limit_bytes=32 * 1024 * 1024),   # safe budget on v5e/v6e/v7x
    )(*operands)
    return out[:M, :N]


def _max_kernel(x_ref, o_ref):
    o_ref[...] = jnp.max(x_ref[...], axis=0)


def maxpool2d(x, ksize=3, stride=2):
    """nn.MaxPool2d(3, stride=2), valid padding, NHWC."""
    N, H, W, C = x.shape
    OH = (H - ksize) // stride + 1
    OW = (W - ksize) // stride + 1
    # TODO(synk): window stacking materializes ksize^2 shifted copies in HBM; an
    # in-kernel windowed DMA would avoid it (tensors here are small).
    sl = [x[:, kh:kh + stride * (OH - 1) + 1:stride,
            kw:kw + stride * (OW - 1) + 1:stride, :]
          for kh in range(ksize) for kw in range(ksize)]
    st = jnp.stack(sl, axis=0).reshape(ksize * ksize, N * OH * OW, C)
    M = N * OH * OW
    Mp, Cp = _rup(M, 8), _rup(C, 128)
    stp = jnp.pad(st, ((0, 0), (0, Mp - M), (0, Cp - C)))
    out = pl.pallas_call(
        _max_kernel,
        out_shape=jax.ShapeDtypeStruct((Mp, Cp), jnp.float32),
        grid=(1,),
        in_specs=[pl.BlockSpec((ksize * ksize, Mp, Cp), lambda i: (0, 0, 0))],
        out_specs=pl.BlockSpec((Mp, Cp), lambda i: (0, 0)),
    )(stp)
    return out[:M, :C].reshape(N, OH, OW, C)


def _avg_kernel(x_ref, o_ref, *, hw):
    o_ref[...] = jnp.sum(x_ref[...], axis=1) * (1.0 / hw)


def avgpool_flatten(x):
    """AdaptiveAvgPool2d(1) + flatten -> (N, C)."""
    N, H, W, C = x.shape
    HW = H * W
    if HW == 1:                           # average over one element = identity
        return x.reshape(N, C)
    HWp, Cp = _rup(max(HW, 8), 8), _rup(C, 128)
    xp = jnp.pad(x.reshape(N, HW, C), ((0, 0), (0, HWp - HW), (0, Cp - C)))
    out = pl.pallas_call(
        functools.partial(_avg_kernel, hw=HW),
        out_shape=jax.ShapeDtypeStruct((N, Cp), jnp.float32),
        grid=(1,),
        in_specs=[pl.BlockSpec((N, HWp, Cp), lambda i: (0, 0, 0))],
        out_specs=pl.BlockSpec((N, Cp), lambda i: (0, 0)),
    )(xp)
    return out[:, :C]


# ----------------------------------------------------------------------------
# Convolution = (im2col for k>1) + fused Pallas matmul kernel
# ----------------------------------------------------------------------------

def conv2d(x, w, scale, bias, *, stride=1, padding=0, relu=True,
           residual=None, res_scale=1.0):
    """Cross-correlation conv, NHWC.  w: (KH, KW, Cin, Cout)."""
    N, H, W, Cin = x.shape
    KH, KW, _, Cout = w.shape
    sh, sw = (stride, stride) if isinstance(stride, int) else stride
    ph, pw = (padding, padding) if isinstance(padding, int) else padding
    if ph or pw:
        x = jnp.pad(x, ((0, 0), (ph, ph), (pw, pw), (0, 0)))
    Hp, Wp = H + 2 * ph, W + 2 * pw
    OH = (Hp - KH) // sh + 1
    OW = (Wp - KW) // sw + 1
    if KH == 1 and KW == 1 and sh == 1 and sw == 1:
        pm = x.reshape(N * OH * OW, Cin)          # 1x1 conv: no im2col at all
    else:
        # TODO(synk): im2col still materializes KH*KW shifted copies of the input
        # in HBM; a windowed in-kernel DMA formulation would remove that traffic.
        patches = [x[:, kh:kh + sh * (OH - 1) + 1:sh,
                     kw:kw + sw * (OW - 1) + 1:sw, :]
                   for kh in range(KH) for kw in range(KW)]
        pm = jnp.concatenate(patches, axis=-1).reshape(N * OH * OW, KH * KW * Cin)
    wm = w.reshape(KH * KW * Cin, Cout)
    rm = None if residual is None else residual.reshape(N * OH * OW, Cout)
    y = matmul_fused(pm, wm, scale, bias, relu=relu, residual=rm,
                     res_scale=res_scale)
    return y.reshape(N, OH, OW, Cout)


def basic_conv(x, p, stride=1, padding=0):
    # BasicConv2d = Conv(bias=False) + BatchNorm2d(eps=1e-3, eval) + ReLU, BN folded.
    return conv2d(x, p["w"], p["scale"], p["bias"],
                  stride=stride, padding=padding, relu=True)


def up_conv_res(x_cat, p, x_skip, block_scale, relu):
    # Block tail: Conv2d(1x1, bias=True) then relu?(x_skip + block_scale * y),
    # all fused into the matmul epilogue.
    return conv2d(x_cat, p["w"], p["scale"], p["bias"], stride=1, padding=0,
                  relu=relu, residual=x_skip, res_scale=block_scale)


# ----------------------------------------------------------------------------
# Inception-ResNet-V1 blocks (parallel 1x1 branches weight-fused)
# ----------------------------------------------------------------------------

def block35(x, p):  # scale = 0.17
    y = basic_conv(x, p["b_in"])                 # fused b0 | b1_0 | b2_0 -> 96 ch
    b0 = y[..., :32]
    b1 = basic_conv(y[..., 32:64], p["b1_1"], padding=1)
    b2 = basic_conv(y[..., 64:96], p["b2_1"], padding=1)
    b2 = basic_conv(b2, p["b2_2"], padding=1)
    out = jnp.concatenate([b0, b1, b2], axis=-1)
    return up_conv_res(out, p["up"], x, 0.17, relu=True)


def block17(x, p):  # scale = 0.10
    y = basic_conv(x, p["b_in"])                 # fused b0 | b1_0 -> 256 ch
    b0 = y[..., :128]
    b1 = basic_conv(y[..., 128:], p["b1_1"], padding=(0, 3))   # (1,7)
    b1 = basic_conv(b1, p["b1_2"], padding=(3, 0))             # (7,1)
    out = jnp.concatenate([b0, b1], axis=-1)
    return up_conv_res(out, p["up"], x, 0.10, relu=True)


def block8(x, p, scale=0.20, relu=True):
    y = basic_conv(x, p["b_in"])                 # fused b0 | b1_0 -> 384 ch
    b0 = y[..., :192]
    b1 = basic_conv(y[..., 192:], p["b1_1"], padding=(0, 1))   # (1,3)
    b1 = basic_conv(b1, p["b1_2"], padding=(1, 0))             # (3,1)
    out = jnp.concatenate([b0, b1], axis=-1)
    return up_conv_res(out, p["up"], x, scale, relu=relu)


def mixed_6a(x, p):
    b0 = basic_conv(x, p["b0"], stride=2)
    b1 = basic_conv(x, p["b1_0"])
    b1 = basic_conv(b1, p["b1_1"], padding=1)
    b1 = basic_conv(b1, p["b1_2"], stride=2)
    b2 = maxpool2d(x, 3, 2)
    return jnp.concatenate([b0, b1, b2], axis=-1)


def mixed_7a(x, p):
    y = basic_conv(x, p["b_in"])                 # fused b0_0 | b1_0 | b2_0 -> 768 ch
    b0 = basic_conv(y[..., :256], p["b0_1"], stride=2)
    b1 = basic_conv(y[..., 256:512], p["b1_1"], stride=2)
    b2 = basic_conv(y[..., 512:], p["b2_1"], padding=1)
    b2 = basic_conv(b2, p["b2_2"], stride=2)
    b3 = maxpool2d(x, 3, 2)
    return jnp.concatenate([b0, b1, b2, b3], axis=-1)


def stem(x_nchw, p):
    x = jnp.transpose(x_nchw, (0, 2, 3, 1)).astype(jnp.float32)   # NCHW -> NHWC
    x = basic_conv(x, p["conv2d_1a"], stride=2)
    x = basic_conv(x, p["conv2d_2a"])
    x = basic_conv(x, p["conv2d_2b"], padding=1)
    x = maxpool2d(x, 3, 2)
    x = basic_conv(x, p["conv2d_3b"])
    x = basic_conv(x, p["conv2d_4a"])
    x = basic_conv(x, p["conv2d_4b"], stride=2)
    return x


def head(x, ll, lg):
    x = avgpool_flatten(x)                                         # (N, 1792)
    # Dropout is identity in eval() mode, so omitted.
    x = matmul_fused(x, ll["w"], ll["scale"], ll["bias"], relu=False)   # (N, 512)
    return matmul_fused(x, lg["w"], lg["scale"], lg["bias"], relu=False)  # (N, 100)


# ----------------------------------------------------------------------------
# Deterministic synthetic parameters (shapes match InceptionResnetV1), built on
# the host with numpy (single device transfer at the end; fast startup).
# ----------------------------------------------------------------------------

class ParamGen:
    def __init__(self, seed):
        self._rng = np.random.default_rng(seed)

    def _normal(self, shape):
        return self._rng.standard_normal(shape).astype(np.float32)

    def _bn_fold(self, cout, eps=1e-3):
        gamma = 1.0 + 0.1 * self._normal((cout,))
        beta = 0.1 * self._normal((cout,))
        rmean = 0.1 * self._normal((cout,))
        rvar = self._rng.uniform(0.5, 1.5, (cout,)).astype(np.float32)
        scale = gamma / np.sqrt(rvar + eps)
        bias = beta - rmean * scale
        return scale.astype(np.float32), bias.astype(np.float32)

    def conv_bn(self, kh, kw, cin, cout):          # BasicConv2d (conv bias=False + BN)
        w = self._normal((kh, kw, cin, cout)) * math.sqrt(2.0 / (kh * kw * cin))
        scale, bias = self._bn_fold(cout)
        return dict(w=w, scale=scale, bias=bias)

    def conv_bias(self, kh, kw, cin, cout):        # plain conv with bias, no BN
        w = self._normal((kh, kw, cin, cout)) * math.sqrt(1.0 / (kh * kw * cin))
        b = 0.05 * self._normal((cout,))
        return dict(w=w, scale=np.ones((cout,), np.float32), bias=b)

    def linear_bn(self, cin, cout):                # Linear(bias=False) + BatchNorm1d
        w = self._normal((cin, cout)) * math.sqrt(1.0 / cin)
        scale, bias = self._bn_fold(cout)
        return dict(w=w, scale=scale, bias=bias)

    def linear(self, cin, cout):                   # Linear(bias=True)
        w = self._normal((cin, cout)) * math.sqrt(1.0 / cin)
        b = 0.05 * self._normal((cout,))
        return dict(w=w, scale=np.ones((cout,), np.float32), bias=b)


def _fuse_1x1(branches):
    """Concatenate parallel 1x1 convs that read the same input into one conv."""
    return dict(w=np.concatenate([b["w"] for b in branches], axis=-1),
                scale=np.concatenate([b["scale"] for b in branches]),
                bias=np.concatenate([b["bias"] for b in branches]))


def build_params(seed=0):
    g = ParamGen(seed)
    P = {}
    P["conv2d_1a"] = g.conv_bn(3, 3, 3, 32)
    P["conv2d_2a"] = g.conv_bn(3, 3, 32, 32)
    P["conv2d_2b"] = g.conv_bn(3, 3, 32, 64)
    P["conv2d_3b"] = g.conv_bn(1, 1, 64, 80)
    P["conv2d_4a"] = g.conv_bn(3, 3, 80, 192)
    P["conv2d_4b"] = g.conv_bn(3, 3, 192, 256)

    def block35_p():
        b0 = g.conv_bn(1, 1, 256, 32)
        b1_0 = g.conv_bn(1, 1, 256, 32); b1_1 = g.conv_bn(3, 3, 32, 32)
        b2_0 = g.conv_bn(1, 1, 256, 32); b2_1 = g.conv_bn(3, 3, 32, 32)
        b2_2 = g.conv_bn(3, 3, 32, 32)
        return dict(b_in=_fuse_1x1([b0, b1_0, b2_0]),      # 256 -> 96 (=32|32|32)
                    b1_1=b1_1, b2_1=b2_1, b2_2=b2_2,
                    up=g.conv_bias(1, 1, 96, 256))

    P["repeat_1"] = [block35_p() for _ in range(5)]

    P["mixed_6a"] = dict(b0=g.conv_bn(3, 3, 256, 384),
                         b1_0=g.conv_bn(1, 1, 256, 192),
                         b1_1=g.conv_bn(3, 3, 192, 192),
                         b1_2=g.conv_bn(3, 3, 192, 256))

    def block17_p():
        b0 = g.conv_bn(1, 1, 896, 128)
        b1_0 = g.conv_bn(1, 1, 896, 128)
        b1_1 = g.conv_bn(1, 7, 128, 128)
        b1_2 = g.conv_bn(7, 1, 128, 128)
        return dict(b_in=_fuse_1x1([b0, b1_0]),            # 896 -> 256 (=128|128)
                    b1_1=b1_1, b1_2=b1_2,
                    up=g.conv_bias(1, 1, 256, 896))

    P["repeat_2"] = [block17_p() for _ in range(10)]

    m7_b0_0 = g.conv_bn(1, 1, 896, 256); m7_b0_1 = g.conv_bn(3, 3, 256, 384)
    m7_b1_0 = g.conv_bn(1, 1, 896, 256); m7_b1_1 = g.conv_bn(3, 3, 256, 256)
    m7_b2_0 = g.conv_bn(1, 1, 896, 256); m7_b2_1 = g.conv_bn(3, 3, 256, 256)
    m7_b2_2 = g.conv_bn(3, 3, 256, 256)
    P["mixed_7a"] = dict(b_in=_fuse_1x1([m7_b0_0, m7_b1_0, m7_b2_0]),  # 896 -> 768
                         b0_1=m7_b0_1, b1_1=m7_b1_1, b2_1=m7_b2_1, b2_2=m7_b2_2)

    def block8_p():
        b0 = g.conv_bn(1, 1, 1792, 192)
        b1_0 = g.conv_bn(1, 1, 1792, 192)
        b1_1 = g.conv_bn(1, 3, 192, 192)
        b1_2 = g.conv_bn(3, 1, 192, 192)
        return dict(b_in=_fuse_1x1([b0, b1_0]),            # 1792 -> 384 (=192|192)
                    b1_1=b1_1, b1_2=b1_2,
                    up=g.conv_bias(1, 1, 384, 1792))

    P["repeat_3"] = [block8_p() for _ in range(5)]
    P["block8"] = block8_p()                       # Block8(noReLU=True), scale=1.0
    P["last_linear"] = g.linear_bn(1792, 512)      # Linear(1792,512,bias=False)+BN1d
    P["logits"] = g.linear(512, 100)               # replaced head: Linear(512,100)
    # One device transfer for the whole tree (jitted blocks then reuse device arrays).
    return jax.tree_util.tree_map(jnp.asarray, P)


# ----------------------------------------------------------------------------
# Full forward pass (block-level jit: repeated blocks share one compiled program)
# ----------------------------------------------------------------------------

_stem_j = jax.jit(stem)
_block35_j = jax.jit(block35)
_mixed_6a_j = jax.jit(mixed_6a)
_block17_j = jax.jit(block17)
_mixed_7a_j = jax.jit(mixed_7a)
_block8_j = jax.jit(functools.partial(block8, scale=0.20, relu=True))
_block8_last_j = jax.jit(functools.partial(block8, scale=1.0, relu=False))
_head_j = jax.jit(head)

_STEM_KEYS = ("conv2d_1a", "conv2d_2a", "conv2d_2b",
              "conv2d_3b", "conv2d_4a", "conv2d_4b")


def inception_resnet_v1(params, x_nchw):
    x = _stem_j(x_nchw, {k: params[k] for k in _STEM_KEYS})
    for p in params["repeat_1"]:
        x = _block35_j(x, p)
    x = _mixed_6a_j(x, params["mixed_6a"])
    for p in params["repeat_2"]:
        x = _block17_j(x, p)
    x = _mixed_7a_j(x, params["mixed_7a"])
    for p in params["repeat_3"]:
        x = _block8_j(x, p)
    x = _block8_last_j(x, params["block8"])
    return _head_j(x, params["last_linear"], params["logits"])


def inception_v1_forward(params, x_nchw):
    # matches InceptionV1.forward: return (x, self.model(x))
    return x_nchw, inception_resnet_v1(params, x_nchw)


if __name__ == "__main__":
    key = jax.random.PRNGKey(0)
    x_key, _ = jax.random.split(key)
    # batch=2, channels=3 (RGB), 80x80 = smallest spatial size the stem supports.
    x = jax.random.normal(x_key, (2, 3, 80, 80), jnp.float32)

    params = build_params(seed=0)
    x_out, logits = inception_v1_forward(params, x)
    jax.block_until_ready(logits)

    assert x_out.shape == (2, 3, 80, 80)
    assert logits.shape == (2, 100)
    assert bool(jnp.all(jnp.isfinite(logits)))
    print("KERNEL_OK")
</pallas_src>

<mosaic_0001>
module attributes {stable_mosaic.version = 11 : i64} {
  func.func @_mm_kernel(%arg0: i32, %arg1: i32, %arg2: i32, %arg3: memref<256x128xbf16, #tpu.memory_space<vmem>>, %arg4: memref<128x128xbf16, #tpu.memory_space<vmem>>, %arg5: memref<1x128xf32, #tpu.memory_space<vmem>>, %arg6: memref<1x128xf32, #tpu.memory_space<vmem>>, %arg7: memref<256x128xf32, #tpu.memory_space<vmem>>) attributes {dimension_semantics = [#tpu.dimension_semantics<parallel>, #tpu.dimension_semantics<parallel>, #tpu.dimension_semantics<arbitrary>], iteration_bounds = array<i64: 12, 1, 1>, scalar_prefetch = 0 : i64, scratch_operands = 0 : i64, tpu.core_type = #tpu.core_type<tc>, window_params = [{transform_indices = @transform_0, window_bounds = array<i64: 256, 128>}, {transform_indices = @transform_1, window_bounds = array<i64: 128, 128>}, {transform_indices = @transform_2, window_bounds = array<i64: 1, 128>}, {transform_indices = @transform_3, window_bounds = array<i64: 1, 128>}, {transform_indices = @transform_4, window_bounds = array<i64: 256, 128>}]} {
    %c0 = arith.constant 0 : index
    %c0_0 = arith.constant 0 : index
    %0 = vector.load %arg3[%c0, %c0_0] : memref<256x128xbf16, #tpu.memory_space<vmem>>, vector<256x128xbf16>
    %c0_1 = arith.constant 0 : index
    %c0_2 = arith.constant 0 : index
    %1 = vector.load %arg4[%c0_1, %c0_2] : memref<128x128xbf16, #tpu.memory_space<vmem>>, vector<128x128xbf16>
    %cst = arith.constant dense<0.000000e+00> : vector<256x128xf32>
    %2 = tpu.matmul %0, %1, %cst {dimension_numbers = #tpu.dot_dimension_numbers<[1], [0], [0], [1], [0, 0, 1, 1], [], []>} : vector<256x128xbf16>, vector<128x128xbf16>, vector<256x128xf32> -> vector<256x128xf32>
    %c0_3 = arith.constant 0 : index
    %c0_4 = arith.constant 0 : index
    %3 = vector.load %arg5[%c0_3, %c0_4] : memref<1x128xf32, #tpu.memory_space<vmem>>, vector<1x128xf32>
    %4 = vector.broadcast %3 : vector<1x128xf32> to vector<256x128xf32>
    %5 = arith.mulf %2, %4 : vector<256x128xf32>
    %c0_5 = arith.constant 0 : index
    %c0_6 = arith.constant 0 : index
    %6 = vector.load %arg6[%c0_5, %c0_6] : memref<1x128xf32, #tpu.memory_space<vmem>>, vector<1x128xf32>
    %7 = vector.broadcast %6 : vector<1x128xf32> to vector<256x128xf32>
    %8 = arith.addf %5, %7 : vector<256x128xf32>
    %cst_7 = arith.constant 0.000000e+00 : f32
    %9 = vector.broadcast %cst_7 : f32 to vector<256x128xf32>
    %10 = arith.maximumf %8, %9 : vector<256x128xf32>
    %c0_8 = arith.constant 0 : index
    %c0_9 = arith.constant 0 : index
    %11 = vector.load %arg7[%c0_8, %c0_9] : memref<256x128xf32, #tpu.memory_space<vmem>>, vector<256x128xf32>
    tpu.vector_store %arg7[%c0_8, %c0_9], %10 {strides = array<i32>} : memref<256x128xf32, #tpu.memory_space<vmem>>, vector<256x128xf32>,
    return
  }
  func.func @transform_0(%arg0: i32, %arg1: i32, %arg2: i32) -> (i32, i32) {
    %c0_i32 = arith.constant 0 : i32
    return %arg0, %arg2 : i32, i32
  }
  func.func @transform_1(%arg0: i32, %arg1: i32, %arg2: i32) -> (i32, i32) {
    %c0_i32 = arith.constant 0 : i32
    return %arg2, %arg1 : i32, i32
  }
  func.func @transform_2(%arg0: i32, %arg1: i32, %arg2: i32) -> (i32, i32) {
    %c0_i32 = arith.constant 0 : i32
    %c0_i32_0 = arith.constant 0 : i32
    return %c0_i32, %arg1 : i32, i32
  }
  func.func @transform_3(%arg0: i32, %arg1: i32, %arg2: i32) -> (i32, i32) {
    %c0_i32 = arith.constant 0 : i32
    %c0_i32_0 = arith.constant 0 : i32
    return %c0_i32, %arg1 : i32, i32
  }
  func.func @transform_4(%arg0: i32, %arg1: i32, %arg2: i32) -> (i32, i32) {
    %c0_i32 = arith.constant 0 : i32
    return %arg0, %arg1 : i32, i32
  }
}

module attributes {stable_mosaic.version = 11 : i64} {
  func.func @_mm_kernel(%arg0: i32, %arg1: i32, %arg2: i32, %arg3: memref<256x384xbf16, #tpu.memory_space<vmem>>, %arg4: memref<384x128xbf16, #tpu.memory_space<vmem>>, %arg5: memref<1x128xf32, #tpu.memory_space<vmem>>, %arg6: memref<1x128xf32, #tpu.memory_space<vmem>>, %arg7: memref<256x128xf32, #tpu.memory_space<vmem>>) attributes {dimension_semantics = [#tpu.dimension_semantics<parallel>, #tpu.dimension_semantics<parallel>, #tpu.dimension_semantics<arbitrary>], iteration_bounds = array<i64: 11, 1, 1>, scalar_prefetch = 0 : i64, scratch_operands = 0 : i64, tpu.core_type = #tpu.core_type<tc>, window_params = [{transform_indices = @transform_0, window_bounds = array<i64: 256, 384>}, {transform_indices = @transform_1, window_bounds = array<i64: 384, 128>}, {transform_indices = @transform_2, window_bounds = array<i64: 1, 128>}, {transform_indices = @transform_3, window_bounds = array<i64: 1, 128>}, {transform_indices = @transform_4, window_bounds = array<i64: 256, 128>}]} {
    %c0 = arith.constant 0 : index
    %c0_0 = arith.constant 0 : index
    %0 = vector.load %arg3[%c0, %c0_0] : memref<256x384xbf16, #tpu.memory_space<vmem>>, vector<256x384xbf16>
    %c0_1 = arith.constant 0 : index
    %c0_2 = arith.constant 0 : index
    %1 = vector.load %arg4[%c0_1, %c0_2] : memref<384x128xbf16, #tpu.memory_space<vmem>>, vector<384x128xbf16>
    %cst = arith.constant dense<0.000000e+00> : vector<256x128xf32>
    %2 = tpu.matmul %0, %1, %cst {dimension_numbers = #tpu.dot_dimension_numbers<[1], [0], [0], [1], [0, 0, 1, 1], [], []>} : vector<256x384xbf16>, vector<384x128xbf16>, vector<256x128xf32> -> vector<256x128xf32>
    %c0_3 = arith.constant 0 : index
    %c0_4 = arith.constant 0 : index
    %3 = vector.load %arg5[%c0_3, %c0_4] : memref<1x128xf32, #tpu.memory_space<vmem>>, vector<1x128xf32>
    %4 = vector.broadcast %3 : vector<1x128xf32> to vector<256x128xf32>
    %5 = arith.mulf %2, %4 : vector<256x128xf32>
    %c0_5 = arith.constant 0 : index
    %c0_6 = arith.constant 0 : index
    %6 = vector.load %arg6[%c0_5, %c0_6] : memref<1x128xf32, #tpu.memory_space<vmem>>, vector<1x128xf32>
    %7 = vector.broadcast %6 : vector<1x128xf32> to vector<256x128xf32>
    %8 = arith.addf %5, %7 : vector<256x128xf32>
    %cst_7 = arith.constant 0.000000e+00 : f32
    %9 = vector.broadcast %cst_7 : f32 to vector<256x128xf32>
    %10 = arith.maximumf %8, %9 : vector<256x128xf32>
    %c0_8 = arith.constant 0 : index
    %c0_9 = arith.constant 0 : index
    %11 = vector.load %arg7[%c0_8, %c0_9] : memref<256x128xf32, #tpu.memory_space<vmem>>, vector<256x128xf32>
    tpu.vector_store %arg7[%c0_8, %c0_9], %10 {strides = array<i32>} : memref<256x128xf32, #tpu.memory_space<vmem>>, vector<256x128xf32>,
    return
  }
  func.func @transform_0(%arg0: i32, %arg1: i32, %arg2: i32) -> (i32, i32) {
    %c0_i32 = arith.constant 0 : i32
    return %arg0, %arg2 : i32, i32
  }
  func.func @transform_1(%arg0: i32, %arg1: i32, %arg2: i32) -> (i32, i32) {
    %c0_i32 = arith.constant 0 : i32
    return %arg2, %arg1 : i32, i32
  }
  func.func @transform_2(%arg0: i32, %arg1: i32, %arg2: i32) -> (i32, i32) {
    %c0_i32 = arith.constant 0 : i32
    %c0_i32_0 = arith.constant 0 : i32
    return %c0_i32, %arg1 : i32, i32
  }
  func.func @transform_3(%arg0: i32, %arg1: i32, %arg2: i32) -> (i32, i32) {
    %c0_i32 = arith.constant 0 : i32
    %c0_i32_0 = arith.constant 0 : i32
    return %c0_i32, %arg1 : i32, i32
  }
  func.func @transform_4(%arg0: i32, %arg1: i32, %arg2: i32) -> (i32, i32) {
    %c0_i32 = arith.constant 0 : i32
    return %arg0, %arg1 : i32, i32
  }
}

module attributes {stable_mosaic.version = 11 : i64} {
  func.func @_max_kernel(%arg0: i32, %arg1: memref<9x648x128xf32, #tpu.memory_space<vmem>>, %arg2: memref<648x128xf32, #tpu.memory_space<vmem>>) attributes {dimension_semantics = [#tpu.dimension_semantics<arbitrary>], iteration_bounds = array<i64: 1>, scalar_prefetch = 0 : i64, scratch_operands = 0 : i64, tpu.core_type = #tpu.core_type<tc>, window_params = [{pipeline_mode = #tpu.pipeline_mode<synchronous>, transform_indices = @transform_0, window_bounds = array<i64: 9, 648, 128>}, {pipeline_mode = #tpu.pipeline_mode<synchronous>, transform_indices = @transform_1, window_bounds = array<i64: 648, 128>}]} {
    %c0 = arith.constant 0 : index
    %c0_0 = arith.constant 0 : index
    %c0_1 = arith.constant 0 : index
    %0 = vector.load %arg1[%c0, %c0_0, %c0_1] : memref<9x648x128xf32, #tpu.memory_space<vmem>>, vector<9x648x128xf32>
    %cst = arith.constant dense<0xFF800000> : vector<648x128xf32>
    %1 = vector.multi_reduction <maximumf>, %0, %cst [0] : vector<9x648x128xf32> to vector<648x128xf32>
    %c0_2 = arith.constant 0 : index
    %c0_3 = arith.constant 0 : index
    %2 = vector.load %arg2[%c0_2, %c0_3] : memref<648x128xf32, #tpu.memory_space<vmem>>, vector<648x128xf32>
    tpu.vector_store %arg2[%c0_2, %c0_3], %1 {strides = array<i32>} : memref<648x128xf32, #tpu.memory_space<vmem>>, vector<648x128xf32>,
    return
  }
  func.func @transform_0(%arg0: i32) -> (i32, i32, i32) {
    %c0_i32 = arith.constant 0 : i32
    %c0_i32_0 = arith.constant 0 : i32
    %c0_i32_1 = arith.constant 0 : i32
    %c0_i32_2 = arith.constant 0 : i32
    return %c0_i32, %c0_i32_0, %c0_i32_1 : i32, i32, i32
  }
  func.func @transform_1(%arg0: i32) -> (i32, i32) {
    %c0_i32 = arith.constant 0 : i32
    %c0_i32_0 = arith.constant 0 : i32
    %c0_i32_1 = arith.constant 0 : i32
    return %c0_i32, %c0_i32_0 : i32, i32
  }
}

module attributes {stable_mosaic.version = 11 : i64} {
  func.func @_mm_kernel(%arg0: i32, %arg1: i32, %arg2: i32, %arg3: memref<256x128xbf16, #tpu.memory_space<vmem>>, %arg4: memref<128x128xbf16, #tpu.memory_space<vmem>>, %arg5: memref<1x128xf32, #tpu.memory_space<vmem>>, %arg6: memref<1x128xf32, #tpu.memory_space<vmem>>, %arg7: memref<256x128xf32, #tpu.memory_space<vmem>>) attributes {dimension_semantics = [#tpu.dimension_semantics<parallel>, #tpu.dimension_semantics<parallel>, #tpu.dimension_semantics<arbitrary>], iteration_bounds = array<i64: 3, 1, 1>, scalar_prefetch = 0 : i64, scratch_operands = 0 : i64, tpu.core_type = #tpu.core_type<tc>, window_params = [{transform_indices = @transform_0, window_bounds = array<i64: 256, 128>}, {transform_indices = @transform_1, window_bounds = array<i64: 128, 128>}, {transform_indices = @transform_2, window_bounds = array<i64: 1, 128>}, {transform_indices = @transform_3, window_bounds = array<i64: 1, 128>}, {transform_indices = @transform_4, window_bounds = array<i64: 256, 128>}]} {
    %c0 = arith.constant 0 : index
    %c0_0 = arith.constant 0 : index
    %0 = vector.load %arg3[%c0, %c0_0] : memref<256x128xbf16, #tpu.memory_space<vmem>>, vector<256x128xbf16>
    %c0_1 = arith.constant 0 : index
    %c0_2 = arith.constant 0 : index
    %1 = vector.load %arg4[%c0_1, %c0_2] : memref<128x128xbf16, #tpu.memory_space<vmem>>, vector<128x128xbf16>
    %cst = arith.constant dense<0.000000e+00> : vector<256x128xf32>
    %2 = tpu.matmul %0, %1, %cst {dimension_numbers = #tpu.dot_dimension_numbers<[1], [0], [0], [1], [0, 0, 1, 1], [], []>} : vector<256x128xbf16>, vector<128x128xbf16>, vector<256x128xf32> -> vector<256x128xf32>
    %c0_3 = arith.constant 0 : index
    %c0_4 = arith.constant 0 : index
    %3 = vector.load %arg5[%c0_3, %c0_4] : memref<1x128xf32, #tpu.memory_space<vmem>>, vector<1x128xf32>
    %4 = vector.broadcast %3 : vector<1x128xf32> to vector<256x128xf32>
    %5 = arith.mulf %2, %4 : vector<256x128xf32>
    %c0_5 = arith.constant 0 : index
    %c0_6 = arith.constant 0 : index
    %6 = vector.load %arg6[%c0_5, %c0_6] : memref<1x128xf32, #tpu.memory_space<vmem>>, vector<1x128xf32>
    %7 = vector.broadcast %6 : vector<1x128xf32> to vector<256x128xf32>
    %8 = arith.addf %5, %7 : vector<256x128xf32>
    %cst_7 = arith.constant 0.000000e+00 : f32
    %9 = vector.broadcast %cst_7 : f32 to vector<256x128xf32>
    %10 = arith.maximumf %8, %9 : vector<256x128xf32>
    %c0_8 = arith.constant 0 : index
    %c0_9 = arith.constant 0 : index
    %11 = vector.load %arg7[%c0_8, %c0_9] : memref<256x128xf32, #tpu.memory_space<vmem>>, vector<256x128xf32>
    tpu.vector_store %arg7[%c0_8, %c0_9], %10 {strides = array<i32>} : memref<256x128xf32, #tpu.memory_space<vmem>>, vector<256x128xf32>,
    return
  }
  func.func @transform_0(%arg0: i32, %arg1: i32, %arg2: i32) -> (i32, i32) {
    %c0_i32 = arith.constant 0 : i32
    return %arg0, %arg2 : i32, i32
  }
  func.func @transform_1(%arg0: i32, %arg1: i32, %arg2: i32) -> (i32, i32) {
    %c0_i32 = arith.constant 0 : i32
    return %arg2, %arg1 : i32, i32
  }
  func.func @transform_2(%arg0: i32, %arg1: i32, %arg2: i32) -> (i32, i32) {
    %c0_i32 = arith.constant 0 : i32
    %c0_i32_0 = arith.constant 0 : i32
    return %c0_i32, %arg1 : i32, i32
  }
  func.func @transform_3(%arg0: i32, %arg1: i32, %arg2: i32) -> (i32, i32) {
    %c0_i32 = arith.constant 0 : i32
    %c0_i32_0 = arith.constant 0 : i32
    return %c0_i32, %arg1 : i32, i32
  }
  func.func @transform_4(%arg0: i32, %arg1: i32, %arg2: i32) -> (i32, i32) {
    %c0_i32 = arith.constant 0 : i32
    return %arg0, %arg1 : i32, i32
  }
}

module attributes {stable_mosaic.version = 11 : i64} {
  func.func @_mm_kernel(%arg0: i32, %arg1: i32, %arg2: i32, %arg3: memref<256x768xbf16, #tpu.memory_space<vmem>>, %arg4: memref<768x256xbf16, #tpu.memory_space<vmem>>, %arg5: memref<1x256xf32, #tpu.memory_space<vmem>>, %arg6: memref<1x256xf32, #tpu.memory_space<vmem>>, %arg7: memref<256x256xf32, #tpu.memory_space<vmem>>) attributes {dimension_semantics = [#tpu.dimension_semantics<parallel>, #tpu.dimension_semantics<parallel>, #tpu.dimension_semantics<arbitrary>], iteration_bounds = array<i64: 2, 1, 1>, scalar_prefetch = 0 : i64, scratch_operands = 0 : i64, tpu.core_type = #tpu.core_type<tc>, window_params = [{transform_indices = @transform_0, window_bounds = array<i64: 256, 768>}, {transform_indices = @transform_1, window_bounds = array<i64: 768, 256>}, {transform_indices = @transform_2, window_bounds = array<i64: 1, 256>}, {transform_indices = @transform_3, window_bounds = array<i64: 1, 256>}, {transform_indices = @transform_4, window_bounds = array<i64: 256, 256>}]} {
    %c0 = arith.constant 0 : index
    %c0_0 = arith.constant 0 : index
    %0 = vector.load %arg3[%c0, %c0_0] : memref<256x768xbf16, #tpu.memory_space<vmem>>, vector<256x768xbf16>
    %c0_1 = arith.constant 0 : index
    %c0_2 = arith.constant 0 : index
    %1 = vector.load %arg4[%c0_1, %c0_2] : memref<768x256xbf16, #tpu.memory_space<vmem>>, vector<768x256xbf16>
    %cst = arith.constant dense<0.000000e+00> : vector<256x256xf32>
    %2 = tpu.matmul %0, %1, %cst {dimension_numbers = #tpu.dot_dimension_numbers<[1], [0], [0], [1], [0, 0, 1, 1], [], []>} : vector<256x768xbf16>, vector<768x256xbf16>, vector<256x256xf32> -> vector<256x256xf32>
    %c0_3 = arith.constant 0 : index
    %c0_4 = arith.constant 0 : index
    %3 = vector.load %arg5[%c0_3, %c0_4] : memref<1x256xf32, #tpu.memory_space<vmem>>, vector<1x256xf32>
    %4 = vector.broadcast %3 : vector<1x256xf32> to vector<256x256xf32>
    %5 = arith.mulf %2, %4 : vector<256x256xf32>
    %c0_5 = arith.constant 0 : index
    %c0_6 = arith.constant 0 : index
    %6 = vector.load %arg6[%c0_5, %c0_6] : memref<1x256xf32, #tpu.memory_space<vmem>>, vector<1x256xf32>
    %7 = vector.broadcast %6 : vector<1x256xf32> to vector<256x256xf32>
    %8 = arith.addf %5, %7 : vector<256x256xf32>
    %cst_7 = arith.constant 0.000000e+00 : f32
    %9 = vector.broadcast %cst_7 : f32 to vector<256x256xf32>
    %10 = arith.maximumf %8, %9 : vector<256x256xf32>
    %c0_8 = arith.constant 0 : index
    %c0_9 = arith.constant 0 : index
    %11 = vector.load %arg7[%c0_8, %c0_9] : memref<256x256xf32, #tpu.memory_space<vmem>>, vector<256x256xf32>
    tpu.vector_store %arg7[%c0_8, %c0_9], %10 {strides = array<i32>} : memref<256x256xf32, #tpu.memory_space<vmem>>, vector<256x256xf32>,
    return
  }
  func.func @transform_0(%arg0: i32, %arg1: i32, %arg2: i32) -> (i32, i32) {
    %c0_i32 = arith.constant 0 : i32
    return %arg0, %arg2 : i32, i32
  }
  func.func @transform_1(%arg0: i32, %arg1: i32, %arg2: i32) -> (i32, i32) {
    %c0_i32 = arith.constant 0 : i32
    return %arg2, %arg1 : i32, i32
  }
  func.func @transform_2(%arg0: i32, %arg1: i32, %arg2: i32) -> (i32, i32) {
    %c0_i32 = arith.constant 0 : i32
    %c0_i32_0 = arith.constant 0 : i32
    return %c0_i32, %arg1 : i32, i32
  }
  func.func @transform_3(%arg0: i32, %arg1: i32, %arg2: i32) -> (i32, i32) {
    %c0_i32 = arith.constant 0 : i32
    %c0_i32_0 = arith.constant 0 : i32
    return %c0_i32, %arg1 : i32, i32
  }
  func.func @transform_4(%arg0: i32, %arg1: i32, %arg2: i32) -> (i32, i32) {
    %c0_i32 = arith.constant 0 : i32
    return %arg0, %arg1 : i32, i32
  }
}

module attributes {stable_mosaic.version = 11 : i64} {
  func.func @_mm_kernel(%arg0: i32, %arg1: i32, %arg2: i32, %arg3: memref<112x1792xbf16, #tpu.memory_space<vmem>>, %arg4: memref<1792x256xbf16, #tpu.memory_space<vmem>>, %arg5: memref<1x256xf32, #tpu.memory_space<vmem>>, %arg6: memref<1x256xf32, #tpu.memory_space<vmem>>, %arg7: memref<112x256xf32, #tpu.memory_space<vmem>>) attributes {dimension_semantics = [#tpu.dimension_semantics<parallel>, #tpu.dimension_semantics<parallel>, #tpu.dimension_semantics<arbitrary>], iteration_bounds = array<i64: 1, 1, 1>, scalar_prefetch = 0 : i64, scratch_operands = 0 : i64, tpu.core_type = #tpu.core_type<tc>, window_params = [{transform_indices = @transform_0, window_bounds = array<i64: 112, 1792>}, {transform_indices = @transform_1, window_bounds = array<i64: 1792, 256>}, {transform_indices = @transform_2, window_bounds = array<i64: 1, 256>}, {transform_indices = @transform_3, window_bounds = array<i64: 1, 256>}, {transform_indices = @transform_4, window_bounds = array<i64: 112, 256>}]} {
    %c0 = arith.constant 0 : index
    %c0_0 = arith.constant 0 : index
    %0 = vector.load %arg3[%c0, %c0_0] : memref<112x1792xbf16, #tpu.memory_space<vmem>>, vector<112x1792xbf16>
    %c0_1 = arith.constant 0 : index
    %c0_2 = arith.constant 0 : index
    %1 = vector.load %arg4[%c0_1, %c0_2] : memref<1792x256xbf16, #tpu.memory_space<vmem>>, vector<1792x256xbf16>
    %cst = arith.constant dense<0.000000e+00> : vector<112x256xf32>
    %2 = tpu.matmul %0, %1, %cst {dimension_numbers = #tpu.dot_dimension_numbers<[1], [0], [0], [1], [0, 0, 1, 1], [], []>} : vector<112x1792xbf16>, vector<1792x256xbf16>, vector<112x256xf32> -> vector<112x256xf32>
    %c0_3 = arith.constant 0 : index
    %c0_4 = arith.constant 0 : index
    %3 = vector.load %arg5[%c0_3, %c0_4] : memref<1x256xf32, #tpu.memory_space<vmem>>, vector<1x256xf32>
    %4 = vector.broadcast %3 : vector<1x256xf32> to vector<112x256xf32>
    %5 = arith.mulf %2, %4 : vector<112x256xf32>
    %c0_5 = arith.constant 0 : index
    %c0_6 = arith.constant 0 : index
    %6 = vector.load %arg6[%c0_5, %c0_6] : memref<1x256xf32, #tpu.memory_space<vmem>>, vector<1x256xf32>
    %7 = vector.broadcast %6 : vector<1x256xf32> to vector<112x256xf32>
    %8 = arith.addf %5, %7 : vector<112x256xf32>
    %cst_7 = arith.constant 0.000000e+00 : f32
    %9 = vector.broadcast %cst_7 : f32 to vector<112x256xf32>
    %10 = arith.maximumf %8, %9 : vector<112x256xf32>
    %c0_8 = arith.constant 0 : index
    %c0_9 = arith.constant 0 : index
    %11 = vector.load %arg7[%c0_8, %c0_9] : memref<112x256xf32, #tpu.memory_space<vmem>>, vector<112x256xf32>
    tpu.vector_store %arg7[%c0_8, %c0_9], %10 {strides = array<i32>} : memref<112x256xf32, #tpu.memory_space<vmem>>, vector<112x256xf32>,
    return
  }
  func.func @transform_0(%arg0: i32, %arg1: i32, %arg2: i32) -> (i32, i32) {
    %c0_i32 = arith.constant 0 : i32
    return %arg0, %arg2 : i32, i32
  }
  func.func @transform_1(%arg0: i32, %arg1: i32, %arg2: i32) -> (i32, i32) {
    %c0_i32 = arith.constant 0 : i32
    return %arg2, %arg1 : i32, i32
  }
  func.func @transform_2(%arg0: i32, %arg1: i32, %arg2: i32) -> (i32, i32) {
    %c0_i32 = arith.constant 0 : i32
    %c0_i32_0 = arith.constant 0 : i32
    return %c0_i32, %arg1 : i32, i32
  }
  func.func @transform_3(%arg0: i32, %arg1: i32, %arg2: i32) -> (i32, i32) {
    %c0_i32 = arith.constant 0 : i32
    %c0_i32_0 = arith.constant 0 : i32
    return %c0_i32, %arg1 : i32, i32
  }
  func.func @transform_4(%arg0: i32, %arg1: i32, %arg2: i32) -> (i32, i32) {
    %c0_i32 = arith.constant 0 : i32
    return %arg0, %arg1 : i32, i32
  }
}

</mosaic_0001>

<bundles_post_ra>
// kernel: stem.7
= control target key start
LH: loop header
LB: loop body
LE: loop exit
PB: predicated region body
PF: predicated region fallthrough
CT: control target
= control target key end

     0   :  { %s1144_s15 = smov 0   ;;  %s1146_s16 = smov 0   ;;  %s1331_s0 = inlined_call_operand.vmem [shape: bf16[3072,128], index: 0, kind: input, shape index: {}]   ;;  %s1332_s1 = inlined_call_operand.vmem [shape: bf16[128,128], index: 1, kind: input, shape index: {}]   ;;  %s1333_s2 = inlined_call_operand.vmem [shape: f32[1,128], index: 2, kind: input, shape index: {}]   ;;  %s1334_s3 = inlined_call_operand.vmem [shape: f32[1,128], index: 3, kind: input, shape index: {}]   ;;  %s1335_s4 = inlined_call_operand.vmem [shape: f32[3072,128], index: 4, kind: output, shape index: {}]  }
   0x1   :  { %s1148_s17 = smov 0  }
   0x2 LB: > { %s33_s18 = sadd.s32 1, %s1113_s16  ;;  %p926_p0 = scmp.ge.s32.totalorder %s1117_s17, 1  ;;  %s1117_s17 = sphi %s1148_s17, %s14_s17   ;;  %s1113_s16 = sphi %s1146_s16, %s1337_s16   ;;  %s1109_s15 = sphi %s1144_s15, %s1336_s15  }
   0x3   : > { %p35_p1 = scmp.ge.s32.totalorder %s33_s18, 12  ;;  %p221_p2 = scmp.lt.s32.totalorder %s1117_s17, 13 }
   0x5   : > { %s1339_s18 = smov (%p35_p1, %s33_s18), 0  ;;  %p222_p3 = pnand %p926_p0, %p221_p2 }
   0x6   : > { %v1071_v0 = vld [vmem:[%s1332_s1] sm:$0xff] (!%p222_p3)   ;;  %s927_s21 = sshll.u32 (!%p222_p3), %s1109_s15, 5  ;;  %v1072_v1 = vld [vmem:[%s1332_s1 + $0x8] sm:$0xff] (!%p222_p3)   ;;  %v1073_v2 = vld [vmem:[%s1332_s1 + $0x10] sm:$0xff] (!%p222_p3)  }
   0x7   : > { %225 = sbr.rel (%p222_p3) target bundleno = 285 (0x11d), region = 36  ;;  %p268_p4 = scmp.lt.s32.totalorder (!%p222_p3), %s927_s21, 383  ;;  %983 = vmatprep.subr.bf16.mxu0 (!%p222_p3), %v1071_v0  ;;  %1031 = vmatprep.subr.bf16.mxu1 (!%p222_p3), %v1071_v0  ;;  %v1074_v3 = vld [vmem:[%s1332_s1 + $0x18] sm:$0xff] (!%p222_p3)   ;;  %v1075_v6 = vld [vmem:[%s1332_s1 + $0x20] sm:$0xff] (!%p222_p3)   ;;  %v1076_v7 = vld [vmem:[%s1332_s1 + $0x28] sm:$0xff] (!%p222_p3)  }
   0x8   : > { %984 = vmatpush3.bf16.msra.mxu0 (!%p222_p3), %v1071_v0  ;;  %1039 = vmatpush3.bf16.msra.mxu1 (!%p222_p3), %v1071_v0  ;;  %v1077_v8 = vld [vmem:[%s1332_s1 + $0x30] sm:$0xff] (!%p222_p3)   ;;  %v1078_v9 = vld [vmem:[%s1332_s1 + $0x38] sm:$0xff] (!%p222_p3)   ;;  %v1213_v24 = vld [vmem:[%s1333_s2] ss:$0 sm:$0xff] (!%p222_p3) }
   0x9   : > { %985 = vmatprep.subr.bf16.mxu0 (!%p222_p3), %v1072_v1  ;;  %1032 = vmatprep.subr.bf16.mxu1 (!%p222_p3), %v1072_v1  ;;  %v1218_v26 = vld [vmem:[%s1334_s3] ss:$0 sm:$0xff] (!%p222_p3) }
   0xc   : > { %986 = vmatpush3.bf16.msra.mxu0 (!%p222_p3), %v1072_v1  ;;  %1040 = vmatpush3.bf16.msra.mxu1 (!%p222_p3), %v1072_v1 }
   0xd   : > { %987 = vmatprep.subr.bf16.mxu0 (!%p222_p3), %v1073_v2  ;;  %1033 = vmatprep.subr.bf16.mxu1 (!%p222_p3), %v1073_v2 }
   0xe   : > { %s1341_s21 = smov (!%p268_p4, %s927_s21), 383 }
   0xf   : > { %s928_s26 = sshll.u32 %s1341_s21, 2  ;;  %s930_s22 = sshll.u32 %s1341_s21, 3 }
  0x10   : > { %s1177_s29 = scalar_lea.vmem %s1331_s0, %s928_s26  ;;  %988 = vmatpush3.bf16.msra.mxu0 %v1073_v2  ;;  %1041 = vmatpush3.bf16.msra.mxu1 %v1073_v2  ;;  %s1232_s24 = scalar_lea.vmem %s1335_s4, %s930_s22 }
  0x11   : > { %v1079_v4 = vld [vmem:[%s1177_s29] sm:$0xff]   ;;  %989 = vmatprep.subr.bf16.mxu0 %v1074_v3  ;;  %1034 = vmatprep.subr.bf16.mxu1 %v1074_v3  ;;  %v1081_v10 = vld [vmem:[%s1177_s29 + $0x8] sm:$0xff]   ;;  %v1083_v12 = vld [vmem:[%s1177_s29 + $0x10] sm:$0xff]  }
  0x12   : > { %v1080_v5 = vld [vmem:[%s1177_s29 + $0x40] sm:$0xff]   ;;  %999 = vmatprep.mubr.bf16.mxu0 %v1079_v4  ;;  %v1082_v11 = vld [vmem:[%s1177_s29 + $0x48] sm:$0xff]   ;;  %v1084_v13 = vld [vmem:[%s1177_s29 + $0x50] sm:$0xff]  }
  0x13   : > { %1015 = vmatprep.mubr.bf16.mxu1 %v1080_v5  ;;  %v1085_v14 = vld [vmem:[%s1177_s29 + $0x18] sm:$0xff]   ;;  %v1087_v16 = vld [vmem:[%s1177_s29 + $0x20] sm:$0xff]   ;;  %v1089_v18 = vld [vmem:[%s1177_s29 + $0x28] sm:$0xff]  }
  0x14   : > { %990 = vmatpush3.bf16.msra.mxu0 %v1074_v3  ;;  %1042 = vmatpush3.bf16.msra.mxu1 %v1074_v3  ;;  %v1086_v15 = vld [vmem:[%s1177_s29 + $0x58] sm:$0xff]   ;;  %v1088_v17 = vld [vmem:[%s1177_s29 + $0x60] sm:$0xff]   ;;  %v1090_v19 = vld [vmem:[%s1177_s29 + $0x68] sm:$0xff]  }
  0x15   : > { %991 = vmatprep.subr.bf16.mxu0 %v1075_v6  ;;  %1035 = vmatprep.subr.bf16.mxu1 %v1075_v6  ;;  %v1091_v20 = vld [vmem:[%s1177_s29 + $0x30] sm:$0xff]   ;;  %v1093_v22 = vld [vmem:[%s1177_s29 + $0x38] sm:$0xff]  }
  0x16   : > { %v1092_v21 = vld [vmem:[%s1177_s29 + $0x70] sm:$0xff]   ;;  %v1094_v23 = vld [vmem:[%s1177_s29 + $0x78] sm:$0xff]  }
  0x18   : > { %992 = vmatpush3.bf16.msra.mxu0 %v1075_v6  ;;  %1043 = vmatpush3.bf16.msra.mxu1 %v1075_v6 }
  0x19   : > { %993 = vmatprep.subr.bf16.mxu0 %v1076_v7  ;;  %1036 = vmatprep.subr.bf16.mxu1 %v1076_v7 }
  0x1c   : > { %994 = vmatpush3.bf16.msra.mxu0 %v1076_v7  ;;  %1044 = vmatpush3.bf16.msra.mxu1 %v1076_v7 }
  0x1d   : > { %995 = vmatprep.subr.bf16.mxu0 %v1077_v8  ;;  %1037 = vmatprep.subr.bf16.mxu1 %v1077_v8 }
  0x20   : > { %996 = vmatpush3.bf16.msra.mxu0 %v1077_v8  ;;  %1045 = vmatpush3.bf16.msra.mxu1 %v1077_v8 }
  0x21   : > { %997 = vmatprep.subr.bf16.mxu0 %v1078_v9  ;;  %1038 = vmatprep.subr.bf16.mxu1 %v1078_v9 }
  0x24   : > { %998 = vmatpush3.bf16.msra.mxu0 %v1078_v9  ;;  %1046 = vmatpush3.bf16.msra.mxu1 %v1078_v9 }
  0x27   : > { %1000 = vmatmul.mubr.bf16.vlgmr.msra.gmra.mrb[0].mxu0 %v1081_v10  ;;  %1016 = vmatmul.mubr.bf16.vlgmr.msra.gmra.mrb[0].mxu1 %v1082_v11 }
  0x28   : > { %1003 = vmatprep.mubr.bf16.mxu0 %v1083_v12  ;;  %1019 = vmatprep.mubr.bf16.mxu1 %v1084_v13 }
  0x2f   : > { %1004 = vmatmul.mubr.bf16.gmra.mrb[4].mxu0 %v1085_v14  ;;  %1020 = vmatmul.mubr.bf16.gmra.mrb[4].mxu1 %v1086_v15 }
  0x30   : > { %1007 = vmatprep.mubr.bf16.mxu0 %v1087_v16  ;;  %1023 = vmatprep.mubr.bf16.mxu1 %v1088_v17 }
  0x37   : > { %1008 = vmatmul.mubr.bf16.gmra.mrb[8].mxu0 %v1089_v18  ;;  %1024 = vmatmul.mubr.bf16.gmra.mrb[8].mxu1 %v1090_v19 }
  0x38   : > { %1011 = vmatprep.mubr.bf16.mxu0 %v1091_v20  ;;  %1027 = vmatprep.mubr.bf16.mxu1 %v1092_v21 }
  0x3f   : > { %1012 = vmatmul.mubr.bf16.gmra.mrb[12].mxu0 %v1093_v22  ;;  %1028 = vmatmul.mubr.bf16.gmra.mrb[12].mxu1 %v1094_v23 }
  0xfa   : > { %v1001_v25 = vpop.f32.mrb[0].mxu0  ;;  %v1017_v27 = vpop.f32.mrb[0].mxu1 }
  0xfb   : > { %v663_v28 = vmul.f32 %v1001_v25, %v1213_v24  ;;  %v679_v29 = vmul.f32 %v1017_v27, %v1213_v24  ;;  %v527_v30 = vpop.f32.mrb[1].mxu0  ;;  %v591_v31 = vpop.f32.mrb[1].mxu1 }
  0xfc   : > { %v661_v32 = vmul.f32 %v1213_v24, %v527_v30  ;;  %v677_v33 = vmul.f32 %v1213_v24, %v591_v31  ;;  %v1002_v34 = vpop.f32.mrb[2].mxu0  ;;  %v1018_v35 = vpop.f32.mrb[2].mxu1 }
  0xfd   : > { %v702_v36 = vadd.f32 %v1218_v26, %v663_v28  ;;  %v718_v37 = vadd.f32 %v1218_v26, %v679_v29  ;;  %v664_v38 = vmul.f32 %v1002_v34, %v1213_v24  ;;  %v680_v39 = vmul.f32 %v1018_v35, %v1213_v24  ;;  %v530_v40 = vpop.f32.mrb[3].mxu0  ;;  %v594_v41 = vpop.f32.mrb[3].mxu1 }
  0xfe   : > { %v700_v42 = vadd.f32 %v1218_v26, %v661_v32  ;;  %v716_v43 = vadd.f32 %v1218_v26, %v677_v33  ;;  %v662_v44 = vmul.f32 %v1213_v24, %v530_v40  ;;  %v678_v45 = vmul.f32 %v1213_v24, %v594_v41 }
  0xff   : > { %v734_v46 = vmax.f32 %v702_v36, 0.0  ;;  %v750_v47 = vmax.f32 %v718_v37, 0.0  ;;  %v703_v48 = vadd.f32 %v1218_v26, %v664_v38  ;;  %v719_v49 = vadd.f32 %v1218_v26, %v680_v39 }
 0x100   : > { %v732_v50 = vmax.f32 %v700_v42, 0.0  ;;  %v748_v51 = vmax.f32 %v716_v43, 0.0  ;;  %v701_v52 = vadd.f32 %v1218_v26, %v662_v44  ;;  %v717_v53 = vadd.f32 %v1218_v26, %v678_v45 }
 0x101   : > { %766 = vst [vmem:[%s1232_s24 + $0x10] sm:$0xff] %v734_v46  ;;  %782 = vst [vmem:[%s1232_s24 + $0x90] sm:$0xff] %v750_v47  ;;  %v735_v54 = vmax.f32 %v703_v48, 0.0  ;;  %v751_v55 = vmax.f32 %v719_v49, 0.0 }
 0x102   : > { %764 = vst [vmem:[%s1232_s24] sm:$0xff] %v732_v50  ;;  %780 = vst [vmem:[%s1232_s24 + $0x80] sm:$0xff] %v748_v51  ;;  %v733_v56 = vmax.f32 %v701_v52, 0.0  ;;  %v749_v57 = vmax.f32 %v717_v53, 0.0  ;;  %v1005_v58 = vpop.f32.mrb[4].mxu0  ;;  %v1021_v59 = vpop.f32.mrb[4].mxu1 }
 0x103   : > { %767 = vst [vmem:[%s1232_s24 + $0x18] sm:$0xff] %v735_v54  ;;  %783 = vst [vmem:[%s1232_s24 + $0x98] sm:$0xff] %v751_v55  ;;  %v667_v60 = vmul.f32 %v1005_v58, %v1213_v24  ;;  %v683_v61 = vmul.f32 %v1021_v59, %v1213_v24  ;;  %v543_v62 = vpop.f32.mrb[5].mxu0  ;;  %v607_v63 = vpop.f32.mrb[5].mxu1 }
 0x104   : > { %765 = vst [vmem:[%s1232_s24 + $0x8] sm:$0xff] %v733_v56  ;;  %781 = vst [vmem:[%s1232_s24 + $0x88] sm:$0xff] %v749_v57  ;;  %v665_v0 = vmul.f32 %v1213_v24, %v543_v62  ;;  %v681_v1 = vmul.f32 %v1213_v24, %v607_v63  ;;  %v1006_v2 = vpop.f32.mrb[6].mxu0  ;;  %v1022_v3 = vpop.f32.mrb[6].mxu1 }
 0x105   : > { %v706_v4 = vadd.f32 %v1218_v26, %v667_v60  ;;  %v722_v5 = vadd.f32 %v1218_v26, %v683_v61  ;;  %v668_v6 = vmul.f32 %v1006_v2, %v1213_v24  ;;  %v684_v7 = vmul.f32 %v1022_v3, %v1213_v24  ;;  %v546_v8 = vpop.f32.mrb[7].mxu0  ;;  %v610_v9 = vpop.f32.mrb[7].mxu1 }
 0x106   : > { %v704_v10 = vadd.f32 %v1218_v26, %v665_v0  ;;  %v720_v11 = vadd.f32 %v1218_v26, %v681_v1  ;;  %v666_v12 = vmul.f32 %v1213_v24, %v546_v8  ;;  %v682_v13 = vmul.f32 %v1213_v24, %v610_v9 }
 0x107   : > { %v738_v14 = vmax.f32 %v706_v4, 0.0  ;;  %v754_v15 = vmax.f32 %v722_v5, 0.0  ;;  %v707_v16 = vadd.f32 %v1218_v26, %v668_v6  ;;  %v723_v17 = vadd.f32 %v1218_v26, %v684_v7 }
 0x108   : > { %v736_v18 = vmax.f32 %v704_v10, 0.0  ;;  %v752_v19 = vmax.f32 %v720_v11, 0.0  ;;  %v705_v20 = vadd.f32 %v1218_v26, %v666_v12  ;;  %v721_v21 = vadd.f32 %v1218_v26, %v682_v13 }
 0x109   : > { %770 = vst [vmem:[%s1232_s24 + $0x30] sm:$0xff] %v738_v14  ;;  %786 = vst [vmem:[%s1232_s24 + $0xb0] sm:$0xff] %v754_v15  ;;  %v739_v22 = vmax.f32 %v707_v16, 0.0  ;;  %v755_v23 = vmax.f32 %v723_v17, 0.0 }
 0x10a   : > { %768 = vst [vmem:[%s1232_s24 + $0x20] sm:$0xff] %v736_v18  ;;  %784 = vst [vmem:[%s1232_s24 + $0xa0] sm:$0xff] %v752_v19  ;;  %v737_v25 = vmax.f32 %v705_v20, 0.0  ;;  %v753_v27 = vmax.f32 %v721_v21, 0.0  ;;  %v1009_v28 = vpop.f32.mrb[8].mxu0  ;;  %v1025_v29 = vpop.f32.mrb[8].mxu1 }
 0x10b   : > { %771 = vst [vmem:[%s1232_s24 + $0x38] sm:$0xff] %v739_v22  ;;  %787 = vst [vmem:[%s1232_s24 + $0xb8] sm:$0xff] %v755_v23  ;;  %v671_v30 = vmul.f32 %v1009_v28, %v1213_v24  ;;  %v687_v31 = vmul.f32 %v1025_v29, %v1213_v24  ;;  %v559_v32 = vpop.f32.mrb[9].mxu0  ;;  %v623_v33 = vpop.f32.mrb[9].mxu1 }
 0x10c   : > { %769 = vst [vmem:[%s1232_s24 + $0x28] sm:$0xff] %v737_v25  ;;  %785 = vst [vmem:[%s1232_s24 + $0xa8] sm:$0xff] %v753_v27  ;;  %v669_v34 = vmul.f32 %v1213_v24, %v559_v32  ;;  %v685_v35 = vmul.f32 %v1213_v24, %v623_v33  ;;  %v1010_v36 = vpop.f32.mrb[10].mxu0  ;;  %v1026_v37 = vpop.f32.mrb[10].mxu1 }
 0x10d   : > { %v710_v38 = vadd.f32 %v1218_v26, %v671_v30  ;;  %v726_v39 = vadd.f32 %v1218_v26, %v687_v31  ;;  %v672_v40 = vmul.f32 %v1010_v36, %v1213_v24  ;;  %v688_v41 = vmul.f32 %v1026_v37, %v1213_v24  ;;  %v562_v42 = vpop.f32.mrb[11].mxu0  ;;  %v626_v43 = vpop.f32.mrb[11].mxu1 }
 0x10e   : > { %v708_v44 = vadd.f32 %v1218_v26, %v669_v34  ;;  %v724_v45 = vadd.f32 %v1218_v26, %v685_v35  ;;  %v670_v46 = vmul.f32 %v1213_v24, %v562_v42  ;;  %v686_v47 = vmul.f32 %v1213_v24, %v626_v43 }
 0x10f   : > { %v742_v48 = vmax.f32 %v710_v38, 0.0  ;;  %v758_v49 = vmax.f32 %v726_v39, 0.0  ;;  %v711_v50 = vadd.f32 %v1218_v26, %v672_v40  ;;  %v727_v51 = vadd.f32 %v1218_v26, %v688_v41 }
 0x110   : > { %v740_v52 = vmax.f32 %v708_v44, 0.0  ;;  %v756_v53 = vmax.f32 %v724_v45, 0.0  ;;  %v709_v54 = vadd.f32 %v1218_v26, %v670_v46  ;;  %v725_v55 = vadd.f32 %v1218_v26, %v686_v47 }
 0x111   : > { %774 = vst [vmem:[%s1232_s24 + $0x50] sm:$0xff] %v742_v48  ;;  %790 = vst [vmem:[%s1232_s24 + $0xd0] sm:$0xff] %v758_v49  ;;  %v743_v56 = vmax.f32 %v711_v50, 0.0  ;;  %v759_v57 = vmax.f32 %v727_v51, 0.0 }
 0x112   : > { %772 = vst [vmem:[%s1232_s24 + $0x40] sm:$0xff] %v740_v52  ;;  %788 = vst [vmem:[%s1232_s24 + $0xc0] sm:$0xff] %v756_v53  ;;  %v741_v58 = vmax.f32 %v709_v54, 0.0  ;;  %v757_v59 = vmax.f32 %v725_v55, 0.0  ;;  %v1013_v60 = vpop.f32.mrb[12].mxu0  ;;  %v1029_v61 = vpop.f32.mrb[12].mxu1 }
 0x113   : > { %775 = vst [vmem:[%s1232_s24 + $0x58] sm:$0xff] %v743_v56  ;;  %791 = vst [vmem:[%s1232_s24 + $0xd8] sm:$0xff] %v759_v57  ;;  %v675_v62 = vmul.f32 %v1013_v60, %v1213_v24  ;;  %v691_v63 = vmul.f32 %v1029_v61, %v1213_v24  ;;  %v575_v0 = vpop.f32.mrb[13].mxu0  ;;  %v639_v1 = vpop.f32.mrb[13].mxu1 }
 0x114   : > { %773 = vst [vmem:[%s1232_s24 + $0x48] sm:$0xff] %v741_v58  ;;  %789 = vst [vmem:[%s1232_s24 + $0xc8] sm:$0xff] %v757_v59  ;;  %v673_v2 = vmul.f32 %v1213_v24, %v575_v0  ;;  %v689_v3 = vmul.f32 %v1213_v24, %v639_v1  ;;  %v1014_v4 = vpop.f32.mrb[14].mxu0  ;;  %v1030_v5 = vpop.f32.mrb[14].mxu1 }
 0x115   : > { %v714_v6 = vadd.f32 %v1218_v26, %v675_v62  ;;  %v730_v7 = vadd.f32 %v1218_v26, %v691_v63  ;;  %v676_v8 = vmul.f32 %v1014_v4, %v1213_v24  ;;  %v692_v9 = vmul.f32 %v1030_v5, %v1213_v24  ;;  %v578_v10 = vpop.f32.mrb[15].mxu0  ;;  %v642_v11 = vpop.f32.mrb[15].mxu1 }
 0x116   : > { %v712_v12 = vadd.f32 %v1218_v26, %v673_v2  ;;  %v728_v13 = vadd.f32 %v1218_v26, %v689_v3  ;;  %v674_v14 = vmul.f32 %v1213_v24, %v578_v10  ;;  %v690_v15 = vmul.f32 %v1213_v24, %v642_v11 }
 0x117   : > { %v746_v16 = vmax.f32 %v714_v6, 0.0  ;;  %v762_v17 = vmax.f32 %v730_v7, 0.0  ;;  %v715_v18 = vadd.f32 %v1218_v26, %v676_v8  ;;  %v731_v19 = vadd.f32 %v1218_v26, %v692_v9 }
 0x118   : > { %v744_v20 = vmax.f32 %v712_v12, 0.0  ;;  %v760_v21 = vmax.f32 %v728_v13, 0.0  ;;  %v713_v22 = vadd.f32 %v1218_v26, %v674_v14  ;;  %v729_v23 = vadd.f32 %v1218_v26, %v690_v15 }
 0x119   : > { %778 = vst [vmem:[%s1232_s24 + $0x70] sm:$0xff] %v746_v16  ;;  %794 = vst [vmem:[%s1232_s24 + $0xf0] sm:$0xff] %v762_v17  ;;  %v747_v25 = vmax.f32 %v715_v18, 0.0  ;;  %v763_v24 = vmax.f32 %v731_v19, 0.0 }
 0x11a   : > { %776 = vst [vmem:[%s1232_s24 + $0x60] sm:$0xff] %v744_v20  ;;  %792 = vst [vmem:[%s1232_s24 + $0xe0] sm:$0xff] %v760_v21  ;;  %v745_v27 = vmax.f32 %v713_v22, 0.0  ;;  %v761_v28 = vmax.f32 %v729_v23, 0.0 }
 0x11b   : > { %779 = vst [vmem:[%s1232_s24 + $0x78] sm:$0xff] %v747_v25  ;;  %795 = vst [vmem:[%s1232_s24 + $0xf8] sm:$0xff] %v763_v24 }
 0x11c   : > { %777 = vst [vmem:[%s1232_s24 + $0x68] sm:$0xff] %v745_v27  ;;  %793 = vst [vmem:[%s1232_s24 + $0xe8] sm:$0xff] %v761_v28 }
 0x11d PF: > { %s14_s17 = sadd.s32 1, %s1117_s17   ;;  %s1336_s15 = smov %s1113_s16 }
 0x11e   : > { %p11_p5 = scmp.ge.s32.totalorder %s14_s17, 14   ;;  %s1337_s16 = smov %s1339_s18 }
 0x120   :  { %13 = sbr.rel (!%p11_p5) target bundleno = 2 (0x2), region = 75 }

// kernel: stem.8
= control target key start
LH: loop header
LB: loop body
LE: loop exit
PB: predicated region body
PF: predicated region fallthrough
CT: control target
= control target key end

     0   :  { %s1861_s15 = smov 0   ;;  %s1863_s16 = smov 0   ;;  %s2161_s0 = inlined_call_operand.vmem [shape: bf16[2816,384], index: 0, kind: input, shape index: {}]   ;;  %s2162_s1 = inlined_call_operand.vmem [shape: bf16[384,128], index: 1, kind: input, shape index: {}]   ;;  %s2163_s2 = inlined_call_operand.vmem [shape: f32[1,128], index: 2, kind: input, shape index: {}]   ;;  %s2164_s3 = inlined_call_operand.vmem [shape: f32[1,128], index: 3, kind: input, shape index: {}]   ;;  %s2165_s4 = inlined_call_operand.vmem [shape: f32[2816,128], index: 4, kind: output, shape index: {}]  }
   0x1   :  { %s1865_s17 = smov 0  }
   0x2 LB: > { %s33_s18 = sadd.s32 1, %s1830_s16  ;;  %p1418_p0 = scmp.ge.s32.totalorder %s1834_s17, 1  ;;  %s1834_s17 = sphi %s1865_s17, %s14_s17   ;;  %s1830_s16 = sphi %s1863_s16, %s2167_s16   ;;  %s1826_s15 = sphi %s1861_s15, %s2166_s15  }
   0x3   : > { %p35_p1 = scmp.ge.s32.totalorder %s33_s18, 11  ;;  %p224_p2 = scmp.lt.s32.totalorder %s1834_s17, 12 }
   0x5   : > { %s2169_s18 = smov (%p35_p1, %s33_s18), 0  ;;  %p225_p3 = pnand %p1418_p0, %p224_p2 }
   0x6   : > { %v1724_v0 = vld [vmem:[%s2162_s1 + $0x40] sm:$0xff] (!%p225_p3)   ;;  %s1419_s21 = sshll.u32 (!%p225_p3), %s1826_s15, 5  ;;  %v1726_v2 = vld [vmem:[%s2162_s1 + $0x48] sm:$0xff] (!%p225_p3)   ;;  %v1728_v4 = vld [vmem:[%s2162_s1 + $0x50] sm:$0xff] (!%p225_p3)  }
   0x7   : > { %228 = sbr.rel (%p225_p3) target bundleno = 353 (0x161), region = 36  ;;  %v1725_v1 = vld [vmem:[%s2162_s1] sm:$0xff] (!%p225_p3)   ;;  %1499 = vmatprep.subr.bf16.mxu0 (!%p225_p3), %v1724_v0  ;;  %1683 = vmatprep.subr.bf16.mxu1 (!%p225_p3), %v1724_v0  ;;  %p274_p4 = scmp.lt.s32.totalorder (!%p225_p3), %s1419_s21, 351  ;;  %v1727_v3 = vld [vmem:[%s2162_s1 + $0x8] sm:$0xff] (!%p225_p3)   ;;  %v1729_v5 = vld [vmem:[%s2162_s1 + $0x10] sm:$0xff] (!%p225_p3)  }
   0x8   : > { %1500 = vmatpush3.bf16.msra.mxu0 (!%p225_p3), %v1725_v1  ;;  %1691 = vmatpush3.bf16.msra.mxu1 (!%p225_p3), %v1725_v1  ;;  %v1730_v6 = vld [vmem:[%s2162_s1 + $0x58] sm:$0xff] (!%p225_p3)   ;;  %v1732_v8 = vld [vmem:[%s2162_s1 + $0x60] sm:$0xff] (!%p225_p3)   ;;  %v1734_v10 = vld [vmem:[%s2162_s1 + $0x68] sm:$0xff] (!%p225_p3)  }
   0x9   : > { %1501 = vmatprep.subr.bf16.mxu0 (!%p225_p3), %v1726_v2  ;;  %1684 = vmatprep.subr.bf16.mxu1 (!%p225_p3), %v1726_v2  ;;  %v1731_v7 = vld [vmem:[%s2162_s1 + $0x18] sm:$0xff] (!%p225_p3)   ;;  %v1733_v9 = vld [vmem:[%s2162_s1 + $0x20] sm:$0xff] (!%p225_p3)   ;;  %v1735_v13 = vld [vmem:[%s2162_s1 + $0x28] sm:$0xff] (!%p225_p3)  }
   0xa   : > { %v1736_v14 = vld [vmem:[%s2162_s1 + $0x70] sm:$0xff] (!%p225_p3)   ;;  %v1738_v16 = vld [vmem:[%s2162_s1 + $0x78] sm:$0xff] (!%p225_p3)   ;;  %v1746_v18 = vld [vmem:[%s2162_s1 + $0x80] sm:$0xff] (!%p225_p3)  }
   0xb   : > { %v1737_v15 = vld [vmem:[%s2162_s1 + $0x30] sm:$0xff] (!%p225_p3)   ;;  %v1739_v17 = vld [vmem:[%s2162_s1 + $0x38] sm:$0xff] (!%p225_p3)   ;;  %v1747_v22 = vld [vmem:[%s2162_s1 + $0x88] sm:$0xff] (!%p225_p3)  }
   0xc   : > { %1502 = vmatpush3.bf16.msra.mxu0 (!%p225_p3), %v1727_v3  ;;  %1692 = vmatpush3.bf16.msra.mxu1 (!%p225_p3), %v1727_v3  ;;  %v1754_v25 = vld [vmem:[%s2162_s1 + $0x90] sm:$0xff] (!%p225_p3)   ;;  %v1755_v27 = vld [vmem:[%s2162_s1 + $0x98] sm:$0xff] (!%p225_p3)   ;;  %v1762_v30 = vld [vmem:[%s2162_s1 + $0xa0] sm:$0xff] (!%p225_p3)  }
   0xd   : > { %1503 = vmatprep.subr.bf16.mxu0 (!%p225_p3), %v1728_v4  ;;  %1685 = vmatprep.subr.bf16.mxu1 (!%p225_p3), %v1728_v4  ;;  %v1763_v33 = vld [vmem:[%s2162_s1 + $0xa8] sm:$0xff] (!%p225_p3)   ;;  %v1770_v36 = vld [vmem:[%s2162_s1 + $0xb0] sm:$0xff] (!%p225_p3)   ;;  %v1771_v40 = vld [vmem:[%s2162_s1 + $0xb8] sm:$0xff] (!%p225_p3)  }
   0xe   : > { %s2171_s21 = smov (!%p274_p4, %s1419_s21), 351 }
   0xf   : > { %s1699_s8 = smul.u32 12, %s2171_s21  ;;  %s1422_s6 = sshll.u32 %s2171_s21, 3 }
  0x10   : > { %1504 = vmatpush3.bf16.msra.mxu0 %v1729_v5  ;;  %1693 = vmatpush3.bf16.msra.mxu1 %v1729_v5  ;;  %s2043_s9 = scalar_lea.vmem %s2165_s4, %s1422_s6 }
  0x11   : > { %1505 = vmatprep.subr.bf16.mxu0 %v1730_v6  ;;  %1686 = vmatprep.subr.bf16.mxu1 %v1730_v6  ;;  %s1912_s15 = scalar_lea.vmem %s2161_s0, %s1699_s8 }
  0x12   : > { %v1742_v11 = vld [vmem:[%s1912_s15 + $0x4] ss:$12 sps:$4 sm:$0xff]   ;;  %v1740_v19 = vld [vmem:[%s1912_s15] ss:$12 sps:$4 sm:$0xff]   ;;  %v1748_v21 = vld [vmem:[%s1912_s15 + $0x1c] ss:$12 sps:$4 sm:$0xff]  }
  0x13   : > { %v1745_v12 = vld [vmem:[%s1912_s15 + $0x124] ss:$12 sps:$4 sm:$0xff]   ;;  %853 = vmatprep.mubr.bf16.mxu0 %v1742_v11  ;;  %v1743_v20 = vld [vmem:[%s1912_s15 + $0x120] ss:$12 sps:$4 sm:$0xff]   ;;  %v1750_v23 = vld [vmem:[%s1912_s15 + $0x13c] ss:$12 sps:$4 sm:$0xff]  }
  0x14   : > { %1506 = vmatpush3.bf16.msra.mxu0 %v1731_v7  ;;  %1694 = vmatpush3.bf16.msra.mxu1 %v1731_v7  ;;  %v1752_v24 = vld [vmem:[%s1912_s15 + $0x18] ss:$12 sps:$4 sm:$0xff]   ;;  %v1756_v28 = vld [vmem:[%s1912_s15 + $0x34] ss:$12 sps:$4 sm:$0xff]   ;;  %v1760_v31 = vld [vmem:[%s1912_s15 + $0x30] ss:$12 sps:$4 sm:$0xff]  }
  0x15   : > { %1507 = vmatprep.subr.bf16.mxu0 %v1732_v8  ;;  %1687 = vmatprep.subr.bf16.mxu1 %v1732_v8  ;;  %v1753_v26 = vld [vmem:[%s1912_s15 + $0x138] ss:$12 sps:$4 sm:$0xff]   ;;  %v1758_v29 = vld [vmem:[%s1912_s15 + $0x154] ss:$12 sps:$4 sm:$0xff]   ;;  %v1761_v32 = vld [vmem:[%s1912_s15 + $0x150] ss:$12 sps:$4 sm:$0xff]  }
  0x16   : > { %949 = vmatprep.mubr.bf16.mxu1 %v1745_v12  ;;  %v1764_v34 = vld [vmem:[%s1912_s15 + $0x4c] ss:$12 sps:$4 sm:$0xff]   ;;  %v1768_v37 = vld [vmem:[%s1912_s15 + $0x48] ss:$12 sps:$4 sm:$0xff]   ;;  %v1772_v39 = vld [vmem:[%s1912_s15 + $0x64] ss:$12 sps:$4 sm:$0xff]  }
  0x17   : > { %v1766_v35 = vld [vmem:[%s1912_s15 + $0x16c] ss:$12 sps:$4 sm:$0xff]   ;;  %v1769_v38 = vld [vmem:[%s1912_s15 + $0x168] ss:$12 sps:$4 sm:$0xff]   ;;  %v1781_v47 = vld [vmem:[%s1912_s15 + $0x50] ss:$12 sps:$4 sm:$0xff]  }
  0x18   : > { %1508 = vmatpush3.bf16.msra.mxu0 %v1733_v9  ;;  %1695 = vmatpush3.bf16.msra.mxu1 %v1733_v9  ;;  %v1774_v41 = vld [vmem:[%s1912_s15 + $0x8] ss:$12 sps:$4 sm:$0xff]   ;;  %v1775_v42 = vld [vmem:[%s1912_s15 + $0x60] ss:$12 sps:$4 sm:$0xff]   ;;  %v1779_v45 = vld [vmem:[%s1912_s15 + $0x38] ss:$12 sps:$4 sm:$0xff]  }
  0x19   : > { %1509 = vmatprep.subr.bf16.mxu0 %v1734_v10  ;;  %1688 = vmatprep.subr.bf16.mxu1 %v1734_v10  ;;  %v1776_v43 = vld [vmem:[%s1912_s15 + $0x20] ss:$12 sps:$4 sm:$0xff]   ;;  %v1777_v44 = vld [vmem:[%s1912_s15 + $0x7c] ss:$12 sps:$4 sm:$0xff]   ;;  %v1780_v46 = vld [vmem:[%s1912_s15 + $0x78] ss:$12 sps:$4 sm:$0xff]  }
  0x1a   : > { %v1782_v48 = vld [vmem:[%s1912_s15 + $0x94] ss:$12 sps:$4 sm:$0xff]   ;;  %v1785_v50 = vld [vmem:[%s1912_s15 + $0x90] ss:$12 sps:$4 sm:$0xff]   ;;  %v1787_v52 = vld [vmem:[%s1912_s15 + $0xac] ss:$12 sps:$4 sm:$0xff]  }
  0x1b   : > { %v1784_v49 = vld [vmem:[%s1912_s15 + $0x68] ss:$12 sps:$4 sm:$0xff]   ;;  %v1786_v51 = vld [vmem:[%s1912_s15 + $0x80] ss:$12 sps:$4 sm:$0xff]   ;;  %v1789_v53 = vld [vmem:[%s1912_s15 + $0x98] ss:$12 sps:$4 sm:$0xff]  }
  0x1c   : > { %1510 = vmatpush3.bf16.msra.mxu0 %v1735_v13  ;;  %1696 = vmatpush3.bf16.msra.mxu1 %v1735_v13  ;;  %v1790_v54 = vld [vmem:[%s1912_s15 + $0xa8] ss:$12 sps:$4 sm:$0xff]   ;;  %v1791_v55 = vld [vmem:[%s1912_s15 + $0xb0] ss:$12 sps:$4 sm:$0xff]   ;;  %v1795_v58 = vld [vmem:[%s1912_s15 + $0xc0] ss:$12 sps:$4 sm:$0xff]  }
  0x1d   : > { %1511 = vmatprep.subr.bf16.mxu0 %v1736_v14  ;;  %1689 = vmatprep.subr.bf16.mxu1 %v1736_v14  ;;  %v1792_v56 = vld [vmem:[%s1912_s15 + $0xc4] ss:$12 sps:$4 sm:$0xff]   ;;  %v1794_v57 = vld [vmem:[%s1912_s15 + $0xc8] ss:$12 sps:$4 sm:$0xff]   ;;  %v1796_v59 = vld [vmem:[%s1912_s15 + $0xe0] ss:$12 sps:$4 sm:$0xff]  }
  0x1e   : > { %v1797_v60 = vld [vmem:[%s1912_s15 + $0xdc] ss:$12 sps:$4 sm:$0xff]   ;;  %v1799_v61 = vld [vmem:[%s1912_s15 + $0xf8] ss:$12 sps:$4 sm:$0xff]   ;;  %v1802_v0 = vld [vmem:[%s1912_s15 + $0xf4] ss:$12 sps:$4 sm:$0xff]  }
  0x1f   : > { %v1800_v62 = vld [vmem:[%s1912_s15 + $0xd8] ss:$12 sps:$4 sm:$0xff]   ;;  %v1801_v63 = vld [vmem:[%s1912_s15 + $0x110] ss:$12 sps:$4 sm:$0xff]   ;;  %v1804_v1 = vld [vmem:[%s1912_s15 + $0x128] ss:$12 sps:$4 sm:$0xff]  }
  0x20   : > { %1512 = vmatpush3.bf16.msra.mxu0 %v1737_v15  ;;  %1697 = vmatpush3.bf16.msra.mxu1 %v1737_v15  ;;  %v1805_v2 = vld [vmem:[%s1912_s15 + $0xf0] ss:$12 sps:$4 sm:$0xff]   ;;  %v1806_v3 = vld [vmem:[%s1912_s15 + $0x140] ss:$12 sps:$4 sm:$0xff]   ;;  %v1809_v5 = vld [vmem:[%s1912_s15 + $0x158] ss:$12 sps:$4 sm:$0xff]  }
  0x21   : > { %1513 = vmatprep.subr.bf16.mxu0 %v1738_v16  ;;  %1690 = vmatprep.subr.bf16.mxu1 %v1738_v16  ;;  %v1807_v4 = vld [vmem:[%s1912_s15 + $0x10c] ss:$12 sps:$4 sm:$0xff]   ;;  %v1810_v6 = vld [vmem:[%s1912_s15 + $0x108] ss:$12 sps:$4 sm:$0xff]   ;;  %v1811_v7 = vld [vmem:[%s1912_s15 + $0x170] ss:$12 sps:$4 sm:$0xff]  }
  0x24   : > { %1514 = vmatpush3.bf16.msra.mxu0 %v1739_v17  ;;  %1698 = vmatpush3.bf16.msra.mxu1 %v1739_v17 }
  0x25   : > { %1635 = vmatprep.subr.bf16.mxu1 %v1746_v18 }
  0x27   : > { %854 = vmatmul.mubr.bf16.vlgmr.msra.gmra.mrb[0].mxu0 %v1740_v19  ;;  %950 = vmatmul.mubr.bf16.vlgmr.msra.gmra.mrb[0].mxu1 %v1743_v20 }
  0x28   : > { %1636 = vmatpush3.bf16.msra.mxu1 %v1746_v18  ;;  %861 = vmatprep.mubr.bf16.mxu0 %v1748_v21 }
  0x29   : > { %1637 = vmatprep.subr.bf16.mxu1 %v1747_v22  ;;  %957 = vmatprep.mubr.bf16.mxu1 %v1750_v23 }
  0x2c   : > { %1638 = vmatpush3.bf16.msra.mxu1 %v1747_v22 }
  0x2d   : > { %1639 = vmatprep.subr.bf16.mxu1 %v1754_v25 }
  0x2f   : > { %862 = vmatmul.mubr.bf16.gmra.mrb[4].mxu0 %v1752_v24  ;;  %958 = vmatmul.mubr.bf16.gmra.mrb[4].mxu1 %v1753_v26 }
  0x30   : > { %1640 = vmatpush3.bf16.msra.mxu1 %v1754_v25  ;;  %869 = vmatprep.mubr.bf16.mxu0 %v1756_v28 }
  0x31   : > { %1641 = vmatprep.subr.bf16.mxu1 %v1755_v27  ;;  %965 = vmatprep.mubr.bf16.mxu1 %v1758_v29 }
  0x34   : > { %1642 = vmatpush3.bf16.msra.mxu1 %v1755_v27 }
  0x35   : > { %1643 = vmatprep.subr.bf16.mxu1 %v1762_v30 }
  0x37   : > { %870 = vmatmul.mubr.bf16.gmra.mrb[8].mxu0 %v1760_v31  ;;  %966 = vmatmul.mubr.bf16.gmra.mrb[8].mxu1 %v1761_v32 }
  0x38   : > { %1644 = vmatpush3.bf16.msra.mxu1 %v1762_v30  ;;  %877 = vmatprep.mubr.bf16.mxu0 %v1764_v34 }
  0x39   : > { %1645 = vmatprep.subr.bf16.mxu1 %v1763_v33  ;;  %973 = vmatprep.mubr.bf16.mxu1 %v1766_v35 }
  0x3c   : > { %1646 = vmatpush3.bf16.msra.mxu1 %v1763_v33 }
  0x3d   : > { %1647 = vmatprep.subr.bf16.mxu1 %v1770_v36 }
  0x3f   : > { %878 = vmatmul.mubr.bf16.gmra.mrb[12].mxu0 %v1768_v37  ;;  %974 = vmatmul.mubr.bf16.gmra.mrb[12].mxu1 %v1769_v38 }
  0x40   : > { %1648 = vmatpush3.bf16.msra.mxu1 %v1770_v36  ;;  %885 = vmatprep.mubr.bf16.mxu0 %v1772_v39 }
  0x41   : > { %1649 = vmatprep.subr.bf16.mxu1 %v1771_v40  ;;  %1651 = vmatprep.mubr.bf16.mxu1 %v1774_v41 }
  0x44   : > { %1650 = vmatpush3.bf16.msra.mxu1 %v1771_v40 }
  0x47   : > { %886 = vmatmul.mubr.bf16.gmra.mrb[16].mxu0 %v1775_v42  ;;  %1652 = vmatmul.mubr.bf16.vlgmr.msra.gmra.mrb[16].mxu1 %v1776_v43 }
  0x48   : > { %893 = vmatprep.mubr.bf16.mxu0 %v1777_v44  ;;  %1655 = vmatprep.mubr.bf16.mxu1 %v1779_v45 }
  0x4f   : > { %894 = vmatmul.mubr.bf16.gmra.mrb[20].mxu0 %v1780_v46  ;;  %1656 = vmatmul.mubr.bf16.gmra.mrb[20].mxu1 %v1781_v47 }
  0x50   : > { %901 = vmatprep.mubr.bf16.mxu0 %v1782_v48  ;;  %1659 = vmatprep.mubr.bf16.mxu1 %v1784_v49 }
  0x57   : > { %902 = vmatmul.mubr.bf16.gmra.mrb[24].mxu0 %v1785_v50  ;;  %1660 = vmatmul.mubr.bf16.gmra.mrb[24].mxu1 %v1786_v51 }
  0x58   : > { %909 = vmatprep.mubr.bf16.mxu0 %v1787_v52  ;;  %1663 = vmatprep.mubr.bf16.mxu1 %v1789_v53 }
  0x5f   : > { %910 = vmatmul.mubr.bf16.gmra.mrb[28].mxu0 %v1790_v54  ;;  %1664 = vmatmul.mubr.bf16.gmra.mrb[28].mxu1 %v1791_v55 }
  0x60   : > { %917 = vmatprep.mubr.bf16.mxu0 %v1792_v56  ;;  %1667 = vmatprep.mubr.bf16.mxu1 %v1794_v57 }
  0x67   : > { %918 = vmatmul.mubr.bf16.gmra.mrb[32].mxu0 %v1795_v58  ;;  %1668 = vmatmul.mubr.bf16.gmra.mrb[32].mxu1 %v1796_v59  ;;  %v2028_v58 = vld [vmem:[%s2163_s2] ss:$0 sm:$0xff] }
  0x68   : > { %925 = vmatprep.mubr.bf16.mxu0 %v1797_v60  ;;  %1671 = vmatprep.mubr.bf16.mxu1 %v1799_v61 }
  0x6f   : > { %926 = vmatmul.mubr.bf16.gmra.mrb[36].mxu0 %v1800_v62  ;;  %1672 = vmatmul.mubr.bf16.gmra.mrb[36].mxu1 %v1801_v63  ;;  %v2033_v62 = vld [vmem:[%s2164_s3] ss:$0 sm:$0xff] }
  0x70   : > { %933 = vmatprep.mubr.bf16.mxu0 %v1802_v0  ;;  %1675 = vmatprep.mubr.bf16.mxu1 %v1804_v1 }
  0x77   : > { %934 = vmatmul.mubr.bf16.gmra.mrb[40].mxu0 %v1805_v2  ;;  %1676 = vmatmul.mubr.bf16.gmra.mrb[40].mxu1 %v1806_v3 }
  0x78   : > { %941 = vmatprep.mubr.bf16.mxu0 %v1807_v4  ;;  %1679 = vmatprep.mubr.bf16.mxu1 %v1809_v5 }
  0x7f   : > { %942 = vmatmul.mubr.bf16.gmra.mrb[44].mxu0 %v1810_v6  ;;  %1680 = vmatmul.mubr.bf16.gmra.mrb[44].mxu1 %v1811_v7 }
  0xfa   : > { %v1515_v8 = vpop.f32.mrb[0].mxu0  ;;  %v1587_v9 = vpop.f32.mrb[0].mxu1 }
  0xfb   : > { %v1516_v10 = vpop.f32.mrb[1].mxu0  ;;  %v1588_v11 = vpop.f32.mrb[1].mxu1 }
  0xfc   : > { %v1517_v12 = vadd.f32 %v1516_v10, %v1515_v8  ;;  %v2007_v13 = vadd.f32 %v1588_v11, %v1587_v9  ;;  %v1518_v14 = vpop.f32.mrb[2].mxu0  ;;  %v1590_v15 = vpop.f32.mrb[2].mxu1 }
  0xfd   : > { %v1519_v16 = vpop.f32.mrb[3].mxu0  ;;  %v1591_v17 = vpop.f32.mrb[3].mxu1 }
  0xfe   : > { %v1520_v18 = vadd.f32 %v1519_v16, %v1518_v14  ;;  %v2009_v19 = vadd.f32 %v1591_v17, %v1590_v15 }
 0x102   : > { %v1521_v20 = vpop.f32.mrb[4].mxu0  ;;  %v1593_v21 = vpop.f32.mrb[4].mxu1 }
 0x103   : > { %v1522_v22 = vpop.f32.mrb[5].mxu0  ;;  %v1594_v23 = vpop.f32.mrb[5].mxu1 }
 0x104   : > { %v1523_v24 = vadd.f32 %v1522_v22, %v1521_v20  ;;  %v2011_v25 = vadd.f32 %v1594_v23, %v1593_v21  ;;  %v1524_v26 = vpop.f32.mrb[6].mxu0  ;;  %v1596_v27 = vpop.f32.mrb[6].mxu1 }
 0x105   : > { %v1525_v28 = vpop.f32.mrb[7].mxu0  ;;  %v1597_v29 = vpop.f32.mrb[7].mxu1 }
 0x106   : > { %v1526_v30 = vadd.f32 %v1525_v28, %v1524_v26  ;;  %v2013_v31 = vadd.f32 %v1597_v29, %v1596_v27 }
 0x10a   : > { %v1527_v32 = vpop.f32.mrb[8].mxu0  ;;  %v1599_v33 = vpop.f32.mrb[8].mxu1 }
 0x10b   : > { %v1528_v34 = vpop.f32.mrb[9].mxu0  ;;  %v1600_v35 = vpop.f32.mrb[9].mxu1 }
 0x10c   : > { %v1529_v36 = vadd.f32 %v1528_v34, %v1527_v32  ;;  %v2015_v37 = vadd.f32 %v1600_v35, %v1599_v33  ;;  %v1530_v38 = vpop.f32.mrb[10].mxu0  ;;  %v1602_v39 = vpop.f32.mrb[10].mxu1 }
 0x10d   : > { %v1531_v40 = vpop.f32.mrb[11].mxu0  ;;  %v1603_v41 = vpop.f32.mrb[11].mxu1 }
 0x10e   : > { %v2017_v42 = vadd.f32 %v1531_v40, %v1530_v38  ;;  %v2019_v43 = vadd.f32 %v1603_v41, %v1602_v39 }
 0x112   : > { %v1533_v44 = vpop.f32.mrb[12].mxu0  ;;  %v1605_v45 = vpop.f32.mrb[12].mxu1 }
 0x113   : > { %v1534_v46 = vpop.f32.mrb[13].mxu0  ;;  %v1606_v47 = vpop.f32.mrb[13].mxu1 }
 0x114   : > { %v1535_v48 = vadd.f32 %v1534_v46, %v1533_v44  ;;  %v2021_v49 = vadd.f32 %v1606_v47, %v1605_v45  ;;  %v1536_v50 = vpop.f32.mrb[14].mxu0  ;;  %v1608_v51 = vpop.f32.mrb[14].mxu1 }
 0x115   : > { %v1537_v52 = vpop.f32.mrb[15].mxu0  ;;  %v1609_v53 = vpop.f32.mrb[15].mxu1 }
 0x116   : > { %v1538_v54 = vadd.f32 %v1537_v52, %v1536_v50  ;;  %v2023_v55 = vadd.f32 %v1609_v53, %v1608_v51 }
 0x11a   : > { %v1539_v56 = vpop.f32.mrb[16].mxu0  ;;  %v1653_v57 = vpop.f32.mrb[16].mxu1 }
 0x11b   : > { %v1025_v59 = vadd.f32 %v1653_v57, %v1523_v24  ;;  %v1540_v60 = vpop.f32.mrb[17].mxu0  ;;  %v1016_v61 = vpop.f32.mrb[17].mxu1 }
 0x11c   : > { %v1541_v63 = vadd.f32 %v1540_v60, %v1539_v56  ;;  %v1017_v0 = vadd.f32 %v1517_v12, %v1016_v61  ;;  %v1542_v1 = vpop.f32.mrb[18].mxu0  ;;  %v1654_v2 = vpop.f32.mrb[18].mxu1 }
 0x11d   : > { %v1152_v3 = vmul.f32 %v2028_v58, %v1025_v59  ;;  %v1028_v4 = vadd.f32 %v1654_v2, %v1526_v30  ;;  %v1543_v5 = vpop.f32.mrb[19].mxu0  ;;  %v1019_v6 = vpop.f32.mrb[19].mxu1 }
 0x11e   : > { %v1150_v7 = vmul.f32 %v2028_v58, %v1017_v0  ;;  %v1544_v8 = vadd.f32 %v1543_v5, %v1542_v1  ;;  %v1020_v9 = vadd.f32 %v1520_v18, %v1019_v6 }
 0x11f   : > { %v1191_v10 = vadd.f32 %v2033_v62, %v1152_v3  ;;  %v1153_v11 = vmul.f32 %v2028_v58, %v1028_v4 }
 0x120   : > { %v1189_v12 = vadd.f32 %v2033_v62, %v1150_v7  ;;  %v1151_v14 = vmul.f32 %v2028_v58, %v1020_v9 }
 0x121   : > { %v1223_v15 = vmax.f32 %v1191_v10, 0.0  ;;  %v1192_v16 = vadd.f32 %v2033_v62, %v1153_v11 }
 0x122   : > { %v1221_v17 = vmax.f32 %v1189_v12, 0.0  ;;  %v1190_v18 = vadd.f32 %v2033_v62, %v1151_v14  ;;  %v1545_v20 = vpop.f32.mrb[20].mxu0  ;;  %v1657_v21 = vpop.f32.mrb[20].mxu1 }
 0x123   : > { %1255 = vst [vmem:[%s2043_s9 + $0x10] sm:$0xff] %v1223_v15  ;;  %v1224_v22 = vmax.f32 %v1192_v16, 0.0  ;;  %v1041_v23 = vadd.f32 %v1657_v21, %v1535_v48  ;;  %v1546_v24 = vpop.f32.mrb[21].mxu0  ;;  %v1032_v26 = vpop.f32.mrb[21].mxu1 }
 0x124   : > { %1253 = vst [vmem:[%s2043_s9] sm:$0xff] %v1221_v17  ;;  %v1222_v27 = vmax.f32 %v1190_v18, 0.0  ;;  %v1547_v28 = vadd.f32 %v1546_v24, %v1545_v20  ;;  %v1033_v29 = vadd.f32 %v1529_v36, %v1032_v26  ;;  %v1548_v30 = vpop.f32.mrb[22].mxu0  ;;  %v1658_v32 = vpop.f32.mrb[22].mxu1 }
 0x125   : > { %1256 = vst [vmem:[%s2043_s9 + $0x18] sm:$0xff] %v1224_v22  ;;  %v1156_v33 = vmul.f32 %v2028_v58, %v1041_v23  ;;  %v1044_v34 = vadd.f32 %v1658_v32, %v1538_v54  ;;  %v1549_v35 = vpop.f32.mrb[23].mxu0  ;;  %v1035_v38 = vpop.f32.mrb[23].mxu1 }
 0x126   : > { %1254 = vst [vmem:[%s2043_s9 + $0x8] sm:$0xff] %v1222_v27  ;;  %v1154_v39 = vmul.f32 %v2028_v58, %v1033_v29  ;;  %v1550_v40 = vadd.f32 %v1549_v35, %v1548_v30  ;;  %v1036_v41 = vadd.f32 %v2017_v42, %v1035_v38 }
 0x127   : > { %v1195_v44 = vadd.f32 %v2033_v62, %v1156_v33  ;;  %v1157_v36 = vmul.f32 %v2028_v58, %v1044_v34 }
 0x128   : > { %v1193_v45 = vadd.f32 %v2033_v62, %v1154_v39  ;;  %v1155_v46 = vmul.f32 %v2028_v58, %v1036_v41 }
 0x129   : > { %v1227_v47 = vmax.f32 %v1195_v44, 0.0  ;;  %v1196_v48 = vadd.f32 %v2033_v62, %v1157_v36 }
 0x12a   : > { %v1225_v50 = vmax.f32 %v1193_v45, 0.0  ;;  %v1194_v51 = vadd.f32 %v2033_v62, %v1155_v46  ;;  %v1551_v52 = vpop.f32.mrb[24].mxu0  ;;  %v1661_v53 = vpop.f32.mrb[24].mxu1 }
 0x12b   : > { %1259 = vst [vmem:[%s2043_s9 + $0x30] sm:$0xff] %v1227_v47  ;;  %v1228_v42 = vmax.f32 %v1196_v48, 0.0  ;;  %v1057_v54 = vadd.f32 %v1661_v53, %v1547_v28  ;;  %v1552_v56 = vpop.f32.mrb[25].mxu0  ;;  %v1048_v57 = vpop.f32.mrb[25].mxu1 }
 0x12c   : > { %1257 = vst [vmem:[%s2043_s9 + $0x20] sm:$0xff] %v1225_v50  ;;  %v1226_v59 = vmax.f32 %v1194_v51, 0.0  ;;  %v1553_v60 = vadd.f32 %v1552_v56, %v1551_v52  ;;  %v1049_v61 = vadd.f32 %v1541_v63, %v1048_v57  ;;  %v1554_v0 = vpop.f32.mrb[26].mxu0  ;;  %v1662_v1 = vpop.f32.mrb[26].mxu1 }
 0x12d   : > { %1260 = vst [vmem:[%s2043_s9 + $0x38] sm:$0xff] %v1228_v42  ;;  %v1160_v2 = vmul.f32 %v2028_v58, %v1057_v54  ;;  %v1060_v3 = vadd.f32 %v1662_v1, %v1550_v40  ;;  %v1555_v4 = vpop.f32.mrb[27].mxu0  ;;  %v1051_v5 = vpop.f32.mrb[27].mxu1 }
 0x12e   : > { %1258 = vst [vmem:[%s2043_s9 + $0x28] sm:$0xff] %v1226_v59  ;;  %v1158_v6 = vmul.f32 %v2028_v58, %v1049_v61  ;;  %v1556_v7 = vadd.f32 %v1555_v4, %v1554_v0  ;;  %v1052_v9 = vadd.f32 %v1544_v8, %v1051_v5 }
 0x12f   : > { %v1199_v10 = vadd.f32 %v2033_v62, %v1160_v2  ;;  %v1161_v11 = vmul.f32 %v2028_v58, %v1060_v3 }
 0x130   : > { %v1197_v63 = vadd.f32 %v2033_v62, %v1158_v6  ;;  %v1159_v12 = vmul.f32 %v2028_v58, %v1052_v9 }
 0x131   : > { %v1231_v14 = vmax.f32 %v1199_v10, 0.0  ;;  %v1200_v15 = vadd.f32 %v2033_v62, %v1161_v11 }
 0x132   : > { %v1229_v16 = vmax.f32 %v1197_v63, 0.0  ;;  %v1198_v17 = vadd.f32 %v2033_v62, %v1159_v12  ;;  %v1557_v18 = vpop.f32.mrb[28].mxu0  ;;  %v1665_v20 = vpop.f32.mrb[28].mxu1 }
 0x133   : > { %1263 = vst [vmem:[%s2043_s9 + $0x50] sm:$0xff] %v1231_v14  ;;  %v1232_v8 = vmax.f32 %v1200_v15, 0.0  ;;  %v1558_v21 = vpop.f32.mrb[29].mxu0  ;;  %v1064_v22 = vpop.f32.mrb[29].mxu1 }
 0x134   : > { %1261 = vst [vmem:[%s2043_s9 + $0x40] sm:$0xff] %v1229_v16  ;;  %v1230_v23 = vmax.f32 %v1198_v17, 0.0  ;;  %v1559_v24 = vadd.f32 %v1558_v21, %v1557_v18  ;;  %v1065_v26 = vadd.f32 %v1553_v60, %v1064_v22  ;;  %v1560_v27 = vpop.f32.mrb[30].mxu0  ;;  %v1666_v28 = vpop.f32.mrb[30].mxu1 }
 0x135   : > { %1264 = vst [vmem:[%s2043_s9 + $0x58] sm:$0xff] %v1232_v8  ;;  %v1561_v29 = vpop.f32.mrb[31].mxu0  ;;  %v1067_v30 = vpop.f32.mrb[31].mxu1 }
 0x136   : > { %1262 = vst [vmem:[%s2043_s9 + $0x48] sm:$0xff] %v1230_v23  ;;  %v1073_v32 = vadd.f32 %v1665_v20, %v1559_v24  ;;  %v1162_v33 = vmul.f32 %v2028_v58, %v1065_v26  ;;  %v1562_v34 = vadd.f32 %v1561_v29, %v1560_v27  ;;  %v1068_v35 = vadd.f32 %v1556_v7, %v1067_v30 }
 0x138   : > { %v1164_v38 = vmul.f32 %v2028_v58, %v1073_v32  ;;  %v1201_v39 = vadd.f32 %v2033_v62, %v1162_v33  ;;  %v1076_v40 = vadd.f32 %v1666_v28, %v1562_v34  ;;  %v1163_v41 = vmul.f32 %v2028_v58, %v1068_v35 }
 0x13a   : > { %v1203_v44 = vadd.f32 %v2033_v62, %v1164_v38  ;;  %v1233_v36 = vmax.f32 %v1201_v39, 0.0  ;;  %v1165_v45 = vmul.f32 %v2028_v58, %v1076_v40  ;;  %v1202_v46 = vadd.f32 %v2033_v62, %v1163_v41  ;;  %v1563_v47 = vpop.f32.mrb[32].mxu0  ;;  %v1669_v48 = vpop.f32.mrb[32].mxu1 }
 0x13b   : > { %v1564_v50 = vpop.f32.mrb[33].mxu0  ;;  %v1080_v51 = vpop.f32.mrb[33].mxu1 }
 0x13c   : > { %v1235_v52 = vmax.f32 %v1203_v44, 0.0  ;;  %1265 = vst [vmem:[%s2043_s9 + $0x60] sm:$0xff] %v1233_v36  ;;  %v1204_v53 = vadd.f32 %v2033_v62, %v1165_v45  ;;  %v1234_v42 = vmax.f32 %v1202_v46, 0.0  ;;  %v1565_v54 = vadd.f32 %v1564_v50, %v1563_v47  ;;  %v1566_v56 = vpop.f32.mrb[34].mxu0  ;;  %v1670_v57 = vpop.f32.mrb[34].mxu1 }
 0x13d   : > { %v1567_v59 = vpop.f32.mrb[35].mxu0  ;;  %v1083_v60 = vpop.f32.mrb[35].mxu1 }
 0x13e   : > { %1267 = vst [vmem:[%s2043_s9 + $0x70] sm:$0xff] %v1235_v52  ;;  %v1236_v61 = vmax.f32 %v1204_v53, 0.0  ;;  %1266 = vst [vmem:[%s2043_s9 + $0x68] sm:$0xff] %v1234_v42  ;;  %v1081_v0 = vadd.f32 %v1565_v54, %v1080_v51  ;;  %v1568_v1 = vadd.f32 %v1567_v59, %v1566_v56 }
 0x140   : > { %1268 = vst [vmem:[%s2043_s9 + $0x78] sm:$0xff] %v1236_v61  ;;  %v1166_v2 = vmul.f32 %v2028_v58, %v1081_v0  ;;  %v1084_v3 = vadd.f32 %v1568_v1, %v1083_v60 }
 0x142   : > { %v1205_v4 = vadd.f32 %v2033_v62, %v1166_v2  ;;  %v1167_v5 = vmul.f32 %v2028_v58, %v1084_v3  ;;  %v1569_v6 = vpop.f32.mrb[36].mxu0  ;;  %v2093_v7 = vpop.f32.mrb[36].mxu1 }
 0x143   : > { %v1570_v9 = vpop.f32.mrb[37].mxu0  ;;  %v1096_v10 = vpop.f32.mrb[37].mxu1 }
 0x144   : > { %v1237_v11 = vmax.f32 %v1205_v4, 0.0  ;;  %v1206_v63 = vadd.f32 %v2033_v62, %v1167_v5  ;;  %v1571_v12 = vadd.f32 %v1570_v9, %v1569_v6  ;;  %v1572_v14 = vpop.f32.mrb[38].mxu0  ;;  %v2096_v15 = vpop.f32.mrb[38].mxu1 }
 0x145   : > { %v1573_v16 = vpop.f32.mrb[39].mxu0  ;;  %v1099_v17 = vpop.f32.mrb[39].mxu1 }
 0x146   : > { %1269 = vst [vmem:[%s2043_s9 + $0x80] sm:$0xff] %v1237_v11  ;;  %v1238_v18 = vmax.f32 %v1206_v63, 0.0  ;;  %v1089_v20 = vadd.f32 %v1669_v48, %v1571_v12  ;;  %v1574_v8 = vadd.f32 %v1573_v16, %v1572_v14 }
 0x148   : > { %1270 = vst [vmem:[%s2043_s9 + $0x88] sm:$0xff] %v1238_v18  ;;  %v1168_v21 = vmul.f32 %v2028_v58, %v1089_v20  ;;  %v1092_v22 = vadd.f32 %v1670_v57, %v1574_v8 }
 0x14a   : > { %v1207_v23 = vadd.f32 %v2033_v62, %v1168_v21  ;;  %v1169_v24 = vmul.f32 %v2028_v58, %v1092_v22  ;;  %v1575_v26 = vpop.f32.mrb[40].mxu0  ;;  %v1677_v27 = vpop.f32.mrb[40].mxu1 }
 0x14b   : > { %v1121_v28 = vadd.f32 %v1677_v27, %v2011_v25  ;;  %v1576_v29 = vpop.f32.mrb[41].mxu0  ;;  %v1112_v30 = vpop.f32.mrb[41].mxu1 }
 0x14c   : > { %v1239_v32 = vmax.f32 %v1207_v23, 0.0  ;;  %v1208_v33 = vadd.f32 %v2033_v62, %v1169_v24  ;;  %v1577_v34 = vadd.f32 %v1576_v29, %v1575_v26  ;;  %v1113_v35 = vadd.f32 %v2007_v13, %v1112_v30  ;;  %v1578_v38 = vpop.f32.mrb[42].mxu0  ;;  %v1678_v39 = vpop.f32.mrb[42].mxu1 }
 0x14d   : > { %v1176_v40 = vmul.f32 %v2028_v58, %v1121_v28  ;;  %v1124_v41 = vadd.f32 %v1678_v39, %v2013_v31  ;;  %v1579_v44 = vpop.f32.mrb[43].mxu0  ;;  %v1115_v36 = vpop.f32.mrb[43].mxu1 }
 0x14e   : > { %1271 = vst [vmem:[%s2043_s9 + $0x90] sm:$0xff] %v1239_v32  ;;  %v1240_v45 = vmax.f32 %v1208_v33, 0.0  ;;  %v1097_v25 = vadd.f32 %v1577_v34, %v1096_v10  ;;  %v1174_v46 = vmul.f32 %v2028_v58, %v1113_v35  ;;  %v1580_v47 = vadd.f32 %v1579_v44, %v1578_v38 }
 0x14f   : > { %v1215_v48 = vadd.f32 %v2033_v62, %v1176_v40  ;;  %v1177_v50 = vmul.f32 %v2028_v58, %v1124_v41  ;;  %v1116_v13 = vadd.f32 %v2009_v19, %v1115_v36 }
 0x150   : > { %1272 = vst [vmem:[%s2043_s9 + $0x98] sm:$0xff] %v1240_v45  ;;  %v1170_v51 = vmul.f32 %v2028_v58, %v1097_v25  ;;  %v1213_v31 = vadd.f32 %v2033_v62, %v1174_v46  ;;  %v1100_v52 = vadd.f32 %v1580_v47, %v1099_v17 }
 0x151   : > { %v1247_v53 = vmax.f32 %v1215_v48, 0.0  ;;  %v1216_v42 = vadd.f32 %v2033_v62, %v1177_v50  ;;  %v1175_v54 = vmul.f32 %v2028_v58, %v1116_v13 }
 0x152   : > { %v1209_v56 = vadd.f32 %v2033_v62, %v1170_v51  ;;  %v1245_v57 = vmax.f32 %v1213_v31, 0.0  ;;  %v1171_v59 = vmul.f32 %v2028_v58, %v1100_v52  ;;  %v1581_v60 = vpop.f32.mrb[44].mxu0  ;;  %v1681_v19 = vpop.f32.mrb[44].mxu1 }
 0x153   : > { %1279 = vst [vmem:[%s2043_s9 + $0xd0] sm:$0xff] %v1247_v53  ;;  %v1248_v61 = vmax.f32 %v1216_v42, 0.0  ;;  %v1214_v0 = vadd.f32 %v2033_v62, %v1175_v54  ;;  %v1137_v1 = vadd.f32 %v1681_v19, %v2021_v49  ;;  %v1582_v2 = vpop.f32.mrb[45].mxu0  ;;  %v1128_v3 = vpop.f32.mrb[45].mxu1 }
 0x154   : > { %v1241_v4 = vmax.f32 %v1209_v56, 0.0  ;;  %1277 = vst [vmem:[%s2043_s9 + $0xc0] sm:$0xff] %v1245_v57  ;;  %v1210_v5 = vadd.f32 %v2033_v62, %v1171_v59  ;;  %v1583_v6 = vadd.f32 %v1582_v2, %v1581_v60  ;;  %v1129_v9 = vadd.f32 %v2015_v37, %v1128_v3  ;;  %v1584_v10 = vpop.f32.mrb[46].mxu0  ;;  %v1682_v11 = vpop.f32.mrb[46].mxu1 }
 0x155   : > { %1280 = vst [vmem:[%s2043_s9 + $0xd8] sm:$0xff] %v1248_v61  ;;  %v1246_v63 = vmax.f32 %v1214_v0, 0.0  ;;  %v1180_v12 = vmul.f32 %v2028_v58, %v1137_v1  ;;  %v1140_v49 = vadd.f32 %v1682_v11, %v2023_v55  ;;  %v1585_v14 = vpop.f32.mrb[47].mxu0  ;;  %v1131_v16 = vpop.f32.mrb[47].mxu1 }
 0x156   : > { %1273 = vst [vmem:[%s2043_s9 + $0xa0] sm:$0xff] %v1241_v4  ;;  %v1242_v17 = vmax.f32 %v1210_v5, 0.0  ;;  %v1105_v18 = vadd.f32 %v2093_v7, %v1583_v6  ;;  %v1178_v20 = vmul.f32 %v2028_v58, %v1129_v9  ;;  %v1586_v8 = vadd.f32 %v1585_v14, %v1584_v10 }
 0x157   : > { %1278 = vst [vmem:[%s2043_s9 + $0xc8] sm:$0xff] %v1246_v63  ;;  %v1219_v37 = vadd.f32 %v2033_v62, %v1180_v12  ;;  %v1181_v21 = vmul.f32 %v2028_v58, %v1140_v49  ;;  %v1132_v22 = vadd.f32 %v2019_v43, %v1131_v16 }
 0x158   : > { %1274 = vst [vmem:[%s2043_s9 + $0xa8] sm:$0xff] %v1242_v17  ;;  %v1172_v55 = vmul.f32 %v2028_v58, %v1105_v18  ;;  %v1217_v23 = vadd.f32 %v2033_v62, %v1178_v20  ;;  %v1108_v7 = vadd.f32 %v2096_v15, %v1586_v8 }
 0x159   : > { %v1251_v24 = vmax.f32 %v1219_v37, 0.0  ;;  %v1220_v26 = vadd.f32 %v2033_v62, %v1181_v21  ;;  %v1179_v27 = vmul.f32 %v2028_v58, %v1132_v22 }
 0x15a   : > { %v1211_v28 = vadd.f32 %v2033_v62, %v1172_v55  ;;  %v1249_v29 = vmax.f32 %v1217_v23, 0.0  ;;  %v1173_v43 = vmul.f32 %v2028_v58, %v1108_v7 }
 0x15b   : > { %1283 = vst [vmem:[%s2043_s9 + $0xf0] sm:$0xff] %v1251_v24  ;;  %v1252_v30 = vmax.f32 %v1220_v26, 0.0  ;;  %v1218_v32 = vadd.f32 %v2033_v62, %v1179_v27 }
 0x15c   : > { %v1243_v33 = vmax.f32 %v1211_v28, 0.0  ;;  %1281 = vst [vmem:[%s2043_s9 + $0xe0] sm:$0xff] %v1249_v29  ;;  %v1212_v15 = vadd.f32 %v2033_v62, %v1173_v43 }
 0x15d   : > { %1284 = vst [vmem:[%s2043_s9 + $0xf8] sm:$0xff] %v1252_v30  ;;  %v1250_v34 = vmax.f32 %v1218_v32, 0.0 }
 0x15e   : > { %1275 = vst [vmem:[%s2043_s9 + $0xb0] sm:$0xff] %v1243_v33  ;;  %v1244_v35 = vmax.f32 %v1212_v15, 0.0 }
 0x15f   : > { %1282 = vst [vmem:[%s2043_s9 + $0xe8] sm:$0xff] %v1250_v34 }
 0x160   : > { %1276 = vst [vmem:[%s2043_s9 + $0xb8] sm:$0xff] %v1244_v35 }
 0x161 PF: > { %s14_s17 = sadd.s32 1, %s1834_s17   ;;  %s2166_s15 = smov %s1830_s16 }
 0x162   : > { %p11_p5 = scmp.ge.s32.totalorder %s14_s17, 13   ;;  %s2167_s16 = smov %s2169_s18 }
 0x164   :  { %13 = sbr.rel (!%p11_p5) target bundleno = 2 (0x2), region = 75 }

// kernel: stem.10
= control target key start
LH: loop header
LB: loop body
LE: loop exit
PB: predicated region body
PF: predicated region fallthrough
CT: control target
= control target key end

     0   :  { %s3910_s0 = inlined_call_operand.vmem [shape: f32[9,648,128], index: 0, kind: input, shape index: {}]   ;;  %s3911_s1 = inlined_call_operand.vmem [shape: f32[648,128], index: 1, kind: output, shape index: {}]  }
   0x1   :  { %v8_v0 = vld [vmem:[%s3910_s0] sm:$0xff]  ;;  %v89_v1 = vld [vmem:[%s3910_s0 + $0x288] sm:$0xff]  ;;  %v170_v2 = vld [vmem:[%s3910_s0 + $0x510] sm:$0xff] }
   0x2   :  { %v737_v3 = vmax.f32 %v8_v0, %v89_v1  ;;  %v251_v4 = vld [vmem:[%s3910_s0 + $0x798] sm:$0xff]  ;;  %v9_v6 = vld [vmem:[%s3910_s0 + $0x8] sm:$0xff]  ;;  %v90_v7 = vld [vmem:[%s3910_s0 + $0x290] sm:$0xff] }
   0x3   :  { %v171_v8 = vld [vmem:[%s3910_s0 + $0x518] sm:$0xff]  ;;  %v332_v9 = vld [vmem:[%s3910_s0 + $0xa20] sm:$0xff]  ;;  %v745_v10 = vmax.f32 %v9_v6, %v90_v7  ;;  %v413_v11 = vld [vmem:[%s3910_s0 + $0xca8] sm:$0xff] }
   0x4   :  { %v738_v5 = vmax.f32 %v737_v3, %v170_v2  ;;  %v252_v13 = vld [vmem:[%s3910_s0 + $0x7a0] sm:$0xff]  ;;  %v10_v15 = vld [vmem:[%s3910_s0 + $0x10] sm:$0xff]  ;;  %v91_v16 = vld [vmem:[%s3910_s0 + $0x298] sm:$0xff] }
   0x5   :  { %v746_v14 = vmax.f32 %v745_v10, %v171_v8  ;;  %v172_v17 = vld [vmem:[%s3910_s0 + $0x520] sm:$0xff]  ;;  %v333_v19 = vld [vmem:[%s3910_s0 + $0xa28] sm:$0xff]  ;;  %v753_v20 = vmax.f32 %v10_v15, %v91_v16  ;;  %v494_v21 = vld [vmem:[%s3910_s0 + $0xf30] sm:$0xff] }
   0x6   :  { %v739_v12 = vmax.f32 %v738_v5, %v251_v4  ;;  %v414_v22 = vld [vmem:[%s3910_s0 + $0xcb0] sm:$0xff]  ;;  %v253_v24 = vld [vmem:[%s3910_s0 + $0x7a8] sm:$0xff]  ;;  %v11_v27 = vld [vmem:[%s3910_s0 + $0x18] sm:$0xff] }
   0x7   :  { %v747_v23 = vmax.f32 %v746_v14, %v252_v13  ;;  %v754_v26 = vmax.f32 %v753_v20, %v172_v17  ;;  %v92_v28 = vld [vmem:[%s3910_s0 + $0x2a0] sm:$0xff]  ;;  %v173_v29 = vld [vmem:[%s3910_s0 + $0x528] sm:$0xff]  ;;  %v575_v30 = vld [vmem:[%s3910_s0 + $0x11b8] sm:$0xff] }
   0x8   :  { %v740_v18 = vmax.f32 %v739_v12, %v332_v9  ;;  %v656_v31 = vld [vmem:[%s3910_s0 + $0x1440] sm:$0xff]  ;;  %v334_v33 = vld [vmem:[%s3910_s0 + $0xa30] sm:$0xff]  ;;  %v761_v34 = vmax.f32 %v11_v27, %v92_v28  ;;  %v495_v36 = vld [vmem:[%s3910_s0 + $0xf38] sm:$0xff] }
   0x9   :  { %v748_v32 = vmax.f32 %v747_v23, %v333_v19  ;;  %v415_v37 = vld [vmem:[%s3910_s0 + $0xcb8] sm:$0xff]  ;;  %v755_v38 = vmax.f32 %v754_v26, %v253_v24  ;;  %v254_v39 = vld [vmem:[%s3910_s0 + $0x7b0] sm:$0xff]  ;;  %v12_v42 = vld [vmem:[%s3910_s0 + $0x20] sm:$0xff] }
   0xa   :  { %v741_v25 = vmax.f32 %v740_v18, %v413_v11  ;;  %v762_v41 = vmax.f32 %v761_v34, %v173_v29  ;;  %v93_v43 = vld [vmem:[%s3910_s0 + $0x2a8] sm:$0xff]  ;;  %v174_v44 = vld [vmem:[%s3910_s0 + $0x530] sm:$0xff]  ;;  %v576_v46 = vld [vmem:[%s3910_s0 + $0x11c0] sm:$0xff] }
   0xb   :  { %v749_v40 = vmax.f32 %v748_v32, %v414_v22  ;;  %v657_v47 = vld [vmem:[%s3910_s0 + $0x1448] sm:$0xff]  ;;  %v756_v48 = vmax.f32 %v755_v38, %v334_v33  ;;  %v335_v49 = vld [vmem:[%s3910_s0 + $0xa38] sm:$0xff]  ;;  %v769_v50 = vmax.f32 %v12_v42, %v93_v43  ;;  %v496_v52 = vld [vmem:[%s3910_s0 + $0xf40] sm:$0xff] }
   0xc   :  { %v742_v35 = vmax.f32 %v741_v25, %v494_v21  ;;  %v416_v53 = vld [vmem:[%s3910_s0 + $0xcc0] sm:$0xff]  ;;  %v763_v54 = vmax.f32 %v762_v41, %v254_v39  ;;  %v255_v55 = vld [vmem:[%s3910_s0 + $0x7b8] sm:$0xff]  ;;  %v13_v59 = vld [vmem:[%s3910_s0 + $0x28] sm:$0xff] }
   0xd   :  { %v750_v51 = vmax.f32 %v749_v40, %v495_v36  ;;  %v757_v57 = vmax.f32 %v756_v48, %v415_v37  ;;  %v770_v58 = vmax.f32 %v769_v50, %v174_v44  ;;  %v94_v60 = vld [vmem:[%s3910_s0 + $0x2b0] sm:$0xff]  ;;  %v175_v61 = vld [vmem:[%s3910_s0 + $0x538] sm:$0xff]  ;;  %v577_v63 = vld [vmem:[%s3910_s0 + $0x11c8] sm:$0xff] }
   0xe   :  { %v743_v45 = vmax.f32 %v742_v35, %v575_v30  ;;  %v658_v0 = vld [vmem:[%s3910_s0 + $0x1450] sm:$0xff]  ;;  %v764_v1 = vmax.f32 %v763_v54, %v335_v49  ;;  %v336_v2 = vld [vmem:[%s3910_s0 + $0xa40] sm:$0xff]  ;;  %v777_v3 = vmax.f32 %v13_v59, %v94_v60  ;;  %v497_v5 = vld [vmem:[%s3910_s0 + $0xf48] sm:$0xff] }
   0xf   :  { %v751_v62 = vmax.f32 %v750_v51, %v576_v46  ;;  %v758_v4 = vmax.f32 %v757_v57, %v496_v52  ;;  %v417_v6 = vld [vmem:[%s3910_s0 + $0xcc8] sm:$0xff]  ;;  %v771_v7 = vmax.f32 %v770_v58, %v255_v55  ;;  %v256_v8 = vld [vmem:[%s3910_s0 + $0x7c0] sm:$0xff]  ;;  %v14_v12 = vld [vmem:[%s3910_s0 + $0x30] sm:$0xff] }
  0x10   :  { %v744_v56 = vmax.f32 %v743_v45, %v656_v31  ;;  %v765_v10 = vmax.f32 %v764_v1, %v416_v53  ;;  %v778_v11 = vmax.f32 %v777_v3, %v175_v61  ;;  %v95_v13 = vld [vmem:[%s3910_s0 + $0x2b8] sm:$0xff]  ;;  %v176_v14 = vld [vmem:[%s3910_s0 + $0x540] sm:$0xff]  ;;  %v578_v16 = vld [vmem:[%s3910_s0 + $0x11d0] sm:$0xff] }
  0x11   :  { %v752_v9 = vmax.f32 %v751_v62, %v657_v47  ;;  %v759_v15 = vmax.f32 %v758_v4, %v577_v63  ;;  %v659_v17 = vld [vmem:[%s3910_s0 + $0x1458] sm:$0xff]  ;;  %v772_v18 = vmax.f32 %v771_v7, %v336_v2  ;;  %v337_v19 = vld [vmem:[%s3910_s0 + $0xa48] sm:$0xff]  ;;  %v785_v20 = vmax.f32 %v14_v12, %v95_v13  ;;  %v498_v22 = vld [vmem:[%s3910_s0 + $0xf50] sm:$0xff] }
  0x12   :  { %1385 = vst [vmem:[%s3911_s1] sm:$0xff] %v744_v56  ;;  %v766_v21 = vmax.f32 %v765_v10, %v497_v5  ;;  %v418_v23 = vld [vmem:[%s3910_s0 + $0xcd0] sm:$0xff]  ;;  %v779_v24 = vmax.f32 %v778_v11, %v256_v8  ;;  %v257_v25 = vld [vmem:[%s3910_s0 + $0x7c8] sm:$0xff]  ;;  %v15_v29 = vld [vmem:[%s3910_s0 + $0x38] sm:$0xff] }
  0x13   :  { %1386 = vst [vmem:[%s3911_s1 + $0x8] sm:$0xff] %v752_v9  ;;  %v760_v26 = vmax.f32 %v759_v15, %v658_v0  ;;  %v773_v27 = vmax.f32 %v772_v18, %v417_v6  ;;  %v786_v28 = vmax.f32 %v785_v20, %v176_v14  ;;  %v96_v30 = vld [vmem:[%s3910_s0 + $0x2c0] sm:$0xff]  ;;  %v177_v31 = vld [vmem:[%s3910_s0 + $0x548] sm:$0xff]  ;;  %v579_v33 = vld [vmem:[%s3910_s0 + $0x11d8] sm:$0xff] }
  0x14   :  { %v767_v32 = vmax.f32 %v766_v21, %v578_v16  ;;  %v660_v34 = vld [vmem:[%s3910_s0 + $0x1460] sm:$0xff]  ;;  %v780_v35 = vmax.f32 %v779_v24, %v337_v19  ;;  %v338_v36 = vld [vmem:[%s3910_s0 + $0xa50] sm:$0xff]  ;;  %v793_v37 = vmax.f32 %v15_v29, %v96_v30  ;;  %v499_v39 = vld [vmem:[%s3910_s0 + $0xf58] sm:$0xff] }
  0x15   :  { %1387 = vst [vmem:[%s3911_s1 + $0x10] sm:$0xff] %v760_v26  ;;  %v774_v38 = vmax.f32 %v773_v27, %v498_v22  ;;  %v419_v40 = vld [vmem:[%s3910_s0 + $0xcd8] sm:$0xff]  ;;  %v787_v41 = vmax.f32 %v786_v28, %v257_v25  ;;  %v258_v42 = vld [vmem:[%s3910_s0 + $0x7d0] sm:$0xff]  ;;  %v16_v46 = vld [vmem:[%s3910_s0 + $0x40] sm:$0xff] }
  0x16   :  { %v768_v43 = vmax.f32 %v767_v32, %v659_v17  ;;  %v781_v44 = vmax.f32 %v780_v35, %v418_v23  ;;  %v794_v45 = vmax.f32 %v793_v37, %v177_v31  ;;  %v97_v47 = vld [vmem:[%s3910_s0 + $0x2c8] sm:$0xff]  ;;  %v178_v48 = vld [vmem:[%s3910_s0 + $0x550] sm:$0xff]  ;;  %v580_v50 = vld [vmem:[%s3910_s0 + $0x11e0] sm:$0xff] }
  0x17   :  { %v775_v49 = vmax.f32 %v774_v38, %v579_v33  ;;  %v661_v51 = vld [vmem:[%s3910_s0 + $0x1468] sm:$0xff]  ;;  %v788_v52 = vmax.f32 %v787_v41, %v338_v36  ;;  %v339_v53 = vld [vmem:[%s3910_s0 + $0xa58] sm:$0xff]  ;;  %v801_v54 = vmax.f32 %v16_v46, %v97_v47  ;;  %v500_v56 = vld [vmem:[%s3910_s0 + $0xf60] sm:$0xff] }
  0x18   :  { %1388 = vst [vmem:[%s3911_s1 + $0x18] sm:$0xff] %v768_v43  ;;  %v782_v55 = vmax.f32 %v781_v44, %v499_v39  ;;  %v420_v57 = vld [vmem:[%s3910_s0 + $0xce0] sm:$0xff]  ;;  %v795_v58 = vmax.f32 %v794_v45, %v258_v42  ;;  %v259_v59 = vld [vmem:[%s3910_s0 + $0x7d8] sm:$0xff]  ;;  %v17_v63 = vld [vmem:[%s3910_s0 + $0x48] sm:$0xff] }
  0x19   :  { %v776_v60 = vmax.f32 %v775_v49, %v660_v34  ;;  %v789_v61 = vmax.f32 %v788_v52, %v419_v40  ;;  %v802_v62 = vmax.f32 %v801_v54, %v178_v48  ;;  %v98_v0 = vld [vmem:[%s3910_s0 + $0x2d0] sm:$0xff]  ;;  %v179_v1 = vld [vmem:[%s3910_s0 + $0x558] sm:$0xff]  ;;  %v581_v3 = vld [vmem:[%s3910_s0 + $0x11e8] sm:$0xff] }
  0x1a   :  { %v783_v2 = vmax.f32 %v782_v55, %v580_v50  ;;  %v662_v4 = vld [vmem:[%s3910_s0 + $0x1470] sm:$0xff]  ;;  %v796_v5 = vmax.f32 %v795_v58, %v339_v53  ;;  %v340_v6 = vld [vmem:[%s3910_s0 + $0xa60] sm:$0xff]  ;;  %v809_v7 = vmax.f32 %v17_v63, %v98_v0  ;;  %v501_v9 = vld [vmem:[%s3910_s0 + $0xf68] sm:$0xff] }
  0x1b   :  { %1389 = vst [vmem:[%s3911_s1 + $0x20] sm:$0xff] %v776_v60  ;;  %v790_v8 = vmax.f32 %v789_v61, %v500_v56  ;;  %v421_v10 = vld [vmem:[%s3910_s0 + $0xce8] sm:$0xff]  ;;  %v803_v11 = vmax.f32 %v802_v62, %v259_v59  ;;  %v260_v12 = vld [vmem:[%s3910_s0 + $0x7e0] sm:$0xff]  ;;  %v18_v16 = vld [vmem:[%s3910_s0 + $0x50] sm:$0xff] }
  0x1c   :  { %v784_v13 = vmax.f32 %v783_v2, %v661_v51  ;;  %v797_v14 = vmax.f32 %v796_v5, %v420_v57  ;;  %v810_v15 = vmax.f32 %v809_v7, %v179_v1  ;;  %v99_v17 = vld [vmem:[%s3910_s0 + $0x2d8] sm:$0xff]  ;;  %v180_v18 = vld [vmem:[%s3910_s0 + $0x560] sm:$0xff]  ;;  %v582_v20 = vld [vmem:[%s3910_s0 + $0x11f0] sm:$0xff] }
  0x1d   :  { %v791_v19 = vmax.f32 %v790_v8, %v581_v3  ;;  %v663_v21 = vld [vmem:[%s3910_s0 + $0x1478] sm:$0xff]  ;;  %v804_v22 = vmax.f32 %v803_v11, %v340_v6  ;;  %v341_v23 = vld [vmem:[%s3910_s0 + $0xa68] sm:$0xff]  ;;  %v817_v24 = vmax.f32 %v18_v16, %v99_v17  ;;  %v502_v26 = vld [vmem:[%s3910_s0 + $0xf70] sm:$0xff] }
  0x1e   :  { %1390 = vst [vmem:[%s3911_s1 + $0x28] sm:$0xff] %v784_v13  ;;  %v798_v25 = vmax.f32 %v797_v14, %v501_v9  ;;  %v422_v27 = vld [vmem:[%s3910_s0 + $0xcf0] sm:$0xff]  ;;  %v811_v28 = vmax.f32 %v810_v15, %v260_v12  ;;  %v261_v29 = vld [vmem:[%s3910_s0 + $0x7e8] sm:$0xff]  ;;  %v19_v33 = vld [vmem:[%s3910_s0 + $0x58] sm:$0xff] }
  0x1f   :  { %v792_v30 = vmax.f32 %v791_v19, %v662_v4  ;;  %v805_v31 = vmax.f32 %v804_v22, %v421_v10  ;;  %v818_v32 = vmax.f32 %v817_v24, %v180_v18  ;;  %v100_v34 = vld [vmem:[%s3910_s0 + $0x2e0] sm:$0xff]  ;;  %v181_v35 = vld [vmem:[%s3910_s0 + $0x568] sm:$0xff]  ;;  %v583_v37 = vld [vmem:[%s3910_s0 + $0x11f8] sm:$0xff] }
  0x20   :  { %v799_v36 = vmax.f32 %v798_v25, %v582_v20  ;;  %v664_v38 = vld [vmem:[%s3910_s0 + $0x1480] sm:$0xff]  ;;  %v812_v39 = vmax.f32 %v811_v28, %v341_v23  ;;  %v342_v40 = vld [vmem:[%s3910_s0 + $0xa70] sm:$0xff]  ;;  %v825_v41 = vmax.f32 %v19_v33, %v100_v34  ;;  %v503_v43 = vld [vmem:[%s3910_s0 + $0xf78] sm:$0xff] }
  0x21   :  { %1391 = vst [vmem:[%s3911_s1 + $0x30] sm:$0xff] %v792_v30  ;;  %v806_v42 = vmax.f32 %v805_v31, %v502_v26  ;;  %v423_v44 = vld [vmem:[%s3910_s0 + $0xcf8] sm:$0xff]  ;;  %v819_v45 = vmax.f32 %v818_v32, %v261_v29  ;;  %v262_v46 = vld [vmem:[%s3910_s0 + $0x7f0] sm:$0xff]  ;;  %v20_v50 = vld [vmem:[%s3910_s0 + $0x60] sm:$0xff] }
  0x22   :  { %v800_v47 = vmax.f32 %v799_v36, %v663_v21  ;;  %v813_v48 = vmax.f32 %v812_v39, %v422_v27  ;;  %v826_v49 = vmax.f32 %v825_v41, %v181_v35  ;;  %v101_v51 = vld [vmem:[%s3910_s0 + $0x2e8] sm:$0xff]  ;;  %v182_v52 = vld [vmem:[%s3910_s0 + $0x570] sm:$0xff]  ;;  %v584_v54 = vld [vmem:[%s3910_s0 + $0x1200] sm:$0xff] }
  0x23   :  { %v807_v53 = vmax.f32 %v806_v42, %v583_v37  ;;  %v665_v55 = vld [vmem:[%s3910_s0 + $0x1488] sm:$0xff]  ;;  %v820_v56 = vmax.f32 %v819_v45, %v342_v40  ;;  %v343_v57 = vld [vmem:[%s3910_s0 + $0xa78] sm:$0xff]  ;;  %v833_v58 = vmax.f32 %v20_v50, %v101_v51  ;;  %v504_v60 = vld [vmem:[%s3910_s0 + $0xf80] sm:$0xff] }
  0x24   :  { %1392 = vst [vmem:[%s3911_s1 + $0x38] sm:$0xff] %v800_v47  ;;  %v814_v59 = vmax.f32 %v813_v48, %v503_v43  ;;  %v424_v61 = vld [vmem:[%s3910_s0 + $0xd00] sm:$0xff]  ;;  %v827_v62 = vmax.f32 %v826_v49, %v262_v46  ;;  %v263_v63 = vld [vmem:[%s3910_s0 + $0x7f8] sm:$0xff]  ;;  %v21_v3 = vld [vmem:[%s3910_s0 + $0x68] sm:$0xff] }
  0x25   :  { %v808_v0 = vmax.f32 %v807_v53, %v664_v38  ;;  %v821_v1 = vmax.f32 %v820_v56, %v423_v44  ;;  %v834_v2 = vmax.f32 %v833_v58, %v182_v52  ;;  %v102_v4 = vld [vmem:[%s3910_s0 + $0x2f0] sm:$0xff]  ;;  %v183_v5 = vld [vmem:[%s3910_s0 + $0x578] sm:$0xff]  ;;  %v585_v7 = vld [vmem:[%s3910_s0 + $0x1208] sm:$0xff] }
  0x26   :  { %v815_v6 = vmax.f32 %v814_v59, %v584_v54  ;;  %v666_v8 = vld [vmem:[%s3910_s0 + $0x1490] sm:$0xff]  ;;  %v828_v9 = vmax.f32 %v827_v62, %v343_v57  ;;  %v344_v10 = vld [vmem:[%s3910_s0 + $0xa80] sm:$0xff]  ;;  %v841_v11 = vmax.f32 %v21_v3, %v102_v4  ;;  %v505_v13 = vld [vmem:[%s3910_s0 + $0xf88] sm:$0xff] }
  0x27   :  { %1393 = vst [vmem:[%s3911_s1 + $0x40] sm:$0xff] %v808_v0  ;;  %v822_v12 = vmax.f32 %v821_v1, %v504_v60  ;;  %v425_v14 = vld [vmem:[%s3910_s0 + $0xd08] sm:$0xff]  ;;  %v835_v15 = vmax.f32 %v834_v2, %v263_v63  ;;  %v264_v16 = vld [vmem:[%s3910_s0 + $0x800] sm:$0xff]  ;;  %v22_v20 = vld [vmem:[%s3910_s0 + $0x70] sm:$0xff] }
  0x28   :  { %v816_v17 = vmax.f32 %v815_v6, %v665_v55  ;;  %v829_v18 = vmax.f32 %v828_v9, %v424_v61  ;;  %v842_v19 = vmax.f32 %v841_v11, %v183_v5  ;;  %v103_v21 = vld [vmem:[%s3910_s0 + $0x2f8] sm:$0xff]  ;;  %v184_v22 = vld [vmem:[%s3910_s0 + $0x580] sm:$0xff]  ;;  %v586_v24 = vld [vmem:[%s3910_s0 + $0x1210] sm:$0xff] }
  0x29   :  { %v823_v23 = vmax.f32 %v822_v12, %v585_v7  ;;  %v667_v25 = vld [vmem:[%s3910_s0 + $0x1498] sm:$0xff]  ;;  %v836_v26 = vmax.f32 %v835_v15, %v344_v10  ;;  %v345_v27 = vld [vmem:[%s3910_s0 + $0xa88] sm:$0xff]  ;;  %v849_v28 = vmax.f32 %v22_v20, %v103_v21  ;;  %v506_v30 = vld [vmem:[%s3910_s0 + $0xf90] sm:$0xff] }
  0x2a   :  { %1394 = vst [vmem:[%s3911_s1 + $0x48] sm:$0xff] %v816_v17  ;;  %v830_v29 = vmax.f32 %v829_v18, %v505_v13  ;;  %v426_v31 = vld [vmem:[%s3910_s0 + $0xd10] sm:$0xff]  ;;  %v843_v32 = vmax.f32 %v842_v19, %v264_v16  ;;  %v265_v33 = vld [vmem:[%s3910_s0 + $0x808] sm:$0xff]  ;;  %v23_v37 = vld [vmem:[%s3910_s0 + $0x78] sm:$0xff] }
  0x2b   :  { %v824_v34 = vmax.f32 %v823_v23, %v666_v8  ;;  %v837_v35 = vmax.f32 %v836_v26, %v425_v14  ;;  %v850_v36 = vmax.f32 %v849_v28, %v184_v22  ;;  %v104_v38 = vld [vmem:[%s3910_s0 + $0x300] sm:$0xff]  ;;  %v185_v39 = vld [vmem:[%s3910_s0 + $0x588] sm:$0xff]  ;;  %v587_v41 = vld [vmem:[%s3910_s0 + $0x1218] sm:$0xff] }
  0x2c   :  { %v831_v40 = vmax.f32 %v830_v29, %v586_v24  ;;  %v668_v42 = vld [vmem:[%s3910_s0 + $0x14a0] sm:$0xff]  ;;  %v844_v43 = vmax.f32 %v843_v32, %v345_v27  ;;  %v346_v44 = vld [vmem:[%s3910_s0 + $0xa90] sm:$0xff]  ;;  %v857_v45 = vmax.f32 %v23_v37, %v104_v38  ;;  %v507_v47 = vld [vmem:[%s3910_s0 + $0xf98] sm:$0xff] }
  0x2d   :  { %1395 = vst [vmem:[%s3911_s1 + $0x50] sm:$0xff] %v824_v34  ;;  %v838_v46 = vmax.f32 %v837_v35, %v506_v30  ;;  %v427_v48 = vld [vmem:[%s3910_s0 + $0xd18] sm:$0xff]  ;;  %v851_v49 = vmax.f32 %v850_v36, %v265_v33  ;;  %v266_v50 = vld [vmem:[%s3910_s0 + $0x810] sm:$0xff]  ;;  %v24_v54 = vld [vmem:[%s3910_s0 + $0x80] sm:$0xff] }
  0x2e   :  { %v832_v51 = vmax.f32 %v831_v40, %v667_v25  ;;  %v845_v52 = vmax.f32 %v844_v43, %v426_v31  ;;  %v858_v53 = vmax.f32 %v857_v45, %v185_v39  ;;  %v105_v55 = vld [vmem:[%s3910_s0 + $0x308] sm:$0xff]  ;;  %v186_v56 = vld [vmem:[%s3910_s0 + $0x590] sm:$0xff]  ;;  %v588_v58 = vld [vmem:[%s3910_s0 + $0x1220] sm:$0xff] }
  0x2f   :  { %v839_v57 = vmax.f32 %v838_v46, %v587_v41  ;;  %v669_v59 = vld [vmem:[%s3910_s0 + $0x14a8] sm:$0xff]  ;;  %v852_v60 = vmax.f32 %v851_v49, %v346_v44  ;;  %v347_v61 = vld [vmem:[%s3910_s0 + $0xa98] sm:$0xff]  ;;  %v865_v62 = vmax.f32 %v24_v54, %v105_v55  ;;  %v508_v0 = vld [vmem:[%s3910_s0 + $0xfa0] sm:$0xff] }
  0x30   :  { %1396 = vst [vmem:[%s3911_s1 + $0x58] sm:$0xff] %v832_v51  ;;  %v846_v63 = vmax.f32 %v845_v52, %v507_v47  ;;  %v428_v1 = vld [vmem:[%s3910_s0 + $0xd20] sm:$0xff]  ;;  %v859_v2 = vmax.f32 %v858_v53, %v266_v50  ;;  %v267_v3 = vld [vmem:[%s3910_s0 + $0x818] sm:$0xff]  ;;  %v25_v7 = vld [vmem:[%s3910_s0 + $0x88] sm:$0xff] }
  0x31   :  { %v840_v4 = vmax.f32 %v839_v57, %v668_v42  ;;  %v853_v5 = vmax.f32 %v852_v60, %v427_v48  ;;  %v866_v6 = vmax.f32 %v865_v62, %v186_v56  ;;  %v106_v8 = vld [vmem:[%s3910_s0 + $0x310] sm:$0xff]  ;;  %v187_v9 = vld [vmem:[%s3910_s0 + $0x598] sm:$0xff]  ;;  %v589_v11 = vld [vmem:[%s3910_s0 + $0x1228] sm:$0xff] }
  0x32   :  { %v847_v10 = vmax.f32 %v846_v63, %v588_v58  ;;  %v670_v12 = vld [vmem:[%s3910_s0 + $0x14b0] sm:$0xff]  ;;  %v860_v13 = vmax.f32 %v859_v2, %v347_v61  ;;  %v348_v14 = vld [vmem:[%s3910_s0 + $0xaa0] sm:$0xff]  ;;  %v873_v15 = vmax.f32 %v25_v7, %v106_v8  ;;  %v509_v17 = vld [vmem:[%s3910_s0 + $0xfa8] sm:$0xff] }
  0x33   :  { %1397 = vst [vmem:[%s3911_s1 + $0x60] sm:$0xff] %v840_v4  ;;  %v854_v16 = vmax.f32 %v853_v5, %v508_v0  ;;  %v429_v18 = vld [vmem:[%s3910_s0 + $0xd28] sm:$0xff]  ;;  %v867_v19 = vmax.f32 %v866_v6, %v267_v3  ;;  %v268_v20 = vld [vmem:[%s3910_s0 + $0x820] sm:$0xff]  ;;  %v26_v24 = vld [vmem:[%s3910_s0 + $0x90] sm:$0xff] }
  0x34   :  { %v848_v21 = vmax.f32 %v847_v10, %v669_v59  ;;  %v861_v22 = vmax.f32 %v860_v13, %v428_v1  ;;  %v874_v23 = vmax.f32 %v873_v15, %v187_v9  ;;  %v107_v25 = vld [vmem:[%s3910_s0 + $0x318] sm:$0xff]  ;;  %v188_v26 = vld [vmem:[%s3910_s0 + $0x5a0] sm:$0xff]  ;;  %v590_v28 = vld [vmem:[%s3910_s0 + $0x1230] sm:$0xff] }
  0x35   :  { %v855_v27 = vmax.f32 %v854_v16, %v589_v11  ;;  %v671_v29 = vld [vmem:[%s3910_s0 + $0x14b8] sm:$0xff]  ;;  %v868_v30 = vmax.f32 %v867_v19, %v348_v14  ;;  %v349_v31 = vld [vmem:[%s3910_s0 + $0xaa8] sm:$0xff]  ;;  %v881_v32 = vmax.f32 %v26_v24, %v107_v25  ;;  %v510_v34 = vld [vmem:[%s3910_s0 + $0xfb0] sm:$0xff] }
  0x36   :  { %1398 = vst [vmem:[%s3911_s1 + $0x68] sm:$0xff] %v848_v21  ;;  %v862_v33 = vmax.f32 %v861_v22, %v509_v17  ;;  %v430_v35 = vld [vmem:[%s3910_s0 + $0xd30] sm:$0xff]  ;;  %v875_v36 = vmax.f32 %v874_v23, %v268_v20  ;;  %v269_v37 = vld [vmem:[%s3910_s0 + $0x828] sm:$0xff]  ;;  %v27_v41 = vld [vmem:[%s3910_s0 + $0x98] sm:$0xff] }
  0x37   :  { %v856_v38 = vmax.f32 %v855_v27, %v670_v12  ;;  %v869_v39 = vmax.f32 %v868_v30, %v429_v18  ;;  %v882_v40 = vmax.f32 %v881_v32, %v188_v26  ;;  %v108_v42 = vld [vmem:[%s3910_s0 + $0x320] sm:$0xff]  ;;  %v189_v43 = vld [vmem:[%s3910_s0 + $0x5a8] sm:$0xff]  ;;  %v591_v45 = vld [vmem:[%s3910_s0 + $0x1238] sm:$0xff] }
  0x38   :  { %v863_v44 = vmax.f32 %v862_v33, %v590_v28  ;;  %v672_v46 = vld [vmem:[%s3910_s0 + $0x14c0] sm:$0xff]  ;;  %v876_v47 = vmax.f32 %v875_v36, %v349_v31  ;;  %v350_v48 = vld [vmem:[%s3910_s0 + $0xab0] sm:$0xff]  ;;  %v889_v49 = vmax.f32 %v27_v41, %v108_v42  ;;  %v511_v51 = vld [vmem:[%s3910_s0 + $0xfb8] sm:$0xff] }
  0x39   :  { %1399 = vst [vmem:[%s3911_s1 + $0x70] sm:$0xff] %v856_v38  ;;  %v870_v50 = vmax.f32 %v869_v39, %v510_v34  ;;  %v431_v52 = vld [vmem:[%s3910_s0 + $0xd38] sm:$0xff]  ;;  %v883_v53 = vmax.f32 %v882_v40, %v269_v37  ;;  %v270_v54 = vld [vmem:[%s3910_s0 + $0x830] sm:$0xff]  ;;  %v28_v58 = vld [vmem:[%s3910_s0 + $0xa0] sm:$0xff] }
  0x3a   :  { %v864_v55 = vmax.f32 %v863_v44, %v671_v29  ;;  %v877_v56 = vmax.f32 %v876_v47, %v430_v35  ;;  %v890_v57 = vmax.f32 %v889_v49, %v189_v43  ;;  %v109_v59 = vld [vmem:[%s3910_s0 + $0x328] sm:$0xff]  ;;  %v190_v60 = vld [vmem:[%s3910_s0 + $0x5b0] sm:$0xff]  ;;  %v592_v62 = vld [vmem:[%s3910_s0 + $0x1240] sm:$0xff] }
  0x3b   :  { %v871_v61 = vmax.f32 %v870_v50, %v591_v45  ;;  %v673_v63 = vld [vmem:[%s3910_s0 + $0x14c8] sm:$0xff]  ;;  %v884_v0 = vmax.f32 %v883_v53, %v350_v48  ;;  %v351_v1 = vld [vmem:[%s3910_s0 + $0xab8] sm:$0xff]  ;;  %v897_v2 = vmax.f32 %v28_v58, %v109_v59  ;;  %v512_v4 = vld [vmem:[%s3910_s0 + $0xfc0] sm:$0xff] }
  0x3c   :  { %1400 = vst [vmem:[%s3911_s1 + $0x78] sm:$0xff] %v864_v55  ;;  %v878_v3 = vmax.f32 %v877_v56, %v511_v51  ;;  %v432_v5 = vld [vmem:[%s3910_s0 + $0xd40] sm:$0xff]  ;;  %v891_v6 = vmax.f32 %v890_v57, %v270_v54  ;;  %v271_v7 = vld [vmem:[%s3910_s0 + $0x838] sm:$0xff]  ;;  %v29_v11 = vld [vmem:[%s3910_s0 + $0xa8] sm:$0xff] }
  0x3d   :  { %v872_v8 = vmax.f32 %v871_v61, %v672_v46  ;;  %v885_v9 = vmax.f32 %v884_v0, %v431_v52  ;;  %v898_v10 = vmax.f32 %v897_v2, %v190_v60  ;;  %v110_v12 = vld [vmem:[%s3910_s0 + $0x330] sm:$0xff]  ;;  %v191_v13 = vld [vmem:[%s3910_s0 + $0x5b8] sm:$0xff]  ;;  %v593_v15 = vld [vmem:[%s3910_s0 + $0x1248] sm:$0xff] }
  0x3e   :  { %v879_v14 = vmax.f32 %v878_v3, %v592_v62  ;;  %v674_v16 = vld [vmem:[%s3910_s0 + $0x14d0] sm:$0xff]  ;;  %v892_v17 = vmax.f32 %v891_v6, %v351_v1  ;;  %v352_v18 = vld [vmem:[%s3910_s0 + $0xac0] sm:$0xff]  ;;  %v905_v19 = vmax.f32 %v29_v11, %v110_v12  ;;  %v513_v21 = vld [vmem:[%s3910_s0 + $0xfc8] sm:$0xff] }
  0x3f   :  { %1401 = vst [vmem:[%s3911_s1 + $0x80] sm:$0xff] %v872_v8  ;;  %v886_v20 = vmax.f32 %v885_v9, %v512_v4  ;;  %v433_v22 = vld [vmem:[%s3910_s0 + $0xd48] sm:$0xff]  ;;  %v899_v23 = vmax.f32 %v898_v10, %v271_v7  ;;  %v272_v24 = vld [vmem:[%s3910_s0 + $0x840] sm:$0xff]  ;;  %v30_v28 = vld [vmem:[%s3910_s0 + $0xb0] sm:$0xff] }
  0x40   :  { %v880_v25 = vmax.f32 %v879_v14, %v673_v63  ;;  %v893_v26 = vmax.f32 %v892_v17, %v432_v5  ;;  %v906_v27 = vmax.f32 %v905_v19, %v191_v13  ;;  %v111_v29 = vld [vmem:[%s3910_s0 + $0x338] sm:$0xff]  ;;  %v192_v30 = vld [vmem:[%s3910_s0 + $0x5c0] sm:$0xff]  ;;  %v594_v32 = vld [vmem:[%s3910_s0 + $0x1250] sm:$0xff] }
  0x41   :  { %v887_v31 = vmax.f32 %v886_v20, %v593_v15  ;;  %v675_v33 = vld [vmem:[%s3910_s0 + $0x14d8] sm:$0xff]  ;;  %v900_v34 = vmax.f32 %v899_v23, %v352_v18  ;;  %v353_v35 = vld [vmem:[%s3910_s0 + $0xac8] sm:$0xff]  ;;  %v913_v36 = vmax.f32 %v30_v28, %v111_v29  ;;  %v514_v38 = vld [vmem:[%s3910_s0 + $0xfd0] sm:$0xff] }
  0x42   :  { %1402 = vst [vmem:[%s3911_s1 + $0x88] sm:$0xff] %v880_v25  ;;  %v894_v37 = vmax.f32 %v893_v26, %v513_v21  ;;  %v434_v39 = vld [vmem:[%s3910_s0 + $0xd50] sm:$0xff]  ;;  %v907_v40 = vmax.f32 %v906_v27, %v272_v24  ;;  %v273_v41 = vld [vmem:[%s3910_s0 + $0x848] sm:$0xff]  ;;  %v31_v45 = vld [vmem:[%s3910_s0 + $0xb8] sm:$0xff] }
  0x43   :  { %v888_v42 = vmax.f32 %v887_v31, %v674_v16  ;;  %v901_v43 = vmax.f32 %v900_v34, %v433_v22  ;;  %v914_v44 = vmax.f32 %v913_v36, %v192_v30  ;;  %v112_v46 = vld [vmem:[%s3910_s0 + $0x340] sm:$0xff]  ;;  %v193_v47 = vld [vmem:[%s3910_s0 + $0x5c8] sm:$0xff]  ;;  %v595_v49 = vld [vmem:[%s3910_s0 + $0x1258] sm:$0xff] }
  0x44   :  { %v895_v48 = vmax.f32 %v894_v37, %v594_v32  ;;  %v676_v50 = vld [vmem:[%s3910_s0 + $0x14e0] sm:$0xff]  ;;  %v908_v51 = vmax.f32 %v907_v40, %v353_v35  ;;  %v354_v52 = vld [vmem:[%s3910_s0 + $0xad0] sm:$0xff]  ;;  %v921_v53 = vmax.f32 %v31_v45, %v112_v46  ;;  %v515_v55 = vld [vmem:[%s3910_s0 + $0xfd8] sm:$0xff] }
  0x45   :  { %1403 = vst [vmem:[%s3911_s1 + $0x90] sm:$0xff] %v888_v42  ;;  %v902_v54 = vmax.f32 %v901_v43, %v514_v38  ;;  %v435_v56 = vld [vmem:[%s3910_s0 + $0xd58] sm:$0xff]  ;;  %v915_v57 = vmax.f32 %v914_v44, %v273_v41  ;;  %v274_v58 = vld [vmem:[%s3910_s0 + $0x850] sm:$0xff]  ;;  %v32_v62 = vld [vmem:[%s3910_s0 + $0xc0] sm:$0xff] }
  0x46   :  { %v896_v59 = vmax.f32 %v895_v48, %v675_v33  ;;  %v909_v60 = vmax.f32 %v908_v51, %v434_v39  ;;  %v922_v61 = vmax.f32 %v921_v53, %v193_v47  ;;  %v113_v63 = vld [vmem:[%s3910_s0 + $0x348] sm:$0xff]  ;;  %v194_v0 = vld [vmem:[%s3910_s0 + $0x5d0] sm:$0xff]  ;;  %v596_v2 = vld [vmem:[%s3910_s0 + $0x1260] sm:$0xff] }
  0x47   :  { %v903_v1 = vmax.f32 %v902_v54, %v595_v49  ;;  %v677_v3 = vld [vmem:[%s3910_s0 + $0x14e8] sm:$0xff]  ;;  %v916_v4 = vmax.f32 %v915_v57, %v354_v52  ;;  %v355_v5 = vld [vmem:[%s3910_s0 + $0xad8] sm:$0xff]  ;;  %v929_v6 = vmax.f32 %v32_v62, %v113_v63  ;;  %v516_v8 = vld [vmem:[%s3910_s0 + $0xfe0] sm:$0xff] }
  0x48   :  { %1404 = vst [vmem:[%s3911_s1 + $0x98] sm:$0xff] %v896_v59  ;;  %v910_v7 = vmax.f32 %v909_v60, %v515_v55  ;;  %v436_v9 = vld [vmem:[%s3910_s0 + $0xd60] sm:$0xff]  ;;  %v923_v10 = vmax.f32 %v922_v61, %v274_v58  ;;  %v275_v11 = vld [vmem:[%s3910_s0 + $0x858] sm:$0xff]  ;;  %v33_v15 = vld [vmem:[%s3910_s0 + $0xc8] sm:$0xff] }
  0x49   :  { %v904_v12 = vmax.f32 %v903_v1, %v676_v50  ;;  %v917_v13 = vmax.f32 %v916_v4, %v435_v56  ;;  %v930_v14 = vmax.f32 %v929_v6, %v194_v0  ;;  %v114_v16 = vld [vmem:[%s3910_s0 + $0x350] sm:$0xff]  ;;  %v195_v17 = vld [vmem:[%s3910_s0 + $0x5d8] sm:$0xff]  ;;  %v597_v19 = vld [vmem:[%s3910_s0 + $0x1268] sm:$0xff] }
  0x4a   :  { %v911_v18 = vmax.f32 %v910_v7, %v596_v2  ;;  %v678_v20 = vld [vmem:[%s3910_s0 + $0x14f0] sm:$0xff]  ;;  %v924_v21 = vmax.f32 %v923_v10, %v355_v5  ;;  %v356_v22 = vld [vmem:[%s3910_s0 + $0xae0] sm:$0xff]  ;;  %v937_v23 = vmax.f32 %v33_v15, %v114_v16  ;;  %v517_v25 = vld [vmem:[%s3910_s0 + $0xfe8] sm:$0xff] }
  0x4b   :  { %1405 = vst [vmem:[%s3911_s1 + $0xa0] sm:$0xff] %v904_v12  ;;  %v918_v24 = vmax.f32 %v917_v13, %v516_v8  ;;  %v437_v26 = vld [vmem:[%s3910_s0 + $0xd68] sm:$0xff]  ;;  %v931_v27 = vmax.f32 %v930_v14, %v275_v11  ;;  %v276_v28 = vld [vmem:[%s3910_s0 + $0x860] sm:$0xff]  ;;  %v34_v32 = vld [vmem:[%s3910_s0 + $0xd0] sm:$0xff] }
  0x4c   :  { %v912_v29 = vmax.f32 %v911_v18, %v677_v3  ;;  %v925_v30 = vmax.f32 %v924_v21, %v436_v9  ;;  %v938_v31 = vmax.f32 %v937_v23, %v195_v17  ;;  %v115_v33 = vld [vmem:[%s3910_s0 + $0x358] sm:$0xff]  ;;  %v196_v34 = vld [vmem:[%s3910_s0 + $0x5e0] sm:$0xff]  ;;  %v598_v36 = vld [vmem:[%s3910_s0 + $0x1270] sm:$0xff] }
  0x4d   :  { %v919_v35 = vmax.f32 %v918_v24, %v597_v19  ;;  %v679_v37 = vld [vmem:[%s3910_s0 + $0x14f8] sm:$0xff]  ;;  %v932_v38 = vmax.f32 %v931_v27, %v356_v22  ;;  %v357_v39 = vld [vmem:[%s3910_s0 + $0xae8] sm:$0xff]  ;;  %v945_v40 = vmax.f32 %v34_v32, %v115_v33  ;;  %v518_v42 = vld [vmem:[%s3910_s0 + $0xff0] sm:$0xff] }
  0x4e   :  { %1406 = vst [vmem:[%s3911_s1 + $0xa8] sm:$0xff] %v912_v29  ;;  %v926_v41 = vmax.f32 %v925_v30, %v517_v25  ;;  %v438_v43 = vld [vmem:[%s3910_s0 + $0xd70] sm:$0xff]  ;;  %v939_v44 = vmax.f32 %v938_v31, %v276_v28  ;;  %v277_v45 = vld [vmem:[%s3910_s0 + $0x868] sm:$0xff]  ;;  %v35_v49 = vld [vmem:[%s3910_s0 + $0xd8] sm:$0xff] }
  0x4f   :  { %v920_v46 = vmax.f32 %v919_v35, %v678_v20  ;;  %v933_v47 = vmax.f32 %v932_v38, %v437_v26  ;;  %v946_v48 = vmax.f32 %v945_v40, %v196_v34  ;;  %v116_v50 = vld [vmem:[%s3910_s0 + $0x360] sm:$0xff]  ;;  %v197_v51 = vld [vmem:[%s3910_s0 + $0x5e8] sm:$0xff]  ;;  %v599_v53 = vld [vmem:[%s3910_s0 + $0x1278] sm:$0xff] }
  0x50   :  { %v927_v52 = vmax.f32 %v926_v41, %v598_v36  ;;  %v680_v54 = vld [vmem:[%s3910_s0 + $0x1500] sm:$0xff]  ;;  %v940_v55 = vmax.f32 %v939_v44, %v357_v39  ;;  %v358_v56 = vld [vmem:[%s3910_s0 + $0xaf0] sm:$0xff]  ;;  %v953_v57 = vmax.f32 %v35_v49, %v116_v50  ;;  %v519_v59 = vld [vmem:[%s3910_s0 + $0xff8] sm:$0xff] }
  0x51   :  { %1407 = vst [vmem:[%s3911_s1 + $0xb0] sm:$0xff] %v920_v46  ;;  %v934_v58 = vmax.f32 %v933_v47, %v518_v42  ;;  %v439_v60 = vld [vmem:[%s3910_s0 + $0xd78] sm:$0xff]  ;;  %v947_v61 = vmax.f32 %v946_v48, %v277_v45  ;;  %v278_v62 = vld [vmem:[%s3910_s0 + $0x870] sm:$0xff]  ;;  %v36_v2 = vld [vmem:[%s3910_s0 + $0xe0] sm:$0xff] }
  0x52   :  { %v928_v63 = vmax.f32 %v927_v52, %v679_v37  ;;  %v941_v0 = vmax.f32 %v940_v55, %v438_v43  ;;  %v954_v1 = vmax.f32 %v953_v57, %v197_v51  ;;  %v117_v3 = vld [vmem:[%s3910_s0 + $0x368] sm:$0xff]  ;;  %v198_v4 = vld [vmem:[%s3910_s0 + $0x5f0] sm:$0xff]  ;;  %v600_v6 = vld [vmem:[%s3910_s0 + $0x1280] sm:$0xff] }
  0x53   :  { %v935_v5 = vmax.f32 %v934_v58, %v599_v53  ;;  %v681_v7 = vld [vmem:[%s3910_s0 + $0x1508] sm:$0xff]  ;;  %v948_v8 = vmax.f32 %v947_v61, %v358_v56  ;;  %v359_v9 = vld [vmem:[%s3910_s0 + $0xaf8] sm:$0xff]  ;;  %v961_v10 = vmax.f32 %v36_v2, %v117_v3  ;;  %v520_v12 = vld [vmem:[%s3910_s0 + $0x1000] sm:$0xff] }
  0x54   :  { %1408 = vst [vmem:[%s3911_s1 + $0xb8] sm:$0xff] %v928_v63  ;;  %v942_v11 = vmax.f32 %v941_v0, %v519_v59  ;;  %v440_v13 = vld [vmem:[%s3910_s0 + $0xd80] sm:$0xff]  ;;  %v955_v14 = vmax.f32 %v954_v1, %v278_v62  ;;  %v279_v15 = vld [vmem:[%s3910_s0 + $0x878] sm:$0xff]  ;;  %v37_v19 = vld [vmem:[%s3910_s0 + $0xe8] sm:$0xff] }
  0x55   :  { %v936_v16 = vmax.f32 %v935_v5, %v680_v54  ;;  %v949_v17 = vmax.f32 %v948_v8, %v439_v60  ;;  %v962_v18 = vmax.f32 %v961_v10, %v198_v4  ;;  %v118_v20 = vld [vmem:[%s3910_s0 + $0x370] sm:$0xff]  ;;  %v199_v21 = vld [vmem:[%s3910_s0 + $0x5f8] sm:$0xff]  ;;  %v601_v23 = vld [vmem:[%s3910_s0 + $0x1288] sm:$0xff] }
  0x56   :  { %v943_v22 = vmax.f32 %v942_v11, %v600_v6  ;;  %v682_v24 = vld [vmem:[%s3910_s0 + $0x1510] sm:$0xff]  ;;  %v956_v25 = vmax.f32 %v955_v14, %v359_v9  ;;  %v360_v26 = vld [vmem:[%s3910_s0 + $0xb00] sm:$0xff]  ;;  %v969_v27 = vmax.f32 %v37_v19, %v118_v20  ;;  %v521_v29 = vld [vmem:[%s3910_s0 + $0x1008] sm:$0xff] }
  0x57   :  { %1409 = vst [vmem:[%s3911_s1 + $0xc0] sm:$0xff] %v936_v16  ;;  %v950_v28 = vmax.f32 %v949_v17, %v520_v12  ;;  %v441_v30 = vld [vmem:[%s3910_s0 + $0xd88] sm:$0xff]  ;;  %v963_v31 = vmax.f32 %v962_v18, %v279_v15  ;;  %v280_v32 = vld [vmem:[%s3910_s0 + $0x880] sm:$0xff]  ;;  %v38_v36 = vld [vmem:[%s3910_s0 + $0xf0] sm:$0xff] }
  0x58   :  { %v944_v33 = vmax.f32 %v943_v22, %v681_v7  ;;  %v957_v34 = vmax.f32 %v956_v25, %v440_v13  ;;  %v970_v35 = vmax.f32 %v969_v27, %v199_v21  ;;  %v119_v37 = vld [vmem:[%s3910_s0 + $0x378] sm:$0xff]  ;;  %v200_v38 = vld [vmem:[%s3910_s0 + $0x600] sm:$0xff]  ;;  %v602_v40 = vld [vmem:[%s3910_s0 + $0x1290] sm:$0xff] }
  0x59   :  { %v951_v39 = vmax.f32 %v950_v28, %v601_v23  ;;  %v683_v41 = vld [vmem:[%s3910_s0 + $0x1518] sm:$0xff]  ;;  %v964_v42 = vmax.f32 %v963_v31, %v360_v26  ;;  %v361_v43 = vld [vmem:[%s3910_s0 + $0xb08] sm:$0xff]  ;;  %v977_v44 = vmax.f32 %v38_v36, %v119_v37  ;;  %v522_v46 = vld [vmem:[%s3910_s0 + $0x1010] sm:$0xff] }
  0x5a   :  { %1410 = vst [vmem:[%s3911_s1 + $0xc8] sm:$0xff] %v944_v33  ;;  %v958_v45 = vmax.f32 %v957_v34, %v521_v29  ;;  %v442_v47 = vld [vmem:[%s3910_s0 + $0xd90] sm:$0xff]  ;;  %v971_v48 = vmax.f32 %v970_v35, %v280_v32  ;;  %v281_v49 = vld [vmem:[%s3910_s0 + $0x888] sm:$0xff]  ;;  %v39_v53 = vld [vmem:[%s3910_s0 + $0xf8] sm:$0xff] }
  0x5b   :  { %v952_v50 = vmax.f32 %v951_v39, %v682_v24  ;;  %v965_v51 = vmax.f32 %v964_v42, %v441_v30  ;;  %v978_v52 = vmax.f32 %v977_v44, %v200_v38  ;;  %v120_v54 = vld [vmem:[%s3910_s0 + $0x380] sm:$0xff]  ;;  %v201_v55 = vld [vmem:[%s3910_s0 + $0x608] sm:$0xff]  ;;  %v603_v57 = vld [vmem:[%s3910_s0 + $0x1298] sm:$0xff] }
  0x5c   :  { %v959_v56 = vmax.f32 %v958_v45, %v602_v40  ;;  %v684_v58 = vld [vmem:[%s3910_s0 + $0x1520] sm:$0xff]  ;;  %v972_v59 = vmax.f32 %v971_v48, %v361_v43  ;;  %v362_v60 = vld [vmem:[%s3910_s0 + $0xb10] sm:$0xff]  ;;  %v985_v61 = vmax.f32 %v39_v53, %v120_v54  ;;  %v523_v63 = vld [vmem:[%s3910_s0 + $0x1018] sm:$0xff] }
  0x5d   :  { %1411 = vst [vmem:[%s3911_s1 + $0xd0] sm:$0xff] %v952_v50  ;;  %v966_v62 = vmax.f32 %v965_v51, %v522_v46  ;;  %v443_v0 = vld [vmem:[%s3910_s0 + $0xd98] sm:$0xff]  ;;  %v979_v1 = vmax.f32 %v978_v52, %v281_v49  ;;  %v282_v2 = vld [vmem:[%s3910_s0 + $0x890] sm:$0xff]  ;;  %v40_v6 = vld [vmem:[%s3910_s0 + $0x100] sm:$0xff] }
  0x5e   :  { %v960_v3 = vmax.f32 %v959_v56, %v683_v41  ;;  %v973_v4 = vmax.f32 %v972_v59, %v442_v47  ;;  %v986_v5 = vmax.f32 %v985_v61, %v201_v55  ;;  %v121_v7 = vld [vmem:[%s3910_s0 + $0x388] sm:$0xff]  ;;  %v202_v8 = vld [vmem:[%s3910_s0 + $0x610] sm:$0xff]  ;;  %v604_v10 = vld [vmem:[%s3910_s0 + $0x12a0] sm:$0xff] }
  0x5f   :  { %v967_v9 = vmax.f32 %v966_v62, %v603_v57  ;;  %v685_v11 = vld [vmem:[%s3910_s0 + $0x1528] sm:$0xff]  ;;  %v980_v12 = vmax.f32 %v979_v1, %v362_v60  ;;  %v363_v13 = vld [vmem:[%s3910_s0 + $0xb18] sm:$0xff]  ;;  %v993_v14 = vmax.f32 %v40_v6, %v121_v7  ;;  %v524_v16 = vld [vmem:[%s3910_s0 + $0x1020] sm:$0xff] }
  0x60   :  { %1412 = vst [vmem:[%s3911_s1 + $0xd8] sm:$0xff] %v960_v3  ;;  %v974_v15 = vmax.f32 %v973_v4, %v523_v63  ;;  %v444_v17 = vld [vmem:[%s3910_s0 + $0xda0] sm:$0xff]  ;;  %v987_v18 = vmax.f32 %v986_v5, %v282_v2  ;;  %v283_v19 = vld [vmem:[%s3910_s0 + $0x898] sm:$0xff]  ;;  %v41_v23 = vld [vmem:[%s3910_s0 + $0x108] sm:$0xff] }
  0x61   :  { %v968_v20 = vmax.f32 %v967_v9, %v684_v58  ;;  %v981_v21 = vmax.f32 %v980_v12, %v443_v0  ;;  %v994_v22 = vmax.f32 %v993_v14, %v202_v8  ;;  %v122_v24 = vld [vmem:[%s3910_s0 + $0x390] sm:$0xff]  ;;  %v203_v25 = vld [vmem:[%s3910_s0 + $0x618] sm:$0xff]  ;;  %v605_v27 = vld [vmem:[%s3910_s0 + $0x12a8] sm:$0xff] }
  0x62   :  { %v975_v26 = vmax.f32 %v974_v15, %v604_v10  ;;  %v686_v28 = vld [vmem:[%s3910_s0 + $0x1530] sm:$0xff]  ;;  %v988_v29 = vmax.f32 %v987_v18, %v363_v13  ;;  %v364_v30 = vld [vmem:[%s3910_s0 + $0xb20] sm:$0xff]  ;;  %v1001_v31 = vmax.f32 %v41_v23, %v122_v24  ;;  %v525_v33 = vld [vmem:[%s3910_s0 + $0x1028] sm:$0xff] }
  0x63   :  { %1413 = vst [vmem:[%s3911_s1 + $0xe0] sm:$0xff] %v968_v20  ;;  %v982_v32 = vmax.f32 %v981_v21, %v524_v16  ;;  %v445_v34 = vld [vmem:[%s3910_s0 + $0xda8] sm:$0xff]  ;;  %v995_v35 = vmax.f32 %v994_v22, %v283_v19  ;;  %v284_v36 = vld [vmem:[%s3910_s0 + $0x8a0] sm:$0xff]  ;;  %v42_v40 = vld [vmem:[%s3910_s0 + $0x110] sm:$0xff] }
  0x64   :  { %v976_v37 = vmax.f32 %v975_v26, %v685_v11  ;;  %v989_v38 = vmax.f32 %v988_v29, %v444_v17  ;;  %v1002_v39 = vmax.f32 %v1001_v31, %v203_v25  ;;  %v123_v41 = vld [vmem:[%s3910_s0 + $0x398] sm:$0xff]  ;;  %v204_v42 = vld [vmem:[%s3910_s0 + $0x620] sm:$0xff]  ;;  %v606_v44 = vld [vmem:[%s3910_s0 + $0x12b0] sm:$0xff] }
  0x65   :  { %v983_v43 = vmax.f32 %v982_v32, %v605_v27  ;;  %v687_v45 = vld [vmem:[%s3910_s0 + $0x1538] sm:$0xff]  ;;  %v996_v46 = vmax.f32 %v995_v35, %v364_v30  ;;  %v365_v47 = vld [vmem:[%s3910_s0 + $0xb28] sm:$0xff]  ;;  %v1009_v48 = vmax.f32 %v42_v40, %v123_v41  ;;  %v526_v50 = vld [vmem:[%s3910_s0 + $0x1030] sm:$0xff] }
  0x66   :  { %1414 = vst [vmem:[%s3911_s1 + $0xe8] sm:$0xff] %v976_v37  ;;  %v990_v49 = vmax.f32 %v989_v38, %v525_v33  ;;  %v446_v51 = vld [vmem:[%s3910_s0 + $0xdb0] sm:$0xff]  ;;  %v1003_v52 = vmax.f32 %v1002_v39, %v284_v36  ;;  %v285_v53 = vld [vmem:[%s3910_s0 + $0x8a8] sm:$0xff]  ;;  %v43_v57 = vld [vmem:[%s3910_s0 + $0x118] sm:$0xff] }
  0x67   :  { %v984_v54 = vmax.f32 %v983_v43, %v686_v28  ;;  %v997_v55 = vmax.f32 %v996_v46, %v445_v34  ;;  %v1010_v56 = vmax.f32 %v1009_v48, %v204_v42  ;;  %v124_v58 = vld [vmem:[%s3910_s0 + $0x3a0] sm:$0xff]  ;;  %v205_v59 = vld [vmem:[%s3910_s0 + $0x628] sm:$0xff]  ;;  %v607_v61 = vld [vmem:[%s3910_s0 + $0x12b8] sm:$0xff] }
  0x68   :  { %v991_v60 = vmax.f32 %v990_v49, %v606_v44  ;;  %v688_v62 = vld [vmem:[%s3910_s0 + $0x1540] sm:$0xff]  ;;  %v1004_v63 = vmax.f32 %v1003_v52, %v365_v47  ;;  %v366_v0 = vld [vmem:[%s3910_s0 + $0xb30] sm:$0xff]  ;;  %v1017_v1 = vmax.f32 %v43_v57, %v124_v58  ;;  %v527_v3 = vld [vmem:[%s3910_s0 + $0x1038] sm:$0xff] }
  0x69   :  { %1415 = vst [vmem:[%s3911_s1 + $0xf0] sm:$0xff] %v984_v54  ;;  %v998_v2 = vmax.f32 %v997_v55, %v526_v50  ;;  %v447_v4 = vld [vmem:[%s3910_s0 + $0xdb8] sm:$0xff]  ;;  %v1011_v5 = vmax.f32 %v1010_v56, %v285_v53  ;;  %v286_v6 = vld [vmem:[%s3910_s0 + $0x8b0] sm:$0xff]  ;;  %v44_v10 = vld [vmem:[%s3910_s0 + $0x120] sm:$0xff] }
  0x6a   :  { %v992_v7 = vmax.f32 %v991_v60, %v687_v45  ;;  %v1005_v8 = vmax.f32 %v1004_v63, %v446_v51  ;;  %v1018_v9 = vmax.f32 %v1017_v1, %v205_v59  ;;  %v125_v11 = vld [vmem:[%s3910_s0 + $0x3a8] sm:$0xff]  ;;  %v206_v12 = vld [vmem:[%s3910_s0 + $0x630] sm:$0xff]  ;;  %v608_v14 = vld [vmem:[%s3910_s0 + $0x12c0] sm:$0xff] }
  0x6b   :  { %v999_v13 = vmax.f32 %v998_v2, %v607_v61  ;;  %v689_v15 = vld [vmem:[%s3910_s0 + $0x1548] sm:$0xff]  ;;  %v1012_v16 = vmax.f32 %v1011_v5, %v366_v0  ;;  %v367_v17 = vld [vmem:[%s3910_s0 + $0xb38] sm:$0xff]  ;;  %v1025_v18 = vmax.f32 %v44_v10, %v125_v11  ;;  %v528_v20 = vld [vmem:[%s3910_s0 + $0x1040] sm:$0xff] }
  0x6c   :  { %1416 = vst [vmem:[%s3911_s1 + $0xf8] sm:$0xff] %v992_v7  ;;  %v1006_v19 = vmax.f32 %v1005_v8, %v527_v3  ;;  %v448_v21 = vld [vmem:[%s3910_s0 + $0xdc0] sm:$0xff]  ;;  %v1019_v22 = vmax.f32 %v1018_v9, %v286_v6  ;;  %v287_v23 = vld [vmem:[%s3910_s0 + $0x8b8] sm:$0xff]  ;;  %v45_v27 = vld [vmem:[%s3910_s0 + $0x128] sm:$0xff] }
  0x6d   :  { %v1000_v24 = vmax.f32 %v999_v13, %v688_v62  ;;  %v1013_v25 = vmax.f32 %v1012_v16, %v447_v4  ;;  %v1026_v26 = vmax.f32 %v1025_v18, %v206_v12  ;;  %v126_v28 = vld [vmem:[%s3910_s0 + $0x3b0] sm:$0xff]  ;;  %v207_v29 = vld [vmem:[%s3910_s0 + $0x638] sm:$0xff]  ;;  %v609_v31 = vld [vmem:[%s3910_s0 + $0x12c8] sm:$0xff] }
  0x6e   :  { %v1007_v30 = vmax.f32 %v1006_v19, %v608_v14  ;;  %v690_v32 = vld [vmem:[%s3910_s0 + $0x1550] sm:$0xff]  ;;  %v1020_v33 = vmax.f32 %v1019_v22, %v367_v17  ;;  %v368_v34 = vld [vmem:[%s3910_s0 + $0xb40] sm:$0xff]  ;;  %v1033_v35 = vmax.f32 %v45_v27, %v126_v28  ;;  %v529_v37 = vld [vmem:[%s3910_s0 + $0x1048] sm:$0xff] }
  0x6f   :  { %1417 = vst [vmem:[%s3911_s1 + $0x100] sm:$0xff] %v1000_v24  ;;  %v1014_v36 = vmax.f32 %v1013_v25, %v528_v20  ;;  %v449_v38 = vld [vmem:[%s3910_s0 + $0xdc8] sm:$0xff]  ;;  %v1027_v39 = vmax.f32 %v1026_v26, %v287_v23  ;;  %v288_v40 = vld [vmem:[%s3910_s0 + $0x8c0] sm:$0xff]  ;;  %v46_v44 = vld [vmem:[%s3910_s0 + $0x130] sm:$0xff] }
  0x70   :  { %v1008_v41 = vmax.f32 %v1007_v30, %v689_v15  ;;  %v1021_v42 = vmax.f32 %v1020_v33, %v448_v21  ;;  %v1034_v43 = vmax.f32 %v1033_v35, %v207_v29  ;;  %v127_v45 = vld [vmem:[%s3910_s0 + $0x3b8] sm:$0xff]  ;;  %v208_v46 = vld [vmem:[%s3910_s0 + $0x640] sm:$0xff]  ;;  %v610_v48 = vld [vmem:[%s3910_s0 + $0x12d0] sm:$0xff] }
  0x71   :  { %v1015_v47 = vmax.f32 %v1014_v36, %v609_v31  ;;  %v691_v49 = vld [vmem:[%s3910_s0 + $0x1558] sm:$0xff]  ;;  %v1028_v50 = vmax.f32 %v1027_v39, %v368_v34  ;;  %v369_v51 = vld [vmem:[%s3910_s0 + $0xb48] sm:$0xff]  ;;  %v1041_v52 = vmax.f32 %v46_v44, %v127_v45  ;;  %v530_v54 = vld [vmem:[%s3910_s0 + $0x1050] sm:$0xff] }
  0x72   :  { %1418 = vst [vmem:[%s3911_s1 + $0x108] sm:$0xff] %v1008_v41  ;;  %v1022_v53 = vmax.f32 %v1021_v42, %v529_v37  ;;  %v450_v55 = vld [vmem:[%s3910_s0 + $0xdd0] sm:$0xff]  ;;  %v1035_v56 = vmax.f32 %v1034_v43, %v288_v40  ;;  %v289_v57 = vld [vmem:[%s3910_s0 + $0x8c8] sm:$0xff]  ;;  %v47_v61 = vld [vmem:[%s3910_s0 + $0x138] sm:$0xff] }
  0x73   :  { %v1016_v58 = vmax.f32 %v1015_v47, %v690_v32  ;;  %v1029_v59 = vmax.f32 %v1028_v50, %v449_v38  ;;  %v1042_v60 = vmax.f32 %v1041_v52, %v208_v46  ;;  %v128_v62 = vld [vmem:[%s3910_s0 + $0x3c0] sm:$0xff]  ;;  %v209_v63 = vld [vmem:[%s3910_s0 + $0x648] sm:$0xff]  ;;  %v611_v1 = vld [vmem:[%s3910_s0 + $0x12d8] sm:$0xff] }
  0x74   :  { %v1023_v0 = vmax.f32 %v1022_v53, %v610_v48  ;;  %v692_v2 = vld [vmem:[%s3910_s0 + $0x1560] sm:$0xff]  ;;  %v1036_v3 = vmax.f32 %v1035_v56, %v369_v51  ;;  %v370_v4 = vld [vmem:[%s3910_s0 + $0xb50] sm:$0xff]  ;;  %v1049_v5 = vmax.f32 %v47_v61, %v128_v62  ;;  %v531_v7 = vld [vmem:[%s3910_s0 + $0x1058] sm:$0xff] }
  0x75   :  { %1419 = vst [vmem:[%s3911_s1 + $0x110] sm:$0xff] %v1016_v58  ;;  %v1030_v6 = vmax.f32 %v1029_v59, %v530_v54  ;;  %v451_v8 = vld [vmem:[%s3910_s0 + $0xdd8] sm:$0xff]  ;;  %v1043_v9 = vmax.f32 %v1042_v60, %v289_v57  ;;  %v290_v10 = vld [vmem:[%s3910_s0 + $0x8d0] sm:$0xff]  ;;  %v48_v14 = vld [vmem:[%s3910_s0 + $0x140] sm:$0xff] }
  0x76   :  { %v1024_v11 = vmax.f32 %v1023_v0, %v691_v49  ;;  %v1037_v12 = vmax.f32 %v1036_v3, %v450_v55  ;;  %v1050_v13 = vmax.f32 %v1049_v5, %v209_v63  ;;  %v129_v15 = vld [vmem:[%s3910_s0 + $0x3c8] sm:$0xff]  ;;  %v210_v16 = vld [vmem:[%s3910_s0 + $0x650] sm:$0xff]  ;;  %v612_v18 = vld [vmem:[%s3910_s0 + $0x12e0] sm:$0xff] }
  0x77   :  { %v1031_v17 = vmax.f32 %v1030_v6, %v611_v1  ;;  %v693_v19 = vld [vmem:[%s3910_s0 + $0x1568] sm:$0xff]  ;;  %v1044_v20 = vmax.f32 %v1043_v9, %v370_v4  ;;  %v371_v21 = vld [vmem:[%s3910_s0 + $0xb58] sm:$0xff]  ;;  %v1057_v22 = vmax.f32 %v48_v14, %v129_v15  ;;  %v532_v24 = vld [vmem:[%s3910_s0 + $0x1060] sm:$0xff] }
  0x78   :  { %1420 = vst [vmem:[%s3911_s1 + $0x118] sm:$0xff] %v1024_v11  ;;  %v1038_v23 = vmax.f32 %v1037_v12, %v531_v7  ;;  %v452_v25 = vld [vmem:[%s3910_s0 + $0xde0] sm:$0xff]  ;;  %v1051_v26 = vmax.f32 %v1050_v13, %v290_v10  ;;  %v291_v27 = vld [vmem:[%s3910_s0 + $0x8d8] sm:$0xff]  ;;  %v49_v31 = vld [vmem:[%s3910_s0 + $0x148] sm:$0xff] }
  0x79   :  { %v1032_v28 = vmax.f32 %v1031_v17, %v692_v2  ;;  %v1045_v29 = vmax.f32 %v1044_v20, %v451_v8  ;;  %v1058_v30 = vmax.f32 %v1057_v22, %v210_v16  ;;  %v130_v32 = vld [vmem:[%s3910_s0 + $0x3d0] sm:$0xff]  ;;  %v211_v33 = vld [vmem:[%s3910_s0 + $0x658] sm:$0xff]  ;;  %v613_v35 = vld [vmem:[%s3910_s0 + $0x12e8] sm:$0xff] }
  0x7a   :  { %v1039_v34 = vmax.f32 %v1038_v23, %v612_v18  ;;  %v694_v36 = vld [vmem:[%s3910_s0 + $0x1570] sm:$0xff]  ;;  %v1052_v37 = vmax.f32 %v1051_v26, %v371_v21  ;;  %v372_v38 = vld [vmem:[%s3910_s0 + $0xb60] sm:$0xff]  ;;  %v1065_v39 = vmax.f32 %v49_v31, %v130_v32  ;;  %v533_v41 = vld [vmem:[%s3910_s0 + $0x1068] sm:$0xff] }
  0x7b   :  { %1421 = vst [vmem:[%s3911_s1 + $0x120] sm:$0xff] %v1032_v28  ;;  %v1046_v40 = vmax.f32 %v1045_v29, %v532_v24  ;;  %v453_v42 = vld [vmem:[%s3910_s0 + $0xde8] sm:$0xff]  ;;  %v1059_v43 = vmax.f32 %v1058_v30, %v291_v27  ;;  %v292_v44 = vld [vmem:[%s3910_s0 + $0x8e0] sm:$0xff]  ;;  %v50_v48 = vld [vmem:[%s3910_s0 + $0x150] sm:$0xff] }
  0x7c   :  { %v1040_v45 = vmax.f32 %v1039_v34, %v693_v19  ;;  %v1053_v46 = vmax.f32 %v1052_v37, %v452_v25  ;;  %v1066_v47 = vmax.f32 %v1065_v39, %v211_v33  ;;  %v131_v49 = vld [vmem:[%s3910_s0 + $0x3d8] sm:$0xff]  ;;  %v212_v50 = vld [vmem:[%s3910_s0 + $0x660] sm:$0xff]  ;;  %v614_v52 = vld [vmem:[%s3910_s0 + $0x12f0] sm:$0xff] }
  0x7d   :  { %v1047_v51 = vmax.f32 %v1046_v40, %v613_v35  ;;  %v695_v53 = vld [vmem:[%s3910_s0 + $0x1578] sm:$0xff]  ;;  %v1060_v54 = vmax.f32 %v1059_v43, %v372_v38  ;;  %v373_v55 = vld [vmem:[%s3910_s0 + $0xb68] sm:$0xff]  ;;  %v1073_v56 = vmax.f32 %v50_v48, %v131_v49  ;;  %v534_v58 = vld [vmem:[%s3910_s0 + $0x1070] sm:$0xff] }
  0x7e   :  { %1422 = vst [vmem:[%s3911_s1 + $0x128] sm:$0xff] %v1040_v45  ;;  %v1054_v57 = vmax.f32 %v1053_v46, %v533_v41  ;;  %v454_v59 = vld [vmem:[%s3910_s0 + $0xdf0] sm:$0xff]  ;;  %v1067_v60 = vmax.f32 %v1066_v47, %v292_v44  ;;  %v293_v61 = vld [vmem:[%s3910_s0 + $0x8e8] sm:$0xff]  ;;  %v51_v1 = vld [vmem:[%s3910_s0 + $0x158] sm:$0xff] }
  0x7f   :  { %v1048_v62 = vmax.f32 %v1047_v51, %v694_v36  ;;  %v1061_v63 = vmax.f32 %v1060_v54, %v453_v42  ;;  %v1074_v0 = vmax.f32 %v1073_v56, %v212_v50  ;;  %v132_v2 = vld [vmem:[%s3910_s0 + $0x3e0] sm:$0xff]  ;;  %v213_v3 = vld [vmem:[%s3910_s0 + $0x668] sm:$0xff]  ;;  %v615_v5 = vld [vmem:[%s3910_s0 + $0x12f8] sm:$0xff] }
  0x80   :  { %v1055_v4 = vmax.f32 %v1054_v57, %v614_v52  ;;  %v696_v6 = vld [vmem:[%s3910_s0 + $0x1580] sm:$0xff]  ;;  %v1068_v7 = vmax.f32 %v1067_v60, %v373_v55  ;;  %v374_v8 = vld [vmem:[%s3910_s0 + $0xb70] sm:$0xff]  ;;  %v1081_v9 = vmax.f32 %v51_v1, %v132_v2  ;;  %v535_v11 = vld [vmem:[%s3910_s0 + $0x1078] sm:$0xff] }
  0x81   :  { %1423 = vst [vmem:[%s3911_s1 + $0x130] sm:$0xff] %v1048_v62  ;;  %v1062_v10 = vmax.f32 %v1061_v63, %v534_v58  ;;  %v455_v12 = vld [vmem:[%s3910_s0 + $0xdf8] sm:$0xff]  ;;  %v1075_v13 = vmax.f32 %v1074_v0, %v293_v61  ;;  %v294_v14 = vld [vmem:[%s3910_s0 + $0x8f0] sm:$0xff]  ;;  %v52_v18 = vld [vmem:[%s3910_s0 + $0x160] sm:$0xff] }
  0x82   :  { %v1056_v15 = vmax.f32 %v1055_v4, %v695_v53  ;;  %v1069_v16 = vmax.f32 %v1068_v7, %v454_v59  ;;  %v1082_v17 = vmax.f32 %v1081_v9, %v213_v3  ;;  %v133_v19 = vld [vmem:[%s3910_s0 + $0x3e8] sm:$0xff]  ;;  %v214_v20 = vld [vmem:[%s3910_s0 + $0x670] sm:$0xff]  ;;  %v616_v22 = vld [vmem:[%s3910_s0 + $0x1300] sm:$0xff] }
  0x83   :  { %v1063_v21 = vmax.f32 %v1062_v10, %v615_v5  ;;  %v697_v23 = vld [vmem:[%s3910_s0 + $0x1588] sm:$0xff]  ;;  %v1076_v24 = vmax.f32 %v1075_v13, %v374_v8  ;;  %v375_v25 = vld [vmem:[%s3910_s0 + $0xb78] sm:$0xff]  ;;  %v1089_v26 = vmax.f32 %v52_v18, %v133_v19  ;;  %v536_v28 = vld [vmem:[%s3910_s0 + $0x1080] sm:$0xff] }
  0x84   :  { %1424 = vst [vmem:[%s3911_s1 + $0x138] sm:$0xff] %v1056_v15  ;;  %v1070_v27 = vmax.f32 %v1069_v16, %v535_v11  ;;  %v456_v29 = vld [vmem:[%s3910_s0 + $0xe00] sm:$0xff]  ;;  %v1083_v30 = vmax.f32 %v1082_v17, %v294_v14  ;;  %v295_v31 = vld [vmem:[%s3910_s0 + $0x8f8] sm:$0xff]  ;;  %v53_v35 = vld [vmem:[%s3910_s0 + $0x168] sm:$0xff] }
  0x85   :  { %v1064_v32 = vmax.f32 %v1063_v21, %v696_v6  ;;  %v1077_v33 = vmax.f32 %v1076_v24, %v455_v12  ;;  %v1090_v34 = vmax.f32 %v1089_v26, %v214_v20  ;;  %v134_v36 = vld [vmem:[%s3910_s0 + $0x3f0] sm:$0xff]  ;;  %v215_v37 = vld [vmem:[%s3910_s0 + $0x678] sm:$0xff]  ;;  %v617_v39 = vld [vmem:[%s3910_s0 + $0x1308] sm:$0xff] }
  0x86   :  { %v1071_v38 = vmax.f32 %v1070_v27, %v616_v22  ;;  %v698_v40 = vld [vmem:[%s3910_s0 + $0x1590] sm:$0xff]  ;;  %v1084_v41 = vmax.f32 %v1083_v30, %v375_v25  ;;  %v376_v42 = vld [vmem:[%s3910_s0 + $0xb80] sm:$0xff]  ;;  %v1097_v43 = vmax.f32 %v53_v35, %v134_v36  ;;  %v537_v45 = vld [vmem:[%s3910_s0 + $0x1088] sm:$0xff] }
  0x87   :  { %1425 = vst [vmem:[%s3911_s1 + $0x140] sm:$0xff] %v1064_v32  ;;  %v1078_v44 = vmax.f32 %v1077_v33, %v536_v28  ;;  %v457_v46 = vld [vmem:[%s3910_s0 + $0xe08] sm:$0xff]  ;;  %v1091_v47 = vmax.f32 %v1090_v34, %v295_v31  ;;  %v296_v48 = vld [vmem:[%s3910_s0 + $0x900] sm:$0xff]  ;;  %v54_v52 = vld [vmem:[%s3910_s0 + $0x170] sm:$0xff] }
  0x88   :  { %v1072_v49 = vmax.f32 %v1071_v38, %v697_v23  ;;  %v1085_v50 = vmax.f32 %v1084_v41, %v456_v29  ;;  %v1098_v51 = vmax.f32 %v1097_v43, %v215_v37  ;;  %v135_v53 = vld [vmem:[%s3910_s0 + $0x3f8] sm:$0xff]  ;;  %v216_v54 = vld [vmem:[%s3910_s0 + $0x680] sm:$0xff]  ;;  %v618_v56 = vld [vmem:[%s3910_s0 + $0x1310] sm:$0xff] }
  0x89   :  { %v1079_v55 = vmax.f32 %v1078_v44, %v617_v39  ;;  %v699_v57 = vld [vmem:[%s3910_s0 + $0x1598] sm:$0xff]  ;;  %v1092_v58 = vmax.f32 %v1091_v47, %v376_v42  ;;  %v377_v59 = vld [vmem:[%s3910_s0 + $0xb88] sm:$0xff]  ;;  %v1105_v60 = vmax.f32 %v54_v52, %v135_v53  ;;  %v538_v62 = vld [vmem:[%s3910_s0 + $0x1090] sm:$0xff] }
  0x8a   :  { %1426 = vst [vmem:[%s3911_s1 + $0x148] sm:$0xff] %v1072_v49  ;;  %v1086_v61 = vmax.f32 %v1085_v50, %v537_v45  ;;  %v458_v63 = vld [vmem:[%s3910_s0 + $0xe10] sm:$0xff]  ;;  %v1099_v0 = vmax.f32 %v1098_v51, %v296_v48  ;;  %v297_v1 = vld [vmem:[%s3910_s0 + $0x908] sm:$0xff]  ;;  %v55_v5 = vld [vmem:[%s3910_s0 + $0x178] sm:$0xff] }
  0x8b   :  { %v1080_v2 = vmax.f32 %v1079_v55, %v698_v40  ;;  %v1093_v3 = vmax.f32 %v1092_v58, %v457_v46  ;;  %v1106_v4 = vmax.f32 %v1105_v60, %v216_v54  ;;  %v136_v6 = vld [vmem:[%s3910_s0 + $0x400] sm:$0xff]  ;;  %v217_v7 = vld [vmem:[%s3910_s0 + $0x688] sm:$0xff]  ;;  %v619_v9 = vld [vmem:[%s3910_s0 + $0x1318] sm:$0xff] }
  0x8c   :  { %v1087_v8 = vmax.f32 %v1086_v61, %v618_v56  ;;  %v700_v10 = vld [vmem:[%s3910_s0 + $0x15a0] sm:$0xff]  ;;  %v1100_v11 = vmax.f32 %v1099_v0, %v377_v59  ;;  %v378_v12 = vld [vmem:[%s3910_s0 + $0xb90] sm:$0xff]  ;;  %v1113_v13 = vmax.f32 %v55_v5, %v136_v6  ;;  %v539_v15 = vld [vmem:[%s3910_s0 + $0x1098] sm:$0xff] }
  0x8d   :  { %1427 = vst [vmem:[%s3911_s1 + $0x150] sm:$0xff] %v1080_v2  ;;  %v1094_v14 = vmax.f32 %v1093_v3, %v538_v62  ;;  %v459_v16 = vld [vmem:[%s3910_s0 + $0xe18] sm:$0xff]  ;;  %v1107_v17 = vmax.f32 %v1106_v4, %v297_v1  ;;  %v298_v18 = vld [vmem:[%s3910_s0 + $0x910] sm:$0xff]  ;;  %v56_v22 = vld [vmem:[%s3910_s0 + $0x180] sm:$0xff] }
  0x8e   :  { %v1088_v19 = vmax.f32 %v1087_v8, %v699_v57  ;;  %v1101_v20 = vmax.f32 %v1100_v11, %v458_v63  ;;  %v1114_v21 = vmax.f32 %v1113_v13, %v217_v7  ;;  %v137_v23 = vld [vmem:[%s3910_s0 + $0x408] sm:$0xff]  ;;  %v218_v24 = vld [vmem:[%s3910_s0 + $0x690] sm:$0xff]  ;;  %v620_v26 = vld [vmem:[%s3910_s0 + $0x1320] sm:$0xff] }
  0x8f   :  { %v1095_v25 = vmax.f32 %v1094_v14, %v619_v9  ;;  %v701_v27 = vld [vmem:[%s3910_s0 + $0x15a8] sm:$0xff]  ;;  %v1108_v28 = vmax.f32 %v1107_v17, %v378_v12  ;;  %v379_v29 = vld [vmem:[%s3910_s0 + $0xb98] sm:$0xff]  ;;  %v1121_v30 = vmax.f32 %v56_v22, %v137_v23  ;;  %v540_v32 = vld [vmem:[%s3910_s0 + $0x10a0] sm:$0xff] }
  0x90   :  { %1428 = vst [vmem:[%s3911_s1 + $0x158] sm:$0xff] %v1088_v19  ;;  %v1102_v31 = vmax.f32 %v1101_v20, %v539_v15  ;;  %v460_v33 = vld [vmem:[%s3910_s0 + $0xe20] sm:$0xff]  ;;  %v1115_v34 = vmax.f32 %v1114_v21, %v298_v18  ;;  %v299_v35 = vld [vmem:[%s3910_s0 + $0x918] sm:$0xff]  ;;  %v57_v39 = vld [vmem:[%s3910_s0 + $0x188] sm:$0xff] }
  0x91   :  { %v1096_v36 = vmax.f32 %v1095_v25, %v700_v10  ;;  %v1109_v37 = vmax.f32 %v1108_v28, %v459_v16  ;;  %v1122_v38 = vmax.f32 %v1121_v30, %v218_v24  ;;  %v138_v40 = vld [vmem:[%s3910_s0 + $0x410] sm:$0xff]  ;;  %v219_v41 = vld [vmem:[%s3910_s0 + $0x698] sm:$0xff]  ;;  %v621_v43 = vld [vmem:[%s3910_s0 + $0x1328] sm:$0xff] }
  0x92   :  { %v1103_v42 = vmax.f32 %v1102_v31, %v620_v26  ;;  %v702_v44 = vld [vmem:[%s3910_s0 + $0x15b0] sm:$0xff]  ;;  %v1116_v45 = vmax.f32 %v1115_v34, %v379_v29  ;;  %v380_v46 = vld [vmem:[%s3910_s0 + $0xba0] sm:$0xff]  ;;  %v1129_v47 = vmax.f32 %v57_v39, %v138_v40  ;;  %v541_v49 = vld [vmem:[%s3910_s0 + $0x10a8] sm:$0xff] }
  0x93   :  { %1429 = vst [vmem:[%s3911_s1 + $0x160] sm:$0xff] %v1096_v36  ;;  %v1110_v48 = vmax.f32 %v1109_v37, %v540_v32  ;;  %v461_v50 = vld [vmem:[%s3910_s0 + $0xe28] sm:$0xff]  ;;  %v1123_v51 = vmax.f32 %v1122_v38, %v299_v35  ;;  %v300_v52 = vld [vmem:[%s3910_s0 + $0x920] sm:$0xff]  ;;  %v58_v56 = vld [vmem:[%s3910_s0 + $0x190] sm:$0xff] }
  0x94   :  { %v1104_v53 = vmax.f32 %v1103_v42, %v701_v27  ;;  %v1117_v54 = vmax.f32 %v1116_v45, %v460_v33  ;;  %v1130_v55 = vmax.f32 %v1129_v47, %v219_v41  ;;  %v139_v57 = vld [vmem:[%s3910_s0 + $0x418] sm:$0xff]  ;;  %v220_v58 = vld [vmem:[%s3910_s0 + $0x6a0] sm:$0xff]  ;;  %v622_v60 = vld [vmem:[%s3910_s0 + $0x1330] sm:$0xff] }
  0x95   :  { %v1111_v59 = vmax.f32 %v1110_v48, %v621_v43  ;;  %v703_v61 = vld [vmem:[%s3910_s0 + $0x15b8] sm:$0xff]  ;;  %v1124_v62 = vmax.f32 %v1123_v51, %v380_v46  ;;  %v381_v63 = vld [vmem:[%s3910_s0 + $0xba8] sm:$0xff]  ;;  %v1137_v0 = vmax.f32 %v58_v56, %v139_v57  ;;  %v542_v2 = vld [vmem:[%s3910_s0 + $0x10b0] sm:$0xff] }
  0x96   :  { %1430 = vst [vmem:[%s3911_s1 + $0x168] sm:$0xff] %v1104_v53  ;;  %v1118_v1 = vmax.f32 %v1117_v54, %v541_v49  ;;  %v462_v3 = vld [vmem:[%s3910_s0 + $0xe30] sm:$0xff]  ;;  %v1131_v4 = vmax.f32 %v1130_v55, %v300_v52  ;;  %v301_v5 = vld [vmem:[%s3910_s0 + $0x928] sm:$0xff]  ;;  %v59_v9 = vld [vmem:[%s3910_s0 + $0x198] sm:$0xff] }
  0x97   :  { %v1112_v6 = vmax.f32 %v1111_v59, %v702_v44  ;;  %v1125_v7 = vmax.f32 %v1124_v62, %v461_v50  ;;  %v1138_v8 = vmax.f32 %v1137_v0, %v220_v58  ;;  %v140_v10 = vld [vmem:[%s3910_s0 + $0x420] sm:$0xff]  ;;  %v221_v11 = vld [vmem:[%s3910_s0 + $0x6a8] sm:$0xff]  ;;  %v623_v13 = vld [vmem:[%s3910_s0 + $0x1338] sm:$0xff] }
  0x98   :  { %v1119_v12 = vmax.f32 %v1118_v1, %v622_v60  ;;  %v704_v14 = vld [vmem:[%s3910_s0 + $0x15c0] sm:$0xff]  ;;  %v1132_v15 = vmax.f32 %v1131_v4, %v381_v63  ;;  %v382_v16 = vld [vmem:[%s3910_s0 + $0xbb0] sm:$0xff]  ;;  %v1145_v17 = vmax.f32 %v59_v9, %v140_v10  ;;  %v543_v19 = vld [vmem:[%s3910_s0 + $0x10b8] sm:$0xff] }
  0x99   :  { %1431 = vst [vmem:[%s3911_s1 + $0x170] sm:$0xff] %v1112_v6  ;;  %v1126_v18 = vmax.f32 %v1125_v7, %v542_v2  ;;  %v463_v20 = vld [vmem:[%s3910_s0 + $0xe38] sm:$0xff]  ;;  %v1139_v21 = vmax.f32 %v1138_v8, %v301_v5  ;;  %v302_v22 = vld [vmem:[%s3910_s0 + $0x930] sm:$0xff]  ;;  %v60_v26 = vld [vmem:[%s3910_s0 + $0x1a0] sm:$0xff] }
  0x9a   :  { %v1120_v23 = vmax.f32 %v1119_v12, %v703_v61  ;;  %v1133_v24 = vmax.f32 %v1132_v15, %v462_v3  ;;  %v1146_v25 = vmax.f32 %v1145_v17, %v221_v11  ;;  %v141_v27 = vld [vmem:[%s3910_s0 + $0x428] sm:$0xff]  ;;  %v222_v28 = vld [vmem:[%s3910_s0 + $0x6b0] sm:$0xff]  ;;  %v624_v30 = vld [vmem:[%s3910_s0 + $0x1340] sm:$0xff] }
  0x9b   :  { %v1127_v29 = vmax.f32 %v1126_v18, %v623_v13  ;;  %v705_v31 = vld [vmem:[%s3910_s0 + $0x15c8] sm:$0xff]  ;;  %v1140_v32 = vmax.f32 %v1139_v21, %v382_v16  ;;  %v383_v33 = vld [vmem:[%s3910_s0 + $0xbb8] sm:$0xff]  ;;  %v1153_v34 = vmax.f32 %v60_v26, %v141_v27  ;;  %v544_v36 = vld [vmem:[%s3910_s0 + $0x10c0] sm:$0xff] }
  0x9c   :  { %1432 = vst [vmem:[%s3911_s1 + $0x178] sm:$0xff] %v1120_v23  ;;  %v1134_v35 = vmax.f32 %v1133_v24, %v543_v19  ;;  %v464_v37 = vld [vmem:[%s3910_s0 + $0xe40] sm:$0xff]  ;;  %v1147_v38 = vmax.f32 %v1146_v25, %v302_v22  ;;  %v303_v39 = vld [vmem:[%s3910_s0 + $0x938] sm:$0xff]  ;;  %v61_v43 = vld [vmem:[%s3910_s0 + $0x1a8] sm:$0xff] }
  0x9d   :  { %v1128_v40 = vmax.f32 %v1127_v29, %v704_v14  ;;  %v1141_v41 = vmax.f32 %v1140_v32, %v463_v20  ;;  %v1154_v42 = vmax.f32 %v1153_v34, %v222_v28  ;;  %v142_v44 = vld [vmem:[%s3910_s0 + $0x430] sm:$0xff]  ;;  %v223_v45 = vld [vmem:[%s3910_s0 + $0x6b8] sm:$0xff]  ;;  %v625_v47 = vld [vmem:[%s3910_s0 + $0x1348] sm:$0xff] }
  0x9e   :  { %v1135_v46 = vmax.f32 %v1134_v35, %v624_v30  ;;  %v706_v48 = vld [vmem:[%s3910_s0 + $0x15d0] sm:$0xff]  ;;  %v1148_v49 = vmax.f32 %v1147_v38, %v383_v33  ;;  %v384_v50 = vld [vmem:[%s3910_s0 + $0xbc0] sm:$0xff]  ;;  %v1161_v51 = vmax.f32 %v61_v43, %v142_v44  ;;  %v545_v53 = vld [vmem:[%s3910_s0 + $0x10c8] sm:$0xff] }
  0x9f   :  { %1433 = vst [vmem:[%s3911_s1 + $0x180] sm:$0xff] %v1128_v40  ;;  %v1142_v52 = vmax.f32 %v1141_v41, %v544_v36  ;;  %v465_v54 = vld [vmem:[%s3910_s0 + $0xe48] sm:$0xff]  ;;  %v1155_v55 = vmax.f32 %v1154_v42, %v303_v39  ;;  %v304_v56 = vld [vmem:[%s3910_s0 + $0x940] sm:$0xff]  ;;  %v62_v60 = vld [vmem:[%s3910_s0 + $0x1b0] sm:$0xff] }
  0xa0   :  { %v1136_v57 = vmax.f32 %v1135_v46, %v705_v31  ;;  %v1149_v58 = vmax.f32 %v1148_v49, %v464_v37  ;;  %v1162_v59 = vmax.f32 %v1161_v51, %v223_v45  ;;  %v143_v61 = vld [vmem:[%s3910_s0 + $0x438] sm:$0xff]  ;;  %v224_v62 = vld [vmem:[%s3910_s0 + $0x6c0] sm:$0xff]  ;;  %v626_v0 = vld [vmem:[%s3910_s0 + $0x1350] sm:$0xff] }
  0xa1   :  { %v1143_v63 = vmax.f32 %v1142_v52, %v625_v47  ;;  %v707_v1 = vld [vmem:[%s3910_s0 + $0x15d8] sm:$0xff]  ;;  %v1156_v2 = vmax.f32 %v1155_v55, %v384_v50  ;;  %v385_v3 = vld [vmem:[%s3910_s0 + $0xbc8] sm:$0xff]  ;;  %v1169_v4 = vmax.f32 %v62_v60, %v143_v61  ;;  %v546_v6 = vld [vmem:[%s3910_s0 + $0x10d0] sm:$0xff] }
  0xa2   :  { %1434 = vst [vmem:[%s3911_s1 + $0x188] sm:$0xff] %v1136_v57  ;;  %v1150_v5 = vmax.f32 %v1149_v58, %v545_v53  ;;  %v466_v7 = vld [vmem:[%s3910_s0 + $0xe50] sm:$0xff]  ;;  %v1163_v8 = vmax.f32 %v1162_v59, %v304_v56  ;;  %v305_v9 = vld [vmem:[%s3910_s0 + $0x948] sm:$0xff]  ;;  %v63_v13 = vld [vmem:[%s3910_s0 + $0x1b8] sm:$0xff] }
  0xa3   :  { %v1144_v10 = vmax.f32 %v1143_v63, %v706_v48  ;;  %v1157_v11 = vmax.f32 %v1156_v2, %v465_v54  ;;  %v1170_v12 = vmax.f32 %v1169_v4, %v224_v62  ;;  %v144_v14 = vld [vmem:[%s3910_s0 + $0x440] sm:$0xff]  ;;  %v225_v15 = vld [vmem:[%s3910_s0 + $0x6c8] sm:$0xff]  ;;  %v627_v17 = vld [vmem:[%s3910_s0 + $0x1358] sm:$0xff] }
  0xa4   :  { %v1151_v16 = vmax.f32 %v1150_v5, %v626_v0  ;;  %v708_v18 = vld [vmem:[%s3910_s0 + $0x15e0] sm:$0xff]  ;;  %v1164_v19 = vmax.f32 %v1163_v8, %v385_v3  ;;  %v386_v20 = vld [vmem:[%s3910_s0 + $0xbd0] sm:$0xff]  ;;  %v1177_v21 = vmax.f32 %v63_v13, %v144_v14  ;;  %v547_v23 = vld [vmem:[%s3910_s0 + $0x10d8] sm:$0xff] }
  0xa5   :  { %1435 = vst [vmem:[%s3911_s1 + $0x190] sm:$0xff] %v1144_v10  ;;  %v1158_v22 = vmax.f32 %v1157_v11, %v546_v6  ;;  %v467_v24 = vld [vmem:[%s3910_s0 + $0xe58] sm:$0xff]  ;;  %v1171_v25 = vmax.f32 %v1170_v12, %v305_v9  ;;  %v306_v26 = vld [vmem:[%s3910_s0 + $0x950] sm:$0xff]  ;;  %v64_v30 = vld [vmem:[%s3910_s0 + $0x1c0] sm:$0xff] }
  0xa6   :  { %v1152_v27 = vmax.f32 %v1151_v16, %v707_v1  ;;  %v1165_v28 = vmax.f32 %v1164_v19, %v466_v7  ;;  %v1178_v29 = vmax.f32 %v1177_v21, %v225_v15  ;;  %v145_v31 = vld [vmem:[%s3910_s0 + $0x448] sm:$0xff]  ;;  %v226_v32 = vld [vmem:[%s3910_s0 + $0x6d0] sm:$0xff]  ;;  %v628_v34 = vld [vmem:[%s3910_s0 + $0x1360] sm:$0xff] }
  0xa7   :  { %v1159_v33 = vmax.f32 %v1158_v22, %v627_v17  ;;  %v709_v35 = vld [vmem:[%s3910_s0 + $0x15e8] sm:$0xff]  ;;  %v1172_v36 = vmax.f32 %v1171_v25, %v386_v20  ;;  %v387_v37 = vld [vmem:[%s3910_s0 + $0xbd8] sm:$0xff]  ;;  %v1185_v38 = vmax.f32 %v64_v30, %v145_v31  ;;  %v548_v40 = vld [vmem:[%s3910_s0 + $0x10e0] sm:$0xff] }
  0xa8   :  { %1436 = vst [vmem:[%s3911_s1 + $0x198] sm:$0xff] %v1152_v27  ;;  %v1166_v39 = vmax.f32 %v1165_v28, %v547_v23  ;;  %v468_v41 = vld [vmem:[%s3910_s0 + $0xe60] sm:$0xff]  ;;  %v1179_v42 = vmax.f32 %v1178_v29, %v306_v26  ;;  %v307_v43 = vld [vmem:[%s3910_s0 + $0x958] sm:$0xff]  ;;  %v65_v47 = vld [vmem:[%s3910_s0 + $0x1c8] sm:$0xff] }
  0xa9   :  { %v1160_v44 = vmax.f32 %v1159_v33, %v708_v18  ;;  %v1173_v45 = vmax.f32 %v1172_v36, %v467_v24  ;;  %v1186_v46 = vmax.f32 %v1185_v38, %v226_v32  ;;  %v146_v48 = vld [vmem:[%s3910_s0 + $0x450] sm:$0xff]  ;;  %v227_v49 = vld [vmem:[%s3910_s0 + $0x6d8] sm:$0xff]  ;;  %v629_v51 = vld [vmem:[%s3910_s0 + $0x1368] sm:$0xff] }
  0xaa   :  { %v1167_v50 = vmax.f32 %v1166_v39, %v628_v34  ;;  %v710_v52 = vld [vmem:[%s3910_s0 + $0x15f0] sm:$0xff]  ;;  %v1180_v53 = vmax.f32 %v1179_v42, %v387_v37  ;;  %v388_v54 = vld [vmem:[%s3910_s0 + $0xbe0] sm:$0xff]  ;;  %v1193_v55 = vmax.f32 %v65_v47, %v146_v48  ;;  %v549_v57 = vld [vmem:[%s3910_s0 + $0x10e8] sm:$0xff] }
  0xab   :  { %1437 = vst [vmem:[%s3911_s1 + $0x1a0] sm:$0xff] %v1160_v44  ;;  %v1174_v56 = vmax.f32 %v1173_v45, %v548_v40  ;;  %v469_v58 = vld [vmem:[%s3910_s0 + $0xe68] sm:$0xff]  ;;  %v1187_v59 = vmax.f32 %v1186_v46, %v307_v43  ;;  %v308_v60 = vld [vmem:[%s3910_s0 + $0x960] sm:$0xff]  ;;  %v66_v0 = vld [vmem:[%s3910_s0 + $0x1d0] sm:$0xff] }
  0xac   :  { %v1168_v61 = vmax.f32 %v1167_v50, %v709_v35  ;;  %v1181_v62 = vmax.f32 %v1180_v53, %v468_v41  ;;  %v1194_v63 = vmax.f32 %v1193_v55, %v227_v49  ;;  %v147_v1 = vld [vmem:[%s3910_s0 + $0x458] sm:$0xff]  ;;  %v228_v2 = vld [vmem:[%s3910_s0 + $0x6e0] sm:$0xff]  ;;  %v630_v4 = vld [vmem:[%s3910_s0 + $0x1370] sm:$0xff] }
  0xad   :  { %v1175_v3 = vmax.f32 %v1174_v56, %v629_v51  ;;  %v711_v5 = vld [vmem:[%s3910_s0 + $0x15f8] sm:$0xff]  ;;  %v1188_v6 = vmax.f32 %v1187_v59, %v388_v54  ;;  %v389_v7 = vld [vmem:[%s3910_s0 + $0xbe8] sm:$0xff]  ;;  %v1201_v8 = vmax.f32 %v66_v0, %v147_v1  ;;  %v550_v10 = vld [vmem:[%s3910_s0 + $0x10f0] sm:$0xff] }
  0xae   :  { %1438 = vst [vmem:[%s3911_s1 + $0x1a8] sm:$0xff] %v1168_v61  ;;  %v1182_v9 = vmax.f32 %v1181_v62, %v549_v57  ;;  %v470_v11 = vld [vmem:[%s3910_s0 + $0xe70] sm:$0xff]  ;;  %v1195_v12 = vmax.f32 %v1194_v63, %v308_v60  ;;  %v309_v13 = vld [vmem:[%s3910_s0 + $0x968] sm:$0xff]  ;;  %v67_v17 = vld [vmem:[%s3910_s0 + $0x1d8] sm:$0xff] }
  0xaf   :  { %v1176_v14 = vmax.f32 %v1175_v3, %v710_v52  ;;  %v1189_v15 = vmax.f32 %v1188_v6, %v469_v58  ;;  %v1202_v16 = vmax.f32 %v1201_v8, %v228_v2  ;;  %v148_v18 = vld [vmem:[%s3910_s0 + $0x460] sm:$0xff]  ;;  %v229_v19 = vld [vmem:[%s3910_s0 + $0x6e8] sm:$0xff]  ;;  %v631_v21 = vld [vmem:[%s3910_s0 + $0x1378] sm:$0xff] }
  0xb0   :  { %v1183_v20 = vmax.f32 %v1182_v9, %v630_v4  ;;  %v712_v22 = vld [vmem:[%s3910_s0 + $0x1600] sm:$0xff]  ;;  %v1196_v23 = vmax.f32 %v1195_v12, %v389_v7  ;;  %v390_v24 = vld [vmem:[%s3910_s0 + $0xbf0] sm:$0xff]  ;;  %v1209_v25 = vmax.f32 %v67_v17, %v148_v18  ;;  %v551_v27 = vld [vmem:[%s3910_s0 + $0x10f8] sm:$0xff] }
  0xb1   :  { %1439 = vst [vmem:[%s3911_s1 + $0x1b0] sm:$0xff] %v1176_v14  ;;  %v1190_v26 = vmax.f32 %v1189_v15, %v550_v10  ;;  %v471_v28 = vld [vmem:[%s3910_s0 + $0xe78] sm:$0xff]  ;;  %v1203_v29 = vmax.f32 %v1202_v16, %v309_v13  ;;  %v310_v30 = vld [vmem:[%s3910_s0 + $0x970] sm:$0xff]  ;;  %v68_v34 = vld [vmem:[%s3910_s0 + $0x1e0] sm:$0xff] }
  0xb2   :  { %v1184_v31 = vmax.f32 %v1183_v20, %v711_v5  ;;  %v1197_v32 = vmax.f32 %v1196_v23, %v470_v11  ;;  %v1210_v33 = vmax.f32 %v1209_v25, %v229_v19  ;;  %v149_v35 = vld [vmem:[%s3910_s0 + $0x468] sm:$0xff]  ;;  %v230_v36 = vld [vmem:[%s3910_s0 + $0x6f0] sm:$0xff]  ;;  %v632_v38 = vld [vmem:[%s3910_s0 + $0x1380] sm:$0xff] }
  0xb3   :  { %v1191_v37 = vmax.f32 %v1190_v26, %v631_v21  ;;  %v713_v39 = vld [vmem:[%s3910_s0 + $0x1608] sm:$0xff]  ;;  %v1204_v40 = vmax.f32 %v1203_v29, %v390_v24  ;;  %v391_v41 = vld [vmem:[%s3910_s0 + $0xbf8] sm:$0xff]  ;;  %v1217_v42 = vmax.f32 %v68_v34, %v149_v35  ;;  %v552_v44 = vld [vmem:[%s3910_s0 + $0x1100] sm:$0xff] }
  0xb4   :  { %1440 = vst [vmem:[%s3911_s1 + $0x1b8] sm:$0xff] %v1184_v31  ;;  %v1198_v43 = vmax.f32 %v1197_v32, %v551_v27  ;;  %v472_v45 = vld [vmem:[%s3910_s0 + $0xe80] sm:$0xff]  ;;  %v1211_v46 = vmax.f32 %v1210_v33, %v310_v30  ;;  %v311_v47 = vld [vmem:[%s3910_s0 + $0x978] sm:$0xff]  ;;  %v69_v51 = vld [vmem:[%s3910_s0 + $0x1e8] sm:$0xff] }
  0xb5   :  { %v1192_v48 = vmax.f32 %v1191_v37, %v712_v22  ;;  %v1205_v49 = vmax.f32 %v1204_v40, %v471_v28  ;;  %v1218_v50 = vmax.f32 %v1217_v42, %v230_v36  ;;  %v150_v52 = vld [vmem:[%s3910_s0 + $0x470] sm:$0xff]  ;;  %v231_v53 = vld [vmem:[%s3910_s0 + $0x6f8] sm:$0xff]  ;;  %v633_v55 = vld [vmem:[%s3910_s0 + $0x1388] sm:$0xff] }
  0xb6   :  { %v1199_v54 = vmax.f32 %v1198_v43, %v632_v38  ;;  %v714_v56 = vld [vmem:[%s3910_s0 + $0x1610] sm:$0xff]  ;;  %v1212_v57 = vmax.f32 %v1211_v46, %v391_v41  ;;  %v392_v58 = vld [vmem:[%s3910_s0 + $0xc00] sm:$0xff]  ;;  %v1225_v59 = vmax.f32 %v69_v51, %v150_v52  ;;  %v553_v61 = vld [vmem:[%s3910_s0 + $0x1108] sm:$0xff] }
  0xb7   :  { %1441 = vst [vmem:[%s3911_s1 + $0x1c0] sm:$0xff] %v1192_v48  ;;  %v1206_v60 = vmax.f32 %v1205_v49, %v552_v44  ;;  %v473_v62 = vld [vmem:[%s3910_s0 + $0xe88] sm:$0xff]  ;;  %v1219_v63 = vmax.f32 %v1218_v50, %v311_v47  ;;  %v312_v0 = vld [vmem:[%s3910_s0 + $0x980] sm:$0xff]  ;;  %v70_v4 = vld [vmem:[%s3910_s0 + $0x1f0] sm:$0xff] }
  0xb8   :  { %v1200_v1 = vmax.f32 %v1199_v54, %v713_v39  ;;  %v1213_v2 = vmax.f32 %v1212_v57, %v472_v45  ;;  %v1226_v3 = vmax.f32 %v1225_v59, %v231_v53  ;;  %v151_v5 = vld [vmem:[%s3910_s0 + $0x478] sm:$0xff]  ;;  %v232_v6 = vld [vmem:[%s3910_s0 + $0x700] sm:$0xff]  ;;  %v634_v8 = vld [vmem:[%s3910_s0 + $0x1390] sm:$0xff] }
  0xb9   :  { %v1207_v7 = vmax.f32 %v1206_v60, %v633_v55  ;;  %v715_v9 = vld [vmem:[%s3910_s0 + $0x1618] sm:$0xff]  ;;  %v1220_v10 = vmax.f32 %v1219_v63, %v392_v58  ;;  %v393_v11 = vld [vmem:[%s3910_s0 + $0xc08] sm:$0xff]  ;;  %v1233_v12 = vmax.f32 %v70_v4, %v151_v5  ;;  %v554_v14 = vld [vmem:[%s3910_s0 + $0x1110] sm:$0xff] }
  0xba   :  { %1442 = vst [vmem:[%s3911_s1 + $0x1c8] sm:$0xff] %v1200_v1  ;;  %v1214_v13 = vmax.f32 %v1213_v2, %v553_v61  ;;  %v474_v15 = vld [vmem:[%s3910_s0 + $0xe90] sm:$0xff]  ;;  %v1227_v16 = vmax.f32 %v1226_v3, %v312_v0  ;;  %v313_v17 = vld [vmem:[%s3910_s0 + $0x988] sm:$0xff]  ;;  %v71_v21 = vld [vmem:[%s3910_s0 + $0x1f8] sm:$0xff] }
  0xbb   :  { %v1208_v18 = vmax.f32 %v1207_v7, %v714_v56  ;;  %v1221_v19 = vmax.f32 %v1220_v10, %v473_v62  ;;  %v1234_v20 = vmax.f32 %v1233_v12, %v232_v6  ;;  %v152_v22 = vld [vmem:[%s3910_s0 + $0x480] sm:$0xff]  ;;  %v233_v23 = vld [vmem:[%s3910_s0 + $0x708] sm:$0xff]  ;;  %v635_v25 = vld [vmem:[%s3910_s0 + $0x1398] sm:$0xff] }
  0xbc   :  { %v1215_v24 = vmax.f32 %v1214_v13, %v634_v8  ;;  %v716_v26 = vld [vmem:[%s3910_s0 + $0x1620] sm:$0xff]  ;;  %v1228_v27 = vmax.f32 %v1227_v16, %v393_v11  ;;  %v394_v28 = vld [vmem:[%s3910_s0 + $0xc10] sm:$0xff]  ;;  %v1241_v29 = vmax.f32 %v71_v21, %v152_v22  ;;  %v555_v31 = vld [vmem:[%s3910_s0 + $0x1118] sm:$0xff] }
  0xbd   :  { %1443 = vst [vmem:[%s3911_s1 + $0x1d0] sm:$0xff] %v1208_v18  ;;  %v1222_v30 = vmax.f32 %v1221_v19, %v554_v14  ;;  %v475_v32 = vld [vmem:[%s3910_s0 + $0xe98] sm:$0xff]  ;;  %v1235_v33 = vmax.f32 %v1234_v20, %v313_v17  ;;  %v314_v34 = vld [vmem:[%s3910_s0 + $0x990] sm:$0xff]  ;;  %v72_v38 = vld [vmem:[%s3910_s0 + $0x200] sm:$0xff] }
  0xbe   :  { %v1216_v35 = vmax.f32 %v1215_v24, %v715_v9  ;;  %v1229_v36 = vmax.f32 %v1228_v27, %v474_v15  ;;  %v1242_v37 = vmax.f32 %v1241_v29, %v233_v23  ;;  %v153_v39 = vld [vmem:[%s3910_s0 + $0x488] sm:$0xff]  ;;  %v234_v40 = vld [vmem:[%s3910_s0 + $0x710] sm:$0xff]  ;;  %v636_v42 = vld [vmem:[%s3910_s0 + $0x13a0] sm:$0xff] }
  0xbf   :  { %v1223_v41 = vmax.f32 %v1222_v30, %v635_v25  ;;  %v717_v43 = vld [vmem:[%s3910_s0 + $0x1628] sm:$0xff]  ;;  %v1236_v44 = vmax.f32 %v1235_v33, %v394_v28  ;;  %v395_v45 = vld [vmem:[%s3910_s0 + $0xc18] sm:$0xff]  ;;  %v1249_v46 = vmax.f32 %v72_v38, %v153_v39  ;;  %v556_v48 = vld [vmem:[%s3910_s0 + $0x1120] sm:$0xff] }
  0xc0   :  { %1444 = vst [vmem:[%s3911_s1 + $0x1d8] sm:$0xff] %v1216_v35  ;;  %v1230_v47 = vmax.f32 %v1229_v36, %v555_v31  ;;  %v476_v49 = vld [vmem:[%s3910_s0 + $0xea0] sm:$0xff]  ;;  %v1243_v50 = vmax.f32 %v1242_v37, %v314_v34  ;;  %v315_v51 = vld [vmem:[%s3910_s0 + $0x998] sm:$0xff]  ;;  %v73_v55 = vld [vmem:[%s3910_s0 + $0x208] sm:$0xff] }
  0xc1   :  { %v1224_v52 = vmax.f32 %v1223_v41, %v716_v26  ;;  %v1237_v53 = vmax.f32 %v1236_v44, %v475_v32  ;;  %v1250_v54 = vmax.f32 %v1249_v46, %v234_v40  ;;  %v154_v56 = vld [vmem:[%s3910_s0 + $0x490] sm:$0xff]  ;;  %v235_v57 = vld [vmem:[%s3910_s0 + $0x718] sm:$0xff]  ;;  %v637_v59 = vld [vmem:[%s3910_s0 + $0x13a8] sm:$0xff] }
  0xc2   :  { %v1231_v58 = vmax.f32 %v1230_v47, %v636_v42  ;;  %v718_v60 = vld [vmem:[%s3910_s0 + $0x1630] sm:$0xff]  ;;  %v1244_v61 = vmax.f32 %v1243_v50, %v395_v45  ;;  %v396_v62 = vld [vmem:[%s3910_s0 + $0xc20] sm:$0xff]  ;;  %v1257_v63 = vmax.f32 %v73_v55, %v154_v56  ;;  %v557_v1 = vld [vmem:[%s3910_s0 + $0x1128] sm:$0xff] }
  0xc3   :  { %1445 = vst [vmem:[%s3911_s1 + $0x1e0] sm:$0xff] %v1224_v52  ;;  %v1238_v0 = vmax.f32 %v1237_v53, %v556_v48  ;;  %v477_v2 = vld [vmem:[%s3910_s0 + $0xea8] sm:$0xff]  ;;  %v1251_v3 = vmax.f32 %v1250_v54, %v315_v51  ;;  %v316_v4 = vld [vmem:[%s3910_s0 + $0x9a0] sm:$0xff]  ;;  %v74_v8 = vld [vmem:[%s3910_s0 + $0x210] sm:$0xff] }
  0xc4   :  { %v1232_v5 = vmax.f32 %v1231_v58, %v717_v43  ;;  %v1245_v6 = vmax.f32 %v1244_v61, %v476_v49  ;;  %v1258_v7 = vmax.f32 %v1257_v63, %v235_v57  ;;  %v155_v9 = vld [vmem:[%s3910_s0 + $0x498] sm:$0xff]  ;;  %v236_v10 = vld [vmem:[%s3910_s0 + $0x720] sm:$0xff]  ;;  %v638_v12 = vld [vmem:[%s3910_s0 + $0x13b0] sm:$0xff] }
  0xc5   :  { %v1239_v11 = vmax.f32 %v1238_v0, %v637_v59  ;;  %v719_v13 = vld [vmem:[%s3910_s0 + $0x1638] sm:$0xff]  ;;  %v1252_v14 = vmax.f32 %v1251_v3, %v396_v62  ;;  %v397_v15 = vld [vmem:[%s3910_s0 + $0xc28] sm:$0xff]  ;;  %v1265_v16 = vmax.f32 %v74_v8, %v155_v9  ;;  %v558_v18 = vld [vmem:[%s3910_s0 + $0x1130] sm:$0xff] }
  0xc6   :  { %1446 = vst [vmem:[%s3911_s1 + $0x1e8] sm:$0xff] %v1232_v5  ;;  %v1246_v17 = vmax.f32 %v1245_v6, %v557_v1  ;;  %v478_v19 = vld [vmem:[%s3910_s0 + $0xeb0] sm:$0xff]  ;;  %v1259_v20 = vmax.f32 %v1258_v7, %v316_v4  ;;  %v317_v21 = vld [vmem:[%s3910_s0 + $0x9a8] sm:$0xff]  ;;  %v75_v25 = vld [vmem:[%s3910_s0 + $0x218] sm:$0xff] }
  0xc7   :  { %v1240_v22 = vmax.f32 %v1239_v11, %v718_v60  ;;  %v1253_v23 = vmax.f32 %v1252_v14, %v477_v2  ;;  %v1266_v24 = vmax.f32 %v1265_v16, %v236_v10  ;;  %v156_v26 = vld [vmem:[%s3910_s0 + $0x4a0] sm:$0xff]  ;;  %v237_v27 = vld [vmem:[%s3910_s0 + $0x728] sm:$0xff]  ;;  %v639_v29 = vld [vmem:[%s3910_s0 + $0x13b8] sm:$0xff] }
  0xc8   :  { %v1247_v28 = vmax.f32 %v1246_v17, %v638_v12  ;;  %v720_v30 = vld [vmem:[%s3910_s0 + $0x1640] sm:$0xff]  ;;  %v1260_v31 = vmax.f32 %v1259_v20, %v397_v15  ;;  %v398_v32 = vld [vmem:[%s3910_s0 + $0xc30] sm:$0xff]  ;;  %v1273_v33 = vmax.f32 %v75_v25, %v156_v26  ;;  %v559_v35 = vld [vmem:[%s3910_s0 + $0x1138] sm:$0xff] }
  0xc9   :  { %1447 = vst [vmem:[%s3911_s1 + $0x1f0] sm:$0xff] %v1240_v22  ;;  %v1254_v34 = vmax.f32 %v1253_v23, %v558_v18  ;;  %v479_v36 = vld [vmem:[%s3910_s0 + $0xeb8] sm:$0xff]  ;;  %v1267_v37 = vmax.f32 %v1266_v24, %v317_v21  ;;  %v318_v38 = vld [vmem:[%s3910_s0 + $0x9b0] sm:$0xff]  ;;  %v76_v42 = vld [vmem:[%s3910_s0 + $0x220] sm:$0xff] }
  0xca   :  { %v1248_v39 = vmax.f32 %v1247_v28, %v719_v13  ;;  %v1261_v40 = vmax.f32 %v1260_v31, %v478_v19  ;;  %v1274_v41 = vmax.f32 %v1273_v33, %v237_v27  ;;  %v157_v43 = vld [vmem:[%s3910_s0 + $0x4a8] sm:$0xff]  ;;  %v238_v44 = vld [vmem:[%s3910_s0 + $0x730] sm:$0xff]  ;;  %v640_v46 = vld [vmem:[%s3910_s0 + $0x13c0] sm:$0xff] }
  0xcb   :  { %v1255_v45 = vmax.f32 %v1254_v34, %v639_v29  ;;  %v721_v47 = vld [vmem:[%s3910_s0 + $0x1648] sm:$0xff]  ;;  %v1268_v48 = vmax.f32 %v1267_v37, %v398_v32  ;;  %v399_v49 = vld [vmem:[%s3910_s0 + $0xc38] sm:$0xff]  ;;  %v1281_v50 = vmax.f32 %v76_v42, %v157_v43  ;;  %v560_v52 = vld [vmem:[%s3910_s0 + $0x1140] sm:$0xff] }
  0xcc   :  { %1448 = vst [vmem:[%s3911_s1 + $0x1f8] sm:$0xff] %v1248_v39  ;;  %v1262_v51 = vmax.f32 %v1261_v40, %v559_v35  ;;  %v480_v53 = vld [vmem:[%s3910_s0 + $0xec0] sm:$0xff]  ;;  %v1275_v54 = vmax.f32 %v1274_v41, %v318_v38  ;;  %v319_v55 = vld [vmem:[%s3910_s0 + $0x9b8] sm:$0xff]  ;;  %v77_v59 = vld [vmem:[%s3910_s0 + $0x228] sm:$0xff] }
  0xcd   :  { %v1256_v56 = vmax.f32 %v1255_v45, %v720_v30  ;;  %v1269_v57 = vmax.f32 %v1268_v48, %v479_v36  ;;  %v1282_v58 = vmax.f32 %v1281_v50, %v238_v44  ;;  %v158_v60 = vld [vmem:[%s3910_s0 + $0x4b0] sm:$0xff]  ;;  %v239_v61 = vld [vmem:[%s3910_s0 + $0x738] sm:$0xff]  ;;  %v641_v63 = vld [vmem:[%s3910_s0 + $0x13c8] sm:$0xff] }
  0xce   :  { %v1263_v62 = vmax.f32 %v1262_v51, %v640_v46  ;;  %v722_v0 = vld [vmem:[%s3910_s0 + $0x1650] sm:$0xff]  ;;  %v1276_v1 = vmax.f32 %v1275_v54, %v399_v49  ;;  %v400_v2 = vld [vmem:[%s3910_s0 + $0xc40] sm:$0xff]  ;;  %v1289_v3 = vmax.f32 %v77_v59, %v158_v60  ;;  %v561_v5 = vld [vmem:[%s3910_s0 + $0x1148] sm:$0xff] }
  0xcf   :  { %1449 = vst [vmem:[%s3911_s1 + $0x200] sm:$0xff] %v1256_v56  ;;  %v1270_v4 = vmax.f32 %v1269_v57, %v560_v52  ;;  %v481_v6 = vld [vmem:[%s3910_s0 + $0xec8] sm:$0xff]  ;;  %v1283_v7 = vmax.f32 %v1282_v58, %v319_v55  ;;  %v320_v8 = vld [vmem:[%s3910_s0 + $0x9c0] sm:$0xff]  ;;  %v78_v12 = vld [vmem:[%s3910_s0 + $0x230] sm:$0xff] }
  0xd0   :  { %v1264_v9 = vmax.f32 %v1263_v62, %v721_v47  ;;  %v1277_v10 = vmax.f32 %v1276_v1, %v480_v53  ;;  %v1290_v11 = vmax.f32 %v1289_v3, %v239_v61  ;;  %v159_v13 = vld [vmem:[%s3910_s0 + $0x4b8] sm:$0xff]  ;;  %v240_v14 = vld [vmem:[%s3910_s0 + $0x740] sm:$0xff]  ;;  %v642_v16 = vld [vmem:[%s3910_s0 + $0x13d0] sm:$0xff] }
  0xd1   :  { %v1271_v15 = vmax.f32 %v1270_v4, %v641_v63  ;;  %v723_v17 = vld [vmem:[%s3910_s0 + $0x1658] sm:$0xff]  ;;  %v1284_v18 = vmax.f32 %v1283_v7, %v400_v2  ;;  %v401_v19 = vld [vmem:[%s3910_s0 + $0xc48] sm:$0xff]  ;;  %v1297_v20 = vmax.f32 %v78_v12, %v159_v13  ;;  %v562_v22 = vld [vmem:[%s3910_s0 + $0x1150] sm:$0xff] }
  0xd2   :  { %1450 = vst [vmem:[%s3911_s1 + $0x208] sm:$0xff] %v1264_v9  ;;  %v1278_v21 = vmax.f32 %v1277_v10, %v561_v5  ;;  %v482_v23 = vld [vmem:[%s3910_s0 + $0xed0] sm:$0xff]  ;;  %v1291_v24 = vmax.f32 %v1290_v11, %v320_v8  ;;  %v321_v25 = vld [vmem:[%s3910_s0 + $0x9c8] sm:$0xff]  ;;  %v79_v29 = vld [vmem:[%s3910_s0 + $0x238] sm:$0xff] }
  0xd3   :  { %v1272_v26 = vmax.f32 %v1271_v15, %v722_v0  ;;  %v1285_v27 = vmax.f32 %v1284_v18, %v481_v6  ;;  %v1298_v28 = vmax.f32 %v1297_v20, %v240_v14  ;;  %v160_v30 = vld [vmem:[%s3910_s0 + $0x4c0] sm:$0xff]  ;;  %v241_v31 = vld [vmem:[%s3910_s0 + $0x748] sm:$0xff]  ;;  %v643_v33 = vld [vmem:[%s3910_s0 + $0x13d8] sm:$0xff] }
  0xd4   :  { %v1279_v32 = vmax.f32 %v1278_v21, %v642_v16  ;;  %v724_v34 = vld [vmem:[%s3910_s0 + $0x1660] sm:$0xff]  ;;  %v1292_v35 = vmax.f32 %v1291_v24, %v401_v19  ;;  %v402_v36 = vld [vmem:[%s3910_s0 + $0xc50] sm:$0xff]  ;;  %v1305_v37 = vmax.f32 %v79_v29, %v160_v30  ;;  %v563_v39 = vld [vmem:[%s3910_s0 + $0x1158] sm:$0xff] }
  0xd5   :  { %1451 = vst [vmem:[%s3911_s1 + $0x210] sm:$0xff] %v1272_v26  ;;  %v1286_v38 = vmax.f32 %v1285_v27, %v562_v22  ;;  %v483_v40 = vld [vmem:[%s3910_s0 + $0xed8] sm:$0xff]  ;;  %v1299_v41 = vmax.f32 %v1298_v28, %v321_v25  ;;  %v322_v42 = vld [vmem:[%s3910_s0 + $0x9d0] sm:$0xff]  ;;  %v80_v46 = vld [vmem:[%s3910_s0 + $0x240] sm:$0xff] }
  0xd6   :  { %v1280_v43 = vmax.f32 %v1279_v32, %v723_v17  ;;  %v1293_v44 = vmax.f32 %v1292_v35, %v482_v23  ;;  %v1306_v45 = vmax.f32 %v1305_v37, %v241_v31  ;;  %v161_v47 = vld [vmem:[%s3910_s0 + $0x4c8] sm:$0xff]  ;;  %v242_v48 = vld [vmem:[%s3910_s0 + $0x750] sm:$0xff]  ;;  %v644_v50 = vld [vmem:[%s3910_s0 + $0x13e0] sm:$0xff] }
  0xd7   :  { %v1287_v49 = vmax.f32 %v1286_v38, %v643_v33  ;;  %v725_v51 = vld [vmem:[%s3910_s0 + $0x1668] sm:$0xff]  ;;  %v1300_v52 = vmax.f32 %v1299_v41, %v402_v36  ;;  %v403_v53 = vld [vmem:[%s3910_s0 + $0xc58] sm:$0xff]  ;;  %v1313_v54 = vmax.f32 %v80_v46, %v161_v47  ;;  %v564_v56 = vld [vmem:[%s3910_s0 + $0x1160] sm:$0xff] }
  0xd8   :  { %1452 = vst [vmem:[%s3911_s1 + $0x218] sm:$0xff] %v1280_v43  ;;  %v1294_v55 = vmax.f32 %v1293_v44, %v563_v39  ;;  %v484_v57 = vld [vmem:[%s3910_s0 + $0xee0] sm:$0xff]  ;;  %v1307_v58 = vmax.f32 %v1306_v45, %v322_v42  ;;  %v323_v59 = vld [vmem:[%s3910_s0 + $0x9d8] sm:$0xff]  ;;  %v81_v63 = vld [vmem:[%s3910_s0 + $0x248] sm:$0xff] }
  0xd9   :  { %v1288_v60 = vmax.f32 %v1287_v49, %v724_v34  ;;  %v1301_v61 = vmax.f32 %v1300_v52, %v483_v40  ;;  %v1314_v62 = vmax.f32 %v1313_v54, %v242_v48  ;;  %v162_v0 = vld [vmem:[%s3910_s0 + $0x4d0] sm:$0xff]  ;;  %v243_v1 = vld [vmem:[%s3910_s0 + $0x758] sm:$0xff]  ;;  %v645_v3 = vld [vmem:[%s3910_s0 + $0x13e8] sm:$0xff] }
  0xda   :  { %v1295_v2 = vmax.f32 %v1294_v55, %v644_v50  ;;  %v726_v4 = vld [vmem:[%s3910_s0 + $0x1670] sm:$0xff]  ;;  %v1308_v5 = vmax.f32 %v1307_v58, %v403_v53  ;;  %v404_v6 = vld [vmem:[%s3910_s0 + $0xc60] sm:$0xff]  ;;  %v1321_v7 = vmax.f32 %v81_v63, %v162_v0  ;;  %v565_v9 = vld [vmem:[%s3910_s0 + $0x1168] sm:$0xff] }
  0xdb   :  { %1453 = vst [vmem:[%s3911_s1 + $0x220] sm:$0xff] %v1288_v60  ;;  %v1302_v8 = vmax.f32 %v1301_v61, %v564_v56  ;;  %v485_v10 = vld [vmem:[%s3910_s0 + $0xee8] sm:$0xff]  ;;  %v1315_v11 = vmax.f32 %v1314_v62, %v323_v59  ;;  %v324_v12 = vld [vmem:[%s3910_s0 + $0x9e0] sm:$0xff]  ;;  %v82_v16 = vld [vmem:[%s3910_s0 + $0x250] sm:$0xff] }
  0xdc   :  { %v1296_v13 = vmax.f32 %v1295_v2, %v725_v51  ;;  %v1309_v14 = vmax.f32 %v1308_v5, %v484_v57  ;;  %v1322_v15 = vmax.f32 %v1321_v7, %v243_v1  ;;  %v163_v17 = vld [vmem:[%s3910_s0 + $0x4d8] sm:$0xff]  ;;  %v244_v18 = vld [vmem:[%s3910_s0 + $0x760] sm:$0xff]  ;;  %v646_v20 = vld [vmem:[%s3910_s0 + $0x13f0] sm:$0xff] }
  0xdd   :  { %v1303_v19 = vmax.f32 %v1302_v8, %v645_v3  ;;  %v727_v21 = vld [vmem:[%s3910_s0 + $0x1678] sm:$0xff]  ;;  %v1316_v22 = vmax.f32 %v1315_v11, %v404_v6  ;;  %v405_v23 = vld [vmem:[%s3910_s0 + $0xc68] sm:$0xff]  ;;  %v1329_v24 = vmax.f32 %v82_v16, %v163_v17  ;;  %v566_v26 = vld [vmem:[%s3910_s0 + $0x1170] sm:$0xff] }
  0xde   :  { %1454 = vst [vmem:[%s3911_s1 + $0x228] sm:$0xff] %v1296_v13  ;;  %v1310_v25 = vmax.f32 %v1309_v14, %v565_v9  ;;  %v486_v27 = vld [vmem:[%s3910_s0 + $0xef0] sm:$0xff]  ;;  %v1323_v28 = vmax.f32 %v1322_v15, %v324_v12  ;;  %v325_v29 = vld [vmem:[%s3910_s0 + $0x9e8] sm:$0xff]  ;;  %v83_v33 = vld [vmem:[%s3910_s0 + $0x258] sm:$0xff] }
  0xdf   :  { %v1304_v30 = vmax.f32 %v1303_v19, %v726_v4  ;;  %v1317_v31 = vmax.f32 %v1316_v22, %v485_v10  ;;  %v1330_v32 = vmax.f32 %v1329_v24, %v244_v18  ;;  %v164_v34 = vld [vmem:[%s3910_s0 + $0x4e0] sm:$0xff]  ;;  %v245_v35 = vld [vmem:[%s3910_s0 + $0x768] sm:$0xff]  ;;  %v647_v37 = vld [vmem:[%s3910_s0 + $0x13f8] sm:$0xff] }
  0xe0   :  { %v1311_v36 = vmax.f32 %v1310_v25, %v646_v20  ;;  %v728_v38 = vld [vmem:[%s3910_s0 + $0x1680] sm:$0xff]  ;;  %v1324_v39 = vmax.f32 %v1323_v28, %v405_v23  ;;  %v406_v40 = vld [vmem:[%s3910_s0 + $0xc70] sm:$0xff]  ;;  %v1337_v41 = vmax.f32 %v83_v33, %v164_v34  ;;  %v567_v43 = vld [vmem:[%s3910_s0 + $0x1178] sm:$0xff] }
  0xe1   :  { %1455 = vst [vmem:[%s3911_s1 + $0x230] sm:$0xff] %v1304_v30  ;;  %v1318_v42 = vmax.f32 %v1317_v31, %v566_v26  ;;  %v487_v44 = vld [vmem:[%s3910_s0 + $0xef8] sm:$0xff]  ;;  %v1331_v45 = vmax.f32 %v1330_v32, %v325_v29  ;;  %v326_v46 = vld [vmem:[%s3910_s0 + $0x9f0] sm:$0xff]  ;;  %v84_v50 = vld [vmem:[%s3910_s0 + $0x260] sm:$0xff] }
  0xe2   :  { %v1312_v47 = vmax.f32 %v1311_v36, %v727_v21  ;;  %v1325_v48 = vmax.f32 %v1324_v39, %v486_v27  ;;  %v1338_v49 = vmax.f32 %v1337_v41, %v245_v35  ;;  %v165_v51 = vld [vmem:[%s3910_s0 + $0x4e8] sm:$0xff]  ;;  %v246_v52 = vld [vmem:[%s3910_s0 + $0x770] sm:$0xff]  ;;  %v648_v54 = vld [vmem:[%s3910_s0 + $0x1400] sm:$0xff] }
  0xe3   :  { %v1319_v53 = vmax.f32 %v1318_v42, %v647_v37  ;;  %v729_v55 = vld [vmem:[%s3910_s0 + $0x1688] sm:$0xff]  ;;  %v1332_v56 = vmax.f32 %v1331_v45, %v406_v40  ;;  %v407_v57 = vld [vmem:[%s3910_s0 + $0xc78] sm:$0xff]  ;;  %v1345_v58 = vmax.f32 %v84_v50, %v165_v51  ;;  %v568_v60 = vld [vmem:[%s3910_s0 + $0x1180] sm:$0xff] }
  0xe4   :  { %1456 = vst [vmem:[%s3911_s1 + $0x238] sm:$0xff] %v1312_v47  ;;  %v1326_v59 = vmax.f32 %v1325_v48, %v567_v43  ;;  %v488_v61 = vld [vmem:[%s3910_s0 + $0xf00] sm:$0xff]  ;;  %v1339_v62 = vmax.f32 %v1338_v49, %v326_v46  ;;  %v327_v63 = vld [vmem:[%s3910_s0 + $0x9f8] sm:$0xff]  ;;  %v85_v3 = vld [vmem:[%s3910_s0 + $0x268] sm:$0xff] }
  0xe5   :  { %v1320_v0 = vmax.f32 %v1319_v53, %v728_v38  ;;  %v1333_v1 = vmax.f32 %v1332_v56, %v487_v44  ;;  %v1346_v2 = vmax.f32 %v1345_v58, %v246_v52  ;;  %v166_v4 = vld [vmem:[%s3910_s0 + $0x4f0] sm:$0xff]  ;;  %v247_v5 = vld [vmem:[%s3910_s0 + $0x778] sm:$0xff]  ;;  %v649_v7 = vld [vmem:[%s3910_s0 + $0x1408] sm:$0xff] }
  0xe6   :  { %v1327_v6 = vmax.f32 %v1326_v59, %v648_v54  ;;  %v730_v8 = vld [vmem:[%s3910_s0 + $0x1690] sm:$0xff]  ;;  %v1340_v9 = vmax.f32 %v1339_v62, %v407_v57  ;;  %v408_v10 = vld [vmem:[%s3910_s0 + $0xc80] sm:$0xff]  ;;  %v1353_v11 = vmax.f32 %v85_v3, %v166_v4  ;;  %v569_v13 = vld [vmem:[%s3910_s0 + $0x1188] sm:$0xff] }
  0xe7   :  { %1457 = vst [vmem:[%s3911_s1 + $0x240] sm:$0xff] %v1320_v0  ;;  %v1334_v12 = vmax.f32 %v1333_v1, %v568_v60  ;;  %v489_v14 = vld [vmem:[%s3910_s0 + $0xf08] sm:$0xff]  ;;  %v1347_v15 = vmax.f32 %v1346_v2, %v327_v63  ;;  %v328_v16 = vld [vmem:[%s3910_s0 + $0xa00] sm:$0xff]  ;;  %v86_v20 = vld [vmem:[%s3910_s0 + $0x270] sm:$0xff] }
  0xe8   :  { %v1328_v17 = vmax.f32 %v1327_v6, %v729_v55  ;;  %v1341_v18 = vmax.f32 %v1340_v9, %v488_v61  ;;  %v1354_v19 = vmax.f32 %v1353_v11, %v247_v5  ;;  %v167_v21 = vld [vmem:[%s3910_s0 + $0x4f8] sm:$0xff]  ;;  %v248_v22 = vld [vmem:[%s3910_s0 + $0x780] sm:$0xff]  ;;  %v650_v24 = vld [vmem:[%s3910_s0 + $0x1410] sm:$0xff] }
  0xe9   :  { %v1335_v23 = vmax.f32 %v1334_v12, %v649_v7  ;;  %v731_v25 = vld [vmem:[%s3910_s0 + $0x1698] sm:$0xff]  ;;  %v1348_v26 = vmax.f32 %v1347_v15, %v408_v10  ;;  %v409_v27 = vld [vmem:[%s3910_s0 + $0xc88] sm:$0xff]  ;;  %v1361_v28 = vmax.f32 %v86_v20, %v167_v21  ;;  %v570_v30 = vld [vmem:[%s3910_s0 + $0x1190] sm:$0xff] }
  0xea   :  { %1458 = vst [vmem:[%s3911_s1 + $0x248] sm:$0xff] %v1328_v17  ;;  %v1342_v29 = vmax.f32 %v1341_v18, %v569_v13  ;;  %v490_v31 = vld [vmem:[%s3910_s0 + $0xf10] sm:$0xff]  ;;  %v1355_v32 = vmax.f32 %v1354_v19, %v328_v16  ;;  %v329_v33 = vld [vmem:[%s3910_s0 + $0xa08] sm:$0xff]  ;;  %v87_v37 = vld [vmem:[%s3910_s0 + $0x278] sm:$0xff] }
  0xeb   :  { %v1336_v34 = vmax.f32 %v1335_v23, %v730_v8  ;;  %v1349_v35 = vmax.f32 %v1348_v26, %v489_v14  ;;  %v1362_v36 = vmax.f32 %v1361_v28, %v248_v22  ;;  %v168_v38 = vld [vmem:[%s3910_s0 + $0x500] sm:$0xff]  ;;  %v249_v39 = vld [vmem:[%s3910_s0 + $0x788] sm:$0xff]  ;;  %v651_v41 = vld [vmem:[%s3910_s0 + $0x1418] sm:$0xff] }
  0xec   :  { %v1343_v40 = vmax.f32 %v1342_v29, %v650_v24  ;;  %v732_v42 = vld [vmem:[%s3910_s0 + $0x16a0] sm:$0xff]  ;;  %v1356_v43 = vmax.f32 %v1355_v32, %v409_v27  ;;  %v410_v44 = vld [vmem:[%s3910_s0 + $0xc90] sm:$0xff]  ;;  %v1369_v45 = vmax.f32 %v87_v37, %v168_v38  ;;  %v571_v47 = vld [vmem:[%s3910_s0 + $0x1198] sm:$0xff] }
  0xed   :  { %1459 = vst [vmem:[%s3911_s1 + $0x250] sm:$0xff] %v1336_v34  ;;  %v1350_v46 = vmax.f32 %v1349_v35, %v570_v30  ;;  %v491_v48 = vld [vmem:[%s3910_s0 + $0xf18] sm:$0xff]  ;;  %v1363_v49 = vmax.f32 %v1362_v36, %v329_v33  ;;  %v330_v50 = vld [vmem:[%s3910_s0 + $0xa10] sm:$0xff]  ;;  %v88_v54 = vld [vmem:[%s3910_s0 + $0x280] sm:$0xff] }
  0xee   :  { %v1344_v51 = vmax.f32 %v1343_v40, %v731_v25  ;;  %v1357_v52 = vmax.f32 %v1356_v43, %v490_v31  ;;  %v1370_v53 = vmax.f32 %v1369_v45, %v249_v39  ;;  %v169_v55 = vld [vmem:[%s3910_s0 + $0x508] sm:$0xff]  ;;  %v250_v56 = vld [vmem:[%s3910_s0 + $0x790] sm:$0xff]  ;;  %v652_v58 = vld [vmem:[%s3910_s0 + $0x1420] sm:$0xff] }
  0xef   :  { %v1351_v57 = vmax.f32 %v1350_v46, %v651_v41  ;;  %v1364_v59 = vmax.f32 %v1363_v49, %v410_v44  ;;  %v411_v60 = vld [vmem:[%s3910_s0 + $0xc98] sm:$0xff]  ;;  %v1377_v61 = vmax.f32 %v88_v54, %v169_v55  ;;  %v572_v63 = vld [vmem:[%s3910_s0 + $0x11a0] sm:$0xff]  ;;  %v733_v3 = vld [vmem:[%s3910_s0 + $0x16a8] sm:$0xff] }
  0xf0   :  { %1460 = vst [vmem:[%s3911_s1 + $0x258] sm:$0xff] %v1344_v51  ;;  %v1358_v62 = vmax.f32 %v1357_v52, %v571_v47  ;;  %v1371_v0 = vmax.f32 %v1370_v53, %v330_v50  ;;  %v331_v1 = vld [vmem:[%s3910_s0 + $0xa18] sm:$0xff]  ;;  %v492_v5 = vld [vmem:[%s3910_s0 + $0xf20] sm:$0xff]  ;;  %v653_v8 = vld [vmem:[%s3910_s0 + $0x1428] sm:$0xff] }
  0xf1   :  { %v1352_v2 = vmax.f32 %v1351_v57, %v732_v42  ;;  %v1365_v4 = vmax.f32 %v1364_v59, %v491_v48  ;;  %v1378_v6 = vmax.f32 %v1377_v61, %v250_v56  ;;  %v412_v10 = vld [vmem:[%s3910_s0 + $0xca0] sm:$0xff]  ;;  %v573_v12 = vld [vmem:[%s3910_s0 + $0x11a8] sm:$0xff]  ;;  %v734_v15 = vld [vmem:[%s3910_s0 + $0x16b0] sm:$0xff] }
  0xf2   :  { %v1359_v7 = vmax.f32 %v1358_v62, %v652_v58  ;;  %v1372_v9 = vmax.f32 %v1371_v0, %v411_v60  ;;  %v493_v17 = vld [vmem:[%s3910_s0 + $0xf28] sm:$0xff]  ;;  %v654_v19 = vld [vmem:[%s3910_s0 + $0x1430] sm:$0xff]  ;;  %v735_v24 = vld [vmem:[%s3910_s0 + $0x16b8] sm:$0xff] }
  0xf3   :  { %1461 = vst [vmem:[%s3911_s1 + $0x260] sm:$0xff] %v1352_v2  ;;  %v1366_v11 = vmax.f32 %v1365_v4, %v572_v63  ;;  %v1379_v13 = vmax.f32 %v1378_v6, %v331_v1  ;;  %v574_v22 = vld [vmem:[%s3910_s0 + $0x11b0] sm:$0xff]  ;;  %v655_v27 = vld [vmem:[%s3910_s0 + $0x1438] sm:$0xff]  ;;  %v736_v30 = vld [vmem:[%s3910_s0 + $0x16c0] sm:$0xff] }
  0xf4   :  { %v1360_v14 = vmax.f32 %v1359_v7, %v733_v3  ;;  %v1373_v16 = vmax.f32 %v1372_v9, %v492_v5 }
  0xf5   :  { %v1367_v18 = vmax.f32 %v1366_v11, %v653_v8  ;;  %v1380_v20 = vmax.f32 %v1379_v13, %v412_v10 }
  0xf6   :  { %1462 = vst [vmem:[%s3911_s1 + $0x268] sm:$0xff] %v1360_v14  ;;  %v1374_v21 = vmax.f32 %v1373_v16, %v573_v12 }
  0xf7   :  { %v1368_v23 = vmax.f32 %v1367_v18, %v734_v15  ;;  %v1381_v25 = vmax.f32 %v1380_v20, %v493_v17 }
  0xf8   :  { %v1375_v26 = vmax.f32 %v1374_v21, %v654_v19 }
  0xf9   :  { %1463 = vst [vmem:[%s3911_s1 + $0x270] sm:$0xff] %v1368_v23  ;;  %v1382_v28 = vmax.f32 %v1381_v25, %v574_v22 }
  0xfa   :  { %v1376_v29 = vmax.f32 %v1375_v26, %v735_v24 }
  0xfb   :  { %v1383_v31 = vmax.f32 %v1382_v28, %v655_v27 }
  0xfc   :  { %1464 = vst [vmem:[%s3911_s1 + $0x278] sm:$0xff] %v1376_v29 }
  0xfd   :  { %v1384_v32 = vmax.f32 %v1383_v31, %v736_v30 }
  0xff   :  { %1465 = vst [vmem:[%s3911_s1 + $0x280] sm:$0xff] %v1384_v32 }

// kernel: stem.11
= control target key start
LH: loop header
LB: loop body
LE: loop exit
PB: predicated region body
PF: predicated region fallthrough
CT: control target
= control target key end

     0   :  { %s1144_s15 = smov 0   ;;  %s1146_s16 = smov 0   ;;  %s1331_s0 = inlined_call_operand.vmem [shape: bf16[768,128], index: 0, kind: input, shape index: {}]   ;;  %s1332_s1 = inlined_call_operand.vmem [shape: bf16[128,128], index: 1, kind: input, shape index: {}]   ;;  %s1333_s2 = inlined_call_operand.vmem [shape: f32[1,128], index: 2, kind: input, shape index: {}]   ;;  %s1334_s3 = inlined_call_operand.vmem [shape: f32[1,128], index: 3, kind: input, shape index: {}]   ;;  %s1335_s4 = inlined_call_operand.vmem [shape: f32[768,128], index: 4, kind: output, shape index: {}]  }
   0x1   :  { %s1148_s17 = smov 0  }
   0x2 LB: > { %s33_s18 = sadd.s32 1, %s1113_s16  ;;  %p926_p0 = scmp.ge.s32.totalorder %s1117_s17, 1  ;;  %s1117_s17 = sphi %s1148_s17, %s14_s17   ;;  %s1113_s16 = sphi %s1146_s16, %s1337_s16   ;;  %s1109_s15 = sphi %s1144_s15, %s1336_s15  }
   0x3   : > { %p35_p1 = scmp.ge.s32.totalorder %s33_s18, 3  ;;  %p221_p2 = scmp.lt.s32.totalorder %s1117_s17, 4 }
   0x5   : > { %s1339_s18 = smov (%p35_p1, %s33_s18), 0  ;;  %p222_p3 = pnand %p926_p0, %p221_p2 }
   0x6   : > { %v1071_v0 = vld [vmem:[%s1332_s1] sm:$0xff] (!%p222_p3)   ;;  %s927_s21 = sshll.u32 (!%p222_p3), %s1109_s15, 5  ;;  %v1072_v1 = vld [vmem:[%s1332_s1 + $0x8] sm:$0xff] (!%p222_p3)   ;;  %v1073_v2 = vld [vmem:[%s1332_s1 + $0x10] sm:$0xff] (!%p222_p3)  }
   0x7   : > { %225 = sbr.rel (%p222_p3) target bundleno = 285 (0x11d), region = 36  ;;  %p268_p4 = scmp.lt.s32.totalorder (!%p222_p3), %s927_s21, 95  ;;  %983 = vmatprep.subr.bf16.mxu0 (!%p222_p3), %v1071_v0  ;;  %1031 = vmatprep.subr.bf16.mxu1 (!%p222_p3), %v1071_v0  ;;  %v1074_v3 = vld [vmem:[%s1332_s1 + $0x18] sm:$0xff] (!%p222_p3)   ;;  %v1075_v6 = vld [vmem:[%s1332_s1 + $0x20] sm:$0xff] (!%p222_p3)   ;;  %v1076_v7 = vld [vmem:[%s1332_s1 + $0x28] sm:$0xff] (!%p222_p3)  }
   0x8   : > { %984 = vmatpush3.bf16.msra.mxu0 (!%p222_p3), %v1071_v0  ;;  %1039 = vmatpush3.bf16.msra.mxu1 (!%p222_p3), %v1071_v0  ;;  %v1077_v8 = vld [vmem:[%s1332_s1 + $0x30] sm:$0xff] (!%p222_p3)   ;;  %v1078_v9 = vld [vmem:[%s1332_s1 + $0x38] sm:$0xff] (!%p222_p3)   ;;  %v1213_v24 = vld [vmem:[%s1333_s2] ss:$0 sm:$0xff] (!%p222_p3) }
   0x9   : > { %985 = vmatprep.subr.bf16.mxu0 (!%p222_p3), %v1072_v1  ;;  %1032 = vmatprep.subr.bf16.mxu1 (!%p222_p3), %v1072_v1  ;;  %v1218_v26 = vld [vmem:[%s1334_s3] ss:$0 sm:$0xff] (!%p222_p3) }
   0xc   : > { %986 = vmatpush3.bf16.msra.mxu0 (!%p222_p3), %v1072_v1  ;;  %1040 = vmatpush3.bf16.msra.mxu1 (!%p222_p3), %v1072_v1 }
   0xd   : > { %987 = vmatprep.subr.bf16.mxu0 (!%p222_p3), %v1073_v2  ;;  %1033 = vmatprep.subr.bf16.mxu1 (!%p222_p3), %v1073_v2 }
   0xe   : > { %s1341_s21 = smov (!%p268_p4, %s927_s21), 95 }
   0xf   : > { %s928_s26 = sshll.u32 %s1341_s21, 2  ;;  %s930_s22 = sshll.u32 %s1341_s21, 3 }
  0x10   : > { %s1177_s29 = scalar_lea.vmem %s1331_s0, %s928_s26  ;;  %988 = vmatpush3.bf16.msra.mxu0 %v1073_v2  ;;  %1041 = vmatpush3.bf16.msra.mxu1 %v1073_v2  ;;  %s1232_s24 = scalar_lea.vmem %s1335_s4, %s930_s22 }
  0x11   : > { %v1079_v4 = vld [vmem:[%s1177_s29] sm:$0xff]   ;;  %989 = vmatprep.subr.bf16.mxu0 %v1074_v3  ;;  %1034 = vmatprep.subr.bf16.mxu1 %v1074_v3  ;;  %v1081_v10 = vld [vmem:[%s1177_s29 + $0x8] sm:$0xff]   ;;  %v1083_v12 = vld [vmem:[%s1177_s29 + $0x10] sm:$0xff]  }
  0x12   : > { %v1080_v5 = vld [vmem:[%s1177_s29 + $0x40] sm:$0xff]   ;;  %999 = vmatprep.mubr.bf16.mxu0 %v1079_v4  ;;  %v1082_v11 = vld [vmem:[%s1177_s29 + $0x48] sm:$0xff]   ;;  %v1084_v13 = vld [vmem:[%s1177_s29 + $0x50] sm:$0xff]  }
  0x13   : > { %1015 = vmatprep.mubr.bf16.mxu1 %v1080_v5  ;;  %v1085_v14 = vld [vmem:[%s1177_s29 + $0x18] sm:$0xff]   ;;  %v1087_v16 = vld [vmem:[%s1177_s29 + $0x20] sm:$0xff]   ;;  %v1089_v18 = vld [vmem:[%s1177_s29 + $0x28] sm:$0xff]  }
  0x14   : > { %990 = vmatpush3.bf16.msra.mxu0 %v1074_v3  ;;  %1042 = vmatpush3.bf16.msra.mxu1 %v1074_v3  ;;  %v1086_v15 = vld [vmem:[%s1177_s29 + $0x58] sm:$0xff]   ;;  %v1088_v17 = vld [vmem:[%s1177_s29 + $0x60] sm:$0xff]   ;;  %v1090_v19 = vld [vmem:[%s1177_s29 + $0x68] sm:$0xff]  }
  0x15   : > { %991 = vmatprep.subr.bf16.mxu0 %v1075_v6  ;;  %1035 = vmatprep.subr.bf16.mxu1 %v1075_v6  ;;  %v1091_v20 = vld [vmem:[%s1177_s29 + $0x30] sm:$0xff]   ;;  %v1093_v22 = vld [vmem:[%s1177_s29 + $0x38] sm:$0xff]  }
  0x16   : > { %v1092_v21 = vld [vmem:[%s1177_s29 + $0x70] sm:$0xff]   ;;  %v1094_v23 = vld [vmem:[%s1177_s29 + $0x78] sm:$0xff]  }
  0x18   : > { %992 = vmatpush3.bf16.msra.mxu0 %v1075_v6  ;;  %1043 = vmatpush3.bf16.msra.mxu1 %v1075_v6 }
  0x19   : > { %993 = vmatprep.subr.bf16.mxu0 %v1076_v7  ;;  %1036 = vmatprep.subr.bf16.mxu1 %v1076_v7 }
  0x1c   : > { %994 = vmatpush3.bf16.msra.mxu0 %v1076_v7  ;;  %1044 = vmatpush3.bf16.msra.mxu1 %v1076_v7 }
  0x1d   : > { %995 = vmatprep.subr.bf16.mxu0 %v1077_v8  ;;  %1037 = vmatprep.subr.bf16.mxu1 %v1077_v8 }
  0x20   : > { %996 = vmatpush3.bf16.msra.mxu0 %v1077_v8  ;;  %1045 = vmatpush3.bf16.msra.mxu1 %v1077_v8 }
  0x21   : > { %997 = vmatprep.subr.bf16.mxu0 %v1078_v9  ;;  %1038 = vmatprep.subr.bf16.mxu1 %v1078_v9 }
  0x24   : > { %998 = vmatpush3.bf16.msra.mxu0 %v1078_v9  ;;  %1046 = vmatpush3.bf16.msra.mxu1 %v1078_v9 }
  0x27   : > { %1000 = vmatmul.mubr.bf16.vlgmr.msra.gmra.mrb[0].mxu0 %v1081_v10  ;;  %1016 = vmatmul.mubr.bf16.vlgmr.msra.gmra.mrb[0].mxu1 %v1082_v11 }
  0x28   : > { %1003 = vmatprep.mubr.bf16.mxu0 %v1083_v12  ;;  %1019 = vmatprep.mubr.bf16.mxu1 %v1084_v13 }
  0x2f   : > { %1004 = vmatmul.mubr.bf16.gmra.mrb[4].mxu0 %v1085_v14  ;;  %1020 = vmatmul.mubr.bf16.gmra.mrb[4].mxu1 %v1086_v15 }
  0x30   : > { %1007 = vmatprep.mubr.bf16.mxu0 %v1087_v16  ;;  %1023 = vmatprep.mubr.bf16.mxu1 %v1088_v17 }
  0x37   : > { %1008 = vmatmul.mubr.bf16.gmra.mrb[8].mxu0 %v1089_v18  ;;  %1024 = vmatmul.mubr.bf16.gmra.mrb[8].mxu1 %v1090_v19 }
  0x38   : > { %1011 = vmatprep.mubr.bf16.mxu0 %v1091_v20  ;;  %1027 = vmatprep.mubr.bf16.mxu1 %v1092_v21 }
  0x3f   : > { %1012 = vmatmul.mubr.bf16.gmra.mrb[12].mxu0 %v1093_v22  ;;  %1028 = vmatmul.mubr.bf16.gmra.mrb[12].mxu1 %v1094_v23 }
  0xfa   : > { %v1001_v25 = vpop.f32.mrb[0].mxu0  ;;  %v1017_v27 = vpop.f32.mrb[0].mxu1 }
  0xfb   : > { %v663_v28 = vmul.f32 %v1001_v25, %v1213_v24  ;;  %v679_v29 = vmul.f32 %v1017_v27, %v1213_v24  ;;  %v527_v30 = vpop.f32.mrb[1].mxu0  ;;  %v591_v31 = vpop.f32.mrb[1].mxu1 }
  0xfc   : > { %v661_v32 = vmul.f32 %v1213_v24, %v527_v30  ;;  %v677_v33 = vmul.f32 %v1213_v24, %v591_v31  ;;  %v1002_v34 = vpop.f32.mrb[2].mxu0  ;;  %v1018_v35 = vpop.f32.mrb[2].mxu1 }
  0xfd   : > { %v702_v36 = vadd.f32 %v1218_v26, %v663_v28  ;;  %v718_v37 = vadd.f32 %v1218_v26, %v679_v29  ;;  %v664_v38 = vmul.f32 %v1002_v34, %v1213_v24  ;;  %v680_v39 = vmul.f32 %v1018_v35, %v1213_v24  ;;  %v530_v40 = vpop.f32.mrb[3].mxu0  ;;  %v594_v41 = vpop.f32.mrb[3].mxu1 }
  0xfe   : > { %v700_v42 = vadd.f32 %v1218_v26, %v661_v32  ;;  %v716_v43 = vadd.f32 %v1218_v26, %v677_v33  ;;  %v662_v44 = vmul.f32 %v1213_v24, %v530_v40  ;;  %v678_v45 = vmul.f32 %v1213_v24, %v594_v41 }
  0xff   : > { %v734_v46 = vmax.f32 %v702_v36, 0.0  ;;  %v750_v47 = vmax.f32 %v718_v37, 0.0  ;;  %v703_v48 = vadd.f32 %v1218_v26, %v664_v38  ;;  %v719_v49 = vadd.f32 %v1218_v26, %v680_v39 }
 0x100   : > { %v732_v50 = vmax.f32 %v700_v42, 0.0  ;;  %v748_v51 = vmax.f32 %v716_v43, 0.0  ;;  %v701_v52 = vadd.f32 %v1218_v26, %v662_v44  ;;  %v717_v53 = vadd.f32 %v1218_v26, %v678_v45 }
 0x101   : > { %766 = vst [vmem:[%s1232_s24 + $0x10] sm:$0xff] %v734_v46  ;;  %782 = vst [vmem:[%s1232_s24 + $0x90] sm:$0xff] %v750_v47  ;;  %v735_v54 = vmax.f32 %v703_v48, 0.0  ;;  %v751_v55 = vmax.f32 %v719_v49, 0.0 }
 0x102   : > { %764 = vst [vmem:[%s1232_s24] sm:$0xff] %v732_v50  ;;  %780 = vst [vmem:[%s1232_s24 + $0x80] sm:$0xff] %v748_v51  ;;  %v733_v56 = vmax.f32 %v701_v52, 0.0  ;;  %v749_v57 = vmax.f32 %v717_v53, 0.0  ;;  %v1005_v58 = vpop.f32.mrb[4].mxu0  ;;  %v1021_v59 = vpop.f32.mrb[4].mxu1 }
 0x103   : > { %767 = vst [vmem:[%s1232_s24 + $0x18] sm:$0xff] %v735_v54  ;;  %783 = vst [vmem:[%s1232_s24 + $0x98] sm:$0xff] %v751_v55  ;;  %v667_v60 = vmul.f32 %v1005_v58, %v1213_v24  ;;  %v683_v61 = vmul.f32 %v1021_v59, %v1213_v24  ;;  %v543_v62 = vpop.f32.mrb[5].mxu0  ;;  %v607_v63 = vpop.f32.mrb[5].mxu1 }
 0x104   : > { %765 = vst [vmem:[%s1232_s24 + $0x8] sm:$0xff] %v733_v56  ;;  %781 = vst [vmem:[%s1232_s24 + $0x88] sm:$0xff] %v749_v57  ;;  %v665_v0 = vmul.f32 %v1213_v24, %v543_v62  ;;  %v681_v1 = vmul.f32 %v1213_v24, %v607_v63  ;;  %v1006_v2 = vpop.f32.mrb[6].mxu0  ;;  %v1022_v3 = vpop.f32.mrb[6].mxu1 }
 0x105   : > { %v706_v4 = vadd.f32 %v1218_v26, %v667_v60  ;;  %v722_v5 = vadd.f32 %v1218_v26, %v683_v61  ;;  %v668_v6 = vmul.f32 %v1006_v2, %v1213_v24  ;;  %v684_v7 = vmul.f32 %v1022_v3, %v1213_v24  ;;  %v546_v8 = vpop.f32.mrb[7].mxu0  ;;  %v610_v9 = vpop.f32.mrb[7].mxu1 }
 0x106   : > { %v704_v10 = vadd.f32 %v1218_v26, %v665_v0  ;;  %v720_v11 = vadd.f32 %v1218_v26, %v681_v1  ;;  %v666_v12 = vmul.f32 %v1213_v24, %v546_v8  ;;  %v682_v13 = vmul.f32 %v1213_v24, %v610_v9 }
 0x107   : > { %v738_v14 = vmax.f32 %v706_v4, 0.0  ;;  %v754_v15 = vmax.f32 %v722_v5, 0.0  ;;  %v707_v16 = vadd.f32 %v1218_v26, %v668_v6  ;;  %v723_v17 = vadd.f32 %v1218_v26, %v684_v7 }
 0x108   : > { %v736_v18 = vmax.f32 %v704_v10, 0.0  ;;  %v752_v19 = vmax.f32 %v720_v11, 0.0  ;;  %v705_v20 = vadd.f32 %v1218_v26, %v666_v12  ;;  %v721_v21 = vadd.f32 %v1218_v26, %v682_v13 }
 0x109   : > { %770 = vst [vmem:[%s1232_s24 + $0x30] sm:$0xff] %v738_v14  ;;  %786 = vst [vmem:[%s1232_s24 + $0xb0] sm:$0xff] %v754_v15  ;;  %v739_v22 = vmax.f32 %v707_v16, 0.0  ;;  %v755_v23 = vmax.f32 %v723_v17, 0.0 }
 0x10a   : > { %768 = vst [vmem:[%s1232_s24 + $0x20] sm:$0xff] %v736_v18  ;;  %784 = vst [vmem:[%s1232_s24 + $0xa0] sm:$0xff] %v752_v19  ;;  %v737_v25 = vmax.f32 %v705_v20, 0.0  ;;  %v753_v27 = vmax.f32 %v721_v21, 0.0  ;;  %v1009_v28 = vpop.f32.mrb[8].mxu0  ;;  %v1025_v29 = vpop.f32.mrb[8].mxu1 }
 0x10b   : > { %771 = vst [vmem:[%s1232_s24 + $0x38] sm:$0xff] %v739_v22  ;;  %787 = vst [vmem:[%s1232_s24 + $0xb8] sm:$0xff] %v755_v23  ;;  %v671_v30 = vmul.f32 %v1009_v28, %v1213_v24  ;;  %v687_v31 = vmul.f32 %v1025_v29, %v1213_v24  ;;  %v559_v32 = vpop.f32.mrb[9].mxu0  ;;  %v623_v33 = vpop.f32.mrb[9].mxu1 }
 0x10c   : > { %769 = vst [vmem:[%s1232_s24 + $0x28] sm:$0xff] %v737_v25  ;;  %785 = vst [vmem:[%s1232_s24 + $0xa8] sm:$0xff] %v753_v27  ;;  %v669_v34 = vmul.f32 %v1213_v24, %v559_v32  ;;  %v685_v35 = vmul.f32 %v1213_v24, %v623_v33  ;;  %v1010_v36 = vpop.f32.mrb[10].mxu0  ;;  %v1026_v37 = vpop.f32.mrb[10].mxu1 }
 0x10d   : > { %v710_v38 = vadd.f32 %v1218_v26, %v671_v30  ;;  %v726_v39 = vadd.f32 %v1218_v26, %v687_v31  ;;  %v672_v40 = vmul.f32 %v1010_v36, %v1213_v24  ;;  %v688_v41 = vmul.f32 %v1026_v37, %v1213_v24  ;;  %v562_v42 = vpop.f32.mrb[11].mxu0  ;;  %v626_v43 = vpop.f32.mrb[11].mxu1 }
 0x10e   : > { %v708_v44 = vadd.f32 %v1218_v26, %v669_v34  ;;  %v724_v45 = vadd.f32 %v1218_v26, %v685_v35  ;;  %v670_v46 = vmul.f32 %v1213_v24, %v562_v42  ;;  %v686_v47 = vmul.f32 %v1213_v24, %v626_v43 }
 0x10f   : > { %v742_v48 = vmax.f32 %v710_v38, 0.0  ;;  %v758_v49 = vmax.f32 %v726_v39, 0.0  ;;  %v711_v50 = vadd.f32 %v1218_v26, %v672_v40  ;;  %v727_v51 = vadd.f32 %v1218_v26, %v688_v41 }
 0x110   : > { %v740_v52 = vmax.f32 %v708_v44, 0.0  ;;  %v756_v53 = vmax.f32 %v724_v45, 0.0  ;;  %v709_v54 = vadd.f32 %v1218_v26, %v670_v46  ;;  %v725_v55 = vadd.f32 %v1218_v26, %v686_v47 }
 0x111   : > { %774 = vst [vmem:[%s1232_s24 + $0x50] sm:$0xff] %v742_v48  ;;  %790 = vst [vmem:[%s1232_s24 + $0xd0] sm:$0xff] %v758_v49  ;;  %v743_v56 = vmax.f32 %v711_v50, 0.0  ;;  %v759_v57 = vmax.f32 %v727_v51, 0.0 }
 0x112   : > { %772 = vst [vmem:[%s1232_s24 + $0x40] sm:$0xff] %v740_v52  ;;  %788 = vst [vmem:[%s1232_s24 + $0xc0] sm:$0xff] %v756_v53  ;;  %v741_v58 = vmax.f32 %v709_v54, 0.0  ;;  %v757_v59 = vmax.f32 %v725_v55, 0.0  ;;  %v1013_v60 = vpop.f32.mrb[12].mxu0  ;;  %v1029_v61 = vpop.f32.mrb[12].mxu1 }
 0x113   : > { %775 = vst [vmem:[%s1232_s24 + $0x58] sm:$0xff] %v743_v56  ;;  %791 = vst [vmem:[%s1232_s24 + $0xd8] sm:$0xff] %v759_v57  ;;  %v675_v62 = vmul.f32 %v1013_v60, %v1213_v24  ;;  %v691_v63 = vmul.f32 %v1029_v61, %v1213_v24  ;;  %v575_v0 = vpop.f32.mrb[13].mxu0  ;;  %v639_v1 = vpop.f32.mrb[13].mxu1 }
 0x114   : > { %773 = vst [vmem:[%s1232_s24 + $0x48] sm:$0xff] %v741_v58  ;;  %789 = vst [vmem:[%s1232_s24 + $0xc8] sm:$0xff] %v757_v59  ;;  %v673_v2 = vmul.f32 %v1213_v24, %v575_v0  ;;  %v689_v3 = vmul.f32 %v1213_v24, %v639_v1  ;;  %v1014_v4 = vpop.f32.mrb[14].mxu0  ;;  %v1030_v5 = vpop.f32.mrb[14].mxu1 }
 0x115   : > { %v714_v6 = vadd.f32 %v1218_v26, %v675_v62  ;;  %v730_v7 = vadd.f32 %v1218_v26, %v691_v63  ;;  %v676_v8 = vmul.f32 %v1014_v4, %v1213_v24  ;;  %v692_v9 = vmul.f32 %v1030_v5, %v1213_v24  ;;  %v578_v10 = vpop.f32.mrb[15].mxu0  ;;  %v642_v11 = vpop.f32.mrb[15].mxu1 }
 0x116   : > { %v712_v12 = vadd.f32 %v1218_v26, %v673_v2  ;;  %v728_v13 = vadd.f32 %v1218_v26, %v689_v3  ;;  %v674_v14 = vmul.f32 %v1213_v24, %v578_v10  ;;  %v690_v15 = vmul.f32 %v1213_v24, %v642_v11 }
 0x117   : > { %v746_v16 = vmax.f32 %v714_v6, 0.0  ;;  %v762_v17 = vmax.f32 %v730_v7, 0.0  ;;  %v715_v18 = vadd.f32 %v1218_v26, %v676_v8  ;;  %v731_v19 = vadd.f32 %v1218_v26, %v692_v9 }
 0x118   : > { %v744_v20 = vmax.f32 %v712_v12, 0.0  ;;  %v760_v21 = vmax.f32 %v728_v13, 0.0  ;;  %v713_v22 = vadd.f32 %v1218_v26, %v674_v14  ;;  %v729_v23 = vadd.f32 %v1218_v26, %v690_v15 }
 0x119   : > { %778 = vst [vmem:[%s1232_s24 + $0x70] sm:$0xff] %v746_v16  ;;  %794 = vst [vmem:[%s1232_s24 + $0xf0] sm:$0xff] %v762_v17  ;;  %v747_v25 = vmax.f32 %v715_v18, 0.0  ;;  %v763_v24 = vmax.f32 %v731_v19, 0.0 }
 0x11a   : > { %776 = vst [vmem:[%s1232_s24 + $0x60] sm:$0xff] %v744_v20  ;;  %792 = vst [vmem:[%s1232_s24 + $0xe0] sm:$0xff] %v760_v21  ;;  %v745_v27 = vmax.f32 %v713_v22, 0.0  ;;  %v761_v28 = vmax.f32 %v729_v23, 0.0 }
 0x11b   : > { %779 = vst [vmem:[%s1232_s24 + $0x78] sm:$0xff] %v747_v25  ;;  %795 = vst [vmem:[%s1232_s24 + $0xf8] sm:$0xff] %v763_v24 }
 0x11c   : > { %777 = vst [vmem:[%s1232_s24 + $0x68] sm:$0xff] %v745_v27  ;;  %793 = vst [vmem:[%s1232_s24 + $0xe8] sm:$0xff] %v761_v28 }
 0x11d PF: > { %s14_s17 = sadd.s32 1, %s1117_s17   ;;  %s1336_s15 = smov %s1113_s16 }
 0x11e   : > { %p11_p5 = scmp.ge.s32.totalorder %s14_s17, 5   ;;  %s1337_s16 = smov %s1339_s18 }
 0x120   :  { %13 = sbr.rel (!%p11_p5) target bundleno = 2 (0x2), region = 75 }

// kernel: stem.12
= control target key start
LH: loop header
LB: loop body
LE: loop exit
PB: predicated region body
PF: predicated region fallthrough
CT: control target
= control target key end

     0   :  { %s3210_s15 = smov 0   ;;  %s3212_s16 = smov 0   ;;  %s4053_s0 = inlined_call_operand.vmem [shape: bf16[512,768], index: 0, kind: input, shape index: {}]   ;;  %s4054_s1 = inlined_call_operand.vmem [shape: bf16[768,256], index: 1, kind: input, shape index: {}]   ;;  %s4055_s2 = inlined_call_operand.vmem [shape: f32[1,256], index: 2, kind: input, shape index: {}]   ;;  %s4056_s3 = inlined_call_operand.vmem [shape: f32[1,256], index: 3, kind: input, shape index: {}]   ;;  %s4057_s4 = inlined_call_operand.vmem [shape: f32[512,256], index: 4, kind: output, shape index: {}]  }
   0x1   :  { %s3214_s17 = smov 0  }
   0x2 LB: > { %s33_s18 = sadd.s32 1, %s3179_s16  ;;  %p2487_p0 = scmp.ge.s32.totalorder %s3183_s17, 1  ;;  %s3183_s17 = sphi %s3214_s17, %s14_s17   ;;  %s3179_s16 = sphi %s3212_s16, %s4059_s16   ;;  %s3175_s15 = sphi %s3210_s15, %s4058_s15  }
   0x3   : > { %p35_p1 = scmp.ge.s32.totalorder %s33_s18, 2  ;;  %p231_p2 = scmp.lt.s32.totalorder %s3183_s17, 3 }
   0x5   : > { %s4061_s18 = smov (%p35_p1, %s33_s18), 0  ;;  %p232_p3 = pnand %p2487_p0, %p231_p2 }
   0x6   : > { %v2873_v0 = vld [vmem:[%s4054_s1 + $0x4] ss:$8 sps:$4 sm:$0xff] (!%p232_p3)   ;;  %v2877_v2 = vld [vmem:[%s4054_s1] ss:$8 sps:$4 sm:$0xff] (!%p232_p3)   ;;  %v2879_v4 = vld [vmem:[%s4054_s1 + $0x14] ss:$8 sps:$4 sm:$0xff] (!%p232_p3)  }
   0x7   : > { %235 = sbr.rel (%p232_p3) target bundleno = 480 (0x1e0), region = 36  ;;  %v3236_v1 = vld [vmem:[%s4054_s1 + $0x104] ss:$8 sps:$4 sm:$0xff] (!%p232_p3)   ;;  %1483 = vmatprep.subr.bf16.mxu1 (!%p232_p3), %v2873_v0  ;;  %v3244_v3 = vld [vmem:[%s4054_s1 + $0x100] ss:$8 sps:$4 sm:$0xff] (!%p232_p3)   ;;  %s2488_s9 = sshll.u32 (!%p232_p3), %s3175_s15, 5 }
   0x8   : > { %1676 = vmatprep.subr.bf16.mxu0 (!%p232_p3), %v3236_v1  ;;  %1484 = vmatpush1.bf16.msra.mxu1 (!%p232_p3), %v2877_v2  ;;  %v3254_v5 = vld [vmem:[%s4054_s1 + $0x114] ss:$8 sps:$4 sm:$0xff] (!%p232_p3)   ;;  %v2883_v6 = vld [vmem:[%s4054_s1 + $0x10] ss:$8 sps:$4 sm:$0xff] (!%p232_p3)   ;;  %v2885_v8 = vld [vmem:[%s4054_s1 + $0x24] ss:$8 sps:$4 sm:$0xff] (!%p232_p3)  }
   0x9   : > { %1677 = vmatpush1.bf16.msra.mxu0 (!%p232_p3), %v3244_v3  ;;  %1485 = vmatprep.subr.bf16.mxu1 (!%p232_p3), %v2879_v4  ;;  %v3262_v7 = vld [vmem:[%s4054_s1 + $0x110] ss:$8 sps:$4 sm:$0xff] (!%p232_p3)   ;;  %v3271_v9 = vld [vmem:[%s4054_s1 + $0x124] ss:$8 sps:$4 sm:$0xff] (!%p232_p3)   ;;  %v2889_v10 = vld [vmem:[%s4054_s1 + $0x20] ss:$8 sps:$4 sm:$0xff] (!%p232_p3)  }
   0xa   : > { %1678 = vmatprep.subr.bf16.mxu0 (!%p232_p3), %v3254_v5  ;;  %v3279_v11 = vld [vmem:[%s4054_s1 + $0x120] ss:$8 sps:$4 sm:$0xff] (!%p232_p3)   ;;  %v2891_v12 = vld [vmem:[%s4054_s1 + $0x34] ss:$8 sps:$4 sm:$0xff] (!%p232_p3)   ;;  %v2895_v14 = vld [vmem:[%s4054_s1 + $0x30] ss:$8 sps:$4 sm:$0xff] (!%p232_p3)  }
   0xb   : > { %v3289_v13 = vld [vmem:[%s4054_s1 + $0x134] ss:$8 sps:$4 sm:$0xff] (!%p232_p3)   ;;  %v3298_v15 = vld [vmem:[%s4054_s1 + $0x130] ss:$8 sps:$4 sm:$0xff] (!%p232_p3)   ;;  %v2897_v16 = vld [vmem:[%s4054_s1 + $0x44] ss:$8 sps:$4 sm:$0xff] (!%p232_p3)  }
   0xc   : > { %1486 = vmatpush1.bf16.msra.mxu1 (!%p232_p3), %v2883_v6  ;;  %v3307_v17 = vld [vmem:[%s4054_s1 + $0x144] ss:$8 sps:$4 sm:$0xff] (!%p232_p3)   ;;  %v2901_v18 = vld [vmem:[%s4054_s1 + $0x40] ss:$8 sps:$4 sm:$0xff] (!%p232_p3)   ;;  %v2903_v20 = vld [vmem:[%s4054_s1 + $0x54] ss:$8 sps:$4 sm:$0xff] (!%p232_p3)  }
   0xd   : > { %1679 = vmatpush1.bf16.msra.mxu0 (!%p232_p3), %v3262_v7  ;;  %1487 = vmatprep.subr.bf16.mxu1 (!%p232_p3), %v2885_v8  ;;  %v3315_v19 = vld [vmem:[%s4054_s1 + $0x140] ss:$8 sps:$4 sm:$0xff] (!%p232_p3)   ;;  %v3325_v21 = vld [vmem:[%s4054_s1 + $0x154] ss:$8 sps:$4 sm:$0xff] (!%p232_p3)   ;;  %v2907_v22 = vld [vmem:[%s4054_s1 + $0x50] ss:$8 sps:$4 sm:$0xff] (!%p232_p3)  }
   0xe   : > { %1680 = vmatprep.subr.bf16.mxu0 %v3271_v9  ;;  %v3334_v23 = vld [vmem:[%s4054_s1 + $0x150] ss:$8 sps:$4 sm:$0xff]   ;;  %v2909_v24 = vld [vmem:[%s4054_s1 + $0x64] ss:$8 sps:$4 sm:$0xff]   ;;  %v2913_v26 = vld [vmem:[%s4054_s1 + $0x60] ss:$8 sps:$4 sm:$0xff]  }
   0xf   : > { %v3343_v25 = vld [vmem:[%s4054_s1 + $0x164] ss:$8 sps:$4 sm:$0xff]   ;;  %v3351_v27 = vld [vmem:[%s4054_s1 + $0x160] ss:$8 sps:$4 sm:$0xff]   ;;  %v2915_v28 = vld [vmem:[%s4054_s1 + $0x74] ss:$8 sps:$4 sm:$0xff]  }
  0x10   : > { %1488 = vmatpush1.bf16.msra.mxu1 %v2889_v10  ;;  %v3361_v29 = vld [vmem:[%s4054_s1 + $0x174] ss:$8 sps:$4 sm:$0xff]   ;;  %v2919_v30 = vld [vmem:[%s4054_s1 + $0x70] ss:$8 sps:$4 sm:$0xff]   ;;  %v2921_v32 = vld [vmem:[%s4054_s1 + $0x84] ss:$8 sps:$4 sm:$0xff]  }
  0x11   : > { %1681 = vmatpush1.bf16.msra.mxu0 %v3279_v11  ;;  %1489 = vmatprep.subr.bf16.mxu1 %v2891_v12  ;;  %v3371_v31 = vld [vmem:[%s4054_s1 + $0x170] ss:$8 sps:$4 sm:$0xff]   ;;  %p287_p4 = scmp.lt.s32.totalorder %s2488_s9, 63  ;;  %v3380_v33 = vld [vmem:[%s4054_s1 + $0x184] ss:$8 sps:$4 sm:$0xff]  }
  0x12   : > { %1682 = vmatprep.subr.bf16.mxu0 %v3289_v13  ;;  %v2925_v34 = vld [vmem:[%s4054_s1 + $0x80] ss:$8 sps:$4 sm:$0xff]   ;;  %v2927_v36 = vld [vmem:[%s4054_s1 + $0x94] ss:$8 sps:$4 sm:$0xff]   ;;  %v2931_v38 = vld [vmem:[%s4054_s1 + $0x90] ss:$8 sps:$4 sm:$0xff]  }
  0x13   : > { %v3388_v35 = vld [vmem:[%s4054_s1 + $0x180] ss:$8 sps:$4 sm:$0xff]   ;;  %s4063_s9 = smov (!%p287_p4, %s2488_s9), 63  ;;  %v3400_v37 = vld [vmem:[%s4054_s1 + $0x194] ss:$8 sps:$4 sm:$0xff]  }
  0x14   : > { %1490 = vmatpush1.bf16.msra.mxu1 %v2895_v14  ;;  %v3409_v39 = vld [vmem:[%s4054_s1 + $0x190] ss:$8 sps:$4 sm:$0xff]   ;;  %v2933_v40 = vld [vmem:[%s4054_s1 + $0xa4] ss:$8 sps:$4 sm:$0xff]   ;;  %s2848_s10 = smul.u32 24, %s4063_s9  ;;  %s2687_s25 = sshll.u32 %s4063_s9, 4 }
  0x15   : > { %1683 = vmatpush1.bf16.msra.mxu0 %v3298_v15  ;;  %1491 = vmatprep.subr.bf16.mxu1 %v2897_v16  ;;  %v3419_v41 = vld [vmem:[%s4054_s1 + $0x1a4] ss:$8 sps:$4 sm:$0xff]   ;;  %v2937_v42 = vld [vmem:[%s4054_s1 + $0xa0] ss:$8 sps:$4 sm:$0xff]   ;;  %v2939_v44 = vld [vmem:[%s4054_s1 + $0xb4] ss:$8 sps:$4 sm:$0xff]   ;;  %s3827_s28 = scalar_lea.vmem %s4057_s4, %s2687_s25 }
  0x16   : > { %1684 = vmatprep.subr.bf16.mxu0 %v3307_v17  ;;  %v3427_v43 = vld [vmem:[%s4054_s1 + $0x1a0] ss:$8 sps:$4 sm:$0xff]   ;;  %s3436_s24 = scalar_lea.vmem %s4053_s0, %s2848_s10  ;;  %v3442_v45 = vld [vmem:[%s4054_s1 + $0x1b4] ss:$8 sps:$4 sm:$0xff]   ;;  %v2943_v46 = vld [vmem:[%s4054_s1 + $0xb0] ss:$8 sps:$4 sm:$0xff]  }
  0x17   : > { %v3450_v47 = vld [vmem:[%s4054_s1 + $0x1b0] ss:$8 sps:$4 sm:$0xff]   ;;  %v2945_v48 = vld [vmem:[%s4054_s1 + $0xc4] ss:$8 sps:$4 sm:$0xff]   ;;  %v2949_v52 = vld [vmem:[%s4054_s1 + $0xc0] ss:$8 sps:$4 sm:$0xff]  }
  0x18   : > { %1492 = vmatpush1.bf16.msra.mxu1 %v2901_v18  ;;  %v2971_v49 = vld [vmem:[%s3436_s24 + $0x4] ss:$24 sps:$4 sm:$0xff]   ;;  %v3470_v53 = vld [vmem:[%s4054_s1 + $0x1c0] ss:$8 sps:$4 sm:$0xff]   ;;  %v2955_v56 = vld [vmem:[%s4054_s1 + $0xd0] ss:$8 sps:$4 sm:$0xff]  }
  0x19   : > { %1685 = vmatpush1.bf16.msra.mxu0 %v3315_v19  ;;  %1493 = vmatprep.subr.bf16.mxu1 %v2903_v20  ;;  %v3460_v50 = vld [vmem:[%s4054_s1 + $0x1c4] ss:$8 sps:$4 sm:$0xff]   ;;  %v2951_v54 = vld [vmem:[%s4054_s1 + $0xd4] ss:$8 sps:$4 sm:$0xff]   ;;  %v3488_v57 = vld [vmem:[%s4054_s1 + $0x1d0] ss:$8 sps:$4 sm:$0xff]  }
  0x1a   : > { %1686 = vmatprep.subr.bf16.mxu0 %v3325_v21  ;;  %v2974_v51 = vld [vmem:[%s3436_s24 + $0xc] ss:$24 sps:$4 sm:$0xff]   ;;  %1515 = vmatprep.mubr.bf16.mxu1 %v2971_v49  ;;  %v3480_v55 = vld [vmem:[%s4054_s1 + $0x1d4] ss:$8 sps:$4 sm:$0xff]   ;;  %v2961_v60 = vld [vmem:[%s4054_s1 + $0xe0] ss:$8 sps:$4 sm:$0xff]  }
  0x1b   : > { %1708 = vmatprep.mubr.bf16.mxu0 %v2974_v51  ;;  %v2957_v58 = vld [vmem:[%s4054_s1 + $0xe4] ss:$8 sps:$4 sm:$0xff]   ;;  %v3506_v61 = vld [vmem:[%s4054_s1 + $0x1e0] ss:$8 sps:$4 sm:$0xff]   ;;  %v2963_v62 = vld [vmem:[%s4054_s1 + $0xf4] ss:$8 sps:$4 sm:$0xff]  }
  0x1c   : > { %1494 = vmatpush1.bf16.msra.mxu1 %v2907_v22  ;;  %v3498_v59 = vld [vmem:[%s4054_s1 + $0x1e4] ss:$8 sps:$4 sm:$0xff]   ;;  %v3516_v63 = vld [vmem:[%s4054_s1 + $0x1f4] ss:$8 sps:$4 sm:$0xff]   ;;  %v2967_v0 = vld [vmem:[%s4054_s1 + $0xf0] ss:$8 sps:$4 sm:$0xff]  }
  0x1d   : > { %1687 = vmatpush1.bf16.msra.mxu0 %v3334_v23  ;;  %1495 = vmatprep.subr.bf16.mxu1 %v2909_v24  ;;  %v3525_v2 = vld [vmem:[%s4054_s1 + $0x1f0] ss:$8 sps:$4 sm:$0xff]   ;;  %v2977_v4 = vld [vmem:[%s4054_s1 + $0x204] ss:$8 sps:$4 sm:$0xff]   ;;  %v2972_v8 = vld [vmem:[%s3436_s24 + $0x8] ss:$24 sps:$4 sm:$0xff]  }
  0x1e   : > { %1688 = vmatprep.subr.bf16.mxu0 %v3343_v25  ;;  %v2969_v6 = vld [vmem:[%s3436_s24] ss:$24 sps:$4 sm:$0xff]   ;;  %v2980_v12 = vld [vmem:[%s4054_s1 + $0x214] ss:$8 sps:$4 sm:$0xff]   ;;  %v2985_v20 = vld [vmem:[%s3436_s24 + $0x30] ss:$24 sps:$4 sm:$0xff]  }
  0x1f   : > { %v2975_v10 = vld [vmem:[%s4054_s1 + $0x200] ss:$8 sps:$4 sm:$0xff]   ;;  %v2981_v14 = vld [vmem:[%s3436_s24 + $0x34] ss:$24 sps:$4 sm:$0xff]   ;;  %v2978_v18 = vld [vmem:[%s4054_s1 + $0x210] ss:$8 sps:$4 sm:$0xff]  }
  0x20   : > { %1496 = vmatpush1.bf16.msra.mxu1 %v2913_v26  ;;  %v2983_v16 = vld [vmem:[%s3436_s24 + $0x3c] ss:$24 sps:$4 sm:$0xff]   ;;  %v2986_v22 = vld [vmem:[%s3436_s24 + $0x38] ss:$24 sps:$4 sm:$0xff]   ;;  %v3023_v51 = vld [vmem:[%s4054_s1 + $0x280] ss:$8 sps:$4 sm:$0xff]  }
  0x21   : > { %1689 = vmatpush1.bf16.msra.mxu0 %v3351_v27  ;;  %1497 = vmatprep.subr.bf16.mxu1 %v2915_v28  ;;  %v2992_v24 = vld [vmem:[%s4054_s1 + $0x234] ss:$8 sps:$4 sm:$0xff]   ;;  %v2995_v28 = vld [vmem:[%s3436_s24 + $0x6c] ss:$24 sps:$4 sm:$0xff]   ;;  %v3021_v49 = vld [vmem:[%s3436_s24 + $0xc0] ss:$24 sps:$4 sm:$0xff]  }
  0x22   : > { %1690 = vmatprep.subr.bf16.mxu0 %v3361_v29  ;;  %v2993_v26 = vld [vmem:[%s3436_s24 + $0x64] ss:$24 sps:$4 sm:$0xff]  }
  0x24   : > { %1498 = vmatpush1.bf16.msra.mxu1 %v2919_v30  ;;  %v2997_v30 = vld [vmem:[%s3436_s24 + $0x60] ss:$24 sps:$4 sm:$0xff]  }
  0x25   : > { %1691 = vmatpush1.bf16.msra.mxu0 %v3371_v31  ;;  %1499 = vmatprep.subr.bf16.mxu1 %v2921_v32  ;;  %v2998_v32 = vld [vmem:[%s3436_s24 + $0x68] ss:$24 sps:$4 sm:$0xff]  }
  0x26   : > { %1692 = vmatprep.subr.bf16.mxu0 %v3380_v33 }
  0x28   : > { %1500 = vmatpush1.bf16.msra.mxu1 %v2925_v34  ;;  %v3004_v34 = vld [vmem:[%s4054_s1 + $0x254] ss:$8 sps:$4 sm:$0xff]  }
  0x29   : > { %1693 = vmatpush1.bf16.msra.mxu0 %v3388_v35  ;;  %1501 = vmatprep.subr.bf16.mxu1 %v2927_v36  ;;  %v3005_v36 = vld [vmem:[%s3436_s24 + $0x94] ss:$24 sps:$4 sm:$0xff]  }
  0x2a   : > { %1694 = vmatprep.subr.bf16.mxu0 %v3400_v37 }
  0x2c   : > { %1502 = vmatpush1.bf16.msra.mxu1 %v2931_v38  ;;  %v3007_v38 = vld [vmem:[%s3436_s24 + $0x9c] ss:$24 sps:$4 sm:$0xff]  }
  0x2d   : > { %1695 = vmatpush1.bf16.msra.mxu0 %v3409_v39  ;;  %1503 = vmatprep.subr.bf16.mxu1 %v2933_v40  ;;  %v3009_v40 = vld [vmem:[%s3436_s24 + $0x90] ss:$24 sps:$4 sm:$0xff]  }
  0x2e   : > { %1696 = vmatprep.subr.bf16.mxu0 %v3419_v41 }
  0x30   : > { %1504 = vmatpush1.bf16.msra.mxu1 %v2937_v42  ;;  %v3011_v42 = vld [vmem:[%s4054_s1 + $0x260] ss:$8 sps:$4 sm:$0xff]  }
  0x31   : > { %1697 = vmatpush1.bf16.msra.mxu0 %v3427_v43  ;;  %1505 = vmatprep.subr.bf16.mxu1 %v2939_v44  ;;  %v3016_v44 = vld [vmem:[%s4054_s1 + $0x274] ss:$8 sps:$4 sm:$0xff]  }
  0x32   : > { %1698 = vmatprep.subr.bf16.mxu0 %v3442_v45 }
  0x34   : > { %1506 = vmatpush1.bf16.msra.mxu1 %v2943_v46  ;;  %v3017_v46 = vld [vmem:[%s3436_s24 + $0xc4] ss:$24 sps:$4 sm:$0xff]  }
  0x35   : > { %1699 = vmatpush1.bf16.msra.mxu0 %v3450_v47  ;;  %1507 = vmatprep.subr.bf16.mxu1 %v2945_v48  ;;  %v3019_v48 = vld [vmem:[%s3436_s24 + $0xcc] ss:$24 sps:$4 sm:$0xff]  }
  0x36   : > { %1700 = vmatprep.subr.bf16.mxu0 %v3460_v50 }
  0x38   : > { %1508 = vmatpush1.bf16.msra.mxu1 %v2949_v52  ;;  %v3028_v52 = vld [vmem:[%s4054_s1 + $0x294] ss:$8 sps:$4 sm:$0xff]  }
  0x39   : > { %1701 = vmatpush1.bf16.msra.mxu0 %v3470_v53  ;;  %1509 = vmatprep.subr.bf16.mxu1 %v2951_v54  ;;  %v3029_v54 = vld [vmem:[%s3436_s24 + $0xf4] ss:$24 sps:$4 sm:$0xff]  }
  0x3a   : > { %1702 = vmatprep.subr.bf16.mxu0 %v3480_v55 }
  0x3c   : > { %1510 = vmatpush1.bf16.msra.mxu1 %v2955_v56  ;;  %v3031_v56 = vld [vmem:[%s3436_s24 + $0xfc] ss:$24 sps:$4 sm:$0xff]  }
  0x3d   : > { %1703 = vmatpush1.bf16.msra.mxu0 %v3488_v57  ;;  %1511 = vmatprep.subr.bf16.mxu1 %v2957_v58  ;;  %v3033_v58 = vld [vmem:[%s3436_s24 + $0xf0] ss:$24 sps:$4 sm:$0xff]  }
  0x3e   : > { %1704 = vmatprep.subr.bf16.mxu0 %v3498_v59 }
  0x40   : > { %1512 = vmatpush1.bf16.msra.mxu1 %v2961_v60  ;;  %v3035_v60 = vld [vmem:[%s4054_s1 + $0x2a0] ss:$8 sps:$4 sm:$0xff]  }
  0x41   : > { %1705 = vmatpush1.bf16.msra.mxu0 %v3506_v61  ;;  %1513 = vmatprep.subr.bf16.mxu1 %v2963_v62  ;;  %v3040_v62 = vld [vmem:[%s4054_s1 + $0x2b4] ss:$8 sps:$4 sm:$0xff]  }
  0x42   : > { %1706 = vmatprep.subr.bf16.mxu0 %v3516_v63 }
  0x44   : > { %1514 = vmatpush1.bf16.msra.mxu1 %v2967_v0  ;;  %v3041_v0 = vld [vmem:[%s3436_s24 + $0x124] ss:$24 sps:$4 sm:$0xff]  }
  0x45   : > { %1707 = vmatpush1.bf16.msra.mxu0 %v3525_v2  ;;  %2688 = vmatprep.subr.bf16.mxu1 %v3236_v1  ;;  %v2989_v1 = vld [vmem:[%s4054_s1 + $0x224] ss:$8 sps:$4 sm:$0xff]  }
  0x46   : > { %1869 = vmatprep.subr.bf16.mxu0 %v2977_v4  ;;  %v3043_v4 = vld [vmem:[%s3436_s24 + $0x12c] ss:$24 sps:$4 sm:$0xff]  }
  0x47   : > { %1516 = vmatmul.mubr.bf16.vlgmr.msra.gmra.mrb[0].mxu1 %v2969_v6  ;;  %v3045_v6 = vld [vmem:[%s3436_s24 + $0x120] ss:$24 sps:$4 sm:$0xff]  }
  0x48   : > { %1709 = vmatmul.mubr.bf16.vlgmr.msra.gmra.mrb[0].mxu0 %v2972_v8  ;;  %2704 = vmatpush1.bf16.msra.mxu1 %v3244_v3  ;;  %v2987_v3 = vld [vmem:[%s4054_s1 + $0x220] ss:$8 sps:$4 sm:$0xff]  }
  0x49   : > { %1870 = vmatpush1.bf16.msra.mxu0 %v2975_v10  ;;  %1525 = vmatprep.mubr.bf16.mxu1 %v2981_v14  ;;  %v3047_v8 = vld [vmem:[%s4054_s1 + $0x2c0] ss:$8 sps:$4 sm:$0xff]   ;;  %v3052_v10 = vld [vmem:[%s4054_s1 + $0x2d4] ss:$8 sps:$4 sm:$0xff]  }
  0x4a   : > { %1871 = vmatprep.subr.bf16.mxu0 %v2980_v12  ;;  %1718 = vmatprep.mubr.bf16.mxu0 %v2983_v16  ;;  %v3053_v12 = vld [vmem:[%s3436_s24 + $0x154] ss:$24 sps:$4 sm:$0xff]   ;;  %v3057_v16 = vld [vmem:[%s3436_s24 + $0x150] ss:$24 sps:$4 sm:$0xff]  }
  0x4b   : > { %2689 = vmatprep.subr.bf16.mxu1 %v3254_v5  ;;  %v2990_v5 = vld [vmem:[%s4054_s1 + $0x230] ss:$8 sps:$4 sm:$0xff]   ;;  %v3055_v14 = vld [vmem:[%s3436_s24 + $0x15c] ss:$24 sps:$4 sm:$0xff]  }
  0x4c   : > { %2705 = vmatpush1.bf16.msra.mxu1 %v3262_v7  ;;  %v3001_v7 = vld [vmem:[%s4054_s1 + $0x244] ss:$8 sps:$4 sm:$0xff]  }
  0x4d   : > { %1872 = vmatpush1.bf16.msra.mxu0 %v2978_v18  ;;  %2690 = vmatprep.subr.bf16.mxu1 %v3271_v9  ;;  %v2999_v9 = vld [vmem:[%s4054_s1 + $0x240] ss:$8 sps:$4 sm:$0xff]  }
  0x4e   : > { %1873 = vmatprep.subr.bf16.mxu0 %v2989_v1  ;;  %v3059_v18 = vld [vmem:[%s4054_s1 + $0x2e0] ss:$8 sps:$4 sm:$0xff]   ;;  %v3064_v1 = vld [vmem:[%s4054_s1 + $0x2f4] ss:$8 sps:$4 sm:$0xff]  }
  0x4f   : > { %1526 = vmatmul.mubr.bf16.gmra.mrb[4].mxu1 %v2985_v20  ;;  %v3065_v20 = vld [vmem:[%s3436_s24 + $0x184] ss:$24 sps:$4 sm:$0xff]  }
  0x50   : > { %1719 = vmatmul.mubr.bf16.gmra.mrb[4].mxu0 %v2986_v22  ;;  %1535 = vmatprep.mubr.bf16.mxu1 %v2993_v26  ;;  %v3062_v22 = vld [vmem:[%s4054_s1 + $0x2f0] ss:$8 sps:$4 sm:$0xff]  }
  0x51   : > { %1874 = vmatpush1.bf16.msra.mxu0 %v2987_v3  ;;  %1728 = vmatprep.mubr.bf16.mxu0 %v2995_v28  ;;  %v3071_v3 = vld [vmem:[%s3436_s24 + $0x1b4] ss:$24 sps:$4 sm:$0xff]   ;;  %v3076_v26 = vld [vmem:[%s3436_s24 + $0x40] ss:$24 sps:$4 sm:$0xff]  }
  0x52   : > { %1875 = vmatprep.subr.bf16.mxu0 %v2992_v24  ;;  %2706 = vmatpush1.bf16.msra.mxu1 %v3279_v11  ;;  %v3002_v11 = vld [vmem:[%s4054_s1 + $0x250] ss:$8 sps:$4 sm:$0xff]   ;;  %v3073_v24 = vld [vmem:[%s3436_s24 + $0x44] ss:$24 sps:$4 sm:$0xff]   ;;  %v3079_v28 = vld [vmem:[%s3436_s24 + $0x74] ss:$24 sps:$4 sm:$0xff]  }
  0x53   : > { %2691 = vmatprep.subr.bf16.mxu1 %v3289_v13  ;;  %v3013_v13 = vld [vmem:[%s4054_s1 + $0x264] ss:$8 sps:$4 sm:$0xff]  }
  0x55   : > { %1876 = vmatpush1.bf16.msra.mxu0 %v2990_v5  ;;  %v3088_v5 = vld [vmem:[%s3436_s24 + $0xa0] ss:$24 sps:$4 sm:$0xff]  }
  0x56   : > { %1877 = vmatprep.subr.bf16.mxu0 %v3001_v7  ;;  %2707 = vmatpush1.bf16.msra.mxu1 %v3298_v15  ;;  %v3010_v15 = vld [vmem:[%s3436_s24 + $0x98] ss:$24 sps:$4 sm:$0xff]   ;;  %v3089_v7 = vld [vmem:[%s3436_s24 + $0x244] ss:$24 sps:$4 sm:$0xff]  }
  0x57   : > { %1536 = vmatmul.mubr.bf16.gmra.mrb[8].mxu1 %v2997_v30  ;;  %2692 = vmatprep.subr.bf16.mxu1 %v3307_v17  ;;  %v3014_v17 = vld [vmem:[%s4054_s1 + $0x270] ss:$8 sps:$4 sm:$0xff]  }
  0x58   : > { %1729 = vmatmul.mubr.bf16.gmra.mrb[8].mxu0 %v2998_v32  ;;  %1545 = vmatprep.mubr.bf16.mxu1 %v3005_v36  ;;  %v3094_v30 = vld [vmem:[%s3436_s24 + $0xd0] ss:$24 sps:$4 sm:$0xff]   ;;  %v3095_v32 = vld [vmem:[%s3436_s24 + $0x274] ss:$24 sps:$4 sm:$0xff]   ;;  %v3100_v36 = vld [vmem:[%s3436_s24 + $0x100] ss:$24 sps:$4 sm:$0xff]  }
  0x59   : > { %1878 = vmatpush1.bf16.msra.mxu0 %v2999_v9  ;;  %1738 = vmatprep.mubr.bf16.mxu0 %v3007_v38  ;;  %v3097_v9 = vld [vmem:[%s3436_s24 + $0x104] ss:$24 sps:$4 sm:$0xff]  }
  0x5a   : > { %1879 = vmatprep.subr.bf16.mxu0 %v3004_v34  ;;  %2708 = vmatpush1.bf16.msra.mxu1 %v3315_v19  ;;  %v3025_v19 = vld [vmem:[%s4054_s1 + $0x284] ss:$8 sps:$4 sm:$0xff]   ;;  %v3099_v34 = vld [vmem:[%s3436_s24 + $0x270] ss:$24 sps:$4 sm:$0xff]  }
  0x5b   : > { %2693 = vmatprep.subr.bf16.mxu1 %v3325_v21  ;;  %v3022_v21 = vld [vmem:[%s3436_s24 + $0xc8] ss:$24 sps:$4 sm:$0xff]   ;;  %v3101_v38 = vld [vmem:[%s3436_s24 + $0x2a4] ss:$24 sps:$4 sm:$0xff]  }
  0x5d   : > { %1880 = vmatpush1.bf16.msra.mxu0 %v3002_v11  ;;  %v3103_v11 = vld [vmem:[%s3436_s24 + $0x134] ss:$24 sps:$4 sm:$0xff]  }
  0x5e   : > { %1881 = vmatprep.subr.bf16.mxu0 %v3013_v13  ;;  %2709 = vmatpush1.bf16.msra.mxu1 %v3334_v23  ;;  %v3026_v23 = vld [vmem:[%s4054_s1 + $0x290] ss:$8 sps:$4 sm:$0xff]  }
  0x5f   : > { %1546 = vmatmul.mubr.bf16.gmra.mrb[12].mxu1 %v3009_v40  ;;  %2694 = vmatprep.subr.bf16.mxu1 %v3343_v25  ;;  %v3037_v25 = vld [vmem:[%s4054_s1 + $0x2a4] ss:$8 sps:$4 sm:$0xff]   ;;  %v3105_v13 = vld [vmem:[%s3436_s24 + $0x2a0] ss:$24 sps:$4 sm:$0xff]   ;;  %v3106_v40 = vld [vmem:[%s3436_s24 + $0x130] ss:$24 sps:$4 sm:$0xff]  }
  0x60   : > { %1739 = vmatmul.mubr.bf16.gmra.mrb[12].mxu0 %v3010_v15  ;;  %1555 = vmatprep.mubr.bf16.mxu1 %v3017_v46  ;;  %v3107_v15 = vld [vmem:[%s3436_s24 + $0x2d4] ss:$24 sps:$4 sm:$0xff]   ;;  %v3112_v46 = vld [vmem:[%s3436_s24 + $0x160] ss:$24 sps:$4 sm:$0xff]  }
  0x61   : > { %1882 = vmatpush1.bf16.msra.mxu0 %v3011_v42  ;;  %1748 = vmatprep.mubr.bf16.mxu0 %v3019_v48  ;;  %v3109_v42 = vld [vmem:[%s3436_s24 + $0x164] ss:$24 sps:$4 sm:$0xff]  }
  0x62   : > { %1883 = vmatprep.subr.bf16.mxu0 %v3016_v44  ;;  %2710 = vmatpush1.bf16.msra.mxu1 %v3351_v27  ;;  %v3034_v27 = vld [vmem:[%s3436_s24 + $0xf8] ss:$24 sps:$4 sm:$0xff]   ;;  %v3115_v48 = vld [vmem:[%s3436_s24 + $0x18c] ss:$24 sps:$4 sm:$0xff]  }
  0x63   : > { %2695 = vmatprep.subr.bf16.mxu1 %v3361_v29  ;;  %v3038_v29 = vld [vmem:[%s4054_s1 + $0x2b0] ss:$8 sps:$4 sm:$0xff]  }
  0x64   : > { %v3111_v44 = vld [vmem:[%s3436_s24 + $0x2d0] ss:$24 sps:$4 sm:$0xff]  }
  0x65   : > { %1884 = vmatpush1.bf16.msra.mxu0 %v3014_v17  ;;  %v3116_v17 = vld [vmem:[%s3436_s24 + $0x194] ss:$24 sps:$4 sm:$0xff]  }
  0x66   : > { %1885 = vmatprep.subr.bf16.mxu0 %v3025_v19  ;;  %2711 = vmatpush1.bf16.msra.mxu1 %v3371_v31  ;;  %v3049_v31 = vld [vmem:[%s4054_s1 + $0x2c4] ss:$8 sps:$4 sm:$0xff]   ;;  %v3113_v19 = vld [vmem:[%s3436_s24 + $0x188] ss:$24 sps:$4 sm:$0xff]  }
  0x67   : > { %1556 = vmatmul.mubr.bf16.gmra.mrb[16].mxu1 %v3021_v49  ;;  %2696 = vmatprep.subr.bf16.mxu1 %v3380_v33  ;;  %v3046_v33 = vld [vmem:[%s3436_s24 + $0x128] ss:$24 sps:$4 sm:$0xff]  }
  0x68   : > { %1749 = vmatmul.mubr.bf16.gmra.mrb[16].mxu0 %v3022_v21  ;;  %1565 = vmatprep.mubr.bf16.mxu1 %v3029_v54  ;;  %v3118_v49 = vld [vmem:[%s3436_s24 + $0x190] ss:$24 sps:$4 sm:$0xff]   ;;  %v3119_v21 = vld [vmem:[%s3436_s24 + $0x1bc] ss:$24 sps:$4 sm:$0xff]   ;;  %v3124_v54 = vld [vmem:[%s3436_s24 + $0x1c0] ss:$24 sps:$4 sm:$0xff]  }
  0x69   : > { %1886 = vmatpush1.bf16.msra.mxu0 %v3023_v51  ;;  %1758 = vmatprep.mubr.bf16.mxu0 %v3031_v56  ;;  %v3121_v51 = vld [vmem:[%s3436_s24 + $0x1c4] ss:$24 sps:$4 sm:$0xff]  }
  0x6a   : > { %1887 = vmatprep.subr.bf16.mxu0 %v3028_v52  ;;  %2712 = vmatpush1.bf16.msra.mxu1 %v3388_v35  ;;  %v3050_v35 = vld [vmem:[%s4054_s1 + $0x2d0] ss:$8 sps:$4 sm:$0xff]   ;;  %v3125_v56 = vld [vmem:[%s3436_s24 + $0x1ec] ss:$24 sps:$4 sm:$0xff]  }
  0x6b   : > { %2697 = vmatprep.subr.bf16.mxu1 %v3400_v37  ;;  %v3061_v37 = vld [vmem:[%s4054_s1 + $0x2e4] ss:$8 sps:$4 sm:$0xff]   ;;  %v3123_v52 = vld [vmem:[%s3436_s24 + $0x1b8] ss:$24 sps:$4 sm:$0xff]  }
  0x6d   : > { %1888 = vmatpush1.bf16.msra.mxu0 %v3026_v23  ;;  %v3127_v23 = vld [vmem:[%s3436_s24 + $0x1f4] ss:$24 sps:$4 sm:$0xff]  }
  0x6e   : > { %1889 = vmatprep.subr.bf16.mxu0 %v3037_v25  ;;  %2713 = vmatpush1.bf16.msra.mxu1 %v3409_v39  ;;  %v3058_v39 = vld [vmem:[%s3436_s24 + $0x158] ss:$24 sps:$4 sm:$0xff]   ;;  %v3129_v25 = vld [vmem:[%s3436_s24 + $0x1e8] ss:$24 sps:$4 sm:$0xff]  }
  0x6f   : > { %1566 = vmatmul.mubr.bf16.gmra.mrb[20].mxu1 %v3033_v58  ;;  %2698 = vmatprep.subr.bf16.mxu1 %v3419_v41  ;;  %v3069_v41 = vld [vmem:[%s3436_s24 + $0x14] ss:$24 sps:$4 sm:$0xff]   ;;  %v3130_v58 = vld [vmem:[%s3436_s24 + $0x1f0] ss:$24 sps:$4 sm:$0xff]  }
  0x70   : > { %1759 = vmatmul.mubr.bf16.gmra.mrb[20].mxu0 %v3034_v27  ;;  %1575 = vmatprep.mubr.bf16.mxu1 %v3041_v0  ;;  %v3131_v27 = vld [vmem:[%s3436_s24 + $0x21c] ss:$24 sps:$4 sm:$0xff]   ;;  %v3136_v0 = vld [vmem:[%s3436_s24 + $0x220] ss:$24 sps:$4 sm:$0xff]  }
  0x71   : > { %1890 = vmatpush1.bf16.msra.mxu0 %v3035_v60  ;;  %1768 = vmatprep.mubr.bf16.mxu0 %v3043_v4  ;;  %v3133_v60 = vld [vmem:[%s3436_s24 + $0x224] ss:$24 sps:$4 sm:$0xff]  }
  0x72   : > { %1891 = vmatprep.subr.bf16.mxu0 %v3040_v62  ;;  %2714 = vmatpush1.bf16.msra.mxu1 %v3427_v43  ;;  %v3067_v43 = vld [vmem:[%s3436_s24 + $0x10] ss:$24 sps:$4 sm:$0xff]   ;;  %v3137_v4 = vld [vmem:[%s3436_s24 + $0x24c] ss:$24 sps:$4 sm:$0xff]  }
  0x73   : > { %2699 = vmatprep.subr.bf16.mxu1 %v3442_v45  ;;  %v3070_v45 = vld [vmem:[%s3436_s24 + $0x180] ss:$24 sps:$4 sm:$0xff]  }
  0x74   : > { %v3135_v62 = vld [vmem:[%s3436_s24 + $0x218] ss:$24 sps:$4 sm:$0xff]  }
  0x75   : > { %1892 = vmatpush1.bf16.msra.mxu0 %v3038_v29  ;;  %v3139_v29 = vld [vmem:[%s3436_s24 + $0x254] ss:$24 sps:$4 sm:$0xff]  }
  0x76   : > { %1893 = vmatprep.subr.bf16.mxu0 %v3049_v31  ;;  %2715 = vmatpush1.bf16.msra.mxu1 %v3450_v47  ;;  %v3075_v47 = vld [vmem:[%s3436_s24 + $0x1b0] ss:$24 sps:$4 sm:$0xff]  }
  0x77   : > { %1576 = vmatmul.mubr.bf16.gmra.mrb[24].mxu1 %v3045_v6  ;;  %2700 = vmatprep.subr.bf16.mxu1 %v3460_v50  ;;  %v3077_v50 = vld [vmem:[%s3436_s24 + $0x1e4] ss:$24 sps:$4 sm:$0xff]   ;;  %v3141_v31 = vld [vmem:[%s3436_s24 + $0x248] ss:$24 sps:$4 sm:$0xff]  }
  0x78   : > { %1769 = vmatmul.mubr.bf16.gmra.mrb[24].mxu0 %v3046_v33  ;;  %1585 = vmatprep.mubr.bf16.mxu1 %v3053_v12  ;;  %v3142_v6 = vld [vmem:[%s3436_s24 + $0x250] ss:$24 sps:$4 sm:$0xff]   ;;  %v3143_v33 = vld [vmem:[%s3436_s24 + $0x27c] ss:$24 sps:$4 sm:$0xff]   ;;  %v3148_v12 = vld [vmem:[%s3436_s24 + $0x280] ss:$24 sps:$4 sm:$0xff]  }
  0x79   : > { %1894 = vmatpush1.bf16.msra.mxu0 %v3047_v8  ;;  %1778 = vmatprep.mubr.bf16.mxu0 %v3055_v14  ;;  %v3145_v8 = vld [vmem:[%s3436_s24 + $0x284] ss:$24 sps:$4 sm:$0xff]  }
  0x7a   : > { %1895 = vmatprep.subr.bf16.mxu0 %v3052_v10  ;;  %2716 = vmatpush1.bf16.msra.mxu1 %v3470_v53  ;;  %v3081_v53 = vld [vmem:[%s3436_s24 + $0x1e0] ss:$24 sps:$4 sm:$0xff]   ;;  %v3149_v14 = vld [vmem:[%s3436_s24 + $0x2ac] ss:$24 sps:$4 sm:$0xff]  }
  0x7b   : > { %2701 = vmatprep.subr.bf16.mxu1 %v3480_v55  ;;  %v3082_v55 = vld [vmem:[%s3436_s24 + $0x70] ss:$24 sps:$4 sm:$0xff]  }
  0x7c   : > { %v3147_v10 = vld [vmem:[%s3436_s24 + $0x278] ss:$24 sps:$4 sm:$0xff]  }
  0x7d   : > { %1896 = vmatpush1.bf16.msra.mxu0 %v3050_v35  ;;  %v3151_v35 = vld [vmem:[%s3436_s24 + $0x2b4] ss:$24 sps:$4 sm:$0xff]  }
  0x7e   : > { %1897 = vmatprep.subr.bf16.mxu0 %v3061_v37  ;;  %2717 = vmatpush1.bf16.msra.mxu1 %v3488_v57  ;;  %v3083_v57 = vld [vmem:[%s3436_s24 + $0x214] ss:$24 sps:$4 sm:$0xff]   ;;  %v3153_v37 = vld [vmem:[%s3436_s24 + $0x2a8] ss:$24 sps:$4 sm:$0xff]  }
  0x7f   : > { %1586 = vmatmul.mubr.bf16.gmra.mrb[28].mxu1 %v3057_v16  ;;  %2702 = vmatprep.subr.bf16.mxu1 %v3498_v59  ;;  %v3085_v59 = vld [vmem:[%s3436_s24 + $0xa4] ss:$24 sps:$4 sm:$0xff]   ;;  %v3154_v16 = vld [vmem:[%s3436_s24 + $0x2b0] ss:$24 sps:$4 sm:$0xff]  }
  0x80   : > { %1779 = vmatmul.mubr.bf16.gmra.mrb[28].mxu0 %v3058_v39  ;;  %1595 = vmatprep.mubr.bf16.mxu1 %v3065_v20  ;;  %v3155_v39 = vld [vmem:[%s3436_s24 + $0x2dc] ss:$24 sps:$4 sm:$0xff]   ;;  %v3160_v20 = vld [vmem:[%s3436_s24 + $0x2e0] ss:$24 sps:$4 sm:$0xff]  }
  0x81   : > { %1898 = vmatpush1.bf16.msra.mxu0 %v3059_v18  ;;  %1901 = vmatprep.mubr.bf16.mxu0 %v3069_v41  ;;  %v3157_v18 = vld [vmem:[%s3436_s24 + $0x2e4] ss:$24 sps:$4 sm:$0xff]  }
  0x82   : > { %1899 = vmatprep.subr.bf16.mxu0 %v3064_v1  ;;  %2718 = vmatpush1.bf16.msra.mxu1 %v3506_v61  ;;  %v3087_v61 = vld [vmem:[%s3436_s24 + $0x210] ss:$24 sps:$4 sm:$0xff]  }
  0x83   : > { %2703 = vmatprep.subr.bf16.mxu1 %v3516_v63  ;;  %v3091_v63 = vld [vmem:[%s3436_s24 + $0xd4] ss:$24 sps:$4 sm:$0xff]   ;;  %v3159_v1 = vld [vmem:[%s3436_s24 + $0x2d8] ss:$24 sps:$4 sm:$0xff]  }
  0x85   : > { %1900 = vmatpush1.bf16.msra.mxu0 %v3062_v22 }
  0x86   : > { %2719 = vmatpush1.bf16.msra.mxu1 %v3525_v2  ;;  %v3093_v2 = vld [vmem:[%s3436_s24 + $0x240] ss:$24 sps:$4 sm:$0xff]  }
  0x87   : > { %1596 = vmatmul.mubr.bf16.gmra.mrb[32].mxu1 %v3070_v45 }
  0x88   : > { %1902 = vmatmul.mubr.bf16.vlgmr.msra.gmra.mrb[0].mxu0 %v3067_v43  ;;  %1605 = vmatprep.mubr.bf16.mxu1 %v3071_v3 }
  0x89   : > { %1911 = vmatprep.mubr.bf16.mxu0 %v3073_v24 }
  0x8f   : > { %1606 = vmatmul.mubr.bf16.gmra.mrb[36].mxu1 %v3075_v47 }
  0x90   : > { %1912 = vmatmul.mubr.bf16.gmra.mrb[4].mxu0 %v3076_v26  ;;  %1615 = vmatprep.mubr.bf16.mxu1 %v3077_v50 }
  0x91   : > { %1921 = vmatprep.mubr.bf16.mxu0 %v3079_v28 }
  0x97   : > { %1616 = vmatmul.mubr.bf16.gmra.mrb[40].mxu1 %v3081_v53 }
  0x98   : > { %1922 = vmatmul.mubr.bf16.gmra.mrb[8].mxu0 %v3082_v55  ;;  %1625 = vmatprep.mubr.bf16.mxu1 %v3083_v57 }
  0x99   : > { %1931 = vmatprep.mubr.bf16.mxu0 %v3085_v59 }
  0x9f   : > { %1626 = vmatmul.mubr.bf16.gmra.mrb[44].mxu1 %v3087_v61 }
  0xa0   : > { %1932 = vmatmul.mubr.bf16.gmra.mrb[12].mxu0 %v3088_v5  ;;  %1635 = vmatprep.mubr.bf16.mxu1 %v3089_v7 }
  0xa1   : > { %1941 = vmatprep.mubr.bf16.mxu0 %v3091_v63 }
  0xa7   : > { %1636 = vmatmul.mubr.bf16.gmra.mrb[48].mxu1 %v3093_v2 }
  0xa8   : > { %1942 = vmatmul.mubr.bf16.gmra.mrb[16].mxu0 %v3094_v30  ;;  %1645 = vmatprep.mubr.bf16.mxu1 %v3095_v32 }
  0xa9   : > { %1951 = vmatprep.mubr.bf16.mxu0 %v3097_v9 }
  0xaf   : > { %1646 = vmatmul.mubr.bf16.gmra.mrb[52].mxu1 %v3099_v34 }
  0xb0   : > { %1952 = vmatmul.mubr.bf16.gmra.mrb[20].mxu0 %v3100_v36  ;;  %1655 = vmatprep.mubr.bf16.mxu1 %v3101_v38 }
  0xb1   : > { %1961 = vmatprep.mubr.bf16.mxu0 %v3103_v11 }
  0xb7   : > { %1656 = vmatmul.mubr.bf16.gmra.mrb[56].mxu1 %v3105_v13 }
  0xb8   : > { %1962 = vmatmul.mubr.bf16.gmra.mrb[24].mxu0 %v3106_v40  ;;  %1665 = vmatprep.mubr.bf16.mxu1 %v3107_v15  ;;  %v2064_v15 = vlaneseq }
  0xb9   : > { %1971 = vmatprep.mubr.bf16.mxu0 %v3109_v42 }
  0xba   : > { %v2065_v42 = vshrl.u32 %v2064_v15, 7 }
  0xbf   : > { %1666 = vmatmul.mubr.bf16.gmra.mrb[60].mxu1 %v3111_v44 }
  0xc0   : > { %1972 = vmatmul.mubr.bf16.gmra.mrb[28].mxu0 %v3112_v46  ;;  %1788 = vmatprep.mubr.bf16.mxu1 %v3115_v48 }
  0xc1   : > { %1981 = vmatprep.mubr.bf16.mxu0 %v3116_v17 }
  0xc7   : > { %1789 = vmatmul.mubr.bf16.vlgmr.msra.gmra.mrb[32].mxu1 %v3113_v19  ;;  %v2066_v19 = vsub.s32 0, %v2065_v42 }
  0xc8   : > { %1982 = vmatmul.mubr.bf16.gmra.mrb[32].mxu0 %v3118_v49  ;;  %1798 = vmatprep.mubr.bf16.mxu1 %v3119_v21  ;;  %v2062_v49 = vld [vmem:[%s4055_s2] sm:$0x3]  ;;  %v2070_v21 = vsub.s32 1, %v2065_v42 }
  0xc9   : > { %1991 = vmatprep.mubr.bf16.mxu0 %v3121_v51  ;;  %v2138_v51 = vld [vmem:[%s4056_s3] sm:$0x3] }
  0xcf   : > { %1799 = vmatmul.mubr.bf16.gmra.mrb[36].mxu1 %v3123_v52  ;;  %v3811_v52 = vrot.slane %v2062_v49, %v2066_v19 }
  0xd0   : > { %1992 = vmatmul.mubr.bf16.gmra.mrb[36].mxu0 %v3124_v54  ;;  %1808 = vmatprep.mubr.bf16.mxu1 %v3125_v56  ;;  %v3813_v56 = vrot.slane %v2062_v49, %v2070_v21 }
  0xd1   : > { %2001 = vmatprep.mubr.bf16.mxu0 %v3127_v23 }
  0xd7   : > { %1809 = vmatmul.mubr.bf16.gmra.mrb[40].mxu1 %v3129_v25  ;;  %v3815_v25 = vrot.slane %v2138_v51, %v2066_v19 }
  0xd8   : > { %2002 = vmatmul.mubr.bf16.gmra.mrb[40].mxu0 %v3130_v58  ;;  %1818 = vmatprep.mubr.bf16.mxu1 %v3131_v27 }
  0xd9   : > { %2011 = vmatprep.mubr.bf16.mxu0 %v3133_v60  ;;  %v3817_v60 = vrot.slane %v2138_v51, %v2070_v21 }
  0xdf   : > { %1819 = vmatmul.mubr.bf16.gmra.mrb[44].mxu1 %v3135_v62 }
  0xe0   : > { %2012 = vmatmul.mubr.bf16.gmra.mrb[44].mxu0 %v3136_v0  ;;  %1828 = vmatprep.mubr.bf16.mxu1 %v3137_v4 }
  0xe1   : > { %2021 = vmatprep.mubr.bf16.mxu0 %v3139_v29 }
  0xe7   : > { %1829 = vmatmul.mubr.bf16.gmra.mrb[48].mxu1 %v3141_v31 }
  0xe8   : > { %2022 = vmatmul.mubr.bf16.gmra.mrb[48].mxu0 %v3142_v6  ;;  %1838 = vmatprep.mubr.bf16.mxu1 %v3143_v33 }
  0xe9   : > { %2031 = vmatprep.mubr.bf16.mxu0 %v3145_v8 }
  0xef   : > { %1839 = vmatmul.mubr.bf16.gmra.mrb[52].mxu1 %v3147_v10 }
  0xf0   : > { %2032 = vmatmul.mubr.bf16.gmra.mrb[52].mxu0 %v3148_v12  ;;  %1848 = vmatprep.mubr.bf16.mxu1 %v3149_v14 }
  0xf1   : > { %2041 = vmatprep.mubr.bf16.mxu0 %v3151_v35 }
  0xf7   : > { %1849 = vmatmul.mubr.bf16.gmra.mrb[56].mxu1 %v3153_v37 }
  0xf8   : > { %2042 = vmatmul.mubr.bf16.gmra.mrb[56].mxu0 %v3154_v16  ;;  %1858 = vmatprep.mubr.bf16.mxu1 %v3155_v39 }
  0xf9   : > { %2051 = vmatprep.mubr.bf16.mxu0 %v3157_v18 }
  0xff   : > { %1859 = vmatmul.mubr.bf16.gmra.mrb[60].mxu1 %v3159_v1 }
 0x100   : > { %2052 = vmatmul.mubr.bf16.gmra.mrb[60].mxu0 %v3160_v20 }
 0x11a   : > { %v1517_v41 = vpop.f32.mrb[0].mxu1 }
 0x11b   : > { %v1519_v22 = vpop.f32.mrb[1].mxu1 }
 0x11c   : > { %v1521_v43 = vpop.f32.mrb[2].mxu1 }
 0x11d   : > { %v1523_v45 = vpop.f32.mrb[3].mxu1 }
 0x122   : > { %v1527_v3 = vpop.f32.mrb[4].mxu1 }
 0x123   : > { %v3751_v24 = vpop.f32.mrb[5].mxu1 }
 0x124   : > { %v3753_v47 = vpop.f32.mrb[6].mxu1 }
 0x125   : > { %v3755_v26 = vpop.f32.mrb[7].mxu1 }
 0x12a   : > { %v3757_v50 = vpop.f32.mrb[8].mxu1 }
 0x12b   : > { %v3759_v28 = vpop.f32.mrb[9].mxu1 }
 0x12c   : > { %v3761_v53 = vpop.f32.mrb[10].mxu1 }
 0x12d   : > { %v3763_v55 = vpop.f32.mrb[11].mxu1 }
 0x132   : > { %v3765_v57 = vpop.f32.mrb[12].mxu1 }
 0x133   : > { %v3767_v59 = vpop.f32.mrb[13].mxu1 }
 0x134   : > { %v3769_v61 = vpop.f32.mrb[14].mxu1 }
 0x135   : > { %v3771_v5 = vpop.f32.mrb[15].mxu1 }
 0x13a   : > { %v3773_v7 = vpop.f32.mrb[16].mxu1 }
 0x13b   : > { %v3775_v63 = vpop.f32.mrb[17].mxu1 }
 0x13c   : > { %v3777_v2 = vpop.f32.mrb[18].mxu1 }
 0x13d   : > { %v3779_v30 = vpop.f32.mrb[19].mxu1 }
 0x142   : > { %v3781_v32 = vpop.f32.mrb[20].mxu1 }
 0x143   : > { %v3783_v9 = vpop.f32.mrb[21].mxu1 }
 0x144   : > { %v3785_v34 = vpop.f32.mrb[22].mxu1 }
 0x145   : > { %v3787_v36 = vpop.f32.mrb[23].mxu1 }
 0x14a   : > { %v3789_v38 = vpop.f32.mrb[24].mxu1 }
 0x14b   : > { %v3791_v11 = vpop.f32.mrb[25].mxu1 }
 0x14c   : > { %v3793_v13 = vpop.f32.mrb[26].mxu1 }
 0x14d   : > { %v3795_v40 = vpop.f32.mrb[27].mxu1 }
 0x152   : > { %v3797_v44 = vpop.f32.mrb[28].mxu1 }
 0x153   : > { %v3799_v46 = vpop.f32.mrb[29].mxu1 }
 0x154   : > { %v3801_v48 = vpop.f32.mrb[30].mxu1 }
 0x155   : > { %v3803_v17 = vpop.f32.mrb[31].mxu1 }
 0x15b   : > { %v1903_v54 = vpop.f32.mrb[0].mxu0 }
 0x15c   : > { %v2720_v23 = vadd.f32 %v1903_v54, %v1517_v41  ;;  %v1905_v58 = vpop.f32.mrb[1].mxu0 }
 0x15d   : > { %v2721_v27 = vadd.f32 %v1905_v58, %v1519_v22  ;;  %v1907_v62 = vpop.f32.mrb[2].mxu0 }
 0x15e   : > { %v2074_v0 = vmul.f32 %v2720_v23, %v3811_v52  ;;  %v2722_v4 = vadd.f32 %v1907_v62, %v1521_v43  ;;  %v1909_v29 = vpop.f32.mrb[3].mxu0 }
 0x15f   : > { %v2075_v31 = vmul.f32 %v2721_v27, %v3813_v56  ;;  %v2723_v6 = vadd.f32 %v1909_v29, %v1523_v45 }
 0x160   : > { %v2150_v33 = vadd.f32 %v3815_v25, %v2074_v0  ;;  %v2076_v8 = vmul.f32 %v2722_v4, %v3811_v52 }
 0x161   : > { %v2151_v10 = vadd.f32 %v3817_v60, %v2075_v31  ;;  %v2077_v12 = vmul.f32 %v2723_v6, %v3813_v56 }
 0x162   : > { %v2214_v14 = vmax.f32 %v2150_v33, 0.0  ;;  %v2152_v35 = vadd.f32 %v3815_v25, %v2076_v8 }
 0x163   : > { %v2215_v37 = vmax.f32 %v2151_v10, 0.0  ;;  %v2153_v16 = vadd.f32 %v3817_v60, %v2077_v12  ;;  %v1913_v39 = vpop.f32.mrb[4].mxu0 }
 0x164   : > { %2278 = vst [vmem:[%s3827_s28] sm:$0xff] %v2214_v14  ;;  %v2216_v18 = vmax.f32 %v2152_v35, 0.0  ;;  %v2724_v1 = vadd.f32 %v1913_v39, %v1527_v3  ;;  %v1915_v20 = vpop.f32.mrb[5].mxu0 }
 0x165   : > { %2279 = vst [vmem:[%s3827_s28 + $0x8] sm:$0xff] %v2215_v37  ;;  %v2217_v41 = vmax.f32 %v2153_v16, 0.0  ;;  %v2725_v22 = vadd.f32 %v1915_v20, %v3751_v24  ;;  %v1917_v43 = vpop.f32.mrb[6].mxu0 }
 0x166   : > { %2280 = vst [vmem:[%s3827_s28 + $0x10] sm:$0xff] %v2216_v18  ;;  %v2078_v45 = vmul.f32 %v2724_v1, %v3811_v52  ;;  %v2726_v15 = vadd.f32 %v1917_v43, %v3753_v47  ;;  %v1919_v42 = vpop.f32.mrb[7].mxu0 }
 0x167   : > { %2281 = vst [vmem:[%s3827_s28 + $0x18] sm:$0xff] %v2217_v41  ;;  %v2079_v19 = vmul.f32 %v2725_v22, %v3813_v56  ;;  %v2727_v49 = vadd.f32 %v1919_v42, %v3755_v26 }
 0x168   : > { %v2154_v3 = vadd.f32 %v3815_v25, %v2078_v45  ;;  %v2080_v21 = vmul.f32 %v2726_v15, %v3811_v52 }
 0x169   : > { %v2155_v24 = vadd.f32 %v3817_v60, %v2079_v19  ;;  %v2081_v51 = vmul.f32 %v2727_v49, %v3813_v56 }
 0x16a   : > { %v2218_v54 = vmax.f32 %v2154_v3, 0.0  ;;  %v2156_v23 = vadd.f32 %v3815_v25, %v2080_v21 }
 0x16b   : > { %v2219_v47 = vmax.f32 %v2155_v24, 0.0  ;;  %v2157_v58 = vadd.f32 %v3817_v60, %v2081_v51  ;;  %v1923_v27 = vpop.f32.mrb[8].mxu0 }
 0x16c   : > { %2282 = vst [vmem:[%s3827_s28 + $0x20] sm:$0xff] %v2218_v54  ;;  %v2220_v62 = vmax.f32 %v2156_v23, 0.0  ;;  %v2728_v26 = vadd.f32 %v1923_v27, %v3757_v50  ;;  %v1925_v0 = vpop.f32.mrb[9].mxu0 }
 0x16d   : > { %2283 = vst [vmem:[%s3827_s28 + $0x28] sm:$0xff] %v2219_v47  ;;  %v2221_v4 = vmax.f32 %v2157_v58, 0.0  ;;  %v2729_v29 = vadd.f32 %v1925_v0, %v3759_v28  ;;  %v1927_v31 = vpop.f32.mrb[10].mxu0 }
 0x16e   : > { %2284 = vst [vmem:[%s3827_s28 + $0x30] sm:$0xff] %v2220_v62  ;;  %v2082_v6 = vmul.f32 %v2728_v26, %v3811_v52  ;;  %v2730_v33 = vadd.f32 %v1927_v31, %v3761_v53  ;;  %v1929_v8 = vpop.f32.mrb[11].mxu0 }
 0x16f   : > { %2285 = vst [vmem:[%s3827_s28 + $0x38] sm:$0xff] %v2221_v4  ;;  %v2083_v10 = vmul.f32 %v2729_v29, %v3813_v56  ;;  %v2731_v12 = vadd.f32 %v1929_v8, %v3763_v55 }
 0x170   : > { %v2158_v50 = vadd.f32 %v3815_v25, %v2082_v6  ;;  %v2084_v14 = vmul.f32 %v2730_v33, %v3811_v52 }
 0x171   : > { %v2159_v28 = vadd.f32 %v3817_v60, %v2083_v10  ;;  %v2085_v35 = vmul.f32 %v2731_v12, %v3813_v56 }
 0x172   : > { %v2222_v37 = vmax.f32 %v2158_v50, 0.0  ;;  %v2160_v16 = vadd.f32 %v3815_v25, %v2084_v14 }
 0x173   : > { %v2223_v53 = vmax.f32 %v2159_v28, 0.0  ;;  %v2161_v39 = vadd.f32 %v3817_v60, %v2085_v35  ;;  %v1933_v18 = vpop.f32.mrb[12].mxu0 }
 0x174   : > { %2286 = vst [vmem:[%s3827_s28 + $0x40] sm:$0xff] %v2222_v37  ;;  %v2224_v1 = vmax.f32 %v2160_v16, 0.0  ;;  %v2732_v55 = vadd.f32 %v1933_v18, %v3765_v57  ;;  %v1935_v20 = vpop.f32.mrb[13].mxu0 }
 0x175   : > { %2287 = vst [vmem:[%s3827_s28 + $0x48] sm:$0xff] %v2223_v53  ;;  %v2225_v41 = vmax.f32 %v2161_v39, 0.0  ;;  %v2733_v22 = vadd.f32 %v1935_v20, %v3767_v59  ;;  %v1937_v43 = vpop.f32.mrb[14].mxu0 }
 0x176   : > { %2288 = vst [vmem:[%s3827_s28 + $0x50] sm:$0xff] %v2224_v1  ;;  %v2086_v45 = vmul.f32 %v2732_v55, %v3811_v52  ;;  %v2734_v15 = vadd.f32 %v1937_v43, %v3769_v61  ;;  %v1939_v42 = vpop.f32.mrb[15].mxu0 }
 0x177   : > { %2289 = vst [vmem:[%s3827_s28 + $0x58] sm:$0xff] %v2225_v41  ;;  %v2087_v19 = vmul.f32 %v2733_v22, %v3813_v56  ;;  %v2735_v49 = vadd.f32 %v1939_v42, %v3771_v5 }
 0x178   : > { %v2162_v57 = vadd.f32 %v3815_v25, %v2086_v45  ;;  %v2088_v3 = vmul.f32 %v2734_v15, %v3811_v52 }
 0x179   : > { %v2163_v59 = vadd.f32 %v3817_v60, %v2087_v19  ;;  %v2089_v21 = vmul.f32 %v2735_v49, %v3813_v56 }
 0x17a   : > { %v2226_v24 = vmax.f32 %v2162_v57, 0.0  ;;  %v2164_v51 = vadd.f32 %v3815_v25, %v2088_v3 }
 0x17b   : > { %v2227_v61 = vmax.f32 %v2163_v59, 0.0  ;;  %v2165_v54 = vadd.f32 %v3817_v60, %v2089_v21  ;;  %v1943_v23 = vpop.f32.mrb[16].mxu0 }
 0x17c   : > { %2290 = vst [vmem:[%s3827_s28 + $0x60] sm:$0xff] %v2226_v24  ;;  %v2228_v47 = vmax.f32 %v2164_v51, 0.0  ;;  %v2736_v5 = vadd.f32 %v1943_v23, %v3773_v7  ;;  %v1945_v58 = vpop.f32.mrb[17].mxu0 }
 0x17d   : > { %2291 = vst [vmem:[%s3827_s28 + $0x68] sm:$0xff] %v2227_v61  ;;  %v2229_v27 = vmax.f32 %v2165_v54, 0.0  ;;  %v2737_v62 = vadd.f32 %v1945_v58, %v3775_v63  ;;  %v1947_v26 = vpop.f32.mrb[18].mxu0 }
 0x17e   : > { %2292 = vst [vmem:[%s3827_s28 + $0x70] sm:$0xff] %v2228_v47  ;;  %v2090_v0 = vmul.f32 %v2736_v5, %v3811_v52  ;;  %v2738_v4 = vadd.f32 %v1947_v26, %v3777_v2  ;;  %v1949_v29 = vpop.f32.mrb[19].mxu0 }
 0x17f   : > { %2293 = vst [vmem:[%s3827_s28 + $0x78] sm:$0xff] %v2229_v27  ;;  %v2091_v31 = vmul.f32 %v2737_v62, %v3813_v56  ;;  %v2739_v6 = vadd.f32 %v1949_v29, %v3779_v30 }
 0x180   : > { %v2166_v7 = vadd.f32 %v3815_v25, %v2090_v0  ;;  %v2092_v33 = vmul.f32 %v2738_v4, %v3811_v52 }
 0x181   : > { %v2167_v63 = vadd.f32 %v3817_v60, %v2091_v31  ;;  %v2093_v8 = vmul.f32 %v2739_v6, %v3813_v56 }
 0x182   : > { %v2230_v10 = vmax.f32 %v2166_v7, 0.0  ;;  %v2168_v12 = vadd.f32 %v3815_v25, %v2092_v33 }
 0x183   : > { %v2231_v2 = vmax.f32 %v2167_v63, 0.0  ;;  %v2169_v50 = vadd.f32 %v3817_v60, %v2093_v8  ;;  %v1953_v14 = vpop.f32.mrb[20].mxu0 }
 0x184   : > { %2294 = vst [vmem:[%s3827_s28 + $0x80] sm:$0xff] %v2230_v10  ;;  %v2232_v28 = vmax.f32 %v2168_v12, 0.0  ;;  %v2740_v30 = vadd.f32 %v1953_v14, %v3781_v32  ;;  %v1955_v35 = vpop.f32.mrb[21].mxu0 }
 0x185   : > { %2295 = vst [vmem:[%s3827_s28 + $0x88] sm:$0xff] %v2231_v2  ;;  %v2233_v37 = vmax.f32 %v2169_v50, 0.0  ;;  %v2741_v16 = vadd.f32 %v1955_v35, %v3783_v9  ;;  %v1957_v53 = vpop.f32.mrb[22].mxu0 }
 0x186   : > { %2296 = vst [vmem:[%s3827_s28 + $0x90] sm:$0xff] %v2232_v28  ;;  %v2094_v39 = vmul.f32 %v2740_v30, %v3811_v52  ;;  %v2742_v18 = vadd.f32 %v1957_v53, %v3785_v34  ;;  %v1959_v1 = vpop.f32.mrb[23].mxu0 }
 0x187   : > { %2297 = vst [vmem:[%s3827_s28 + $0x98] sm:$0xff] %v2233_v37  ;;  %v2095_v55 = vmul.f32 %v2741_v16, %v3813_v56  ;;  %v2743_v20 = vadd.f32 %v1959_v1, %v3787_v36 }
 0x188   : > { %v2170_v32 = vadd.f32 %v3815_v25, %v2094_v39  ;;  %v2096_v41 = vmul.f32 %v2742_v18, %v3811_v52 }
 0x189   : > { %v2171_v9 = vadd.f32 %v3817_v60, %v2095_v55  ;;  %v2097_v22 = vmul.f32 %v2743_v20, %v3813_v56 }
 0x18a   : > { %v2234_v43 = vmax.f32 %v2170_v32, 0.0  ;;  %v2172_v45 = vadd.f32 %v3815_v25, %v2096_v41 }
 0x18b   : > { %v2235_v34 = vmax.f32 %v2171_v9, 0.0  ;;  %v2173_v15 = vadd.f32 %v3817_v60, %v2097_v22  ;;  %v1963_v42 = vpop.f32.mrb[24].mxu0 }
 0x18c   : > { %2298 = vst [vmem:[%s3827_s28 + $0xa0] sm:$0xff] %v2234_v43  ;;  %v2236_v19 = vmax.f32 %v2172_v45, 0.0  ;;  %v2744_v36 = vadd.f32 %v1963_v42, %v3789_v38  ;;  %v1965_v49 = vpop.f32.mrb[25].mxu0 }
 0x18d   : > { %2299 = vst [vmem:[%s3827_s28 + $0xa8] sm:$0xff] %v2235_v34  ;;  %v2237_v57 = vmax.f32 %v2173_v15, 0.0  ;;  %v2745_v3 = vadd.f32 %v1965_v49, %v3791_v11  ;;  %v1967_v59 = vpop.f32.mrb[26].mxu0 }
 0x18e   : > { %2300 = vst [vmem:[%s3827_s28 + $0xb0] sm:$0xff] %v2236_v19  ;;  %v2098_v21 = vmul.f32 %v2744_v36, %v3811_v52  ;;  %v2746_v24 = vadd.f32 %v1967_v59, %v3793_v13  ;;  %v1969_v51 = vpop.f32.mrb[27].mxu0 }
 0x18f   : > { %2301 = vst [vmem:[%s3827_s28 + $0xb8] sm:$0xff] %v2237_v57  ;;  %v2099_v61 = vmul.f32 %v2745_v3, %v3813_v56  ;;  %v2747_v54 = vadd.f32 %v1969_v51, %v3795_v40 }
 0x190   : > { %v2174_v38 = vadd.f32 %v3815_v25, %v2098_v21  ;;  %v2100_v23 = vmul.f32 %v2746_v24, %v3811_v52 }
 0x191   : > { %v2175_v11 = vadd.f32 %v3817_v60, %v2099_v61  ;;  %v2101_v47 = vmul.f32 %v2747_v54, %v3813_v56 }
 0x192   : > { %v2238_v5 = vmax.f32 %v2174_v38, 0.0  ;;  %v2176_v58 = vadd.f32 %v3815_v25, %v2100_v23 }
 0x193   : > { %v2239_v13 = vmax.f32 %v2175_v11, 0.0  ;;  %v2177_v27 = vadd.f32 %v3817_v60, %v2101_v47  ;;  %v1973_v62 = vpop.f32.mrb[28].mxu0 }
 0x194   : > { %2302 = vst [vmem:[%s3827_s28 + $0xc0] sm:$0xff] %v2238_v5  ;;  %v2240_v26 = vmax.f32 %v2176_v58, 0.0  ;;  %v2748_v40 = vadd.f32 %v1973_v62, %v3797_v44  ;;  %v1975_v0 = vpop.f32.mrb[29].mxu0 }
 0x195   : > { %2303 = vst [vmem:[%s3827_s28 + $0xc8] sm:$0xff] %v2239_v13  ;;  %v2241_v4 = vmax.f32 %v2177_v27, 0.0  ;;  %v2749_v29 = vadd.f32 %v1975_v0, %v3799_v46  ;;  %v1977_v31 = vpop.f32.mrb[30].mxu0 }
 0x196   : > { %2304 = vst [vmem:[%s3827_s28 + $0xd0] sm:$0xff] %v2240_v26  ;;  %v2102_v6 = vmul.f32 %v2748_v40, %v3811_v52  ;;  %v2750_v7 = vadd.f32 %v1977_v31, %v3801_v48  ;;  %v1979_v33 = vpop.f32.mrb[31].mxu0 }
 0x197   : > { %2305 = vst [vmem:[%s3827_s28 + $0xd8] sm:$0xff] %v2241_v4  ;;  %v2103_v63 = vmul.f32 %v2749_v29, %v3813_v56  ;;  %v2751_v8 = vadd.f32 %v1979_v33, %v3803_v17 }
 0x198   : > { %v2178_v44 = vadd.f32 %v3815_v25, %v2102_v6  ;;  %v2104_v10 = vmul.f32 %v2750_v7, %v3811_v52 }
 0x199   : > { %v2179_v46 = vadd.f32 %v3817_v60, %v2103_v63  ;;  %v2105_v12 = vmul.f32 %v2751_v8, %v3813_v56 }
 0x19a   : > { %v2242_v2 = vmax.f32 %v2178_v44, 0.0  ;;  %v2180_v50 = vadd.f32 %v3815_v25, %v2104_v10  ;;  %v1790_v28 = vpop.f32.mrb[32].mxu1 }
 0x19b   : > { %v2243_v48 = vmax.f32 %v2179_v46, 0.0  ;;  %v2181_v14 = vadd.f32 %v3817_v60, %v2105_v12  ;;  %v1983_v30 = vpop.f32.mrb[32].mxu0  ;;  %v1792_v37 = vpop.f32.mrb[33].mxu1 }
 0x19c   : > { %2306 = vst [vmem:[%s3827_s28 + $0xe0] sm:$0xff] %v2242_v2  ;;  %v2244_v17 = vmax.f32 %v2180_v50, 0.0  ;;  %v2752_v35 = vadd.f32 %v1983_v30, %v1790_v28  ;;  %v1985_v16 = vpop.f32.mrb[33].mxu0  ;;  %v1794_v18 = vpop.f32.mrb[34].mxu1 }
 0x19d   : > { %2307 = vst [vmem:[%s3827_s28 + $0xe8] sm:$0xff] %v2243_v48  ;;  %v2245_v53 = vmax.f32 %v2181_v14, 0.0  ;;  %v2753_v39 = vadd.f32 %v1985_v16, %v1792_v37  ;;  %v1987_v1 = vpop.f32.mrb[34].mxu0  ;;  %v1796_v32 = vpop.f32.mrb[35].mxu1 }
 0x19e   : > { %2308 = vst [vmem:[%s3827_s28 + $0xf0] sm:$0xff] %v2244_v17  ;;  %v2106_v55 = vmul.f32 %v2752_v35, %v3811_v52  ;;  %v2754_v20 = vadd.f32 %v1987_v1, %v1794_v18  ;;  %v1989_v41 = vpop.f32.mrb[35].mxu0 }
 0x19f   : > { %2309 = vst [vmem:[%s3827_s28 + $0xf8] sm:$0xff] %v2245_v53  ;;  %v2107_v9 = vmul.f32 %v2753_v39, %v3813_v56  ;;  %v2755_v22 = vadd.f32 %v1989_v41, %v1796_v32 }
 0x1a0   : > { %v2182_v43 = vadd.f32 %v3815_v25, %v2106_v55  ;;  %v2108_v45 = vmul.f32 %v2754_v20, %v3811_v52 }
 0x1a1   : > { %v2183_v34 = vadd.f32 %v3817_v60, %v2107_v9  ;;  %v2109_v15 = vmul.f32 %v2755_v22, %v3813_v56 }
 0x1a2   : > { %v2246_v42 = vmax.f32 %v2182_v43, 0.0  ;;  %v2184_v19 = vadd.f32 %v3815_v25, %v2108_v45  ;;  %v1800_v57 = vpop.f32.mrb[36].mxu1 }
 0x1a3   : > { %v2247_v36 = vmax.f32 %v2183_v34, 0.0  ;;  %v2185_v49 = vadd.f32 %v3817_v60, %v2109_v15  ;;  %v1993_v3 = vpop.f32.mrb[36].mxu0  ;;  %v1802_v24 = vpop.f32.mrb[37].mxu1 }
 0x1a4   : > { %2310 = vst [vmem:[%s3827_s28 + $0x100] sm:$0xff] %v2246_v42  ;;  %v2248_v59 = vmax.f32 %v2184_v19, 0.0  ;;  %v2756_v21 = vadd.f32 %v1993_v3, %v1800_v57  ;;  %v1995_v51 = vpop.f32.mrb[37].mxu0  ;;  %v1804_v38 = vpop.f32.mrb[38].mxu1 }
 0x1a5   : > { %2311 = vst [vmem:[%s3827_s28 + $0x108] sm:$0xff] %v2247_v36  ;;  %v2249_v61 = vmax.f32 %v2185_v49, 0.0  ;;  %v2757_v54 = vadd.f32 %v1995_v51, %v1802_v24  ;;  %v1997_v23 = vpop.f32.mrb[38].mxu0  ;;  %v1806_v5 = vpop.f32.mrb[39].mxu1 }
 0x1a6   : > { %2312 = vst [vmem:[%s3827_s28 + $0x110] sm:$0xff] %v2248_v59  ;;  %v2110_v11 = vmul.f32 %v2756_v21, %v3811_v52  ;;  %v2758_v47 = vadd.f32 %v1997_v23, %v1804_v38  ;;  %v1999_v58 = vpop.f32.mrb[39].mxu0 }
 0x1a7   : > { %2313 = vst [vmem:[%s3827_s28 + $0x118] sm:$0xff] %v2249_v61  ;;  %v2111_v13 = vmul.f32 %v2757_v54, %v3813_v56  ;;  %v2759_v27 = vadd.f32 %v1999_v58, %v1806_v5 }
 0x1a8   : > { %v2186_v62 = vadd.f32 %v3815_v25, %v2110_v11  ;;  %v2112_v26 = vmul.f32 %v2758_v47, %v3811_v52 }
 0x1a9   : > { %v2187_v40 = vadd.f32 %v3817_v60, %v2111_v13  ;;  %v2113_v0 = vmul.f32 %v2759_v27, %v3813_v56 }
 0x1aa   : > { %v2250_v4 = vmax.f32 %v2186_v62, 0.0  ;;  %v2188_v29 = vadd.f32 %v3815_v25, %v2112_v26  ;;  %v1810_v7 = vpop.f32.mrb[40].mxu1 }
 0x1ab   : > { %v2251_v31 = vmax.f32 %v2187_v40, 0.0  ;;  %v2189_v6 = vadd.f32 %v3817_v60, %v2113_v0  ;;  %v2003_v33 = vpop.f32.mrb[40].mxu0  ;;  %v1812_v44 = vpop.f32.mrb[41].mxu1 }
 0x1ac   : > { %2314 = vst [vmem:[%s3827_s28 + $0x120] sm:$0xff] %v2250_v4  ;;  %v2252_v63 = vmax.f32 %v2188_v29, 0.0  ;;  %v2760_v8 = vadd.f32 %v2003_v33, %v1810_v7  ;;  %v2005_v10 = vpop.f32.mrb[41].mxu0  ;;  %v1814_v2 = vpop.f32.mrb[42].mxu1 }
 0x1ad   : > { %2315 = vst [vmem:[%s3827_s28 + $0x128] sm:$0xff] %v2251_v31  ;;  %v2253_v46 = vmax.f32 %v2189_v6, 0.0  ;;  %v2761_v12 = vadd.f32 %v2005_v10, %v1812_v44  ;;  %v2007_v50 = vpop.f32.mrb[42].mxu0  ;;  %v1816_v28 = vpop.f32.mrb[43].mxu1 }
 0x1ae   : > { %2316 = vst [vmem:[%s3827_s28 + $0x130] sm:$0xff] %v2252_v63  ;;  %v2114_v48 = vmul.f32 %v2760_v8, %v3811_v52  ;;  %v2762_v14 = vadd.f32 %v2007_v50, %v1814_v2  ;;  %v2009_v30 = vpop.f32.mrb[43].mxu0 }
 0x1af   : > { %2317 = vst [vmem:[%s3827_s28 + $0x138] sm:$0xff] %v2253_v46  ;;  %v2115_v17 = vmul.f32 %v2761_v12, %v3813_v56  ;;  %v2763_v35 = vadd.f32 %v2009_v30, %v1816_v28 }
 0x1b0   : > { %v2190_v37 = vadd.f32 %v3815_v25, %v2114_v48  ;;  %v2116_v16 = vmul.f32 %v2762_v14, %v3811_v52 }
 0x1b1   : > { %v2191_v53 = vadd.f32 %v3817_v60, %v2115_v17  ;;  %v2117_v39 = vmul.f32 %v2763_v35, %v3813_v56 }
 0x1b2   : > { %v2254_v18 = vmax.f32 %v2190_v37, 0.0  ;;  %v2192_v1 = vadd.f32 %v3815_v25, %v2116_v16  ;;  %v1820_v32 = vpop.f32.mrb[44].mxu1 }
 0x1b3   : > { %v2255_v55 = vmax.f32 %v2191_v53, 0.0  ;;  %v2193_v20 = vadd.f32 %v3817_v60, %v2117_v39  ;;  %v2013_v41 = vpop.f32.mrb[44].mxu0  ;;  %v1822_v43 = vpop.f32.mrb[45].mxu1 }
 0x1b4   : > { %2318 = vst [vmem:[%s3827_s28 + $0x140] sm:$0xff] %v2254_v18  ;;  %v2256_v9 = vmax.f32 %v2192_v1, 0.0  ;;  %v2764_v22 = vadd.f32 %v2013_v41, %v1820_v32  ;;  %v2015_v45 = vpop.f32.mrb[45].mxu0  ;;  %v1824_v42 = vpop.f32.mrb[46].mxu1 }
 0x1b5   : > { %2319 = vst [vmem:[%s3827_s28 + $0x148] sm:$0xff] %v2255_v55  ;;  %v2257_v34 = vmax.f32 %v2193_v20, 0.0  ;;  %v2765_v15 = vadd.f32 %v2015_v45, %v1822_v43  ;;  %v2017_v19 = vpop.f32.mrb[46].mxu0  ;;  %v1826_v57 = vpop.f32.mrb[47].mxu1 }
 0x1b6   : > { %2320 = vst [vmem:[%s3827_s28 + $0x150] sm:$0xff] %v2256_v9  ;;  %v2118_v36 = vmul.f32 %v2764_v22, %v3811_v52  ;;  %v2766_v49 = vadd.f32 %v2017_v19, %v1824_v42  ;;  %v2019_v3 = vpop.f32.mrb[47].mxu0 }
 0x1b7   : > { %2321 = vst [vmem:[%s3827_s28 + $0x158] sm:$0xff] %v2257_v34  ;;  %v2119_v59 = vmul.f32 %v2765_v15, %v3813_v56  ;;  %v2767_v21 = vadd.f32 %v2019_v3, %v1826_v57 }
 0x1b8   : > { %v2194_v24 = vadd.f32 %v3815_v25, %v2118_v36  ;;  %v2120_v51 = vmul.f32 %v2766_v49, %v3811_v52 }
 0x1b9   : > { %v2195_v61 = vadd.f32 %v3817_v60, %v2119_v59  ;;  %v2121_v54 = vmul.f32 %v2767_v21, %v3813_v56 }
 0x1ba   : > { %v2258_v38 = vmax.f32 %v2194_v24, 0.0  ;;  %v2196_v23 = vadd.f32 %v3815_v25, %v2120_v51  ;;  %v1830_v5 = vpop.f32.mrb[48].mxu1 }
 0x1bb   : > { %v2259_v11 = vmax.f32 %v2195_v61, 0.0  ;;  %v2197_v47 = vadd.f32 %v3817_v60, %v2121_v54  ;;  %v2023_v58 = vpop.f32.mrb[48].mxu0  ;;  %v1832_v62 = vpop.f32.mrb[49].mxu1 }
 0x1bc   : > { %2322 = vst [vmem:[%s3827_s28 + $0x160] sm:$0xff] %v2258_v38  ;;  %v2260_v13 = vmax.f32 %v2196_v23, 0.0  ;;  %v2768_v27 = vadd.f32 %v2023_v58, %v1830_v5  ;;  %v2025_v26 = vpop.f32.mrb[49].mxu0  ;;  %v1834_v4 = vpop.f32.mrb[50].mxu1 }
 0x1bd   : > { %2323 = vst [vmem:[%s3827_s28 + $0x168] sm:$0xff] %v2259_v11  ;;  %v2261_v40 = vmax.f32 %v2197_v47, 0.0  ;;  %v2769_v0 = vadd.f32 %v2025_v26, %v1832_v62  ;;  %v2027_v29 = vpop.f32.mrb[50].mxu0  ;;  %v1836_v7 = vpop.f32.mrb[51].mxu1 }
 0x1be   : > { %2324 = vst [vmem:[%s3827_s28 + $0x170] sm:$0xff] %v2260_v13  ;;  %v2122_v31 = vmul.f32 %v2768_v27, %v3811_v52  ;;  %v2770_v6 = vadd.f32 %v2027_v29, %v1834_v4  ;;  %v2029_v33 = vpop.f32.mrb[51].mxu0 }
 0x1bf   : > { %2325 = vst [vmem:[%s3827_s28 + $0x178] sm:$0xff] %v2261_v40  ;;  %v2123_v63 = vmul.f32 %v2769_v0, %v3813_v56  ;;  %v2771_v8 = vadd.f32 %v2029_v33, %v1836_v7 }
 0x1c0   : > { %v2198_v44 = vadd.f32 %v3815_v25, %v2122_v31  ;;  %v2124_v10 = vmul.f32 %v2770_v6, %v3811_v52 }
 0x1c1   : > { %v2199_v46 = vadd.f32 %v3817_v60, %v2123_v63  ;;  %v2125_v12 = vmul.f32 %v2771_v8, %v3813_v56 }
 0x1c2   : > { %v2262_v2 = vmax.f32 %v2198_v44, 0.0  ;;  %v2200_v50 = vadd.f32 %v3815_v25, %v2124_v10  ;;  %v1840_v28 = vpop.f32.mrb[52].mxu1 }
 0x1c3   : > { %v2263_v48 = vmax.f32 %v2199_v46, 0.0  ;;  %v2201_v14 = vadd.f32 %v3817_v60, %v2125_v12  ;;  %v2033_v30 = vpop.f32.mrb[52].mxu0  ;;  %v1842_v37 = vpop.f32.mrb[53].mxu1 }
 0x1c4   : > { %2326 = vst [vmem:[%s3827_s28 + $0x180] sm:$0xff] %v2262_v2  ;;  %v2264_v17 = vmax.f32 %v2200_v50, 0.0  ;;  %v2772_v35 = vadd.f32 %v2033_v30, %v1840_v28  ;;  %v2035_v16 = vpop.f32.mrb[53].mxu0  ;;  %v1844_v18 = vpop.f32.mrb[54].mxu1 }
 0x1c5   : > { %2327 = vst [vmem:[%s3827_s28 + $0x188] sm:$0xff] %v2263_v48  ;;  %v2265_v53 = vmax.f32 %v2201_v14, 0.0  ;;  %v2773_v39 = vadd.f32 %v2035_v16, %v1842_v37  ;;  %v2037_v1 = vpop.f32.mrb[54].mxu0  ;;  %v1846_v32 = vpop.f32.mrb[55].mxu1 }
 0x1c6   : > { %2328 = vst [vmem:[%s3827_s28 + $0x190] sm:$0xff] %v2264_v17  ;;  %v2126_v55 = vmul.f32 %v2772_v35, %v3811_v52  ;;  %v2774_v20 = vadd.f32 %v2037_v1, %v1844_v18  ;;  %v2039_v41 = vpop.f32.mrb[55].mxu0 }
 0x1c7   : > { %2329 = vst [vmem:[%s3827_s28 + $0x198] sm:$0xff] %v2265_v53  ;;  %v2127_v9 = vmul.f32 %v2773_v39, %v3813_v56  ;;  %v2775_v22 = vadd.f32 %v2039_v41, %v1846_v32 }
 0x1c8   : > { %v2202_v43 = vadd.f32 %v3815_v25, %v2126_v55  ;;  %v2128_v45 = vmul.f32 %v2774_v20, %v3811_v52 }
 0x1c9   : > { %v2203_v34 = vadd.f32 %v3817_v60, %v2127_v9  ;;  %v2129_v15 = vmul.f32 %v2775_v22, %v3813_v56 }
 0x1ca   : > { %v2266_v42 = vmax.f32 %v2202_v43, 0.0  ;;  %v2204_v19 = vadd.f32 %v3815_v25, %v2128_v45  ;;  %v1850_v57 = vpop.f32.mrb[56].mxu1 }
 0x1cb   : > { %v2267_v36 = vmax.f32 %v2203_v34, 0.0  ;;  %v2205_v49 = vadd.f32 %v3817_v60, %v2129_v15  ;;  %v2043_v3 = vpop.f32.mrb[56].mxu0  ;;  %v1852_v24 = vpop.f32.mrb[57].mxu1 }
 0x1cc   : > { %2330 = vst [vmem:[%s3827_s28 + $0x1a0] sm:$0xff] %v2266_v42  ;;  %v2268_v59 = vmax.f32 %v2204_v19, 0.0  ;;  %v2776_v21 = vadd.f32 %v2043_v3, %v1850_v57  ;;  %v2045_v51 = vpop.f32.mrb[57].mxu0  ;;  %v1854_v38 = vpop.f32.mrb[58].mxu1 }
 0x1cd   : > { %2331 = vst [vmem:[%s3827_s28 + $0x1a8] sm:$0xff] %v2267_v36  ;;  %v2269_v61 = vmax.f32 %v2205_v49, 0.0  ;;  %v2777_v54 = vadd.f32 %v2045_v51, %v1852_v24  ;;  %v2047_v23 = vpop.f32.mrb[58].mxu0  ;;  %v1856_v5 = vpop.f32.mrb[59].mxu1 }
 0x1ce   : > { %2332 = vst [vmem:[%s3827_s28 + $0x1b0] sm:$0xff] %v2268_v59  ;;  %v2130_v11 = vmul.f32 %v2776_v21, %v3811_v52  ;;  %v2778_v47 = vadd.f32 %v2047_v23, %v1854_v38  ;;  %v2049_v58 = vpop.f32.mrb[59].mxu0 }
 0x1cf   : > { %2333 = vst [vmem:[%s3827_s28 + $0x1b8] sm:$0xff] %v2269_v61  ;;  %v2131_v13 = vmul.f32 %v2777_v54, %v3813_v56  ;;  %v2779_v27 = vadd.f32 %v2049_v58, %v1856_v5 }
 0x1d0   : > { %v2206_v62 = vadd.f32 %v3815_v25, %v2130_v11  ;;  %v2132_v26 = vmul.f32 %v2778_v47, %v3811_v52 }
 0x1d1   : > { %v2207_v40 = vadd.f32 %v3817_v60, %v2131_v13  ;;  %v2133_v0 = vmul.f32 %v2779_v27, %v3813_v56 }
 0x1d2   : > { %v2270_v4 = vmax.f32 %v2206_v62, 0.0  ;;  %v2208_v29 = vadd.f32 %v3815_v25, %v2132_v26  ;;  %v1860_v7 = vpop.f32.mrb[60].mxu1 }
 0x1d3   : > { %v2271_v31 = vmax.f32 %v2207_v40, 0.0  ;;  %v2209_v6 = vadd.f32 %v3817_v60, %v2133_v0  ;;  %v2053_v33 = vpop.f32.mrb[60].mxu0  ;;  %v1862_v44 = vpop.f32.mrb[61].mxu1 }
 0x1d4   : > { %2334 = vst [vmem:[%s3827_s28 + $0x1c0] sm:$0xff] %v2270_v4  ;;  %v2272_v63 = vmax.f32 %v2208_v29, 0.0  ;;  %v2780_v8 = vadd.f32 %v2053_v33, %v1860_v7  ;;  %v2055_v10 = vpop.f32.mrb[61].mxu0  ;;  %v1864_v2 = vpop.f32.mrb[62].mxu1 }
 0x1d5   : > { %2335 = vst [vmem:[%s3827_s28 + $0x1c8] sm:$0xff] %v2271_v31  ;;  %v2273_v46 = vmax.f32 %v2209_v6, 0.0  ;;  %v2781_v12 = vadd.f32 %v2055_v10, %v1862_v44  ;;  %v2057_v50 = vpop.f32.mrb[62].mxu0  ;;  %v1866_v28 = vpop.f32.mrb[63].mxu1 }
 0x1d6   : > { %2336 = vst [vmem:[%s3827_s28 + $0x1d0] sm:$0xff] %v2272_v63  ;;  %v2134_v48 = vmul.f32 %v2780_v8, %v3811_v52  ;;  %v2782_v14 = vadd.f32 %v2057_v50, %v1864_v2  ;;  %v2059_v30 = vpop.f32.mrb[63].mxu0 }
 0x1d7   : > { %2337 = vst [vmem:[%s3827_s28 + $0x1d8] sm:$0xff] %v2273_v46  ;;  %v2135_v17 = vmul.f32 %v2781_v12, %v3813_v56  ;;  %v2783_v35 = vadd.f32 %v2059_v30, %v1866_v28 }
 0x1d8   : > { %v2210_v37 = vadd.f32 %v3815_v25, %v2134_v48  ;;  %v2136_v16 = vmul.f32 %v2782_v14, %v3811_v52 }
 0x1d9   : > { %v2211_v53 = vadd.f32 %v3817_v60, %v2135_v17  ;;  %v2137_v39 = vmul.f32 %v2783_v35, %v3813_v56 }
 0x1da   : > { %v2274_v18 = vmax.f32 %v2210_v37, 0.0  ;;  %v2212_v1 = vadd.f32 %v3815_v25, %v2136_v16 }
 0x1db   : > { %v2275_v55 = vmax.f32 %v2211_v53, 0.0  ;;  %v2213_v20 = vadd.f32 %v3817_v60, %v2137_v39 }
 0x1dc   : > { %2338 = vst [vmem:[%s3827_s28 + $0x1e0] sm:$0xff] %v2274_v18  ;;  %v2276_v32 = vmax.f32 %v2212_v1, 0.0 }
 0x1dd   : > { %2339 = vst [vmem:[%s3827_s28 + $0x1e8] sm:$0xff] %v2275_v55  ;;  %v2277_v41 = vmax.f32 %v2213_v20, 0.0 }
 0x1de   : > { %2340 = vst [vmem:[%s3827_s28 + $0x1f0] sm:$0xff] %v2276_v32 }
 0x1df   : > { %2341 = vst [vmem:[%s3827_s28 + $0x1f8] sm:$0xff] %v2277_v41 }
 0x1e0 PF: > { %s14_s17 = sadd.s32 1, %s3183_s17   ;;  %s4058_s15 = smov %s3179_s16 }
 0x1e1   : > { %p11_p5 = scmp.ge.s32.totalorder %s14_s17, 4   ;;  %s4059_s16 = smov %s4061_s18 }
 0x1e3   :  { %13 = sbr.rel (!%p11_p5) target bundleno = 2 (0x2), region = 75 }

// kernel: stem.13
= control target key start
LH: loop header
LB: loop body
LE: loop exit
PB: predicated region body
PF: predicated region fallthrough
CT: control target
= control target key end

     0   :  { %s5032_s1 = inlined_call_operand.vmem [shape: bf16[1792,256], index: 1, kind: input, shape index: {}]   ;;  %s5033_s0 = inlined_call_operand.vmem [shape: bf16[112,1792], index: 0, kind: input, shape index: {}]   ;;  %s5034_s2 = inlined_call_operand.vmem [shape: f32[1,256], index: 2, kind: input, shape index: {}]   ;;  %s5035_s3 = inlined_call_operand.vmem [shape: f32[1,256], index: 3, kind: input, shape index: {}]   ;;  %s5036_s4 = inlined_call_operand.vmem [shape: f32[112,256], index: 4, kind: output, shape index: {}]  }
   0x1   :  { %v3332_v0 = vld [vmem:[%s5032_s1 + $0x4] ss:$8 sps:$4 sm:$0xff]   ;;  %v3336_v2 = vld [vmem:[%s5032_s1] ss:$8 sps:$4 sm:$0xff]   ;;  %v3338_v4 = vld [vmem:[%s5032_s1 + $0x14] ss:$8 sps:$4 sm:$0xff]  }
   0x2   :  { %v3334_v1 = vld [vmem:[%s5032_s1 + $0x304] ss:$8 sps:$4 sm:$0xff]   ;;  %1949 = vmatprep.subr.bf16.mxu1 %v3332_v0  ;;  %v3337_v3 = vld [vmem:[%s5032_s1 + $0x300] ss:$8 sps:$4 sm:$0xff]   ;;  %v3340_v5 = vld [vmem:[%s5032_s1 + $0x314] ss:$8 sps:$4 sm:$0xff]  }
   0x3   :  { %2258 = vmatprep.subr.bf16.mxu0 %v3334_v1  ;;  %1950 = vmatpush1.bf16.msra.mxu1 %v3336_v2  ;;  %v3342_v6 = vld [vmem:[%s5032_s1 + $0x10] ss:$8 sps:$4 sm:$0xff]   ;;  %v3344_v8 = vld [vmem:[%s5032_s1 + $0x24] ss:$8 sps:$4 sm:$0xff]   ;;  %v3348_v10 = vld [vmem:[%s5032_s1 + $0x20] ss:$8 sps:$4 sm:$0xff]  }
   0x4   :  { %2259 = vmatpush1.bf16.msra.mxu0 %v3337_v3  ;;  %1951 = vmatprep.subr.bf16.mxu1 %v3338_v4  ;;  %v3343_v7 = vld [vmem:[%s5032_s1 + $0x310] ss:$8 sps:$4 sm:$0xff]   ;;  %v3346_v9 = vld [vmem:[%s5032_s1 + $0x324] ss:$8 sps:$4 sm:$0xff]   ;;  %v3349_v11 = vld [vmem:[%s5032_s1 + $0x320] ss:$8 sps:$4 sm:$0xff]  }
   0x5   :  { %2260 = vmatprep.subr.bf16.mxu0 %v3340_v5  ;;  %v3350_v12 = vld [vmem:[%s5032_s1 + $0x34] ss:$8 sps:$4 sm:$0xff]   ;;  %v3354_v14 = vld [vmem:[%s5032_s1 + $0x30] ss:$8 sps:$4 sm:$0xff]   ;;  %v3356_v16 = vld [vmem:[%s5032_s1 + $0x44] ss:$8 sps:$4 sm:$0xff]  }
   0x6   :  { %v3352_v13 = vld [vmem:[%s5032_s1 + $0x334] ss:$8 sps:$4 sm:$0xff]   ;;  %v3355_v15 = vld [vmem:[%s5032_s1 + $0x330] ss:$8 sps:$4 sm:$0xff]   ;;  %v3358_v17 = vld [vmem:[%s5032_s1 + $0x344] ss:$8 sps:$4 sm:$0xff]  }
   0x7   :  { %1952 = vmatpush1.bf16.msra.mxu1 %v3342_v6  ;;  %v3360_v18 = vld [vmem:[%s5032_s1 + $0x40] ss:$8 sps:$4 sm:$0xff]   ;;  %v3362_v20 = vld [vmem:[%s5032_s1 + $0x54] ss:$8 sps:$4 sm:$0xff]   ;;  %v3366_v22 = vld [vmem:[%s5032_s1 + $0x50] ss:$8 sps:$4 sm:$0xff]  }
   0x8   :  { %2261 = vmatpush1.bf16.msra.mxu0 %v3343_v7  ;;  %1953 = vmatprep.subr.bf16.mxu1 %v3344_v8  ;;  %v3361_v19 = vld [vmem:[%s5032_s1 + $0x340] ss:$8 sps:$4 sm:$0xff]   ;;  %v3364_v21 = vld [vmem:[%s5032_s1 + $0x354] ss:$8 sps:$4 sm:$0xff]   ;;  %v3367_v23 = vld [vmem:[%s5032_s1 + $0x350] ss:$8 sps:$4 sm:$0xff]  }
   0x9   :  { %2262 = vmatprep.subr.bf16.mxu0 %v3346_v9  ;;  %v3368_v24 = vld [vmem:[%s5032_s1 + $0x64] ss:$8 sps:$4 sm:$0xff]   ;;  %v3372_v26 = vld [vmem:[%s5032_s1 + $0x60] ss:$8 sps:$4 sm:$0xff]   ;;  %v3374_v28 = vld [vmem:[%s5032_s1 + $0x74] ss:$8 sps:$4 sm:$0xff]  }
   0xa   :  { %v3370_v25 = vld [vmem:[%s5032_s1 + $0x364] ss:$8 sps:$4 sm:$0xff]   ;;  %v3373_v27 = vld [vmem:[%s5032_s1 + $0x360] ss:$8 sps:$4 sm:$0xff]   ;;  %v3376_v29 = vld [vmem:[%s5032_s1 + $0x374] ss:$8 sps:$4 sm:$0xff]  }
   0xb   :  { %1954 = vmatpush1.bf16.msra.mxu1 %v3348_v10  ;;  %v3378_v30 = vld [vmem:[%s5032_s1 + $0x70] ss:$8 sps:$4 sm:$0xff]   ;;  %v3380_v32 = vld [vmem:[%s5032_s1 + $0x84] ss:$8 sps:$4 sm:$0xff]   ;;  %v3384_v34 = vld [vmem:[%s5032_s1 + $0x80] ss:$8 sps:$4 sm:$0xff]  }
   0xc   :  { %2263 = vmatpush1.bf16.msra.mxu0 %v3349_v11  ;;  %1955 = vmatprep.subr.bf16.mxu1 %v3350_v12  ;;  %v3379_v31 = vld [vmem:[%s5032_s1 + $0x370] ss:$8 sps:$4 sm:$0xff]   ;;  %v3382_v33 = vld [vmem:[%s5032_s1 + $0x384] ss:$8 sps:$4 sm:$0xff]   ;;  %v3385_v35 = vld [vmem:[%s5032_s1 + $0x380] ss:$8 sps:$4 sm:$0xff]  }
   0xd   :  { %2264 = vmatprep.subr.bf16.mxu0 %v3352_v13  ;;  %v3386_v36 = vld [vmem:[%s5032_s1 + $0x94] ss:$8 sps:$4 sm:$0xff]   ;;  %v3390_v38 = vld [vmem:[%s5032_s1 + $0x90] ss:$8 sps:$4 sm:$0xff]   ;;  %v3392_v40 = vld [vmem:[%s5032_s1 + $0xa4] ss:$8 sps:$4 sm:$0xff]  }
   0xe   :  { %v3388_v37 = vld [vmem:[%s5032_s1 + $0x394] ss:$8 sps:$4 sm:$0xff]   ;;  %v3391_v39 = vld [vmem:[%s5032_s1 + $0x390] ss:$8 sps:$4 sm:$0xff]   ;;  %v3394_v41 = vld [vmem:[%s5032_s1 + $0x3a4] ss:$8 sps:$4 sm:$0xff]  }
   0xf   :  { %1956 = vmatpush1.bf16.msra.mxu1 %v3354_v14  ;;  %v3396_v42 = vld [vmem:[%s5032_s1 + $0xa0] ss:$8 sps:$4 sm:$0xff]   ;;  %v3398_v44 = vld [vmem:[%s5032_s1 + $0xb4] ss:$8 sps:$4 sm:$0xff]   ;;  %v3402_v46 = vld [vmem:[%s5032_s1 + $0xb0] ss:$8 sps:$4 sm:$0xff]  }
  0x10   :  { %2265 = vmatpush1.bf16.msra.mxu0 %v3355_v15  ;;  %1957 = vmatprep.subr.bf16.mxu1 %v3356_v16  ;;  %v3397_v43 = vld [vmem:[%s5032_s1 + $0x3a0] ss:$8 sps:$4 sm:$0xff]   ;;  %v3400_v45 = vld [vmem:[%s5032_s1 + $0x3b4] ss:$8 sps:$4 sm:$0xff]   ;;  %v3403_v47 = vld [vmem:[%s5032_s1 + $0x3b0] ss:$8 sps:$4 sm:$0xff]  }
  0x11   :  { %2266 = vmatprep.subr.bf16.mxu0 %v3358_v17  ;;  %v3430_v48 = vld [vmem:[%s5033_s0 + $0x4] ss:$56 sps:$4 sm:$0xff]   ;;  %v3408_v52 = vld [vmem:[%s5032_s1 + $0xc0] ss:$8 sps:$4 sm:$0xff]   ;;  %v3414_v56 = vld [vmem:[%s5032_s1 + $0xd0] ss:$8 sps:$4 sm:$0xff]  }
  0x12   :  { %v3404_v49 = vld [vmem:[%s5032_s1 + $0xc4] ss:$8 sps:$4 sm:$0xff]   ;;  %1981 = vmatprep.mubr.bf16.mxu1 %v3430_v48  ;;  %v3436_v51 = vld [vmem:[%s5033_s0 + $0x1c] ss:$56 sps:$4 sm:$0xff]   ;;  %v3409_v53 = vld [vmem:[%s5032_s1 + $0x3c0] ss:$8 sps:$4 sm:$0xff]  }
  0x13   :  { %1958 = vmatpush1.bf16.msra.mxu1 %v3360_v18  ;;  %v3406_v50 = vld [vmem:[%s5032_s1 + $0x3c4] ss:$8 sps:$4 sm:$0xff]   ;;  %v3410_v54 = vld [vmem:[%s5032_s1 + $0xd4] ss:$8 sps:$4 sm:$0xff]   ;;  %2290 = vmatprep.mubr.bf16.mxu0 %v3436_v51  ;;  %v3415_v57 = vld [vmem:[%s5032_s1 + $0x3d0] ss:$8 sps:$4 sm:$0xff]  }
  0x14   :  { %2267 = vmatpush1.bf16.msra.mxu0 %v3361_v19  ;;  %1959 = vmatprep.subr.bf16.mxu1 %v3362_v20  ;;  %v3412_v55 = vld [vmem:[%s5032_s1 + $0x3d4] ss:$8 sps:$4 sm:$0xff]   ;;  %v3416_v58 = vld [vmem:[%s5032_s1 + $0xe4] ss:$8 sps:$4 sm:$0xff]   ;;  %v3420_v60 = vld [vmem:[%s5032_s1 + $0xe0] ss:$8 sps:$4 sm:$0xff]  }
  0x15   :  { %2268 = vmatprep.subr.bf16.mxu0 %v3364_v21  ;;  %v3418_v59 = vld [vmem:[%s5032_s1 + $0x3e4] ss:$8 sps:$4 sm:$0xff]   ;;  %v3421_v61 = vld [vmem:[%s5032_s1 + $0x3e0] ss:$8 sps:$4 sm:$0xff]   ;;  %v3422_v62 = vld [vmem:[%s5032_s1 + $0xf4] ss:$8 sps:$4 sm:$0xff]  }
  0x16   :  { %v3424_v63 = vld [vmem:[%s5032_s1 + $0x3f4] ss:$8 sps:$4 sm:$0xff]   ;;  %v3426_v0 = vld [vmem:[%s5032_s1 + $0xf0] ss:$8 sps:$4 sm:$0xff]   ;;  %v3433_v2 = vld [vmem:[%s5032_s1 + $0x104] ss:$8 sps:$4 sm:$0xff]  }
  0x17   :  { %1960 = vmatpush1.bf16.msra.mxu1 %v3366_v22  ;;  %v3427_v1 = vld [vmem:[%s5032_s1 + $0x3f0] ss:$8 sps:$4 sm:$0xff]   ;;  %v3439_v4 = vld [vmem:[%s5032_s1 + $0x404] ss:$8 sps:$4 sm:$0xff]   ;;  %v3431_v5 = vld [vmem:[%s5032_s1 + $0x100] ss:$8 sps:$4 sm:$0xff]  }
  0x18   :  { %2269 = vmatpush1.bf16.msra.mxu0 %v3367_v23  ;;  %1961 = vmatprep.subr.bf16.mxu1 %v3368_v24  ;;  %v3428_v3 = vld [vmem:[%s5033_s0] ss:$56 sps:$4 sm:$0xff]   ;;  %v3442_v8 = vld [vmem:[%s5032_s1 + $0x114] ss:$8 sps:$4 sm:$0xff]   ;;  %v3463_v11 = vld [vmem:[%s5033_s0 + $0x8c] ss:$56 sps:$4 sm:$0xff]  }
  0x19   :  { %2270 = vmatprep.subr.bf16.mxu0 %v3370_v25  ;;  %v3434_v6 = vld [vmem:[%s5033_s0 + $0x18] ss:$56 sps:$4 sm:$0xff]   ;;  %v3437_v7 = vld [vmem:[%s5032_s1 + $0x400] ss:$8 sps:$4 sm:$0xff]   ;;  %v3445_v9 = vld [vmem:[%s5032_s1 + $0x414] ss:$8 sps:$4 sm:$0xff]  }
  0x1a   :  { %v3458_v10 = vld [vmem:[%s5033_s0 + $0x74] ss:$56 sps:$4 sm:$0xff]   ;;  %v3440_v12 = vld [vmem:[%s5032_s1 + $0x110] ss:$8 sps:$4 sm:$0xff]   ;;  %v3446_v16 = vld [vmem:[%s5032_s1 + $0x120] ss:$8 sps:$4 sm:$0xff]  }
  0x1b   :  { %1962 = vmatpush1.bf16.msra.mxu1 %v3372_v26  ;;  %v3443_v13 = vld [vmem:[%s5032_s1 + $0x410] ss:$8 sps:$4 sm:$0xff]   ;;  %v3448_v14 = vld [vmem:[%s5032_s1 + $0x124] ss:$8 sps:$4 sm:$0xff]   ;;  %v3449_v17 = vld [vmem:[%s5032_s1 + $0x420] ss:$8 sps:$4 sm:$0xff]  }
  0x1c   :  { %2271 = vmatpush1.bf16.msra.mxu0 %v3373_v27  ;;  %1963 = vmatprep.subr.bf16.mxu1 %v3374_v28  ;;  %v3451_v15 = vld [vmem:[%s5032_s1 + $0x424] ss:$8 sps:$4 sm:$0xff]   ;;  %v3454_v18 = vld [vmem:[%s5032_s1 + $0x134] ss:$8 sps:$4 sm:$0xff]   ;;  %v3468_v19 = vld [vmem:[%s5033_s0 + $0x70] ss:$56 sps:$4 sm:$0xff]  }
  0x1d   :  { %2272 = vmatprep.subr.bf16.mxu0 %v3376_v29  ;;  %v3469_v20 = vld [vmem:[%s5033_s0 + $0x88] ss:$56 sps:$4 sm:$0xff]   ;;  %v3457_v21 = vld [vmem:[%s5032_s1 + $0x434] ss:$8 sps:$4 sm:$0xff]   ;;  %v3452_v24 = vld [vmem:[%s5032_s1 + $0x130] ss:$8 sps:$4 sm:$0xff]  }
  0x1e   :  { %v3476_v22 = vld [vmem:[%s5033_s0 + $0xe4] ss:$56 sps:$4 sm:$0xff]   ;;  %v3455_v25 = vld [vmem:[%s5032_s1 + $0x430] ss:$8 sps:$4 sm:$0xff]   ;;  %v3460_v28 = vld [vmem:[%s5032_s1 + $0x140] ss:$8 sps:$4 sm:$0xff]  }
  0x1f   :  { %1964 = vmatpush1.bf16.msra.mxu1 %v3378_v30  ;;  %v3481_v23 = vld [vmem:[%s5033_s0 + $0xfc] ss:$56 sps:$4 sm:$0xff]   ;;  %v3462_v26 = vld [vmem:[%s5032_s1 + $0x144] ss:$8 sps:$4 sm:$0xff]   ;;  %v3465_v29 = vld [vmem:[%s5032_s1 + $0x440] ss:$8 sps:$4 sm:$0xff]  }
  0x20   :  { %2273 = vmatpush1.bf16.msra.mxu0 %v3379_v31  ;;  %1965 = vmatprep.subr.bf16.mxu1 %v3380_v32  ;;  %v3467_v27 = vld [vmem:[%s5032_s1 + $0x444] ss:$8 sps:$4 sm:$0xff]   ;;  %v3472_v30 = vld [vmem:[%s5032_s1 + $0x154] ss:$8 sps:$4 sm:$0xff]   ;;  %v3486_v31 = vld [vmem:[%s5033_s0 + $0xe0] ss:$56 sps:$4 sm:$0xff]  }
  0x21   :  { %2274 = vmatprep.subr.bf16.mxu0 %v3382_v33  ;;  %v3487_v32 = vld [vmem:[%s5033_s0 + $0xf8] ss:$56 sps:$4 sm:$0xff]   ;;  %v3475_v33 = vld [vmem:[%s5032_s1 + $0x454] ss:$8 sps:$4 sm:$0xff]   ;;  %v3503_v51 = vld [vmem:[%s5032_s1 + $0x484] ss:$8 sps:$4 sm:$0xff]  }
  0x22   :  { %v3488_v48 = vld [vmem:[%s5032_s1 + $0x170] ss:$8 sps:$4 sm:$0xff]  }
  0x23   :  { %1966 = vmatpush1.bf16.msra.mxu1 %v3384_v34  ;;  %v3494_v34 = vld [vmem:[%s5033_s0 + $0x154] ss:$56 sps:$4 sm:$0xff]  }
  0x24   :  { %2275 = vmatpush1.bf16.msra.mxu0 %v3385_v35  ;;  %1967 = vmatprep.subr.bf16.mxu1 %v3386_v36  ;;  %v3499_v35 = vld [vmem:[%s5033_s0 + $0x16c] ss:$56 sps:$4 sm:$0xff]   ;;  %v3470_v36 = vld [vmem:[%s5032_s1 + $0x150] ss:$8 sps:$4 sm:$0xff]  }
  0x25   :  { %2276 = vmatprep.subr.bf16.mxu0 %v3388_v37  ;;  %v3473_v37 = vld [vmem:[%s5032_s1 + $0x450] ss:$8 sps:$4 sm:$0xff]  }
  0x27   :  { %1968 = vmatpush1.bf16.msra.mxu1 %v3390_v38  ;;  %v3480_v38 = vld [vmem:[%s5032_s1 + $0x164] ss:$8 sps:$4 sm:$0xff]  }
  0x28   :  { %2277 = vmatpush1.bf16.msra.mxu0 %v3391_v39  ;;  %1969 = vmatprep.subr.bf16.mxu1 %v3392_v40  ;;  %v3485_v39 = vld [vmem:[%s5032_s1 + $0x464] ss:$8 sps:$4 sm:$0xff]   ;;  %v3478_v40 = vld [vmem:[%s5032_s1 + $0x160] ss:$8 sps:$4 sm:$0xff]  }
  0x29   :  { %2278 = vmatprep.subr.bf16.mxu0 %v3394_v41  ;;  %v3483_v41 = vld [vmem:[%s5032_s1 + $0x460] ss:$8 sps:$4 sm:$0xff]  }
  0x2b   :  { %1970 = vmatpush1.bf16.msra.mxu1 %v3396_v42  ;;  %v3490_v42 = vld [vmem:[%s5032_s1 + $0x174] ss:$8 sps:$4 sm:$0xff]  }
  0x2c   :  { %2279 = vmatpush1.bf16.msra.mxu0 %v3397_v43  ;;  %1971 = vmatprep.subr.bf16.mxu1 %v3398_v44  ;;  %v3504_v43 = vld [vmem:[%s5033_s0 + $0x150] ss:$56 sps:$4 sm:$0xff]  }
  0x2d   :  { %2280 = vmatprep.subr.bf16.mxu0 %v3400_v45  ;;  %v3505_v44 = vld [vmem:[%s5033_s0 + $0x168] ss:$56 sps:$4 sm:$0xff]   ;;  %v3493_v45 = vld [vmem:[%s5032_s1 + $0x474] ss:$8 sps:$4 sm:$0xff]  }
  0x2f   :  { %1972 = vmatpush1.bf16.msra.mxu1 %v3402_v46  ;;  %v3512_v46 = vld [vmem:[%s5033_s0 + $0x1c4] ss:$56 sps:$4 sm:$0xff]  }
  0x30   :  { %2281 = vmatpush1.bf16.msra.mxu0 %v3403_v47  ;;  %1973 = vmatprep.subr.bf16.mxu1 %v3404_v49  ;;  %v3517_v47 = vld [vmem:[%s5033_s0 + $0x1dc] ss:$56 sps:$4 sm:$0xff]   ;;  %v3491_v49 = vld [vmem:[%s5032_s1 + $0x470] ss:$8 sps:$4 sm:$0xff]  }
  0x31   :  { %2282 = vmatprep.subr.bf16.mxu0 %v3406_v50  ;;  %v3498_v50 = vld [vmem:[%s5032_s1 + $0x184] ss:$8 sps:$4 sm:$0xff]  }
  0x33   :  { %1974 = vmatpush1.bf16.msra.mxu1 %v3408_v52  ;;  %v3496_v52 = vld [vmem:[%s5032_s1 + $0x180] ss:$8 sps:$4 sm:$0xff]  }
  0x34   :  { %2283 = vmatpush1.bf16.msra.mxu0 %v3409_v53  ;;  %1975 = vmatprep.subr.bf16.mxu1 %v3410_v54  ;;  %v3501_v53 = vld [vmem:[%s5032_s1 + $0x480] ss:$8 sps:$4 sm:$0xff]   ;;  %v3508_v54 = vld [vmem:[%s5032_s1 + $0x194] ss:$8 sps:$4 sm:$0xff]  }
  0x35   :  { %2284 = vmatprep.subr.bf16.mxu0 %v3412_v55  ;;  %v3522_v55 = vld [vmem:[%s5033_s0 + $0x1c0] ss:$56 sps:$4 sm:$0xff]  }
  0x37   :  { %1976 = vmatpush1.bf16.msra.mxu1 %v3414_v56  ;;  %v3523_v56 = vld [vmem:[%s5033_s0 + $0x1d8] ss:$56 sps:$4 sm:$0xff]  }
  0x38   :  { %2285 = vmatpush1.bf16.msra.mxu0 %v3415_v57  ;;  %1977 = vmatprep.subr.bf16.mxu1 %v3416_v58  ;;  %v3511_v57 = vld [vmem:[%s5032_s1 + $0x494] ss:$8 sps:$4 sm:$0xff]  }
  0x39   :  { %2286 = vmatprep.subr.bf16.mxu0 %v3418_v59  ;;  %v3530_v58 = vld [vmem:[%s5033_s0 + $0x234] ss:$56 sps:$4 sm:$0xff]  }
  0x3a   :  { %v3535_v59 = vld [vmem:[%s5033_s0 + $0x24c] ss:$56 sps:$4 sm:$0xff]  }
  0x3b   :  { %1978 = vmatpush1.bf16.msra.mxu1 %v3420_v60  ;;  %v3506_v60 = vld [vmem:[%s5032_s1 + $0x190] ss:$8 sps:$4 sm:$0xff]  }
  0x3c   :  { %2287 = vmatpush1.bf16.msra.mxu0 %v3421_v61  ;;  %1979 = vmatprep.subr.bf16.mxu1 %v3422_v62  ;;  %v3509_v61 = vld [vmem:[%s5032_s1 + $0x490] ss:$8 sps:$4 sm:$0xff]   ;;  %v3516_v62 = vld [vmem:[%s5032_s1 + $0x1a4] ss:$8 sps:$4 sm:$0xff]  }
  0x3d   :  { %2288 = vmatprep.subr.bf16.mxu0 %v3424_v63  ;;  %v3521_v63 = vld [vmem:[%s5032_s1 + $0x4a4] ss:$8 sps:$4 sm:$0xff]  }
  0x3f   :  { %1980 = vmatpush1.bf16.msra.mxu1 %v3426_v0  ;;  %v3514_v0 = vld [vmem:[%s5032_s1 + $0x1a0] ss:$8 sps:$4 sm:$0xff]  }
  0x40   :  { %2289 = vmatpush1.bf16.msra.mxu0 %v3427_v1  ;;  %2052 = vmatprep.subr.bf16.mxu1 %v3433_v2  ;;  %v3519_v1 = vld [vmem:[%s5032_s1 + $0x4a0] ss:$8 sps:$4 sm:$0xff]  }
  0x41   :  { %2361 = vmatprep.subr.bf16.mxu0 %v3439_v4  ;;  %v3540_v2 = vld [vmem:[%s5033_s0 + $0x230] ss:$56 sps:$4 sm:$0xff]   ;;  %v3526_v4 = vld [vmem:[%s5032_s1 + $0x1b4] ss:$8 sps:$4 sm:$0xff]  }
  0x42   :  { %1982 = vmatmul.mubr.bf16.vlgmr.msra.gmra.mrb[0].mxu1 %v3428_v3  ;;  %v3541_v3 = vld [vmem:[%s5033_s0 + $0x248] ss:$56 sps:$4 sm:$0xff]  }
  0x43   :  { %2291 = vmatmul.mubr.bf16.vlgmr.msra.gmra.mrb[0].mxu0 %v3434_v6  ;;  %2053 = vmatpush1.bf16.msra.mxu1 %v3431_v5  ;;  %v3529_v5 = vld [vmem:[%s5032_s1 + $0x4b4] ss:$8 sps:$4 sm:$0xff]  }
  0x44   :  { %2362 = vmatpush1.bf16.msra.mxu0 %v3437_v7  ;;  %2054 = vmatprep.subr.bf16.mxu1 %v3442_v8  ;;  %v3548_v6 = vld [vmem:[%s5033_s0 + $0x2a4] ss:$56 sps:$4 sm:$0xff]   ;;  %v3524_v8 = vld [vmem:[%s5032_s1 + $0x1b0] ss:$8 sps:$4 sm:$0xff]  }
  0x45   :  { %2363 = vmatprep.subr.bf16.mxu0 %v3445_v9  ;;  %1991 = vmatprep.mubr.bf16.mxu1 %v3458_v10  ;;  %v3553_v7 = vld [vmem:[%s5033_s0 + $0x2bc] ss:$56 sps:$4 sm:$0xff]   ;;  %v3527_v9 = vld [vmem:[%s5032_s1 + $0x4b0] ss:$8 sps:$4 sm:$0xff]   ;;  %v3534_v10 = vld [vmem:[%s5032_s1 + $0x1c4] ss:$8 sps:$4 sm:$0xff]  }
  0x46   :  { %2300 = vmatprep.mubr.bf16.mxu0 %v3463_v11  ;;  %v3539_v11 = vld [vmem:[%s5032_s1 + $0x4c4] ss:$8 sps:$4 sm:$0xff]  }
  0x47   :  { %2055 = vmatpush1.bf16.msra.mxu1 %v3440_v12  ;;  %v3532_v12 = vld [vmem:[%s5032_s1 + $0x1c0] ss:$8 sps:$4 sm:$0xff]  }
  0x48   :  { %2364 = vmatpush1.bf16.msra.mxu0 %v3443_v13  ;;  %2056 = vmatprep.subr.bf16.mxu1 %v3448_v14  ;;  %v3537_v13 = vld [vmem:[%s5032_s1 + $0x4c0] ss:$8 sps:$4 sm:$0xff]  }
  0x49   :  { %2365 = vmatprep.subr.bf16.mxu0 %v3451_v15  ;;  %v3558_v14 = vld [vmem:[%s5033_s0 + $0x2a0] ss:$56 sps:$4 sm:$0xff]  }
  0x4a   :  { %1992 = vmatmul.mubr.bf16.gmra.mrb[4].mxu1 %v3468_v19  ;;  %v3559_v15 = vld [vmem:[%s5033_s0 + $0x2b8] ss:$56 sps:$4 sm:$0xff]   ;;  %v3574_v19 = vld [vmem:[%s5033_s0 + $0x24] ss:$56 sps:$4 sm:$0xff]  }
  0x4b   :  { %2301 = vmatmul.mubr.bf16.gmra.mrb[4].mxu0 %v3469_v20  ;;  %2057 = vmatpush1.bf16.msra.mxu1 %v3446_v16  ;;  %v3544_v16 = vld [vmem:[%s5032_s1 + $0x1d4] ss:$8 sps:$4 sm:$0xff]   ;;  %v3542_v20 = vld [vmem:[%s5032_s1 + $0x1d0] ss:$8 sps:$4 sm:$0xff]  }
  0x4c   :  { %2366 = vmatpush1.bf16.msra.mxu0 %v3449_v17  ;;  %2058 = vmatprep.subr.bf16.mxu1 %v3454_v18  ;;  %v3547_v17 = vld [vmem:[%s5032_s1 + $0x4d4] ss:$8 sps:$4 sm:$0xff]   ;;  %v3568_v18 = vld [vmem:[%s5033_s0 + $0xc] ss:$56 sps:$4 sm:$0xff]  }
  0x4d   :  { %2367 = vmatprep.subr.bf16.mxu0 %v3457_v21  ;;  %2001 = vmatprep.mubr.bf16.mxu1 %v3476_v22  ;;  %v3545_v21 = vld [vmem:[%s5032_s1 + $0x4d0] ss:$8 sps:$4 sm:$0xff]   ;;  %v3552_v22 = vld [vmem:[%s5032_s1 + $0x1e4] ss:$8 sps:$4 sm:$0xff]  }
  0x4e   :  { %2310 = vmatprep.mubr.bf16.mxu0 %v3481_v23  ;;  %v3557_v23 = vld [vmem:[%s5032_s1 + $0x4e4] ss:$8 sps:$4 sm:$0xff]  }
  0x4f   :  { %2059 = vmatpush1.bf16.msra.mxu1 %v3452_v24  ;;  %v3550_v24 = vld [vmem:[%s5032_s1 + $0x1e0] ss:$8 sps:$4 sm:$0xff]  }
  0x50   :  { %2368 = vmatpush1.bf16.msra.mxu0 %v3455_v25  ;;  %2060 = vmatprep.subr.bf16.mxu1 %v3462_v26  ;;  %v3555_v25 = vld [vmem:[%s5032_s1 + $0x4e0] ss:$8 sps:$4 sm:$0xff]   ;;  %v3562_v26 = vld [vmem:[%s5032_s1 + $0x1f4] ss:$8 sps:$4 sm:$0xff]  }
  0x51   :  { %2369 = vmatprep.subr.bf16.mxu0 %v3467_v27  ;;  %v3565_v27 = vld [vmem:[%s5032_s1 + $0x4f4] ss:$8 sps:$4 sm:$0xff]  }
  0x52   :  { %2002 = vmatmul.mubr.bf16.gmra.mrb[8].mxu1 %v3486_v31  ;;  %v3577_v31 = vld [vmem:[%s5032_s1 + $0x504] ss:$8 sps:$4 sm:$0xff]  }
  0x53   :  { %2311 = vmatmul.mubr.bf16.gmra.mrb[8].mxu0 %v3487_v32  ;;  %2061 = vmatpush1.bf16.msra.mxu1 %v3460_v28  ;;  %v3560_v28 = vld [vmem:[%s5032_s1 + $0x1f0] ss:$8 sps:$4 sm:$0xff]   ;;  %v3566_v32 = vld [vmem:[%s5033_s0 + $0x8] ss:$56 sps:$4 sm:$0xff]  }
  0x54   :  { %2370 = vmatpush1.bf16.msra.mxu0 %v3465_v29  ;;  %2062 = vmatprep.subr.bf16.mxu1 %v3472_v30  ;;  %v3563_v29 = vld [vmem:[%s5032_s1 + $0x4f0] ss:$8 sps:$4 sm:$0xff]   ;;  %v3571_v30 = vld [vmem:[%s5032_s1 + $0x204] ss:$8 sps:$4 sm:$0xff]  }
  0x55   :  { %2371 = vmatprep.subr.bf16.mxu0 %v3475_v33  ;;  %2011 = vmatprep.mubr.bf16.mxu1 %v3494_v34  ;;  %v3569_v33 = vld [vmem:[%s5032_s1 + $0x200] ss:$8 sps:$4 sm:$0xff]  }
  0x56   :  { %2320 = vmatprep.mubr.bf16.mxu0 %v3499_v35  ;;  %v3572_v34 = vld [vmem:[%s5033_s0 + $0x20] ss:$56 sps:$4 sm:$0xff]  }
  0x57   :  { %2063 = vmatpush1.bf16.msra.mxu1 %v3470_v36  ;;  %v3575_v35 = vld [vmem:[%s5032_s1 + $0x500] ss:$8 sps:$4 sm:$0xff]   ;;  %v3580_v36 = vld [vmem:[%s5032_s1 + $0x214] ss:$8 sps:$4 sm:$0xff]  }
  0x58   :  { %2372 = vmatpush1.bf16.msra.mxu0 %v3473_v37  ;;  %2064 = vmatprep.subr.bf16.mxu1 %v3480_v38  ;;  %v3583_v37 = vld [vmem:[%s5032_s1 + $0x514] ss:$8 sps:$4 sm:$0xff]  }
  0x59   :  { %2373 = vmatprep.subr.bf16.mxu0 %v3485_v39  ;;  %v3596_v38 = vld [vmem:[%s5033_s0 + $0x7c] ss:$56 sps:$4 sm:$0xff]  }
  0x5a   :  { %2012 = vmatmul.mubr.bf16.gmra.mrb[12].mxu1 %v3504_v43  ;;  %v3598_v39 = vld [vmem:[%s5033_s0 + $0x94] ss:$56 sps:$4 sm:$0xff]  }
  0x5b   :  { %2321 = vmatmul.mubr.bf16.gmra.mrb[12].mxu0 %v3505_v44  ;;  %2065 = vmatpush1.bf16.msra.mxu1 %v3478_v40  ;;  %v3578_v40 = vld [vmem:[%s5032_s1 + $0x210] ss:$8 sps:$4 sm:$0xff]   ;;  %v3589_v43 = vld [vmem:[%s5032_s1 + $0x524] ss:$8 sps:$4 sm:$0xff]   ;;  %v3584_v44 = vld [vmem:[%s5032_s1 + $0x220] ss:$8 sps:$4 sm:$0xff]  }
  0x5c   :  { %2374 = vmatpush1.bf16.msra.mxu0 %v3483_v41  ;;  %2066 = vmatprep.subr.bf16.mxu1 %v3490_v42  ;;  %v3581_v41 = vld [vmem:[%s5032_s1 + $0x510] ss:$8 sps:$4 sm:$0xff]   ;;  %v3586_v42 = vld [vmem:[%s5032_s1 + $0x224] ss:$8 sps:$4 sm:$0xff]  }
  0x5d   :  { %2375 = vmatprep.subr.bf16.mxu0 %v3493_v45  ;;  %2021 = vmatprep.mubr.bf16.mxu1 %v3512_v46  ;;  %v3600_v45 = vld [vmem:[%s5033_s0 + $0x78] ss:$56 sps:$4 sm:$0xff]  }
  0x5e   :  { %2330 = vmatprep.mubr.bf16.mxu0 %v3517_v47  ;;  %v3604_v46 = vld [vmem:[%s5033_s0 + $0x90] ss:$56 sps:$4 sm:$0xff]  }
  0x5f   :  { %2067 = vmatpush1.bf16.msra.mxu1 %v3488_v48  ;;  %v3587_v47 = vld [vmem:[%s5032_s1 + $0x520] ss:$8 sps:$4 sm:$0xff]   ;;  %v3592_v48 = vld [vmem:[%s5032_s1 + $0x234] ss:$8 sps:$4 sm:$0xff]  }
  0x60   :  { %2376 = vmatpush1.bf16.msra.mxu0 %v3491_v49  ;;  %2068 = vmatprep.subr.bf16.mxu1 %v3498_v50  ;;  %v3595_v49 = vld [vmem:[%s5032_s1 + $0x534] ss:$8 sps:$4 sm:$0xff]   ;;  %v3614_v50 = vld [vmem:[%s5033_s0 + $0xec] ss:$56 sps:$4 sm:$0xff]  }
  0x61   :  { %2377 = vmatprep.subr.bf16.mxu0 %v3503_v51  ;;  %v3616_v51 = vld [vmem:[%s5033_s0 + $0x104] ss:$56 sps:$4 sm:$0xff]  }
  0x62   :  { %2022 = vmatmul.mubr.bf16.gmra.mrb[16].mxu1 %v3522_v55  ;;  %v3607_v55 = vld [vmem:[%s5032_s1 + $0x544] ss:$8 sps:$4 sm:$0xff]  }
  0x63   :  { %2331 = vmatmul.mubr.bf16.gmra.mrb[16].mxu0 %v3523_v56  ;;  %2069 = vmatpush1.bf16.msra.mxu1 %v3496_v52  ;;  %v3590_v52 = vld [vmem:[%s5032_s1 + $0x230] ss:$8 sps:$4 sm:$0xff]   ;;  %v3601_v56 = vld [vmem:[%s5032_s1 + $0x240] ss:$8 sps:$4 sm:$0xff]  }
  0x64   :  { %2378 = vmatpush1.bf16.msra.mxu0 %v3501_v53  ;;  %2070 = vmatprep.subr.bf16.mxu1 %v3508_v54  ;;  %v3593_v53 = vld [vmem:[%s5032_s1 + $0x530] ss:$8 sps:$4 sm:$0xff]   ;;  %v3603_v54 = vld [vmem:[%s5032_s1 + $0x244] ss:$8 sps:$4 sm:$0xff]  }
  0x65   :  { %2379 = vmatprep.subr.bf16.mxu0 %v3511_v57  ;;  %2031 = vmatprep.mubr.bf16.mxu1 %v3530_v58  ;;  %v3618_v57 = vld [vmem:[%s5033_s0 + $0xe8] ss:$56 sps:$4 sm:$0xff]  }
  0x66   :  { %2340 = vmatprep.mubr.bf16.mxu0 %v3535_v59  ;;  %v3622_v58 = vld [vmem:[%s5033_s0 + $0x100] ss:$56 sps:$4 sm:$0xff]  }
  0x67   :  { %2071 = vmatpush1.bf16.msra.mxu1 %v3506_v60  ;;  %v3605_v59 = vld [vmem:[%s5032_s1 + $0x540] ss:$8 sps:$4 sm:$0xff]   ;;  %v3610_v60 = vld [vmem:[%s5032_s1 + $0x254] ss:$8 sps:$4 sm:$0xff]  }
  0x68   :  { %2380 = vmatpush1.bf16.msra.mxu0 %v3509_v61  ;;  %2072 = vmatprep.subr.bf16.mxu1 %v3516_v62  ;;  %v3613_v61 = vld [vmem:[%s5032_s1 + $0x554] ss:$8 sps:$4 sm:$0xff]  }
  0x69   :  { %2381 = vmatprep.subr.bf16.mxu0 %v3521_v63  ;;  %v3632_v62 = vld [vmem:[%s5033_s0 + $0x15c] ss:$56 sps:$4 sm:$0xff]  }
  0x6a   :  { %2032 = vmatmul.mubr.bf16.gmra.mrb[20].mxu1 %v3540_v2  ;;  %v3634_v63 = vld [vmem:[%s5033_s0 + $0x174] ss:$56 sps:$4 sm:$0xff]  }
  0x6b   :  { %2341 = vmatmul.mubr.bf16.gmra.mrb[20].mxu0 %v3541_v3  ;;  %2073 = vmatpush1.bf16.msra.mxu1 %v3514_v0  ;;  %v3608_v0 = vld [vmem:[%s5032_s1 + $0x250] ss:$8 sps:$4 sm:$0xff]   ;;  %v3621_v2 = vld [vmem:[%s5032_s1 + $0x264] ss:$8 sps:$4 sm:$0xff]  }
  0x6c   :  { %2382 = vmatpush1.bf16.msra.mxu0 %v3519_v1  ;;  %2074 = vmatprep.subr.bf16.mxu1 %v3526_v4  ;;  %v3611_v1 = vld [vmem:[%s5032_s1 + $0x550] ss:$8 sps:$4 sm:$0xff]   ;;  %v3625_v3 = vld [vmem:[%s5032_s1 + $0x564] ss:$8 sps:$4 sm:$0xff]   ;;  %v3619_v4 = vld [vmem:[%s5032_s1 + $0x260] ss:$8 sps:$4 sm:$0xff]  }
  0x6d   :  { %2383 = vmatprep.subr.bf16.mxu0 %v3529_v5  ;;  %2041 = vmatprep.mubr.bf16.mxu1 %v3548_v6  ;;  %v3636_v5 = vld [vmem:[%s5033_s0 + $0x158] ss:$56 sps:$4 sm:$0xff]  }
  0x6e   :  { %2350 = vmatprep.mubr.bf16.mxu0 %v3553_v7  ;;  %v3640_v6 = vld [vmem:[%s5033_s0 + $0x170] ss:$56 sps:$4 sm:$0xff]  }
  0x6f   :  { %2075 = vmatpush1.bf16.msra.mxu1 %v3524_v8  ;;  %v3623_v7 = vld [vmem:[%s5032_s1 + $0x560] ss:$8 sps:$4 sm:$0xff]   ;;  %v3628_v8 = vld [vmem:[%s5032_s1 + $0x274] ss:$8 sps:$4 sm:$0xff]  }
  0x70   :  { %2384 = vmatpush1.bf16.msra.mxu0 %v3527_v9  ;;  %2076 = vmatprep.subr.bf16.mxu1 %v3534_v10  ;;  %v3631_v9 = vld [vmem:[%s5032_s1 + $0x574] ss:$8 sps:$4 sm:$0xff]   ;;  %v3650_v10 = vld [vmem:[%s5033_s0 + $0x1cc] ss:$56 sps:$4 sm:$0xff]  }
  0x71   :  { %2385 = vmatprep.subr.bf16.mxu0 %v3539_v11  ;;  %v3652_v11 = vld [vmem:[%s5033_s0 + $0x1e4] ss:$56 sps:$4 sm:$0xff]  }
  0x72   :  { %2042 = vmatmul.mubr.bf16.gmra.mrb[24].mxu1 %v3558_v14  ;;  %v3639_v14 = vld [vmem:[%s5032_s1 + $0x284] ss:$8 sps:$4 sm:$0xff]  }
  0x73   :  { %2351 = vmatmul.mubr.bf16.gmra.mrb[24].mxu0 %v3559_v15  ;;  %2077 = vmatpush1.bf16.msra.mxu1 %v3532_v12  ;;  %v3626_v12 = vld [vmem:[%s5032_s1 + $0x270] ss:$8 sps:$4 sm:$0xff]   ;;  %v3643_v15 = vld [vmem:[%s5032_s1 + $0x584] ss:$8 sps:$4 sm:$0xff]  }
  0x74   :  { %2386 = vmatpush1.bf16.msra.mxu0 %v3537_v13  ;;  %2078 = vmatprep.subr.bf16.mxu1 %v3544_v16  ;;  %v3629_v13 = vld [vmem:[%s5032_s1 + $0x570] ss:$8 sps:$4 sm:$0xff]   ;;  %v3637_v16 = vld [vmem:[%s5032_s1 + $0x280] ss:$8 sps:$4 sm:$0xff]  }
  0x75   :  { %2387 = vmatprep.subr.bf16.mxu0 %v3547_v17  ;;  %2084 = vmatprep.mubr.bf16.mxu1 %v3568_v18  ;;  %v3654_v17 = vld [vmem:[%s5033_s0 + $0x1c8] ss:$56 sps:$4 sm:$0xff]  }
  0x76   :  { %2393 = vmatprep.mubr.bf16.mxu0 %v3574_v19  ;;  %v3658_v18 = vld [vmem:[%s5033_s0 + $0x1e0] ss:$56 sps:$4 sm:$0xff]  }
  0x77   :  { %2079 = vmatpush1.bf16.msra.mxu1 %v3542_v20  ;;  %v3641_v19 = vld [vmem:[%s5032_s1 + $0x580] ss:$8 sps:$4 sm:$0xff]   ;;  %v3646_v20 = vld [vmem:[%s5032_s1 + $0x294] ss:$8 sps:$4 sm:$0xff]  }
  0x78   :  { %2388 = vmatpush1.bf16.msra.mxu0 %v3545_v21  ;;  %2080 = vmatprep.subr.bf16.mxu1 %v3552_v22  ;;  %v3649_v21 = vld [vmem:[%s5032_s1 + $0x594] ss:$8 sps:$4 sm:$0xff]  }
  0x79   :  { %2389 = vmatprep.subr.bf16.mxu0 %v3557_v23  ;;  %v3668_v22 = vld [vmem:[%s5033_s0 + $0x23c] ss:$56 sps:$4 sm:$0xff]  }
  0x7a   :  { %v3670_v23 = vld [vmem:[%s5033_s0 + $0x254] ss:$56 sps:$4 sm:$0xff]  }
  0x7b   :  { %2081 = vmatpush1.bf16.msra.mxu1 %v3550_v24  ;;  %v3644_v24 = vld [vmem:[%s5032_s1 + $0x290] ss:$8 sps:$4 sm:$0xff]  }
  0x7c   :  { %2390 = vmatpush1.bf16.msra.mxu0 %v3555_v25  ;;  %2082 = vmatprep.subr.bf16.mxu1 %v3562_v26  ;;  %v3647_v25 = vld [vmem:[%s5032_s1 + $0x590] ss:$8 sps:$4 sm:$0xff]   ;;  %v3657_v26 = vld [vmem:[%s5032_s1 + $0x2a4] ss:$8 sps:$4 sm:$0xff]  }
  0x7d   :  { %2391 = vmatprep.subr.bf16.mxu0 %v3565_v27  ;;  %v3661_v27 = vld [vmem:[%s5032_s1 + $0x5a4] ss:$8 sps:$4 sm:$0xff]  }
  0x7f   :  { %2083 = vmatpush1.bf16.msra.mxu1 %v3560_v28  ;;  %v3655_v28 = vld [vmem:[%s5032_s1 + $0x2a0] ss:$8 sps:$4 sm:$0xff]  }
  0x80   :  { %2392 = vmatpush1.bf16.msra.mxu0 %v3563_v29  ;;  %2155 = vmatprep.subr.bf16.mxu1 %v3571_v30  ;;  %v3659_v29 = vld [vmem:[%s5032_s1 + $0x5a0] ss:$8 sps:$4 sm:$0xff]   ;;  %v3672_v30 = vld [vmem:[%s5033_s0 + $0x238] ss:$56 sps:$4 sm:$0xff]  }
  0x81   :  { %2464 = vmatprep.subr.bf16.mxu0 %v3577_v31  ;;  %v3676_v31 = vld [vmem:[%s5033_s0 + $0x250] ss:$56 sps:$4 sm:$0xff]  }
  0x82   :  { %2085 = vmatmul.mubr.bf16.vlgmr.msra.gmra.mrb[0].mxu1 %v3566_v32  ;;  %v3664_v32 = vld [vmem:[%s5032_s1 + $0x2b4] ss:$8 sps:$4 sm:$0xff]  }
  0x83   :  { %2394 = vmatmul.mubr.bf16.vlgmr.msra.gmra.mrb[0].mxu0 %v3572_v34  ;;  %2156 = vmatpush1.bf16.msra.mxu1 %v3569_v33  ;;  %v3667_v33 = vld [vmem:[%s5032_s1 + $0x5b4] ss:$8 sps:$4 sm:$0xff]   ;;  %v3686_v34 = vld [vmem:[%s5033_s0 + $0x2ac] ss:$56 sps:$4 sm:$0xff]  }
  0x84   :  { %2465 = vmatpush1.bf16.msra.mxu0 %v3575_v35  ;;  %2157 = vmatprep.subr.bf16.mxu1 %v3580_v36  ;;  %v3688_v35 = vld [vmem:[%s5033_s0 + $0x2c4] ss:$56 sps:$4 sm:$0xff]   ;;  %v3662_v36 = vld [vmem:[%s5032_s1 + $0x2b0] ss:$8 sps:$4 sm:$0xff]  }
  0x85   :  { %2466 = vmatprep.subr.bf16.mxu0 %v3583_v37  ;;  %2094 = vmatprep.mubr.bf16.mxu1 %v3596_v38  ;;  %v3665_v37 = vld [vmem:[%s5032_s1 + $0x5b0] ss:$8 sps:$4 sm:$0xff]   ;;  %v3675_v38 = vld [vmem:[%s5032_s1 + $0x2c4] ss:$8 sps:$4 sm:$0xff]  }
  0x86   :  { %2403 = vmatprep.mubr.bf16.mxu0 %v3598_v39  ;;  %v3679_v39 = vld [vmem:[%s5032_s1 + $0x5c4] ss:$8 sps:$4 sm:$0xff]  }
  0x87   :  { %2158 = vmatpush1.bf16.msra.mxu1 %v3578_v40  ;;  %v3673_v40 = vld [vmem:[%s5032_s1 + $0x2c0] ss:$8 sps:$4 sm:$0xff]  }
  0x88   :  { %2467 = vmatpush1.bf16.msra.mxu0 %v3581_v41  ;;  %2159 = vmatprep.subr.bf16.mxu1 %v3586_v42  ;;  %v3677_v41 = vld [vmem:[%s5032_s1 + $0x5c0] ss:$8 sps:$4 sm:$0xff]  }
  0x89   :  { %2468 = vmatprep.subr.bf16.mxu0 %v3589_v43  ;;  %v3690_v42 = vld [vmem:[%s5033_s0 + $0x2a8] ss:$56 sps:$4 sm:$0xff]  }
  0x8a   :  { %2095 = vmatmul.mubr.bf16.gmra.mrb[4].mxu1 %v3600_v45  ;;  %v3694_v43 = vld [vmem:[%s5033_s0 + $0x2c0] ss:$56 sps:$4 sm:$0xff]   ;;  %v3685_v45 = vld [vmem:[%s5032_s1 + $0x5d4] ss:$8 sps:$4 sm:$0xff]  }
  0x8b   :  { %2404 = vmatmul.mubr.bf16.gmra.mrb[4].mxu0 %v3604_v46  ;;  %2160 = vmatpush1.bf16.msra.mxu1 %v3584_v44  ;;  %v3682_v44 = vld [vmem:[%s5032_s1 + $0x2d4] ss:$8 sps:$4 sm:$0xff]  }
  0x8c   :  { %2469 = vmatpush1.bf16.msra.mxu0 %v3587_v47  ;;  %2161 = vmatprep.subr.bf16.mxu1 %v3592_v48  ;;  %v3706_v46 = vld [vmem:[%s5033_s0 + $0x14] ss:$56 sps:$4 sm:$0xff]   ;;  %v3680_v48 = vld [vmem:[%s5032_s1 + $0x2d0] ss:$8 sps:$4 sm:$0xff]  }
  0x8d   :  { %2470 = vmatprep.subr.bf16.mxu0 %v3595_v49  ;;  %2104 = vmatprep.mubr.bf16.mxu1 %v3614_v50  ;;  %v3709_v47 = vld [vmem:[%s5033_s0 + $0x2c] ss:$56 sps:$4 sm:$0xff]   ;;  %v3683_v49 = vld [vmem:[%s5032_s1 + $0x5d0] ss:$8 sps:$4 sm:$0xff]  }
  0x8e   :  { %2413 = vmatprep.mubr.bf16.mxu0 %v3616_v51  ;;  %v3693_v50 = vld [vmem:[%s5032_s1 + $0x2e4] ss:$8 sps:$4 sm:$0xff]  }
  0x8f   :  { %2162 = vmatpush1.bf16.msra.mxu1 %v3590_v52  ;;  %v3697_v51 = vld [vmem:[%s5032_s1 + $0x5e4] ss:$8 sps:$4 sm:$0xff]   ;;  %v3691_v52 = vld [vmem:[%s5032_s1 + $0x2e0] ss:$8 sps:$4 sm:$0xff]  }
  0x90   :  { %2471 = vmatpush1.bf16.msra.mxu0 %v3593_v53  ;;  %2163 = vmatprep.subr.bf16.mxu1 %v3603_v54  ;;  %v3695_v53 = vld [vmem:[%s5032_s1 + $0x5e0] ss:$8 sps:$4 sm:$0xff]   ;;  %v3700_v54 = vld [vmem:[%s5032_s1 + $0x2f4] ss:$8 sps:$4 sm:$0xff]  }
  0x91   :  { %2472 = vmatprep.subr.bf16.mxu0 %v3607_v55  ;;  %v3703_v55 = vld [vmem:[%s5032_s1 + $0x5f4] ss:$8 sps:$4 sm:$0xff]  }
  0x92   :  { %2105 = vmatmul.mubr.bf16.gmra.mrb[8].mxu1 %v3618_v57  ;;  %v3701_v57 = vld [vmem:[%s5032_s1 + $0x5f0] ss:$8 sps:$4 sm:$0xff]  }
  0x93   :  { %2414 = vmatmul.mubr.bf16.gmra.mrb[8].mxu0 %v3622_v58  ;;  %2164 = vmatpush1.bf16.msra.mxu1 %v3601_v56  ;;  %v3698_v56 = vld [vmem:[%s5032_s1 + $0x2f0] ss:$8 sps:$4 sm:$0xff]   ;;  %v3712_v58 = vld [vmem:[%s5032_s1 + $0x604] ss:$8 sps:$4 sm:$0xff]  }
  0x94   :  { %2473 = vmatpush1.bf16.msra.mxu0 %v3605_v59  ;;  %2165 = vmatprep.subr.bf16.mxu1 %v3610_v60  ;;  %v3704_v59 = vld [vmem:[%s5033_s0 + $0x10] ss:$56 sps:$4 sm:$0xff]  }
  0x95   :  { %2474 = vmatprep.subr.bf16.mxu0 %v3613_v61  ;;  %2114 = vmatprep.mubr.bf16.mxu1 %v3632_v62  ;;  %v3707_v60 = vld [vmem:[%s5033_s0 + $0x28] ss:$56 sps:$4 sm:$0xff]   ;;  %v3715_v62 = vld [vmem:[%s5032_s1 + $0x614] ss:$8 sps:$4 sm:$0xff]  }
  0x96   :  { %2423 = vmatprep.mubr.bf16.mxu0 %v3634_v63  ;;  %v3710_v61 = vld [vmem:[%s5032_s1 + $0x600] ss:$8 sps:$4 sm:$0xff]   ;;  %v3716_v63 = vld [vmem:[%s5033_s0 + $0x84] ss:$56 sps:$4 sm:$0xff]  }
  0x97   :  { %2166 = vmatpush1.bf16.msra.mxu1 %v3608_v0  ;;  %v3718_v0 = vld [vmem:[%s5033_s0 + $0x9c] ss:$56 sps:$4 sm:$0xff]  }
  0x98   :  { %2475 = vmatpush1.bf16.msra.mxu0 %v3611_v1  ;;  %2167 = vmatprep.subr.bf16.mxu1 %v3621_v2  ;;  %v3713_v1 = vld [vmem:[%s5032_s1 + $0x610] ss:$8 sps:$4 sm:$0xff]   ;;  %v3724_v2 = vld [vmem:[%s5032_s1 + $0x624] ss:$8 sps:$4 sm:$0xff]  }
  0x99   :  { %2476 = vmatprep.subr.bf16.mxu0 %v3625_v3  ;;  %v3720_v3 = vld [vmem:[%s5033_s0 + $0x80] ss:$56 sps:$4 sm:$0xff]  }
  0x9a   :  { %2115 = vmatmul.mubr.bf16.gmra.mrb[12].mxu1 %v3636_v5  ;;  %v3722_v5 = vld [vmem:[%s5032_s1 + $0x620] ss:$8 sps:$4 sm:$0xff]  }
  0x9b   :  { %2424 = vmatmul.mubr.bf16.gmra.mrb[12].mxu0 %v3640_v6  ;;  %2168 = vmatpush1.bf16.msra.mxu1 %v3619_v4  ;;  %v3721_v4 = vld [vmem:[%s5033_s0 + $0x98] ss:$56 sps:$4 sm:$0xff]   ;;  %v3727_v6 = vld [vmem:[%s5032_s1 + $0x634] ss:$8 sps:$4 sm:$0xff]  }
  0x9c   :  { %2477 = vmatpush1.bf16.msra.mxu0 %v3623_v7  ;;  %2169 = vmatprep.subr.bf16.mxu1 %v3628_v8  ;;  %v3728_v7 = vld [vmem:[%s5033_s0 + $0xf4] ss:$56 sps:$4 sm:$0xff]  }
  0x9d   :  { %2478 = vmatprep.subr.bf16.mxu0 %v3631_v9  ;;  %2124 = vmatprep.mubr.bf16.mxu1 %v3650_v10  ;;  %v3730_v8 = vld [vmem:[%s5033_s0 + $0x10c] ss:$56 sps:$4 sm:$0xff]   ;;  %v3725_v9 = vld [vmem:[%s5032_s1 + $0x630] ss:$8 sps:$4 sm:$0xff]  }
  0x9e   :  { %2433 = vmatprep.mubr.bf16.mxu0 %v3652_v11  ;;  %v3736_v10 = vld [vmem:[%s5032_s1 + $0x644] ss:$8 sps:$4 sm:$0xff]   ;;  %v3732_v11 = vld [vmem:[%s5033_s0 + $0xf0] ss:$56 sps:$4 sm:$0xff]  }
  0x9f   :  { %2170 = vmatpush1.bf16.msra.mxu1 %v3626_v12  ;;  %v3733_v12 = vld [vmem:[%s5033_s0 + $0x108] ss:$56 sps:$4 sm:$0xff]  }
  0xa0   :  { %2479 = vmatpush1.bf16.msra.mxu0 %v3629_v13  ;;  %2171 = vmatprep.subr.bf16.mxu1 %v3639_v14  ;;  %v3734_v13 = vld [vmem:[%s5032_s1 + $0x640] ss:$8 sps:$4 sm:$0xff]   ;;  %v3739_v14 = vld [vmem:[%s5032_s1 + $0x654] ss:$8 sps:$4 sm:$0xff]  }
  0xa1   :  { %2480 = vmatprep.subr.bf16.mxu0 %v3643_v15  ;;  %v3740_v15 = vld [vmem:[%s5033_s0 + $0x164] ss:$56 sps:$4 sm:$0xff]  }
  0xa2   :  { %2125 = vmatmul.mubr.bf16.gmra.mrb[16].mxu1 %v3654_v17  ;;  %v3737_v17 = vld [vmem:[%s5032_s1 + $0x650] ss:$8 sps:$4 sm:$0xff]  }
  0xa3   :  { %2434 = vmatmul.mubr.bf16.gmra.mrb[16].mxu0 %v3658_v18  ;;  %2172 = vmatpush1.bf16.msra.mxu1 %v3637_v16  ;;  %v3742_v16 = vld [vmem:[%s5033_s0 + $0x17c] ss:$56 sps:$4 sm:$0xff]   ;;  %v3748_v18 = vld [vmem:[%s5032_s1 + $0x664] ss:$8 sps:$4 sm:$0xff]  }
  0xa4   :  { %2481 = vmatpush1.bf16.msra.mxu0 %v3641_v19  ;;  %2173 = vmatprep.subr.bf16.mxu1 %v3646_v20  ;;  %v3744_v19 = vld [vmem:[%s5033_s0 + $0x160] ss:$56 sps:$4 sm:$0xff]  }
  0xa5   :  { %2482 = vmatprep.subr.bf16.mxu0 %v3649_v21  ;;  %2134 = vmatprep.mubr.bf16.mxu1 %v3668_v22  ;;  %v3745_v20 = vld [vmem:[%s5033_s0 + $0x178] ss:$56 sps:$4 sm:$0xff]   ;;  %v3746_v21 = vld [vmem:[%s5032_s1 + $0x660] ss:$8 sps:$4 sm:$0xff]   ;;  %v3751_v22 = vld [vmem:[%s5032_s1 + $0x674] ss:$8 sps:$4 sm:$0xff]  }
  0xa6   :  { %2443 = vmatprep.mubr.bf16.mxu0 %v3670_v23  ;;  %v3752_v23 = vld [vmem:[%s5033_s0 + $0x1d4] ss:$56 sps:$4 sm:$0xff]  }
  0xa7   :  { %2174 = vmatpush1.bf16.msra.mxu1 %v3644_v24  ;;  %v3754_v24 = vld [vmem:[%s5033_s0 + $0x1ec] ss:$56 sps:$4 sm:$0xff]  }
  0xa8   :  { %2483 = vmatpush1.bf16.msra.mxu0 %v3647_v25  ;;  %2175 = vmatprep.subr.bf16.mxu1 %v3657_v26  ;;  %v3749_v25 = vld [vmem:[%s5032_s1 + $0x670] ss:$8 sps:$4 sm:$0xff]   ;;  %v3760_v26 = vld [vmem:[%s5032_s1 + $0x684] ss:$8 sps:$4 sm:$0xff]  }
  0xa9   :  { %2484 = vmatprep.subr.bf16.mxu0 %v3661_v27  ;;  %v3756_v27 = vld [vmem:[%s5033_s0 + $0x1d0] ss:$56 sps:$4 sm:$0xff]  }
  0xaa   :  { %2135 = vmatmul.mubr.bf16.gmra.mrb[20].mxu1 %v3672_v30  ;;  %v3763_v30 = vld [vmem:[%s5032_s1 + $0x694] ss:$8 sps:$4 sm:$0xff]  }
  0xab   :  { %2444 = vmatmul.mubr.bf16.gmra.mrb[20].mxu0 %v3676_v31  ;;  %2176 = vmatpush1.bf16.msra.mxu1 %v3655_v28  ;;  %v3757_v28 = vld [vmem:[%s5033_s0 + $0x1e8] ss:$56 sps:$4 sm:$0xff]   ;;  %v3764_v31 = vld [vmem:[%s5033_s0 + $0x244] ss:$56 sps:$4 sm:$0xff]  }
  0xac   :  { %2485 = vmatpush1.bf16.msra.mxu0 %v3659_v29  ;;  %2177 = vmatprep.subr.bf16.mxu1 %v3664_v32  ;;  %v3758_v29 = vld [vmem:[%s5032_s1 + $0x680] ss:$8 sps:$4 sm:$0xff]   ;;  %v3766_v32 = vld [vmem:[%s5033_s0 + $0x25c] ss:$56 sps:$4 sm:$0xff]  }
  0xad   :  { %2486 = vmatprep.subr.bf16.mxu0 %v3667_v33  ;;  %2144 = vmatprep.mubr.bf16.mxu1 %v3686_v34  ;;  %v3761_v33 = vld [vmem:[%s5032_s1 + $0x690] ss:$8 sps:$4 sm:$0xff]   ;;  %v3772_v34 = vld [vmem:[%s5032_s1 + $0x6a4] ss:$8 sps:$4 sm:$0xff]  }
  0xae   :  { %2453 = vmatprep.mubr.bf16.mxu0 %v3688_v35  ;;  %v3768_v35 = vld [vmem:[%s5033_s0 + $0x240] ss:$56 sps:$4 sm:$0xff]  }
  0xaf   :  { %2178 = vmatpush1.bf16.msra.mxu1 %v3662_v36  ;;  %v3769_v36 = vld [vmem:[%s5033_s0 + $0x258] ss:$56 sps:$4 sm:$0xff]  }
  0xb0   :  { %2487 = vmatpush1.bf16.msra.mxu0 %v3665_v37  ;;  %2179 = vmatprep.subr.bf16.mxu1 %v3675_v38  ;;  %v3770_v37 = vld [vmem:[%s5032_s1 + $0x6a0] ss:$8 sps:$4 sm:$0xff]   ;;  %v3775_v38 = vld [vmem:[%s5032_s1 + $0x6b4] ss:$8 sps:$4 sm:$0xff]  }
  0xb1   :  { %2488 = vmatprep.subr.bf16.mxu0 %v3679_v39  ;;  %v3776_v39 = vld [vmem:[%s5033_s0 + $0x2b4] ss:$56 sps:$4 sm:$0xff]  }
  0xb2   :  { %2145 = vmatmul.mubr.bf16.gmra.mrb[24].mxu1 %v3690_v42  ;;  %v3784_v42 = vld [vmem:[%s5032_s1 + $0x6c4] ss:$8 sps:$4 sm:$0xff]  }
  0xb3   :  { %2454 = vmatmul.mubr.bf16.gmra.mrb[24].mxu0 %v3694_v43  ;;  %2180 = vmatpush1.bf16.msra.mxu1 %v3673_v40  ;;  %v3778_v40 = vld [vmem:[%s5033_s0 + $0x2cc] ss:$56 sps:$4 sm:$0xff]   ;;  %v3780_v43 = vld [vmem:[%s5033_s0 + $0x2b0] ss:$56 sps:$4 sm:$0xff]  }
  0xb4   :  { %2489 = vmatpush1.bf16.msra.mxu0 %v3677_v41  ;;  %2181 = vmatprep.subr.bf16.mxu1 %v3682_v44  ;;  %v3773_v41 = vld [vmem:[%s5032_s1 + $0x6b0] ss:$8 sps:$4 sm:$0xff]   ;;  %v3781_v44 = vld [vmem:[%s5033_s0 + $0x2c8] ss:$56 sps:$4 sm:$0xff]  }
  0xb5   :  { %2490 = vmatprep.subr.bf16.mxu0 %v3685_v45  ;;  %2187 = vmatprep.mubr.bf16.mxu1 %v3706_v46  ;;  %v3782_v45 = vld [vmem:[%s5032_s1 + $0x6c0] ss:$8 sps:$4 sm:$0xff]   ;;  %v3787_v46 = vld [vmem:[%s5032_s1 + $0x6d4] ss:$8 sps:$4 sm:$0xff]  }
  0xb6   :  { %2496 = vmatprep.mubr.bf16.mxu0 %v3709_v47  ;;  %v3796_v47 = vld [vmem:[%s5033_s0 + $0x34] ss:$56 sps:$4 sm:$0xff]  }
  0xb7   :  { %2182 = vmatpush1.bf16.msra.mxu1 %v3680_v48  ;;  %v3799_v48 = vld [vmem:[%s5033_s0 + $0x1f4] ss:$56 sps:$4 sm:$0xff]  }
  0xb8   :  { %2491 = vmatpush1.bf16.msra.mxu0 %v3683_v49  ;;  %2183 = vmatprep.subr.bf16.mxu1 %v3693_v50  ;;  %v3785_v49 = vld [vmem:[%s5032_s1 + $0x6d0] ss:$8 sps:$4 sm:$0xff]   ;;  %v3790_v50 = vld [vmem:[%s5032_s1 + $0x6e4] ss:$8 sps:$4 sm:$0xff]  }
  0xb9   :  { %2492 = vmatprep.subr.bf16.mxu0 %v3697_v51  ;;  %v3788_v51 = vld [vmem:[%s5032_s1 + $0x6e0] ss:$8 sps:$4 sm:$0xff]  }
  0xbb   :  { %2184 = vmatpush1.bf16.msra.mxu1 %v3691_v52  ;;  %v3793_v52 = vld [vmem:[%s5032_s1 + $0x6f4] ss:$8 sps:$4 sm:$0xff]  }
  0xbc   :  { %2493 = vmatpush1.bf16.msra.mxu0 %v3695_v53  ;;  %2185 = vmatprep.subr.bf16.mxu1 %v3700_v54  ;;  %v3791_v53 = vld [vmem:[%s5032_s1 + $0x6f0] ss:$8 sps:$4 sm:$0xff]  }
  0xbd   :  { %2494 = vmatprep.subr.bf16.mxu0 %v3703_v55  ;;  %v3794_v54 = vld [vmem:[%s5033_s0 + $0x30] ss:$56 sps:$4 sm:$0xff]  }
  0xbe   :  { %v3797_v55 = vld [vmem:[%s5033_s0 + $0x1f0] ss:$56 sps:$4 sm:$0xff]  }
  0xbf   :  { %2186 = vmatpush1.bf16.msra.mxu1 %v3698_v56  ;;  %v3800_v56 = vld [vmem:[%s5033_s0 + $0xa4] ss:$56 sps:$4 sm:$0xff]  }
  0xc0   :  { %2495 = vmatpush1.bf16.msra.mxu0 %v3701_v57  ;;  %3132 = vmatprep.subr.bf16.mxu1 %v3712_v58  ;;  %v3802_v57 = vld [vmem:[%s5033_s0 + $0x264] ss:$56 sps:$4 sm:$0xff]  }
  0xc1   :  { %2567 = vmatprep.subr.bf16.mxu0 %v3712_v58  ;;  %v3804_v58 = vld [vmem:[%s5033_s0 + $0xa0] ss:$56 sps:$4 sm:$0xff]  }
  0xc2   :  { %2188 = vmatmul.mubr.bf16.vlgmr.msra.gmra.mrb[0].mxu1 %v3704_v59  ;;  %v3805_v59 = vld [vmem:[%s5033_s0 + $0x260] ss:$56 sps:$4 sm:$0xff]  }
  0xc3   :  { %2497 = vmatmul.mubr.bf16.vlgmr.msra.gmra.mrb[0].mxu0 %v3707_v60  ;;  %3148 = vmatpush1.bf16.msra.mxu1 %v3710_v61  ;;  %v3806_v60 = vld [vmem:[%s5033_s0 + $0x114] ss:$56 sps:$4 sm:$0xff]  }
  0xc4   :  { %2568 = vmatpush1.bf16.msra.mxu0 %v3710_v61  ;;  %3133 = vmatprep.subr.bf16.mxu1 %v3715_v62  ;;  %v3808_v61 = vld [vmem:[%s5033_s0 + $0x2d4] ss:$56 sps:$4 sm:$0xff]  }
  0xc5   :  { %2569 = vmatprep.subr.bf16.mxu0 %v3715_v62  ;;  %2197 = vmatprep.mubr.bf16.mxu1 %v3716_v63  ;;  %v3810_v62 = vld [vmem:[%s5033_s0 + $0x110] ss:$56 sps:$4 sm:$0xff]  }
  0xc6   :  { %2506 = vmatprep.mubr.bf16.mxu0 %v3718_v0  ;;  %v3811_v63 = vld [vmem:[%s5033_s0 + $0x2d0] ss:$56 sps:$4 sm:$0xff]   ;;  %v3812_v0 = vld [vmem:[%s5033_s0 + $0x184] ss:$56 sps:$4 sm:$0xff]  }
  0xc7   :  { %3149 = vmatpush1.bf16.msra.mxu1 %v3713_v1 }
  0xc8   :  { %2570 = vmatpush1.bf16.msra.mxu0 %v3713_v1  ;;  %3134 = vmatprep.subr.bf16.mxu1 %v3724_v2  ;;  %v3814_v1 = vld [vmem:[%s5033_s0 + $0x180] ss:$56 sps:$4 sm:$0xff]  }
  0xc9   :  { %2571 = vmatprep.subr.bf16.mxu0 %v3724_v2 }
  0xca   :  { %2198 = vmatmul.mubr.bf16.gmra.mrb[4].mxu1 %v3720_v3 }
  0xcb   :  { %2507 = vmatmul.mubr.bf16.gmra.mrb[4].mxu0 %v3721_v4  ;;  %3150 = vmatpush1.bf16.msra.mxu1 %v3722_v5 }
  0xcc   :  { %2572 = vmatpush1.bf16.msra.mxu0 %v3722_v5  ;;  %3135 = vmatprep.subr.bf16.mxu1 %v3727_v6 }
  0xcd   :  { %2573 = vmatprep.subr.bf16.mxu0 %v3727_v6  ;;  %2207 = vmatprep.mubr.bf16.mxu1 %v3728_v7 }
  0xce   :  { %2516 = vmatprep.mubr.bf16.mxu0 %v3730_v8 }
  0xcf   :  { %3151 = vmatpush1.bf16.msra.mxu1 %v3725_v9 }
  0xd0   :  { %2574 = vmatpush1.bf16.msra.mxu0 %v3725_v9  ;;  %3136 = vmatprep.subr.bf16.mxu1 %v3736_v10 }
  0xd1   :  { %2575 = vmatprep.subr.bf16.mxu0 %v3736_v10 }
  0xd2   :  { %2208 = vmatmul.mubr.bf16.gmra.mrb[8].mxu1 %v3732_v11 }
  0xd3   :  { %2517 = vmatmul.mubr.bf16.gmra.mrb[8].mxu0 %v3733_v12  ;;  %3152 = vmatpush1.bf16.msra.mxu1 %v3734_v13 }
  0xd4   :  { %2576 = vmatpush1.bf16.msra.mxu0 %v3734_v13  ;;  %3137 = vmatprep.subr.bf16.mxu1 %v3739_v14 }
  0xd5   :  { %2577 = vmatprep.subr.bf16.mxu0 %v3739_v14  ;;  %2217 = vmatprep.mubr.bf16.mxu1 %v3740_v15 }
  0xd6   :  { %2526 = vmatprep.mubr.bf16.mxu0 %v3742_v16 }
  0xd7   :  { %3153 = vmatpush1.bf16.msra.mxu1 %v3737_v17 }
  0xd8   :  { %2578 = vmatpush1.bf16.msra.mxu0 %v3737_v17  ;;  %3138 = vmatprep.subr.bf16.mxu1 %v3748_v18 }
  0xd9   :  { %2579 = vmatprep.subr.bf16.mxu0 %v3748_v18 }
  0xda   :  { %2218 = vmatmul.mubr.bf16.gmra.mrb[12].mxu1 %v3744_v19 }
  0xdb   :  { %2527 = vmatmul.mubr.bf16.gmra.mrb[12].mxu0 %v3745_v20  ;;  %3154 = vmatpush1.bf16.msra.mxu1 %v3746_v21 }
  0xdc   :  { %2580 = vmatpush1.bf16.msra.mxu0 %v3746_v21  ;;  %3139 = vmatprep.subr.bf16.mxu1 %v3751_v22 }
  0xdd   :  { %2581 = vmatprep.subr.bf16.mxu0 %v3751_v22  ;;  %2227 = vmatprep.mubr.bf16.mxu1 %v3752_v23 }
  0xde   :  { %2536 = vmatprep.mubr.bf16.mxu0 %v3754_v24 }
  0xdf   :  { %3155 = vmatpush1.bf16.msra.mxu1 %v3749_v25 }
  0xe0   :  { %2582 = vmatpush1.bf16.msra.mxu0 %v3749_v25  ;;  %3140 = vmatprep.subr.bf16.mxu1 %v3760_v26 }
  0xe1   :  { %2583 = vmatprep.subr.bf16.mxu0 %v3760_v26 }
  0xe2   :  { %2228 = vmatmul.mubr.bf16.gmra.mrb[16].mxu1 %v3756_v27 }
  0xe3   :  { %2537 = vmatmul.mubr.bf16.gmra.mrb[16].mxu0 %v3757_v28  ;;  %3156 = vmatpush1.bf16.msra.mxu1 %v3758_v29 }
  0xe4   :  { %2584 = vmatpush1.bf16.msra.mxu0 %v3758_v29  ;;  %3141 = vmatprep.subr.bf16.mxu1 %v3763_v30 }
  0xe5   :  { %2585 = vmatprep.subr.bf16.mxu0 %v3763_v30  ;;  %2237 = vmatprep.mubr.bf16.mxu1 %v3764_v31 }
  0xe6   :  { %2546 = vmatprep.mubr.bf16.mxu0 %v3766_v32 }
  0xe7   :  { %3157 = vmatpush1.bf16.msra.mxu1 %v3761_v33 }
  0xe8   :  { %2586 = vmatpush1.bf16.msra.mxu0 %v3761_v33  ;;  %3142 = vmatprep.subr.bf16.mxu1 %v3772_v34 }
  0xe9   :  { %2587 = vmatprep.subr.bf16.mxu0 %v3772_v34 }
  0xea   :  { %2238 = vmatmul.mubr.bf16.gmra.mrb[20].mxu1 %v3768_v35 }
  0xeb   :  { %2547 = vmatmul.mubr.bf16.gmra.mrb[20].mxu0 %v3769_v36  ;;  %3158 = vmatpush1.bf16.msra.mxu1 %v3770_v37 }
  0xec   :  { %2588 = vmatpush1.bf16.msra.mxu0 %v3770_v37  ;;  %3143 = vmatprep.subr.bf16.mxu1 %v3775_v38 }
  0xed   :  { %2589 = vmatprep.subr.bf16.mxu0 %v3775_v38  ;;  %2247 = vmatprep.mubr.bf16.mxu1 %v3776_v39 }
  0xee   :  { %2556 = vmatprep.mubr.bf16.mxu0 %v3778_v40 }
  0xef   :  { %3159 = vmatpush1.bf16.msra.mxu1 %v3773_v41 }
  0xf0   :  { %2590 = vmatpush1.bf16.msra.mxu0 %v3773_v41  ;;  %3144 = vmatprep.subr.bf16.mxu1 %v3784_v42 }
  0xf1   :  { %2591 = vmatprep.subr.bf16.mxu0 %v3784_v42 }
  0xf2   :  { %2248 = vmatmul.mubr.bf16.gmra.mrb[24].mxu1 %v3780_v43 }
  0xf3   :  { %2557 = vmatmul.mubr.bf16.gmra.mrb[24].mxu0 %v3781_v44  ;;  %3160 = vmatpush1.bf16.msra.mxu1 %v3782_v45 }
  0xf4   :  { %2592 = vmatpush1.bf16.msra.mxu0 %v3782_v45  ;;  %3145 = vmatprep.subr.bf16.mxu1 %v3787_v46 }
  0xf5   :  { %2593 = vmatprep.subr.bf16.mxu0 %v3787_v46  ;;  %2599 = vmatprep.mubr.bf16.mxu0 %v3796_v47 }
  0xf6   :  { %2639 = vmatprep.mubr.bf16.mxu1 %v3799_v48 }
  0xf7   :  { %3161 = vmatpush1.bf16.msra.mxu1 %v3785_v49 }
  0xf8   :  { %2594 = vmatpush1.bf16.msra.mxu0 %v3785_v49  ;;  %3146 = vmatprep.subr.bf16.mxu1 %v3790_v50 }
  0xf9   :  { %2595 = vmatprep.subr.bf16.mxu0 %v3790_v50 }
  0xfb   :  { %3162 = vmatpush1.bf16.msra.mxu1 %v3788_v51 }
  0xfc   :  { %2596 = vmatpush1.bf16.msra.mxu0 %v3788_v51  ;;  %3147 = vmatprep.subr.bf16.mxu1 %v3793_v52 }
  0xfd   :  { %2597 = vmatprep.subr.bf16.mxu0 %v3793_v52 }
  0xff   :  { %3163 = vmatpush1.bf16.msra.mxu1 %v3791_v53 }
 0x100   :  { %2598 = vmatpush1.bf16.msra.mxu0 %v3791_v53  ;;  %v2672_v53 = vlaneseq }
 0x102   :  { %2640 = vmatmul.mubr.bf16.vlgmr.msra.gmra.mrb[28].mxu1 %v3797_v55  ;;  %v2673_v55 = vshrl.u32 %v2672_v53, 7 }
 0x103   :  { %2600 = vmatmul.mubr.bf16.vlgmr.msra.gmra.mrb[0].mxu0 %v3794_v54  ;;  %2649 = vmatprep.mubr.bf16.mxu1 %v3802_v57  ;;  %v2670_v57 = vld [vmem:[%s5034_s2] sm:$0x3] }
 0x104   :  { %2609 = vmatprep.mubr.bf16.mxu0 %v3800_v56  ;;  %v2674_v56 = vsub.s32 0, %v2673_v55 }
 0x10a   :  { %2650 = vmatmul.mubr.bf16.gmra.mrb[32].mxu1 %v3805_v59  ;;  %v2710_v59 = vld [vmem:[%s5035_s3] sm:$0x3] }
 0x10b   :  { %2610 = vmatmul.mubr.bf16.gmra.mrb[4].mxu0 %v3804_v58  ;;  %2659 = vmatprep.mubr.bf16.mxu1 %v3808_v61  ;;  %v2678_v58 = vsub.s32 1, %v2673_v55 }
 0x10c   :  { %2619 = vmatprep.mubr.bf16.mxu0 %v3806_v60  ;;  %v4860_v60 = vrot.slane %v2670_v57, %v2674_v56 }
 0x112   :  { %2660 = vmatmul.mubr.bf16.gmra.mrb[36].mxu1 %v3811_v63  ;;  %v4862_v63 = vrot.slane %v2670_v57, %v2678_v58 }
 0x113   :  { %2620 = vmatmul.mubr.bf16.gmra.mrb[8].mxu0 %v3810_v62 }
 0x114   :  { %2629 = vmatprep.mubr.bf16.mxu0 %v3812_v0 }
 0x11b   :  { %2630 = vmatmul.mubr.bf16.gmra.mrb[12].mxu0 %v3814_v1  ;;  %v4865_v1 = vrot.slane %v2710_v59, %v2674_v56 }
 0x195   :  { %v4806_v2 = vpop.f32.mrb[0].mxu1 }
 0x196   :  { %v4808_v3 = vpop.f32.mrb[1].mxu1 }
 0x197   :  { %v4810_v4 = vpop.f32.mrb[2].mxu1 }
 0x198   :  { %v4812_v5 = vpop.f32.mrb[3].mxu1 }
 0x19d   :  { %v4814_v6 = vpop.f32.mrb[4].mxu1 }
 0x19e   :  { %v4816_v7 = vpop.f32.mrb[5].mxu1 }
 0x19f   :  { %v4818_v8 = vpop.f32.mrb[6].mxu1 }
 0x1a0   :  { %v4820_v9 = vpop.f32.mrb[7].mxu1 }
 0x1a5   :  { %v4822_v10 = vpop.f32.mrb[8].mxu1 }
 0x1a6   :  { %v4824_v11 = vpop.f32.mrb[9].mxu1 }
 0x1a7   :  { %v4826_v12 = vpop.f32.mrb[10].mxu1 }
 0x1a8   :  { %v4828_v13 = vpop.f32.mrb[11].mxu1 }
 0x1ad   :  { %v4830_v14 = vpop.f32.mrb[12].mxu1 }
 0x1ae   :  { %v4832_v15 = vpop.f32.mrb[13].mxu1 }
 0x1af   :  { %v4834_v16 = vpop.f32.mrb[14].mxu1 }
 0x1b0   :  { %v4836_v17 = vpop.f32.mrb[15].mxu1 }
 0x1b5   :  { %v2229_v18 = vpop.f32.mrb[16].mxu1 }
 0x1b6   :  { %v2538_v19 = vpop.f32.mrb[16].mxu0  ;;  %v2231_v21 = vpop.f32.mrb[17].mxu1 }
 0x1b7   :  { %v3180_v20 = vadd.f32 %v2538_v19, %v2229_v18  ;;  %v2540_v22 = vpop.f32.mrb[17].mxu0  ;;  %v2233_v24 = vpop.f32.mrb[18].mxu1 }
 0x1b8   :  { %v3182_v23 = vadd.f32 %v2540_v22, %v2231_v21  ;;  %v2542_v25 = vpop.f32.mrb[18].mxu0  ;;  %v2235_v27 = vpop.f32.mrb[19].mxu1 }
 0x1b9   :  { %v3184_v26 = vadd.f32 %v2542_v25, %v2233_v24  ;;  %v2544_v28 = vpop.f32.mrb[19].mxu0  ;;  %v4868_v24 = vrot.slane %v2710_v59, %v2678_v58 }
 0x1ba   :  { %v3186_v29 = vadd.f32 %v2544_v28, %v2235_v27 }
 0x1bd   :  { %v2239_v30 = vpop.f32.mrb[20].mxu1 }
 0x1be   :  { %v2548_v31 = vpop.f32.mrb[20].mxu0  ;;  %v2241_v33 = vpop.f32.mrb[21].mxu1 }
 0x1bf   :  { %v4838_v32 = vadd.f32 %v2548_v31, %v2239_v30  ;;  %v2550_v34 = vpop.f32.mrb[21].mxu0  ;;  %v2243_v36 = vpop.f32.mrb[22].mxu1 }
 0x1c0   :  { %v4840_v35 = vadd.f32 %v2550_v34, %v2241_v33  ;;  %v2552_v37 = vpop.f32.mrb[22].mxu0  ;;  %v2245_v39 = vpop.f32.mrb[23].mxu1 }
 0x1c1   :  { %v4842_v38 = vadd.f32 %v2552_v37, %v2243_v36  ;;  %v2554_v40 = vpop.f32.mrb[23].mxu0 }
 0x1c2   :  { %v4844_v41 = vadd.f32 %v2554_v40, %v2245_v39 }
 0x1c5   :  { %v2249_v42 = vpop.f32.mrb[24].mxu1 }
 0x1c6   :  { %v2558_v43 = vpop.f32.mrb[24].mxu0  ;;  %v2251_v45 = vpop.f32.mrb[25].mxu1 }
 0x1c7   :  { %v4846_v44 = vadd.f32 %v2558_v43, %v2249_v42  ;;  %v2560_v46 = vpop.f32.mrb[25].mxu0  ;;  %v2253_v48 = vpop.f32.mrb[26].mxu1 }
 0x1c8   :  { %v4848_v47 = vadd.f32 %v2560_v46, %v2251_v45  ;;  %v2562_v49 = vpop.f32.mrb[26].mxu0  ;;  %v2255_v51 = vpop.f32.mrb[27].mxu1 }
 0x1c9   :  { %v4850_v50 = vadd.f32 %v2562_v49, %v2253_v48  ;;  %v2564_v52 = vpop.f32.mrb[27].mxu0 }
 0x1ca   :  { %v4852_v54 = vadd.f32 %v2564_v52, %v2255_v51 }
 0x1d5   :  { %v2641_v62 = vpop.f32.mrb[28].mxu1 }
 0x1d6   :  { %v2601_v61 = vpop.f32.mrb[0].mxu0  ;;  %v3181_v18 = vadd.f32 %v3180_v20, %v2641_v62  ;;  %v2643_v21 = vpop.f32.mrb[29].mxu1 }
 0x1d7   :  { %v3164_v0 = vadd.f32 %v2601_v61, %v4806_v2  ;;  %v2603_v19 = vpop.f32.mrb[1].mxu0  ;;  %v3183_v25 = vadd.f32 %v3182_v23, %v2643_v21  ;;  %v2645_v28 = vpop.f32.mrb[30].mxu1 }
 0x1d8   :  { %v3165_v22 = vadd.f32 %v2603_v19, %v4808_v3  ;;  %v2605_v27 = vpop.f32.mrb[2].mxu0  ;;  %v2698_v31 = vmul.f32 %v3181_v18, %v4860_v60  ;;  %v3185_v34 = vadd.f32 %v3184_v26, %v2645_v28  ;;  %v2647_v36 = vpop.f32.mrb[31].mxu1 }
 0x1d9   :  { %v2682_v30 = vmul.f32 %v3164_v0, %v4860_v60  ;;  %v3166_v33 = vadd.f32 %v2605_v27, %v4810_v4  ;;  %v2607_v2 = vpop.f32.mrb[3].mxu0  ;;  %v2699_v37 = vmul.f32 %v3183_v25, %v4862_v63  ;;  %v3187_v39 = vadd.f32 %v3186_v29, %v2647_v36 }
 0x1da   :  { %v2683_v20 = vmul.f32 %v3165_v22, %v4862_v63  ;;  %v3167_v3 = vadd.f32 %v2607_v2, %v4812_v5  ;;  %v2738_v40 = vadd.f32 %v4865_v1, %v2698_v31  ;;  %v2700_v43 = vmul.f32 %v3185_v34, %v4860_v60 }
 0x1db   :  { %v2722_v23 = vadd.f32 %v4865_v1, %v2682_v30  ;;  %v2684_v42 = vmul.f32 %v3166_v33, %v4860_v60  ;;  %v2739_v26 = vadd.f32 %v4868_v24, %v2699_v37  ;;  %v2701_v46 = vmul.f32 %v3187_v39, %v4862_v63 }
 0x1dc   :  { %v2723_v4 = vadd.f32 %v4868_v24, %v2683_v20  ;;  %v2685_v45 = vmul.f32 %v3167_v3, %v4862_v63  ;;  %v2766_v49 = vmax.f32 %v2738_v40, 0.0  ;;  %v2740_v29 = vadd.f32 %v4865_v1, %v2700_v43 }
 0x1dd   :  { %v2750_v48 = vmax.f32 %v2722_v23, 0.0  ;;  %v2724_v5 = vadd.f32 %v4865_v1, %v2684_v42  ;;  %v2767_v52 = vmax.f32 %v2739_v26, 0.0  ;;  %v2741_v55 = vadd.f32 %v4868_v24, %v2701_v46  ;;  %v2651_v57 = vpop.f32.mrb[32].mxu1 }
 0x1de   :  { %v2751_v51 = vmax.f32 %v2723_v4, 0.0  ;;  %v2725_v53 = vadd.f32 %v4868_v24, %v2685_v45  ;;  %v2611_v56 = vpop.f32.mrb[4].mxu0  ;;  %2794 = vst [vmem:[%s5036_s4 + $0x80] sm:$0xff] %v2766_v49  ;;  %v2768_v59 = vmax.f32 %v2740_v29, 0.0  ;;  %v3189_v62 = vadd.f32 %v4838_v32, %v2651_v57  ;;  %v2653_v18 = vpop.f32.mrb[33].mxu1 }
 0x1df   :  { %2778 = vst [vmem:[%s5036_s4] sm:$0xff] %v2750_v48  ;;  %v2752_v58 = vmax.f32 %v2724_v5, 0.0  ;;  %v3168_v61 = vadd.f32 %v2611_v56, %v4814_v6  ;;  %v2613_v0 = vpop.f32.mrb[5].mxu0  ;;  %2795 = vst [vmem:[%s5036_s4 + $0x88] sm:$0xff] %v2767_v52  ;;  %v2769_v21 = vmax.f32 %v2741_v55, 0.0  ;;  %v3191_v25 = vadd.f32 %v4840_v35, %v2653_v18  ;;  %v2655_v6 = vpop.f32.mrb[34].mxu1 }
 0x1e0   :  { %2779 = vst [vmem:[%s5036_s4 + $0x8] sm:$0xff] %v2751_v51  ;;  %v2753_v19 = vmax.f32 %v2725_v53, 0.0  ;;  %v3169_v22 = vadd.f32 %v2613_v0, %v4816_v7  ;;  %v2615_v27 = vpop.f32.mrb[6].mxu0  ;;  %2796 = vst [vmem:[%s5036_s4 + $0x90] sm:$0xff] %v2768_v59  ;;  %v2702_v28 = vmul.f32 %v3189_v62, %v4860_v60  ;;  %v3193_v7 = vadd.f32 %v4842_v38, %v2655_v6  ;;  %v2657_v35 = vpop.f32.mrb[35].mxu1 }
 0x1e1   :  { %2780 = vst [vmem:[%s5036_s4 + $0x10] sm:$0xff] %v2752_v58  ;;  %v2686_v32 = vmul.f32 %v3168_v61, %v4860_v60  ;;  %v3170_v30 = vadd.f32 %v2615_v27, %v4818_v8  ;;  %v2617_v31 = vpop.f32.mrb[7].mxu0  ;;  %2797 = vst [vmem:[%s5036_s4 + $0x98] sm:$0xff] %v2769_v21  ;;  %v2703_v34 = vmul.f32 %v3191_v25, %v4862_v63 }
 0x1e2   :  { %2781 = vst [vmem:[%s5036_s4 + $0x18] sm:$0xff] %v2753_v19  ;;  %v2687_v33 = vmul.f32 %v3169_v22, %v4862_v63  ;;  %v3171_v2 = vadd.f32 %v2617_v31, %v4820_v9  ;;  %v3195_v8 = vadd.f32 %v4844_v41, %v2657_v35  ;;  %v2742_v36 = vadd.f32 %v4865_v1, %v2702_v28 }
 0x1e3   :  { %v2726_v38 = vadd.f32 %v4865_v1, %v2686_v32  ;;  %v2688_v20 = vmul.f32 %v3170_v30, %v4860_v60  ;;  %v2704_v37 = vmul.f32 %v3193_v7, %v4860_v60  ;;  %v2743_v39 = vadd.f32 %v4868_v24, %v2703_v34 }
 0x1e4   :  { %v2727_v3 = vadd.f32 %v4868_v24, %v2687_v33  ;;  %v2689_v23 = vmul.f32 %v3171_v2, %v4862_v63  ;;  %v2705_v40 = vmul.f32 %v3195_v8, %v4862_v63  ;;  %v2770_v9 = vmax.f32 %v2742_v36, 0.0 }
 0x1e5   :  { %v2754_v42 = vmax.f32 %v2726_v38, 0.0  ;;  %v2728_v41 = vadd.f32 %v4865_v1, %v2688_v20  ;;  %v2744_v43 = vadd.f32 %v4865_v1, %v2704_v37  ;;  %v2771_v26 = vmax.f32 %v2743_v39, 0.0  ;;  %v2661_v49 = vpop.f32.mrb[36].mxu1 }
 0x1e6   :  { %v2755_v4 = vmax.f32 %v2727_v3, 0.0  ;;  %v2729_v45 = vadd.f32 %v4868_v24, %v2689_v23  ;;  %v2745_v46 = vadd.f32 %v4868_v24, %v2705_v40  ;;  %v2621_v48 = vpop.f32.mrb[8].mxu0  ;;  %2798 = vst [vmem:[%s5036_s4 + $0xa0] sm:$0xff] %v2770_v9  ;;  %v3197_v52 = vadd.f32 %v4846_v44, %v2661_v49  ;;  %v2663_v55 = vpop.f32.mrb[37].mxu1 }
 0x1e7   :  { %2782 = vst [vmem:[%s5036_s4 + $0x20] sm:$0xff] %v2754_v42  ;;  %v2756_v5 = vmax.f32 %v2728_v41, 0.0  ;;  %v2772_v29 = vmax.f32 %v2744_v43, 0.0  ;;  %v3172_v51 = vadd.f32 %v2621_v48, %v4822_v10  ;;  %v2623_v53 = vpop.f32.mrb[9].mxu0  ;;  %2799 = vst [vmem:[%s5036_s4 + $0xa8] sm:$0xff] %v2771_v26  ;;  %v3199_v59 = vadd.f32 %v4848_v47, %v2663_v55  ;;  %v2665_v10 = vpop.f32.mrb[38].mxu1 }
 0x1e8   :  { %2783 = vst [vmem:[%s5036_s4 + $0x28] sm:$0xff] %v2755_v4  ;;  %v2757_v56 = vmax.f32 %v2729_v45, 0.0  ;;  %v2773_v57 = vmax.f32 %v2745_v46, 0.0  ;;  %v3173_v58 = vadd.f32 %v2623_v53, %v4824_v11  ;;  %v2625_v61 = vpop.f32.mrb[10].mxu0  ;;  %v2706_v62 = vmul.f32 %v3197_v52, %v4860_v60  ;;  %v2667_v47 = vpop.f32.mrb[39].mxu1 }
 0x1e9   :  { %2784 = vst [vmem:[%s5036_s4 + $0x30] sm:$0xff] %v2756_v5  ;;  %2800 = vst [vmem:[%s5036_s4 + $0xb0] sm:$0xff] %v2772_v29  ;;  %v2690_v44 = vmul.f32 %v3172_v51, %v4860_v60  ;;  %v3174_v0 = vadd.f32 %v2625_v61, %v4826_v12  ;;  %v3201_v11 = vadd.f32 %v4850_v50, %v2665_v10  ;;  %v2627_v18 = vpop.f32.mrb[11].mxu0 }
 0x1ea   :  { %2785 = vst [vmem:[%s5036_s4 + $0x38] sm:$0xff] %v2757_v56  ;;  %2801 = vst [vmem:[%s5036_s4 + $0xb8] sm:$0xff] %v2773_v57  ;;  %v2691_v19 = vmul.f32 %v3173_v58, %v4862_v63  ;;  %v2707_v21 = vmul.f32 %v3199_v59, %v4862_v63  ;;  %v3175_v22 = vadd.f32 %v2627_v18, %v4828_v13 }
 0x1eb   :  { %v3203_v12 = vadd.f32 %v4852_v54, %v2667_v47  ;;  %v2730_v50 = vadd.f32 %v4865_v1, %v2690_v44  ;;  %v2746_v25 = vadd.f32 %v4865_v1, %v2706_v62  ;;  %v2692_v27 = vmul.f32 %v3174_v0, %v4860_v60 }
 0x1ec   :  { %v2708_v6 = vmul.f32 %v3201_v11, %v4860_v60  ;;  %v2731_v32 = vadd.f32 %v4868_v24, %v2691_v19  ;;  %v2747_v28 = vadd.f32 %v4868_v24, %v2707_v21  ;;  %v2693_v30 = vmul.f32 %v3175_v22, %v4862_v63 }
 0x1ed   :  { %v2709_v7 = vmul.f32 %v3203_v12, %v4862_v63  ;;  %v2758_v31 = vmax.f32 %v2730_v50, 0.0  ;;  %v2774_v13 = vmax.f32 %v2746_v25, 0.0  ;;  %v2732_v54 = vadd.f32 %v4865_v1, %v2692_v27 }
 0x1ee   :  { %v2748_v35 = vadd.f32 %v4865_v1, %v2708_v6  ;;  %v2759_v33 = vmax.f32 %v2731_v32, 0.0  ;;  %v2775_v34 = vmax.f32 %v2747_v28, 0.0  ;;  %v2733_v2 = vadd.f32 %v4868_v24, %v2693_v30  ;;  %v2631_v38 = vpop.f32.mrb[12].mxu0 }
 0x1ef   :  { %v2749_v8 = vadd.f32 %v4868_v24, %v2709_v7  ;;  %2786 = vst [vmem:[%s5036_s4 + $0x40] sm:$0xff] %v2758_v31  ;;  %2802 = vst [vmem:[%s5036_s4 + $0xc0] sm:$0xff] %v2774_v13  ;;  %v2760_v36 = vmax.f32 %v2732_v54, 0.0  ;;  %v3176_v37 = vadd.f32 %v2631_v38, %v4830_v14  ;;  %v2633_v3 = vpop.f32.mrb[13].mxu0 }
 0x1f0   :  { %v2776_v20 = vmax.f32 %v2748_v35, 0.0  ;;  %2787 = vst [vmem:[%s5036_s4 + $0x48] sm:$0xff] %v2759_v33  ;;  %2803 = vst [vmem:[%s5036_s4 + $0xc8] sm:$0xff] %v2775_v34  ;;  %v2761_v39 = vmax.f32 %v2733_v2, 0.0  ;;  %v3177_v40 = vadd.f32 %v2633_v3, %v4832_v15  ;;  %v2635_v42 = vpop.f32.mrb[14].mxu0 }
 0x1f1   :  { %v2777_v23 = vmax.f32 %v2749_v8, 0.0  ;;  %2788 = vst [vmem:[%s5036_s4 + $0x50] sm:$0xff] %v2760_v36  ;;  %v2694_v14 = vmul.f32 %v3176_v37, %v4860_v60  ;;  %v3178_v9 = vadd.f32 %v2635_v42, %v4834_v16  ;;  %v2637_v41 = vpop.f32.mrb[15].mxu0 }
 0x1f2   :  { %2804 = vst [vmem:[%s5036_s4 + $0xd0] sm:$0xff] %v2776_v20  ;;  %2789 = vst [vmem:[%s5036_s4 + $0x58] sm:$0xff] %v2761_v39  ;;  %v2695_v15 = vmul.f32 %v3177_v40, %v4862_v63  ;;  %v3179_v43 = vadd.f32 %v2637_v41, %v4836_v17 }
 0x1f3   :  { %2805 = vst [vmem:[%s5036_s4 + $0xd8] sm:$0xff] %v2777_v23  ;;  %v2734_v4 = vadd.f32 %v4865_v1, %v2694_v14  ;;  %v2696_v26 = vmul.f32 %v3178_v9, %v4860_v60 }
 0x1f4   :  { %v2735_v45 = vadd.f32 %v4868_v24, %v2695_v15  ;;  %v2697_v16 = vmul.f32 %v3179_v43, %v4862_v63 }
 0x1f5   :  { %v2762_v46 = vmax.f32 %v2734_v4, 0.0  ;;  %v2736_v48 = vadd.f32 %v4865_v1, %v2696_v26 }
 0x1f6   :  { %v2763_v49 = vmax.f32 %v2735_v45, 0.0  ;;  %v2737_v5 = vadd.f32 %v4868_v24, %v2697_v16 }
 0x1f7   :  { %2790 = vst [vmem:[%s5036_s4 + $0x60] sm:$0xff] %v2762_v46  ;;  %v2764_v29 = vmax.f32 %v2736_v48, 0.0 }
 0x1f8   :  { %2791 = vst [vmem:[%s5036_s4 + $0x68] sm:$0xff] %v2763_v49  ;;  %v2765_v17 = vmax.f32 %v2737_v5, 0.0 }
 0x1f9   :  { %2792 = vst [vmem:[%s5036_s4 + $0x70] sm:$0xff] %v2764_v29 }
 0x1fa   :  { %2793 = vst [vmem:[%s5036_s4 + $0x78] sm:$0xff] %v2765_v17 }

</bundles_post_ra>
